<compile_context>
chip_gen: v6e
topology: v6e:2x2x1
jax: 0.10.0
libtpu: 0.0.40
codegen_flags: <defaults>
</compile_context>

<pallas_src>
import jax
import jax.numpy as jnp
from jax import lax
from jax.experimental import pallas as pl
from jax.experimental.pallas import tpu as pltpu


# ----------------------------------------------------------------------------
# Pallas kernel
# ----------------------------------------------------------------------------
def _fea_tfusion_kernel(x_ref, w12_ref, b12_ref, w2_ref, b2_ref, w3_ref, b3_ref,
                        o_ref, patches_ref, emb1_ref, emb2_ref, cent_ref, acc_ref):
    """Fused Fea_Tfusion_ forward for one batch element.

    x_ref      : (1, N, H+2, W+2, C) zero-padded frames (channel-last, f32)
    w12_ref    : (10C, 2C) bf16   im2col weights [tAtt_1 | tAtt_2] (rows 9C.. are 0)
    b12_ref    : (1, 2C)   f32    biases         [b1     | b2    ]
    w2_ref     : (10C, 2C) bf16   im2col weights [tAtt_2 | 0     ]
    b2_ref     : (1, 2C)   f32    biases         [b2     | 0     ]
    w3_ref     : (2C, 2C)  bf16   1x1 fusion weight (pre-scaled by 1/N, zero-padded)
    b3_ref     : (1, 2C)   f32    fusion bias (zero-padded)
    o_ref      : (1, H*W, 2C)     output (first C columns are the real channels)
    patches_ref: (N*H*W, 10C) bf16  im2col scratch (K padded to a lane multiple)
    emb1_ref   : (H*W, 2C)    f32   [tAtt_1 | tAtt_2] of frame 0
    emb2_ref   : ((N-1)*H*W, 2C) f32  [tAtt_2 | 0] of frames 1..N-1
    cent_ref   : (N*H*W, 2C)  f32   [center tap | 0] (original frames, f32)
    acc_ref    : (H*W, 2C)    f32   weighted temporal sum accumulator
    """
    N = x_ref.shape[1]
    Hp, Wp, C = x_ref.shape[2], x_ref.shape[3], x_ref.shape[4]
    H, W = Hp - 2, Wp - 2
    M = H * W
    NM = N * M
    C2 = 2 * C

    # ---- im2col: 9 taps written as 5 concatenated pairs (full 128-lane stores) ----
    for tp in range(5):
        ta = 2 * tp
        dya, dxa = divmod(ta, 3)
        tap_a = x_ref[0, :, dya:dya + H, dxa:dxa + W, :]          # (N, H, W, C) f32

        if ta == 4:  # center tap: stash an aligned f32 copy for the weighted sum
            cent_ref[...] = jnp.concatenate(
                [tap_a, jnp.zeros_like(tap_a)], axis=-1).reshape(NM, C2)

        tb = ta + 1
        if tb < 9:
            dyb, dxb = divmod(tb, 3)
            tap_b = x_ref[0, :, dyb:dyb + H, dxb:dxb + W, :]
        else:
            tap_b = jnp.zeros_like(tap_a)                          # K pad 9C -> 10C

        pair = jnp.concatenate([tap_a, tap_b], axis=-1)            # (N, H, W, 2C)
        patches_ref[:, tp * C2:(tp + 1) * C2] = (
            pair.reshape(NM, C2).astype(patches_ref.dtype))

    # ---- frame-0 GEMM: [tAtt_1 | tAtt_2] in one lane-dense 2C-wide output --------
    e12 = jnp.dot(patches_ref[0:M, :], w12_ref[...],
                  preferred_element_type=jnp.float32) + b12_ref[...]
    emb1_ref[...] = e12

    # ---- frames 1..N-1 GEMM: tAtt_2 only (upper weight columns are zero) ---------
    if N > 1:
        emb2_ref[...] = jnp.dot(patches_ref[M:, :], w2_ref[...],
                                preferred_element_type=jnp.float32) + b2_ref[...]

    # ---- frame 0 correlation (roll swaps the halves: lower lanes = emb1*emb2) ----
    cor0 = jax.nn.sigmoid(e12 * pltpu.roll(e12, shift=C, axis=1))
    acc_ref[...] = cent_ref[0:M, :] * cor0            # also initialises the acc

    # ---- frames 1..N-1: correlation + weighted accumulation (all lane-0 aligned) -
    if N > 1:
        def frame_body(i, carry):
            o2 = pl.multiple_of((i - 1) * M, M)
            oc = pl.multiple_of(i * M, M)
            e12_l = emb1_ref[...]                                   # lower = tAtt_1(f0)
            cor = jax.nn.sigmoid(emb2_ref[pl.ds(o2, M), :] * e12_l)
            acc_ref[...] += cent_ref[pl.ds(oc, M), :] * cor
            return carry
        lax.fori_loop(1, N, frame_body, 0, unroll=True)

    # ---- 1x1 fusion GEMM (1/N folded into w3, bf16 operands) + LeakyReLU(0.1) ----
    fea = jnp.dot(acc_ref[...].astype(jnp.bfloat16), w3_ref[...],
                  preferred_element_type=jnp.float32) + b3_ref[...]
    o_ref[0] = jnp.where(fea > 0, fea, 0.1 * fea).astype(o_ref.dtype)


# ----------------------------------------------------------------------------
# Wrapper (layout plumbing + pallas_call)
# ----------------------------------------------------------------------------
@jax.jit
def fea_tfusion_pallas(fea_ext_nchw, w1_oihw, b1, w2_oihw, b2, w3_oi11, b3):
    """Matches Fea_Tfusion_.forward. Input (B,N,C,H,W) -> output (B,C,H,W)."""
    B, N, C, H, W = fea_ext_nchw.shape
    M = H * W
    K = 9 * C
    Kp = 10 * C           # K padded so the im2col taps pack into 2C-wide pairs
    C2 = 2 * C

    # channel-last + SAME zero padding done once in XLA (outside the kernel)
    x = jnp.transpose(fea_ext_nchw, (0, 1, 3, 4, 2)).astype(jnp.float32)
    x = jnp.pad(x, ((0, 0), (0, 0), (1, 1), (1, 1), (0, 0)))        # (B,N,H+2,W+2,C)

    # im2col weights: OIHW -> (ky,kx,ci,co) -> (9C, C), zero-pad rows to 10C
    def im2col_w(w):
        wm = jnp.transpose(w, (2, 3, 1, 0)).reshape(K, C)
        return jnp.pad(wm, ((0, Kp - K), (0, 0)))

    w1m = im2col_w(w1_oihw)
    w2m = im2col_w(w2_oihw)
    w12 = jnp.concatenate([w1m, w2m], axis=1).astype(jnp.bfloat16)   # (10C, 2C)
    w2p = jnp.pad(w2m, ((0, 0), (0, C))).astype(jnp.bfloat16)        # (10C, 2C)
    b12 = jnp.concatenate([b1, b2]).reshape(1, C2).astype(jnp.float32)
    b2p = jnp.pad(b2.reshape(1, C), ((0, 0), (0, C))).astype(jnp.float32)

    # 1x1 fusion conv: (Cout,Cin,1,1) -> (Cin,Cout), fold in 1/N, zero-pad to (2C,2C)
    w3m = jnp.transpose(w3_oi11.reshape(C, C), (1, 0)) / N
    w3p = jnp.pad(w3m, ((0, C), (0, C))).astype(jnp.bfloat16)
    b3p = jnp.pad(b3.reshape(1, C), ((0, 0), (0, C))).astype(jnp.float32)

    grid_spec = pltpu.PrefetchScalarGridSpec(
        num_scalar_prefetch=0,
        grid=(B,),
        in_specs=[
            pl.BlockSpec((1, N, H + 2, W + 2, C), lambda b: (b, 0, 0, 0, 0)),
            pl.BlockSpec((Kp, C2), lambda b: (0, 0)),
            pl.BlockSpec((1, C2), lambda b: (0, 0)),
            pl.BlockSpec((Kp, C2), lambda b: (0, 0)),
            pl.BlockSpec((1, C2), lambda b: (0, 0)),
            pl.BlockSpec((C2, C2), lambda b: (0, 0)),
            pl.BlockSpec((1, C2), lambda b: (0, 0)),
        ],
        out_specs=pl.BlockSpec((1, M, C2), lambda b: (b, 0, 0)),
        scratch_shapes=[
            pltpu.VMEM((N * M, Kp), jnp.bfloat16),              # im2col patches
            pltpu.VMEM((M, C2), jnp.float32),                   # [tAtt_1|tAtt_2](f0)
            pltpu.VMEM((max(N - 1, 1) * M, C2), jnp.float32),   # tAtt_2(frames 1..)
            pltpu.VMEM((N * M, C2), jnp.float32),               # center tap (f32)
            pltpu.VMEM((M, C2), jnp.float32),                   # acc
        ],
    )

    # advisory cost hint so XLA overlaps the surrounding transposes
    flops = B * (2 * M * Kp * C2                     # frame-0 conv GEMM
                 + 2 * max(N - 1, 0) * M * Kp * C2   # tAtt_2 GEMM, frames 1..N-1
                 + 2 * M * C2 * C2                   # 1x1 fusion GEMM
                 + 6 * N * M * C2)                   # element-wise chain
    bytes_accessed = (B * N * (H + 2) * (W + 2) * C * 4       # padded input
                      + 2 * Kp * C2 * 2 + C2 * C2 * 2 + 3 * C2 * 4
                      + B * M * C2 * 4)                        # padded output
    cost = pl.CostEstimate(flops=flops,
                           transcendentals=B * N * M * C2,
                           bytes_accessed=bytes_accessed)

    out = pl.pallas_call(
        _fea_tfusion_kernel,
        out_shape=jax.ShapeDtypeStruct((B, M, C2), jnp.float32),
        grid_spec=grid_spec,
        compiler_params=pltpu.CompilerParams(
            dimension_semantics=("parallel",)),
        cost_estimate=cost,
    )(x, w12, b12, w2p, b2p, w3p, b3p)

    # drop the zero-padded channels, undo the layout plumbing
    out = out[:, :, :C].reshape(B, H, W, C)
    return jnp.transpose(out, (0, 3, 1, 2)).astype(fea_ext_nchw.dtype)   # (B,C,H,W)


# ----------------------------------------------------------------------------
# Pure-JAX reference (for correctness check only)
# ----------------------------------------------------------------------------
def fea_tfusion_ref(x, w1, b1, w2, b2, w3, b3):
    B, N, C, H, W = x.shape
    dn = ('NCHW', 'OIHW', 'NCHW')

    def conv3(img, w, b):
        y = jax.lax.conv_general_dilated(
            img, w, (1, 1), ((1, 1), (1, 1)), dimension_numbers=dn,
            precision=jax.lax.Precision.HIGHEST)
        return y + b[None, :, None, None]

    emb_ref = conv3(x[:, 0], w1, b1)
    cor = jnp.stack(
        [jax.nn.sigmoid(conv3(x[:, i], w2, b2) * emb_ref) for i in range(N)],
        axis=1)
    extraction = jnp.mean(x * cor, axis=1)
    fea = jax.lax.conv_general_dilated(
        extraction, w3, (1, 1), ((0, 0), (0, 0)), dimension_numbers=dn,
        precision=jax.lax.Precision.HIGHEST) + b3[None, :, None, None]
    return jnp.where(fea > 0, fea, 0.1 * fea)


# ----------------------------------------------------------------------------
# Main
# ----------------------------------------------------------------------------
if __name__ == "__main__":
    B, N, C, H, W = 2, 3, 64, 16, 16          # outchannel=64 (module default)

    key = jax.random.PRNGKey(0)
    kx, k1, k2, k3, kb1, kb2, kb3 = jax.random.split(key, 7)

    fea_ext = jax.random.normal(kx, (B, N, C, H, W), jnp.float32)

    # deterministic synthetic parameters (shapes follow nn.Conv2d in __init__)
    w1 = jax.random.normal(k1, (C, C, 3, 3), jnp.float32) * (1.0 / (3 * (C ** 0.5)))
    w2 = jax.random.normal(k2, (C, C, 3, 3), jnp.float32) * (1.0 / (3 * (C ** 0.5)))
    w3 = jax.random.normal(k3, (C, C, 1, 1), jnp.float32) * (1.0 / (C ** 0.5))
    b1 = jax.random.uniform(kb1, (C,), jnp.float32, -0.05, 0.05)
    b2 = jax.random.uniform(kb2, (C,), jnp.float32, -0.05, 0.05)
    b3 = jax.random.uniform(kb3, (C,), jnp.float32, -0.05, 0.05)

    out = fea_tfusion_pallas(fea_ext, w1, b1, w2, b2, w3, b3)
    out = jax.block_until_ready(out)

    ref = fea_tfusion_ref(fea_ext, w1, b1, w2, b2, w3, b3)
    assert out.shape == (B, C, H, W), out.shape
    # both the conv GEMM and the 1x1 fusion GEMM use bf16 MXU operands
    # (f32 accumulation); the element-wise chain is f32 -> compare at 3e-2
    max_err = float(jnp.max(jnp.abs(out - ref)))
    if max_err > 3e-2:
        raise AssertionError(f"Pallas output mismatch, max abs err={max_err}")

    print("KERNEL_OK")
</pallas_src>

<mosaic_0001>
module attributes {stable_mosaic.version = 11 : i64} {
  func.func @_fea_tfusion_kernel(%arg0: i32, %arg1: memref<1x3x18x18x64xf32, #tpu.memory_space<vmem>>, %arg2: memref<640x128xbf16, #tpu.memory_space<vmem>>, %arg3: memref<1x128xf32, #tpu.memory_space<vmem>>, %arg4: memref<640x128xbf16, #tpu.memory_space<vmem>>, %arg5: memref<1x128xf32, #tpu.memory_space<vmem>>, %arg6: memref<128x128xbf16, #tpu.memory_space<vmem>>, %arg7: memref<1x128xf32, #tpu.memory_space<vmem>>, %arg8: memref<1x256x128xf32, #tpu.memory_space<vmem>>, %arg9: memref<768x640xbf16, #tpu.memory_space<vmem>>, %arg10: memref<256x128xf32, #tpu.memory_space<vmem>>, %arg11: memref<512x128xf32, #tpu.memory_space<vmem>>, %arg12: memref<768x128xf32, #tpu.memory_space<vmem>>, %arg13: memref<256x128xf32, #tpu.memory_space<vmem>>) attributes {dimension_semantics = [#tpu.dimension_semantics<parallel>], iteration_bounds = array<i64: 2>, scalar_prefetch = 0 : i64, scratch_operands = 5 : i64, tpu.core_type = #tpu.core_type<tc>, window_params = [{transform_indices = @transform_0, window_bounds = array<i64: 1, 3, 18, 18, 64>}, {pipeline_mode = #tpu.pipeline_mode<synchronous>, transform_indices = @transform_1, window_bounds = array<i64: 640, 128>}, {pipeline_mode = #tpu.pipeline_mode<synchronous>, transform_indices = @transform_2, window_bounds = array<i64: 1, 128>}, {pipeline_mode = #tpu.pipeline_mode<synchronous>, transform_indices = @transform_3, window_bounds = array<i64: 640, 128>}, {pipeline_mode = #tpu.pipeline_mode<synchronous>, transform_indices = @transform_4, window_bounds = array<i64: 1, 128>}, {pipeline_mode = #tpu.pipeline_mode<synchronous>, transform_indices = @transform_5, window_bounds = array<i64: 128, 128>}, {pipeline_mode = #tpu.pipeline_mode<synchronous>, transform_indices = @transform_6, window_bounds = array<i64: 1, 128>}, {transform_indices = @transform_7, window_bounds = array<i64: 1, 256, 128>}]} {
    %c0 = arith.constant 0 : index
    %c0_0 = arith.constant 0 : index
    %c0_1 = arith.constant 0 : index
    %c0_2 = arith.constant 0 : index
    %c0_3 = arith.constant 0 : index
    %0 = vector.load %arg1[%c0, %c0_0, %c0_1, %c0_2, %c0_3] : memref<1x3x18x18x64xf32, #tpu.memory_space<vmem>>, vector<1x3x16x16x64xf32>
    %1 = vector.shape_cast %0 : vector<1x3x16x16x64xf32> to vector<3x16x16x64xf32>
    %c0_4 = arith.constant 0 : index
    %c0_5 = arith.constant 0 : index
    %c0_6 = arith.constant 0 : index
    %c1 = arith.constant 1 : index
    %c0_7 = arith.constant 0 : index
    %2 = vector.load %arg1[%c0_4, %c0_5, %c0_6, %c1, %c0_7] : memref<1x3x18x18x64xf32, #tpu.memory_space<vmem>>, vector<1x3x16x16x64xf32>
    %3 = vector.shape_cast %2 : vector<1x3x16x16x64xf32> to vector<3x16x16x64xf32>
    %4 = tpu.concatenate %1, %3 in 3 : vector<3x16x16x64xf32>, vector<3x16x16x64xf32> -> vector<3x16x16x128xf32>
    %5 = vector.shape_cast %4 : vector<3x16x16x128xf32> to vector<768x128xf32>
    %6 = arith.truncf %5 : vector<768x128xf32> to vector<768x128xbf16>
    %c0_8 = arith.constant 0 : index
    %c0_9 = arith.constant 0 : index
    %7 = vector.load %arg9[%c0_8, %c0_9] : memref<768x640xbf16, #tpu.memory_space<vmem>>, vector<768x128xbf16>
    tpu.vector_store %arg9[%c0_8, %c0_9], %6 {strides = array<i32>} : memref<768x640xbf16, #tpu.memory_space<vmem>>, vector<768x128xbf16>,
    %c0_10 = arith.constant 0 : index
    %c0_11 = arith.constant 0 : index
    %c0_12 = arith.constant 0 : index
    %c2 = arith.constant 2 : index
    %c0_13 = arith.constant 0 : index
    %8 = vector.load %arg1[%c0_10, %c0_11, %c0_12, %c2, %c0_13] : memref<1x3x18x18x64xf32, #tpu.memory_space<vmem>>, vector<1x3x16x16x64xf32>
    %9 = vector.shape_cast %8 : vector<1x3x16x16x64xf32> to vector<3x16x16x64xf32>
    %c0_14 = arith.constant 0 : index
    %c0_15 = arith.constant 0 : index
    %c1_16 = arith.constant 1 : index
    %c0_17 = arith.constant 0 : index
    %c0_18 = arith.constant 0 : index
    %10 = vector.load %arg1[%c0_14, %c0_15, %c1_16, %c0_17, %c0_18] : memref<1x3x18x18x64xf32, #tpu.memory_space<vmem>>, vector<1x3x16x16x64xf32>
    %11 = vector.shape_cast %10 : vector<1x3x16x16x64xf32> to vector<3x16x16x64xf32>
    %12 = tpu.concatenate %9, %11 in 3 : vector<3x16x16x64xf32>, vector<3x16x16x64xf32> -> vector<3x16x16x128xf32>
    %13 = vector.shape_cast %12 : vector<3x16x16x128xf32> to vector<768x128xf32>
    %14 = arith.truncf %13 : vector<768x128xf32> to vector<768x128xbf16>
    %c0_19 = arith.constant 0 : index
    %c128 = arith.constant 128 : index
    %15 = vector.load %arg9[%c0_19, %c128] : memref<768x640xbf16, #tpu.memory_space<vmem>>, vector<768x128xbf16>
    tpu.vector_store %arg9[%c0_19, %c128], %14 {strides = array<i32>} : memref<768x640xbf16, #tpu.memory_space<vmem>>, vector<768x128xbf16>,
    %c0_20 = arith.constant 0 : index
    %c0_21 = arith.constant 0 : index
    %c1_22 = arith.constant 1 : index
    %c1_23 = arith.constant 1 : index
    %c0_24 = arith.constant 0 : index
    %16 = vector.load %arg1[%c0_20, %c0_21, %c1_22, %c1_23, %c0_24] : memref<1x3x18x18x64xf32, #tpu.memory_space<vmem>>, vector<1x3x16x16x64xf32>
    %17 = vector.shape_cast %16 : vector<1x3x16x16x64xf32> to vector<3x16x16x64xf32>
    %cst = arith.constant 0.000000e+00 : f32
    %18 = vector.broadcast %cst : f32 to vector<3x16x16x64xf32>
    %19 = tpu.concatenate %17, %18 in 3 : vector<3x16x16x64xf32>, vector<3x16x16x64xf32> -> vector<3x16x16x128xf32>
    %20 = vector.shape_cast %19 : vector<3x16x16x128xf32> to vector<768x128xf32>
    %c0_25 = arith.constant 0 : index
    %c0_26 = arith.constant 0 : index
    %21 = vector.load %arg12[%c0_25, %c0_26] : memref<768x128xf32, #tpu.memory_space<vmem>>, vector<768x128xf32>
    tpu.vector_store %arg12[%c0_25, %c0_26], %20 {strides = array<i32>} : memref<768x128xf32, #tpu.memory_space<vmem>>, vector<768x128xf32>,
    %c0_27 = arith.constant 0 : index
    %c0_28 = arith.constant 0 : index
    %c1_29 = arith.constant 1 : index
    %c2_30 = arith.constant 2 : index
    %c0_31 = arith.constant 0 : index
    %22 = vector.load %arg1[%c0_27, %c0_28, %c1_29, %c2_30, %c0_31] : memref<1x3x18x18x64xf32, #tpu.memory_space<vmem>>, vector<1x3x16x16x64xf32>
    %23 = vector.shape_cast %22 : vector<1x3x16x16x64xf32> to vector<3x16x16x64xf32>
    %24 = tpu.concatenate %17, %23 in 3 : vector<3x16x16x64xf32>, vector<3x16x16x64xf32> -> vector<3x16x16x128xf32>
    %25 = vector.shape_cast %24 : vector<3x16x16x128xf32> to vector<768x128xf32>
    %26 = arith.truncf %25 : vector<768x128xf32> to vector<768x128xbf16>
    %c0_32 = arith.constant 0 : index
    %c256 = arith.constant 256 : index
    %27 = vector.load %arg9[%c0_32, %c256] : memref<768x640xbf16, #tpu.memory_space<vmem>>, vector<768x128xbf16>
    tpu.vector_store %arg9[%c0_32, %c256], %26 {strides = array<i32>} : memref<768x640xbf16, #tpu.memory_space<vmem>>, vector<768x128xbf16>,
    %c0_33 = arith.constant 0 : index
    %c0_34 = arith.constant 0 : index
    %c2_35 = arith.constant 2 : index
    %c0_36 = arith.constant 0 : index
    %c0_37 = arith.constant 0 : index
    %28 = vector.load %arg1[%c0_33, %c0_34, %c2_35, %c0_36, %c0_37] : memref<1x3x18x18x64xf32, #tpu.memory_space<vmem>>, vector<1x3x16x16x64xf32>
    %29 = vector.shape_cast %28 : vector<1x3x16x16x64xf32> to vector<3x16x16x64xf32>
    %c0_38 = arith.constant 0 : index
    %c0_39 = arith.constant 0 : index
    %c2_40 = arith.constant 2 : index
    %c1_41 = arith.constant 1 : index
    %c0_42 = arith.constant 0 : index
    %30 = vector.load %arg1[%c0_38, %c0_39, %c2_40, %c1_41, %c0_42] : memref<1x3x18x18x64xf32, #tpu.memory_space<vmem>>, vector<1x3x16x16x64xf32>
    %31 = vector.shape_cast %30 : vector<1x3x16x16x64xf32> to vector<3x16x16x64xf32>
    %32 = tpu.concatenate %29, %31 in 3 : vector<3x16x16x64xf32>, vector<3x16x16x64xf32> -> vector<3x16x16x128xf32>
    %33 = vector.shape_cast %32 : vector<3x16x16x128xf32> to vector<768x128xf32>
    %34 = arith.truncf %33 : vector<768x128xf32> to vector<768x128xbf16>
    %c0_43 = arith.constant 0 : index
    %c384 = arith.constant 384 : index
    %35 = vector.load %arg9[%c0_43, %c384] : memref<768x640xbf16, #tpu.memory_space<vmem>>, vector<768x128xbf16>
    tpu.vector_store %arg9[%c0_43, %c384], %34 {strides = array<i32>} : memref<768x640xbf16, #tpu.memory_space<vmem>>, vector<768x128xbf16>,
    %c0_44 = arith.constant 0 : index
    %c0_45 = arith.constant 0 : index
    %c2_46 = arith.constant 2 : index
    %c2_47 = arith.constant 2 : index
    %c0_48 = arith.constant 0 : index
    %36 = vector.load %arg1[%c0_44, %c0_45, %c2_46, %c2_47, %c0_48] : memref<1x3x18x18x64xf32, #tpu.memory_space<vmem>>, vector<1x3x16x16x64xf32>
    %37 = vector.shape_cast %36 : vector<1x3x16x16x64xf32> to vector<3x16x16x64xf32>
    %cst_49 = arith.constant 0.000000e+00 : f32
    %38 = vector.broadcast %cst_49 : f32 to vector<3x16x16x64xf32>
    %39 = tpu.concatenate %37, %38 in 3 : vector<3x16x16x64xf32>, vector<3x16x16x64xf32> -> vector<3x16x16x128xf32>
    %40 = vector.shape_cast %39 : vector<3x16x16x128xf32> to vector<768x128xf32>
    %41 = arith.truncf %40 : vector<768x128xf32> to vector<768x128xbf16>
    %c0_50 = arith.constant 0 : index
    %c512 = arith.constant 512 : index
    %42 = vector.load %arg9[%c0_50, %c512] : memref<768x640xbf16, #tpu.memory_space<vmem>>, vector<768x128xbf16>
    tpu.vector_store %arg9[%c0_50, %c512], %41 {strides = array<i32>} : memref<768x640xbf16, #tpu.memory_space<vmem>>, vector<768x128xbf16>,
    %c0_51 = arith.constant 0 : index
    %c0_52 = arith.constant 0 : index
    %43 = vector.load %arg9[%c0_51, %c0_52] : memref<768x640xbf16, #tpu.memory_space<vmem>>, vector<256x640xbf16>
    %c0_53 = arith.constant 0 : index
    %c0_54 = arith.constant 0 : index
    %44 = vector.load %arg2[%c0_53, %c0_54] : memref<640x128xbf16, #tpu.memory_space<vmem>>, vector<640x128xbf16>
    %cst_55 = arith.constant dense<0.000000e+00> : vector<256x128xf32>
    %45 = tpu.matmul %43, %44, %cst_55 {dimension_numbers = #tpu.dot_dimension_numbers<[1], [0], [0], [1], [0, 0, 1, 1], [], []>} : vector<256x640xbf16>, vector<640x128xbf16>, vector<256x128xf32> -> vector<256x128xf32>
    %c0_56 = arith.constant 0 : index
    %c0_57 = arith.constant 0 : index
    %46 = vector.load %arg3[%c0_56, %c0_57] : memref<1x128xf32, #tpu.memory_space<vmem>>, vector<1x128xf32>
    %47 = vector.broadcast %46 : vector<1x128xf32> to vector<256x128xf32>
    %48 = arith.addf %45, %47 : vector<256x128xf32>
    %c0_58 = arith.constant 0 : index
    %c0_59 = arith.constant 0 : index
    %49 = vector.load %arg10[%c0_58, %c0_59] : memref<256x128xf32, #tpu.memory_space<vmem>>, vector<256x128xf32>
    tpu.vector_store %arg10[%c0_58, %c0_59], %48 {strides = array<i32>} : memref<256x128xf32, #tpu.memory_space<vmem>>, vector<256x128xf32>,
    %c256_60 = arith.constant 256 : index
    %c0_61 = arith.constant 0 : index
    %50 = vector.load %arg9[%c256_60, %c0_61] : memref<768x640xbf16, #tpu.memory_space<vmem>>, vector<512x640xbf16>
    %c0_62 = arith.constant 0 : index
    %c0_63 = arith.constant 0 : index
    %51 = vector.load %arg4[%c0_62, %c0_63] : memref<640x128xbf16, #tpu.memory_space<vmem>>, vector<640x128xbf16>
    %cst_64 = arith.constant dense<0.000000e+00> : vector<512x128xf32>
    %52 = tpu.matmul %50, %51, %cst_64 {dimension_numbers = #tpu.dot_dimension_numbers<[1], [0], [0], [1], [0, 0, 1, 1], [], []>} : vector<512x640xbf16>, vector<640x128xbf16>, vector<512x128xf32> -> vector<512x128xf32>
    %c0_65 = arith.constant 0 : index
    %c0_66 = arith.constant 0 : index
    %53 = vector.load %arg5[%c0_65, %c0_66] : memref<1x128xf32, #tpu.memory_space<vmem>>, vector<1x128xf32>
    %54 = vector.broadcast %53 : vector<1x128xf32> to vector<512x128xf32>
    %55 = arith.addf %52, %54 : vector<512x128xf32>
    %c0_67 = arith.constant 0 : index
    %c0_68 = arith.constant 0 : index
    %56 = vector.load %arg11[%c0_67, %c0_68] : memref<512x128xf32, #tpu.memory_space<vmem>>, vector<512x128xf32>
    tpu.vector_store %arg11[%c0_67, %c0_68], %55 {strides = array<i32>} : memref<512x128xf32, #tpu.memory_space<vmem>>, vector<512x128xf32>,
    %c64_i32 = arith.constant 64 : i32
    %57 = tpu.dynamic_rotate %48 by %c64_i32 dim 1 : vector<256x128xf32>, i32 -> vector<256x128xf32>
    %58 = arith.mulf %48, %57 : vector<256x128xf32>
    %59 = arith.negf %58 : vector<256x128xf32>
    %60 = math.exp %59 : vector<256x128xf32>
    %cst_69 = arith.constant 1.000000e+00 : f32
    %61 = vector.broadcast %cst_69 : f32 to vector<256x128xf32>
    %62 = arith.addf %61, %60 : vector<256x128xf32>
    %63 = arith.divf %61, %62 : vector<256x128xf32>
    %c0_70 = arith.constant 0 : index
    %c0_71 = arith.constant 0 : index
    %64 = vector.load %arg12[%c0_70, %c0_71] : memref<768x128xf32, #tpu.memory_space<vmem>>, vector<256x128xf32>
    %65 = arith.mulf %64, %63 : vector<256x128xf32>
    %c0_72 = arith.constant 0 : index
    %c0_73 = arith.constant 0 : index
    %66 = vector.load %arg13[%c0_72, %c0_73] : memref<256x128xf32, #tpu.memory_space<vmem>>, vector<256x128xf32>
    tpu.vector_store %arg13[%c0_72, %c0_73], %65 {strides = array<i32>} : memref<256x128xf32, #tpu.memory_space<vmem>>, vector<256x128xf32>,
    %c1_i32 = arith.constant 1 : i32
    %c1_i32_74 = arith.constant 1 : i32
    %67 = arith.subi %c1_i32, %c1_i32_74 : i32
    %c256_i32 = arith.constant 256 : i32
    %68 = arith.muli %67, %c256_i32 : i32
    %69 = tpu.assume_multiple %68, 256 : i32
    %c256_i32_75 = arith.constant 256 : i32
    %70 = arith.muli %c1_i32, %c256_i32_75 : i32
    %71 = tpu.assume_multiple %70, 256 : i32
    %c0_76 = arith.constant 0 : index
    %c0_77 = arith.constant 0 : index
    %72 = vector.load %arg10[%c0_76, %c0_77] : memref<256x128xf32, #tpu.memory_space<vmem>>, vector<256x128xf32>
    %73 = arith.index_cast %69 : i32 to index
    %c0_78 = arith.constant 0 : index
    %74 = vector.load %arg11[%73, %c0_78] : memref<512x128xf32, #tpu.memory_space<vmem>>, vector<256x128xf32>
    %75 = arith.mulf %74, %72 : vector<256x128xf32>
    %76 = arith.negf %75 : vector<256x128xf32>
    %77 = math.exp %76 : vector<256x128xf32>
    %cst_79 = arith.constant 1.000000e+00 : f32
    %78 = vector.broadcast %cst_79 : f32 to vector<256x128xf32>
    %79 = arith.addf %78, %77 : vector<256x128xf32>
    %80 = arith.divf %78, %79 : vector<256x128xf32>
    %c0_80 = arith.constant 0 : index
    %c0_81 = arith.constant 0 : index
    %81 = vector.load %arg13[%c0_80, %c0_81] : memref<256x128xf32, #tpu.memory_space<vmem>>, vector<256x128xf32>
    %82 = arith.index_cast %71 : i32 to index
    %c0_82 = arith.constant 0 : index
    %83 = vector.load %arg12[%82, %c0_82] : memref<768x128xf32, #tpu.memory_space<vmem>>, vector<256x128xf32>
    %84 = arith.mulf %83, %80 : vector<256x128xf32>
    %85 = arith.addf %81, %84 : vector<256x128xf32>
    %c0_83 = arith.constant 0 : index
    %c0_84 = arith.constant 0 : index
    %86 = vector.load %arg13[%c0_83, %c0_84] : memref<256x128xf32, #tpu.memory_space<vmem>>, vector<256x128xf32>
    tpu.vector_store %arg13[%c0_83, %c0_84], %85 {strides = array<i32>} : memref<256x128xf32, #tpu.memory_space<vmem>>, vector<256x128xf32>,
    %c2_i32 = arith.constant 2 : i32
    %c1_i32_85 = arith.constant 1 : i32
    %87 = arith.subi %c2_i32, %c1_i32_85 : i32
    %c256_i32_86 = arith.constant 256 : i32
    %88 = arith.muli %87, %c256_i32_86 : i32
    %89 = tpu.assume_multiple %88, 256 : i32
    %c256_i32_87 = arith.constant 256 : i32
    %90 = arith.muli %c2_i32, %c256_i32_87 : i32
    %91 = tpu.assume_multiple %90, 256 : i32
    %c0_88 = arith.constant 0 : index
    %c0_89 = arith.constant 0 : index
    %92 = vector.load %arg10[%c0_88, %c0_89] : memref<256x128xf32, #tpu.memory_space<vmem>>, vector<256x128xf32>
    %93 = arith.index_cast %89 : i32 to index
    %c0_90 = arith.constant 0 : index
    %94 = vector.load %arg11[%93, %c0_90] : memref<512x128xf32, #tpu.memory_space<vmem>>, vector<256x128xf32>
    %95 = arith.mulf %94, %92 : vector<256x128xf32>
    %96 = arith.negf %95 : vector<256x128xf32>
    %97 = math.exp %96 : vector<256x128xf32>
    %cst_91 = arith.constant 1.000000e+00 : f32
    %98 = vector.broadcast %cst_91 : f32 to vector<256x128xf32>
    %99 = arith.addf %98, %97 : vector<256x128xf32>
    %100 = arith.divf %98, %99 : vector<256x128xf32>
    %c0_92 = arith.constant 0 : index
    %c0_93 = arith.constant 0 : index
    %101 = vector.load %arg13[%c0_92, %c0_93] : memref<256x128xf32, #tpu.memory_space<vmem>>, vector<256x128xf32>
    %102 = arith.index_cast %91 : i32 to index
    %c0_94 = arith.constant 0 : index
    %103 = vector.load %arg12[%102, %c0_94] : memref<768x128xf32, #tpu.memory_space<vmem>>, vector<256x128xf32>
    %104 = arith.mulf %103, %100 : vector<256x128xf32>
    %105 = arith.addf %101, %104 : vector<256x128xf32>
    %c0_95 = arith.constant 0 : index
    %c0_96 = arith.constant 0 : index
    %106 = vector.load %arg13[%c0_95, %c0_96] : memref<256x128xf32, #tpu.memory_space<vmem>>, vector<256x128xf32>
    tpu.vector_store %arg13[%c0_95, %c0_96], %105 {strides = array<i32>} : memref<256x128xf32, #tpu.memory_space<vmem>>, vector<256x128xf32>,
    %c2_i32_97 = arith.constant 2 : i32
    %c0_98 = arith.constant 0 : index
    %c0_99 = arith.constant 0 : index
    %107 = vector.load %arg13[%c0_98, %c0_99] : memref<256x128xf32, #tpu.memory_space<vmem>>, vector<256x128xf32>
    %108 = arith.truncf %107 : vector<256x128xf32> to vector<256x128xbf16>
    %c0_100 = arith.constant 0 : index
    %c0_101 = arith.constant 0 : index
    %109 = vector.load %arg6[%c0_100, %c0_101] : memref<128x128xbf16, #tpu.memory_space<vmem>>, vector<128x128xbf16>
    %cst_102 = arith.constant dense<0.000000e+00> : vector<256x128xf32>
    %110 = tpu.matmul %108, %109, %cst_102 {dimension_numbers = #tpu.dot_dimension_numbers<[1], [0], [0], [1], [0, 0, 1, 1], [], []>} : vector<256x128xbf16>, vector<128x128xbf16>, vector<256x128xf32> -> vector<256x128xf32>
    %c0_103 = arith.constant 0 : index
    %c0_104 = arith.constant 0 : index
    %111 = vector.load %arg7[%c0_103, %c0_104] : memref<1x128xf32, #tpu.memory_space<vmem>>, vector<1x128xf32>
    %112 = vector.broadcast %111 : vector<1x128xf32> to vector<256x128xf32>
    %113 = arith.addf %110, %112 : vector<256x128xf32>
    %cst_105 = arith.constant 0.000000e+00 : f32
    %114 = vector.broadcast %cst_105 : f32 to vector<256x128xf32>
    %115 = arith.cmpf ogt, %113, %114 : vector<256x128xf32>
    %cst_106 = arith.constant 1.000000e-01 : f32
    %116 = vector.broadcast %cst_106 : f32 to vector<256x128xf32>
    %117 = arith.mulf %116, %113 : vector<256x128xf32>
    %118 = arith.select %115, %113, %117 : vector<256x128xi1>, vector<256x128xf32>
    %c0_107 = arith.constant 0 : index
    %c0_108 = arith.constant 0 : index
    %c0_109 = arith.constant 0 : index
    %119 = vector.load %arg8[%c0_107, %c0_108, %c0_109] : memref<1x256x128xf32, #tpu.memory_space<vmem>>, vector<1x256x128xf32>
    %120 = vector.shape_cast %119 : vector<1x256x128xf32> to vector<256x128xf32>
    %121 = vector.shape_cast %118 : vector<256x128xf32> to vector<1x256x128xf32>
    tpu.vector_store %arg8[%c0_107, %c0_108, %c0_109], %121 {strides = array<i32>} : memref<1x256x128xf32, #tpu.memory_space<vmem>>, vector<1x256x128xf32>,
    return
  }
  func.func @transform_0(%arg0: i32) -> (i32, i32, i32, i32, i32) {
    %c0_i32 = arith.constant 0 : i32
    %c0_i32_0 = arith.constant 0 : i32
    %c0_i32_1 = arith.constant 0 : i32
    %c0_i32_2 = arith.constant 0 : i32
    %c0_i32_3 = arith.constant 0 : i32
    return %arg0, %c0_i32, %c0_i32_0, %c0_i32_1, %c0_i32_2 : i32, i32, i32, i32, i32
  }
  func.func @transform_1(%arg0: i32) -> (i32, i32) {
    %c0_i32 = arith.constant 0 : i32
    %c0_i32_0 = arith.constant 0 : i32
    %c0_i32_1 = arith.constant 0 : i32
    return %c0_i32, %c0_i32_0 : i32, i32
  }
  func.func @transform_2(%arg0: i32) -> (i32, i32) {
    %c0_i32 = arith.constant 0 : i32
    %c0_i32_0 = arith.constant 0 : i32
    %c0_i32_1 = arith.constant 0 : i32
    return %c0_i32, %c0_i32_0 : i32, i32
  }
  func.func @transform_3(%arg0: i32) -> (i32, i32) {
    %c0_i32 = arith.constant 0 : i32
    %c0_i32_0 = arith.constant 0 : i32
    %c0_i32_1 = arith.constant 0 : i32
    return %c0_i32, %c0_i32_0 : i32, i32
  }
  func.func @transform_4(%arg0: i32) -> (i32, i32) {
    %c0_i32 = arith.constant 0 : i32
    %c0_i32_0 = arith.constant 0 : i32
    %c0_i32_1 = arith.constant 0 : i32
    return %c0_i32, %c0_i32_0 : i32, i32
  }
  func.func @transform_5(%arg0: i32) -> (i32, i32) {
    %c0_i32 = arith.constant 0 : i32
    %c0_i32_0 = arith.constant 0 : i32
    %c0_i32_1 = arith.constant 0 : i32
    return %c0_i32, %c0_i32_0 : i32, i32
  }
  func.func @transform_6(%arg0: i32) -> (i32, i32) {
    %c0_i32 = arith.constant 0 : i32
    %c0_i32_0 = arith.constant 0 : i32
    %c0_i32_1 = arith.constant 0 : i32
    return %c0_i32, %c0_i32_0 : i32, i32
  }
  func.func @transform_7(%arg0: i32) -> (i32, i32, i32) {
    %c0_i32 = arith.constant 0 : i32
    %c0_i32_0 = arith.constant 0 : i32
    %c0_i32_1 = arith.constant 0 : i32
    return %arg0, %c0_i32, %c0_i32_0 : i32, i32, i32
  }
}

</mosaic_0001>

<bundles_post_ra>
// kernel: fea_tfusion_pallas.1
= control target key start
LH: loop header
LB: loop body
LE: loop exit
PB: predicated region body
PF: predicated region fallthrough
CT: control target
= control target key end

     0   :  { %12 = vsyncpa [#allocation8], 0  ;;  %s20842_s0 = inlined_call_operand.vmem [shape: f32[2,3,18,18,64], index: 0, kind: input, shape index: {}]   ;;  %s20843_s1 = inlined_call_operand.vmem [shape: bf16[640,128], index: 1, kind: input, shape index: {}]   ;;  %s20844_s2 = inlined_call_operand.vmem [shape: f32[1,128], index: 2, kind: input, shape index: {}]   ;;  %s20845_s3 = inlined_call_operand.vmem [shape: bf16[640,128], index: 3, kind: input, shape index: {}]   ;;  %s20846_s4 = inlined_call_operand.vmem [shape: f32[1,128], index: 4, kind: input, shape index: {}]   ;;  %s20847_s5 = inlined_call_operand.vmem [shape: bf16[128,128], index: 5, kind: input, shape index: {}]   ;;  %s20848_s6 = inlined_call_operand.vmem [shape: f32[1,128], index: 6, kind: input, shape index: {}]   ;;  %s20849_s7 = inlined_call_operand.hbm [shape: f32[2,256,128], index: 7, kind: output, shape index: {}]  }
   0x1   :  { %14 = vsyncpa [#allocation8 + $0x1], 0  ;;  %s15660_s24 = smov 0   ;;  %s15662_s25 = smov 0  }
   0x2   :  { %s15664_s26 = smov 0   ;;  %s15666_s27 = smov 0  }
   0x3 LB: > { %s15681_s28 = sadd.s32 4294967295, %s15613_s27   ;;  %s11156_s29 = sadd.s32 4294967294, %s15613_s27   ;;  %s15613_s27 = sphi %s15666_s27, %s21381_s27   ;;  %s15609_s26 = sphi %s15664_s26, %s21380_s26   ;;  %s15605_s25 = sphi %s15662_s25, %s21379_s25   ;;  %s15601_s24 = sphi %s15660_s24, %s21378_s24  }
   0x4   : > { %s15685_s30 = sadd.s32 1, %s15613_s27   ;;  %s179_s8 = sadd.s32 1, %s15609_s26 }
   0x5   : > { %s176_s9 = ssub.s32 %s15613_s27, %s15685_s30  ;;  %p189_p0 = scmp.ne.s32.totalorder %s15609_s26, %s15605_s25 }
   0x6   : > { %p177_p1 = scmp.eq.s32.totalorder %s176_s9, 0  ;;  %p190_p2 = scmp.eq.s32.totalorder %s15681_s28, 1 }
   0x7   : > { %p195_p3 = scmp.ne.s32.totalorder %s15605_s25, %s15601_s24  ;;  %p196_p4 = scmp.eq.s32.totalorder %s11156_s29, 1 }
   0x8   : > { %s15696_s10 = scalar_select %p177_p1, %s15609_s26, %s179_s8  }
   0x9   : > { %p15698_p5 = por %p190_p2, %p189_p0  ;;  %p15702_p6 = por %p196_p4, %p195_p3 }
   0xa   : > { %p11159_p7 = scmp.ge.s32.totalorder %s15613_s27, 1  ;;  %p240_p8 = scmp.lt.s32.totalorder %s15613_s27, 3 }
   0xc   : > { %p241_p9 = pnand %p11159_p7, %p240_p8 }
   0xe   : > { %244 = sbr.rel (%p241_p9) target bundleno = 1168 (0x490), region = 48 }
  0x13   : > { %p272_p10 = scmp.lt.s32.totalorder %s15681_s28, 1  ;;  %v14623_v0 = vld [vmem:[%s20843_s1 + $0xf8] sm:$0xff]   ;;  %v14625_v2 = vld [vmem:[%s20843_s1 + $0xf0] sm:$0xff]   ;;  %v14627_v4 = vld [vmem:[%s20843_s1 + $0xe8] sm:$0xff]   ;;  %vm854_vm0 = vcmask 523264   ;;  %s13130_s14 = sshll.u32 %s15681_s28, 12 }
  0x14   : > { %v14624_v1 = vld [vmem:[%s20843_s1 + $0xb8] sm:$0xff]   ;;  %13243 = vmatprep.subr.bf16.mxu1 %v14623_v0  ;;  %v14626_v3 = vld [vmem:[%s20843_s1 + $0xb0] sm:$0xff]   ;;  %v14628_v5 = vld [vmem:[%s20843_s1 + $0xa8] sm:$0xff]   ;;  %s20794_s19 = scalar_lea.hbm %s20849_s7, %s13130_s14  ;;  %s15617_s21 = smov [#allocation7]  }
  0x15   : > { %s273_s15 = scalar_select %p272_p10, %s15681_s28, 1  ;;  %13244 = vmatpush3.bf16.msra.mxu1 %v14624_v1  ;;  %v14629_v0 = vld [vmem:[%s20843_s1 + $0xe0] sm:$0xff]  }
  0x16   : > { %13245 = vmatprep.subr.bf16.mxu1 %v14625_v2  ;;  %v14630_v2 = vld [vmem:[%s20843_s1 + $0xa0] sm:$0xff]   ;;  %s15557_s22 = sshll.u32 %s15617_s21, 4  ;;  %s15558_s22 = int_to_ptr.vmem [resolvable:$false] %s15557_s22 }
  0x17   : > { %s13619_s20 = smul.u32 1296, %s273_s15  ;;  %s15615_s15 = smov 64  }
  0x18   : > { %s15559_s23 = scalar_lea.vmem %s15558_s22, 8192 }
  0x19   : > { %s15728_s13 = scalar_lea.vmem %s20842_s0, %s13619_s20  ;;  %13246 = vmatpush3.bf16.msra.mxu1 %v14626_v3 }
  0x1a   : > { %v11548_v6 = vld [vmem:[%s15728_s13 + $0x32] sm:$0xff]  ;;  %v11549_v7 = vld [vmem:[%s15728_s13 + $0x3a] sm:$0xff]  ;;  %v11547_v10 = vld [vmem:[%s15728_s13 + $0x22] sm:$0xff]  ;;  %13247 = vmatprep.subr.bf16.mxu1 %v14627_v4 }
  0x1b   : > { %v11546_v8 = vld [vmem:[%s15728_s13 + $0x1a] sm:$0xff]  ;;  %v13673_v9 = vpack.i.bf16 %v11549_v7, %v11548_v6  ;;  %v15738_v11 = vld [vmem:[%s15728_s13 + $0x49] sm:$0xff]  ;;  %v15741_v12 = vld [vmem:[%s15728_s13 + $0x51] sm:$0xff] }
  0x1c   : > { %v13663_v13 = vpack.i.bf16 %v11547_v10, %v11546_v8  ;;  %v15744_v14 = vld [vmem:[%s15728_s13 + $0x31] sm:$0xff]  ;;  %v15747_v15 = vld [vmem:[%s15728_s13 + $0x39] sm:$0xff]  ;;  %v15752_v16 = vpack.i.bf16 %v15741_v12, %v15738_v11  ;;  %v15760_v18 = vld [vmem:[%s15728_s13 + $0x61] sm:$0xff] }
  0x1d   : > { %13674 = vrot.lane.b32.xlu1 %v13673_v9, %s15615_s15  ;;  %v15757_v17 = vpack.i.bf16 %v15747_v15, %v15744_v14  ;;  %v15763_v19 = vld [vmem:[%s15728_s13 + $0x69] sm:$0xff]  ;;  %v11551_v21 = vld [vmem:[%s15728_s13 + $0x52] sm:$0xff]  ;;  %13248 = vmatpush3.bf16.msra.mxu1 %v14628_v5  ;;  %v15779_v25 = vld [vmem:[%s15728_s13 + $0x81] sm:$0xff] }
  0x1e   : > { %13664 = vrot.lane.b32.xlu0 %v13663_v13, %s15615_s15  ;;  %v11550_v20 = vld [vmem:[%s15728_s13 + $0x4a] sm:$0xff]  ;;  %v15771_v22 = vpack.i.bf16 %v15763_v19, %v15760_v18  ;;  %v15776_v24 = vld [vmem:[%s15728_s13 + $0x79] sm:$0xff]  ;;  %v11552_v26 = vld [vmem:[%s15728_s13 + $0x62] sm:$0xff]  ;;  %13249 = vmatprep.subr.bf16.mxu1 %v14629_v0 }
  0x1f   : > { %v13683_v23 = vpack.i.bf16 %v11551_v21, %v11550_v20  ;;  %v11553_v27 = vld [vmem:[%s15728_s13 + $0x6a] sm:$0xff]  ;;  %v15787_v28 = vpack.i.bf16 %v15779_v25, %v15776_v24  ;;  %v15794_v31 = vld [vmem:[%s15728_s13 + $0x99] sm:$0xff]  ;;  %v11555_v33 = vld [vmem:[%s15728_s13 + $0x82] sm:$0xff] }
  0x20   : > { %v13693_v29 = vpack.i.bf16 %v11553_v27, %v11552_v26  ;;  %v15791_v30 = vld [vmem:[%s15728_s13 + $0x91] sm:$0xff]  ;;  %v11554_v32 = vld [vmem:[%s15728_s13 + $0x7a] sm:$0xff]  ;;  %v15806_v36 = vld [vmem:[%s15728_s13 + $0xa9] sm:$0xff] }
  0x21   : > { %13679 = vrot.lane.b32.xlu1 %v15752_v16, %s15615_s15  ;;  %v15802_v34 = vpack.i.bf16 %v15794_v31, %v15791_v30  ;;  %v13703_v35 = vpack.i.bf16 %v11555_v33, %v11554_v32  ;;  %v15809_v37 = vld [vmem:[%s15728_s13 + $0xb1] sm:$0xff]  ;;  %v11557_v39 = vld [vmem:[%s15728_s13 + $0x9a] sm:$0xff]  ;;  %v11847_v43 = vld [vmem:[%s15728_s13 + $0xc9] sm:$0xff]  ;;  %13250 = vmatpush3.bf16.msra.mxu1 %v14630_v2 }
  0x22   : > { %13669 = vrot.lane.b32.xlu0 %v15757_v17, %s15615_s15  ;;  %v11556_v38 = vld [vmem:[%s15728_s13 + $0x92] sm:$0xff]  ;;  %v15817_v40 = vpack.i.bf16 %v15809_v37, %v15806_v36  ;;  %v11846_v42 = vld [vmem:[%s15728_s13 + $0xc1] sm:$0xff]  ;;  %v11558_v44 = vld [vmem:[%s15728_s13 + $0xaa] sm:$0xff] }
  0x23   : > { %v13713_v41 = vpack.i.bf16 %v11557_v39, %v11556_v38  ;;  %v11559_v45 = vld [vmem:[%s15728_s13 + $0xb2] sm:$0xff]  ;;  %v15826_v46 = vpack.i.bf16 %v11847_v43, %v11846_v42  ;;  %v11849_v49 = vld [vmem:[%s15728_s13 + $0xe1] sm:$0xff]  ;;  %v11561_v51 = vld [vmem:[%s15728_s13 + $0xca] sm:$0xff] }
  0x24   : > { %v13723_v47 = vpack.i.bf16 %v11559_v45, %v11558_v44  ;;  %v11848_v48 = vld [vmem:[%s15728_s13 + $0xd9] sm:$0xff]  ;;  %v11560_v50 = vld [vmem:[%s15728_s13 + $0xc2] sm:$0xff]  ;;  %v11850_v54 = vld [vmem:[%s15728_s13 + $0xf1] sm:$0xff] }
  0x25   : > { %13689 = vrot.lane.b32.xlu1 %v15771_v22, %s15615_s15  ;;  %v15835_v52 = vpack.i.bf16 %v11849_v49, %v11848_v48  ;;  %v13733_v53 = vpack.i.bf16 %v11561_v51, %v11560_v50  ;;  %v11851_v55 = vld [vmem:[%s15728_s13 + $0xf9] sm:$0xff]  ;;  %v11563_v57 = vld [vmem:[%s15728_s13 + $0xe2] sm:$0xff]  ;;  %v11853_v4 = vld [vmem:[%s15728_s13 + $0x111] sm:$0xff] }
  0x26   : > { %13684 = vrot.lane.b32.xlu0 %v13683_v23, %s15615_s15  ;;  %v11562_v56 = vld [vmem:[%s15728_s13 + $0xda] sm:$0xff]  ;;  %v15844_v58 = vpack.i.bf16 %v11851_v55, %v11850_v54  ;;  %v375_v63 = vld [vmem:[%s15728_s13 + $0x9] sm:$0xff]  ;;  %v11564_v7 = vld [vmem:[%s15728_s13 + $0xf2] sm:$0xff] }
  0x27   : > { %v13743_v59 = vpack.i.bf16 %v11563_v57, %v11562_v56  ;;  %v11258_v60 = vld [vmem:[%s15728_s13 + $0x18] sm:$0xff]  ;;  %v11259_v61 = vld [vmem:[%s15728_s13 + $0x20] sm:$0xff]  ;;  %v11852_v1 = vld [vmem:[%s15728_s13 + $0x109] sm:$0xff] }
  0x28   : > { %v374_v62 = vld [vmem:[%s15728_s13 + $0x1] sm:$0xff]  ;;  %v13758_v3 = vpack.i.bf16 %v11259_v61, %v11258_v60  ;;  %v14631_v6 = vld [vmem:[%s20843_s1 + $0xd8] sm:$0xff]   ;;  %v15871_v10 = vld [vmem:[%s15728_s13 + $0x30] sm:$0xff]  ;;  %v15877_v20 = vpack.i.bf16 %v11853_v4, %v11852_v1  ;;  %v20850_v61 = vmov 0  }
  0x29   : > { %13699 = vrot.lane.b32.xlu1 %v15787_v28, %s15615_s15  ;;  %v13753_v5 = vpack.i.bf16 %v375_v63, %v374_v62  ;;  %v11565_v8 = vld [vmem:[%s15728_s13 + $0xfa] sm:$0xff]  ;;  %13251 = vmatprep.subr.bf16.mxu1 %v14631_v6  ;;  %v14633_v21 = vld [vmem:[%s20843_s1 + $0xd0] sm:$0xff]   ;;  %v14635_v32 = vld [vmem:[%s20843_s1 + $0xc8] sm:$0xff]  }
  0x2a   : > { %13694 = vrot.lane.b32.xlu0 %v13693_v29, %s15615_s15  ;;  %v14632_v9 = vld [vmem:[%s20843_s1 + $0x98] sm:$0xff]   ;;  %v13763_v23 = vpack.i.bf16 %v11565_v8, %v11564_v7  ;;  %v14634_v27 = vld [vmem:[%s20843_s1 + $0x90] sm:$0xff]   ;;  %v15890_v29 = vld [vmem:[%s15728_s13 + $0x21] sm:$0xff] }
  0x2b   : > { %v15874_v13 = vld [vmem:[%s15728_s13 + $0x38] sm:$0xff]  ;;  %13252 = vmatpush3.bf16.msra.mxu1 %v14632_v9  ;;  %v11855_v38 = vld [vmem:[%s15728_s13 + $0x129] sm:$0xff]  ;;  %v14637_v44 = vld [vmem:[%s20843_s1 + $0xc0] sm:$0xff]  }
  0x2c   : > { %v15884_v26 = vld [vmem:[%s15728_s13 + $0x19] sm:$0xff]  ;;  %13253 = vmatprep.subr.bf16.mxu1 %v14633_v21  ;;  %v13778_v33 = vpack.i.bf16 %v15874_v13, %v15871_v10  ;;  %v11566_v39 = vld [vmem:[%s15728_s13 + $0x10a] sm:$0xff]  ;;  %v11857_v56 = vld [vmem:[%s15728_s13 + $0x141] sm:$0xff] }
  0x2d   : > { %13709 = vrot.lane.b32.xlu1 %v15802_v34, %s15615_s15  ;;  %v11567_v42 = vld [vmem:[%s15728_s13 + $0x112] sm:$0xff]  ;;  %v14636_v43 = vld [vmem:[%s20843_s1 + $0x88] sm:$0xff]   ;;  %v14638_v49 = vld [vmem:[%s20843_s1 + $0x80] sm:$0xff]  }
  0x2e   : > { %13704 = vrot.lane.b32.xlu0 %v13703_v35, %s15615_s15  ;;  %v11854_v35 = vld [vmem:[%s15728_s13 + $0x121] sm:$0xff]  ;;  %v13783_v50 = vpack.i.bf16 %v11567_v42, %v11566_v39  ;;  %v14642_v51 = vld [vmem:[%s20843_s1 + $0x78] sm:$0xff]   ;;  %v11569_v60 = vld [vmem:[%s15728_s13 + $0x12a] sm:$0xff] }
  0x2f   : > { %13254 = vmatpush3.bf16.msra.mxu1 %v14634_v27  ;;  %v15913_v45 = vld [vmem:[%s15728_s13 + $0x48] sm:$0xff]  ;;  %v15919_v48 = vpack.i.bf16 %v11855_v38, %v11854_v35  ;;  %13131 = vmatprep.subr.bf16.mxu0 %v14642_v51  ;;  %v14644_v54 = vld [vmem:[%s20843_s1 + $0x38] sm:$0xff]   ;;  %v14648_v62 = vld [vmem:[%s20843_s1 + $0x30] sm:$0xff]  }
  0x30   : > { %13255 = vmatprep.subr.bf16.mxu1 %v14635_v32  ;;  %v11568_v57 = vld [vmem:[%s15728_s13 + $0x122] sm:$0xff]  ;;  %13132 = vmatpush3.bf16.msra.mxu0 %v14644_v54  ;;  %v11859_v7 = vld [vmem:[%s15728_s13 + $0x159] sm:$0xff] }
  0x31   : > { %13719 = vrot.lane.b32.xlu1 %v15817_v40, %s15615_s15  ;;  %v15948_v63 = vld [vmem:[%s15728_s13 + $0x60] sm:$0xff]  ;;  %v14649_v1 = vld [vmem:[%s20843_s1 + $0x68] sm:$0xff]   ;;  %v13803_v2 = vpack.i.bf16 %v11569_v60, %v11568_v57  ;;  %v14657_v35 = vld [vmem:[%s20843_s1 + $0x58] sm:$0xff]  }
  0x32   : > { %13714 = vrot.lane.b32.xlu0 %v13713_v41, %s15615_s15  ;;  %v13773_v41 = vpack.i.bf16 %v15890_v29, %v15884_v26  ;;  %v14652_v4 = vld [vmem:[%s20843_s1 + $0x28] sm:$0xff]   ;;  %v11570_v8 = vld [vmem:[%s15728_s13 + $0x13a] sm:$0xff]  ;;  %v11572_v42 = vld [vmem:[%s15728_s13 + $0x152] sm:$0xff] }
  0x33   : > { %13256 = vmatpush3.bf16.msra.mxu1 %v14636_v43  ;;  %v11571_v9 = vld [vmem:[%s15728_s13 + $0x142] sm:$0xff]  ;;  %v14660_v38 = vld [vmem:[%s20843_s1 + $0x18] sm:$0xff]   ;;  %v11574_v60 = vld [vmem:[%s15728_s13 + $0x16a] sm:$0xff] }
  0x34   : > { %13257 = vmatprep.subr.bf16.mxu1 %v14637_v44  ;;  %v14654_v21 = vld [vmem:[%s20843_s1 + $0x20] sm:$0xff]   ;;  %v14661_v44 = vld [vmem:[%s20843_s1 + $0x50] sm:$0xff]   ;;  %v16018_v54 = vld [vmem:[%s15728_s13 + $0x98] sm:$0xff] }
  0x35   : > { %13729 = vrot.lane.b32.xlu1 %v15826_v46, %s15615_s15  ;;  %v15986_v32 = vld [vmem:[%s15728_s13 + $0x80] sm:$0xff]  ;;  %v11863_v57 = vld [vmem:[%s15728_s13 + $0x189] sm:$0xff] }
  0x36   : > { %13724 = vrot.lane.b32.xlu0 %v13723_v47, %s15615_s15  ;;  %v15916_v47 = vld [vmem:[%s15728_s13 + $0x50] sm:$0xff]  ;;  %v11573_v43 = vld [vmem:[%s15728_s13 + $0x15a] sm:$0xff] }
  0x37   : > { %v13798_v55 = vpack.i.bf16 %v15916_v47, %v15913_v45  ;;  %13258 = vmatpush3.bf16.msra.mxu1 %v14638_v49  ;;  %v14662_v49 = vld [vmem:[%s20843_s1 + $0x10] sm:$0xff]   ;;  %v13843_v51 = vpack.i.bf16 %v11573_v43, %v11572_v42  ;;  %v407_v43 = vld [vmem:[%s15728_s13 + $0x1b9] sm:$0xff] }
  0x38   : > { %8458 = vmatprep.subr.bf16.mxu1 %v20850_v61  ;;  %v11291_v42 = vld [vmem:[%s15728_s13 + $0x1d0] sm:$0xff] }
  0x39   : > { %13739 = vrot.lane.b32.xlu1 %v15835_v52, %s15615_s15 }
  0x3a   : > { %13734 = vrot.lane.b32.xlu0 %v13733_v53, %s15615_s15  ;;  %v11856_v53 = vld [vmem:[%s15728_s13 + $0x139] sm:$0xff] }
  0x3b   : > { %v15951_v0 = vpack.i.bf16 %v11857_v56, %v11856_v53  ;;  %v16015_v53 = vld [vmem:[%s15728_s13 + $0x90] sm:$0xff]  ;;  %v11862_v56 = vld [vmem:[%s15728_s13 + $0x181] sm:$0xff] }
  0x3d   : > { %13749 = vrot.lane.b32.xlu1 %v15844_v58, %s15615_s15 }
  0x3e   : > { %13744 = vrot.lane.b32.xlu0 %v13743_v59, %s15615_s15  ;;  %v14647_v59 = vld [vmem:[%s20843_s1 + $0x70] sm:$0xff]  }
  0x3f   : > { %13133 = vmatprep.subr.bf16.mxu0 %v14647_v59  ;;  %v13858_v59 = vpack.i.bf16 %v16018_v54, %v16015_v53 }
  0x40   : > { %13134 = vmatpush3.bf16.msra.mxu0 %v14648_v62  ;;  %v11575_v62 = vld [vmem:[%s15728_s13 + $0x172] sm:$0xff] }
  0x41   : > { %13759 = vrot.lane.b32.xlu1 %v13758_v3, %s15615_s15  ;;  %v15959_v3 = vld [vmem:[%s15728_s13 + $0x68] sm:$0xff]  ;;  %13135 = vmatprep.subr.bf16.mxu0 %v14649_v1  ;;  %v14669_v1 = vld [vmem:[%s20843_s1 + $0x40] sm:$0xff]  }
  0x42   : > { %13754 = vrot.lane.b32.xlu0 %v13753_v5, %s15615_s15  ;;  %v11858_v5 = vld [vmem:[%s15728_s13 + $0x151] sm:$0xff]  ;;  %v13818_v6 = vpack.i.bf16 %v15959_v3, %v15948_v63 }
  0x43   : > { %v15983_v27 = vpack.i.bf16 %v11859_v7, %v11858_v5  ;;  %v16042_v5 = vld [vmem:[%s15728_s13 + $0xa8] sm:$0xff]  ;;  %v16047_v7 = vld [vmem:[%s15728_s13 + $0xb0] sm:$0xff] }
  0x44   : > { %13136 = vmatpush3.bf16.msra.mxu0 %v14652_v4  ;;  %v13868_v4 = vpack.i.bf16 %v11863_v57, %v11862_v56  ;;  %v11292_v57 = vld [vmem:[%s15728_s13 + $0x1e0] sm:$0xff] }
  0x45   : > { %13769 = vrot.lane.b32.xlu1 %v15877_v20, %s15615_s15 }
  0x46   : > { %13764 = vrot.lane.b32.xlu0 %v13763_v23, %s15615_s15  ;;  %v15980_v23 = vld [vmem:[%s15728_s13 + $0x78] sm:$0xff] }
  0x47   : > { %v13838_v39 = vpack.i.bf16 %v15986_v32, %v15980_v23 }
  0x49   : > { %13779 = vrot.lane.b32.xlu1 %v13778_v33, %s15615_s15  ;;  %v13823_v33 = vpack.i.bf16 %v11571_v9, %v11570_v8  ;;  %v11864_v8 = vld [vmem:[%s15728_s13 + $0x199] sm:$0xff]  ;;  %v11865_v9 = vld [vmem:[%s15728_s13 + $0x1a1] sm:$0xff] }
  0x4a   : > { %13774 = vrot.lane.b32.xlu0 %v13773_v41, %s15615_s15  ;;  %v11861_v41 = vld [vmem:[%s15728_s13 + $0x171] sm:$0xff] }
  0x4d   : > { %13789 = vrot.lane.b32.xlu1 %v15919_v48, %s15615_s15 }
  0x4e   : > { %13784 = vrot.lane.b32.xlu0 %v13783_v50, %s15615_s15 }
  0x51   : > { %13799 = vrot.lane.b32.xlu1 %v13798_v55, %s15615_s15  ;;  %v14665_v55 = vld [vmem:[%s20843_s1 + $0x48] sm:$0xff]  }
  0x52   : > { %13794 = vrot.lane.b32.xlu0 %v15757_v17, %s15615_s15  ;;  %v14653_v17 = vld [vmem:[%s20843_s1 + $0x60] sm:$0xff]  }
  0x53   : > { %13137 = vmatprep.subr.bf16.mxu0 %v14653_v17  ;;  %v13878_v17 = vpack.i.bf16 %v16047_v7, %v16042_v5 }
  0x54   : > { %13138 = vmatpush3.bf16.msra.mxu0 %v14654_v21  ;;  %v11576_v21 = vld [vmem:[%s15728_s13 + $0x182] sm:$0xff] }
  0x55   : > { %13809 = vrot.lane.b32.xlu1 %v15951_v0, %s15615_s15  ;;  %13139 = vmatprep.subr.bf16.mxu0 %v14657_v35 }
  0x56   : > { %13804 = vrot.lane.b32.xlu0 %v13803_v2, %s15615_s15  ;;  %v14670_v2 = vld [vmem:[%s20843_s1] sm:$0xff]  }
  0x58   : > { %13140 = vmatpush3.bf16.msra.mxu0 %v14660_v38  ;;  %v16061_v38 = vld [vmem:[%s15728_s13 + $0xc0] sm:$0xff] }
  0x59   : > { %13819 = vrot.lane.b32.xlu1 %v13818_v6, %s15615_s15  ;;  %13141 = vmatprep.subr.bf16.mxu0 %v14661_v44  ;;  %v13863_v6 = vpack.i.bf16 %v11575_v62, %v11574_v60  ;;  %v14705_v44 = vld [vmem:[%s20843_s1 + $0x138] sm:$0xff]  }
  0x5a   : > { %13814 = vrot.lane.b32.xlu0 %v15752_v16, %s15615_s15  ;;  %v11860_v16 = vld [vmem:[%s15728_s13 + $0x169] sm:$0xff] }
  0x5b   : > { %v13848_v50 = vpack.i.bf16 %v11861_v41, %v11860_v16  ;;  %v11290_v41 = vld [vmem:[%s15728_s13 + $0x1c8] sm:$0xff] }
  0x5c   : > { %13142 = vmatpush3.bf16.msra.mxu0 %v14662_v49  ;;  %v13908_v49 = vpack.i.bf16 %v11291_v42, %v11290_v41  ;;  %v11297_v41 = vld [vmem:[%s15728_s13 + $0x218] sm:$0xff] }
  0x5d   : > { %13829 = vrot.lane.b32.xlu1 %v15983_v27, %s15615_s15  ;;  %13143 = vmatprep.subr.bf16.mxu0 %v14665_v55  ;;  %v16084_v55 = vld [vmem:[%s15728_s13 + $0xe0] sm:$0xff] }
  0x5e   : > { %13824 = vrot.lane.b32.xlu0 %v13823_v33, %s15615_s15  ;;  %v13888_v33 = vpack.i.bf16 %v11865_v9, %v11864_v8  ;;  %v411_v8 = vld [vmem:[%s15728_s13 + $0x1e9] sm:$0xff] }
  0x61   : > { %13839 = vrot.lane.b32.xlu1 %v13838_v39, %s15615_s15  ;;  %v16064_v39 = vld [vmem:[%s15728_s13 + $0xc8] sm:$0xff] }
  0x62   : > { %13834 = vrot.lane.b32.xlu0 %v15771_v22, %s15615_s15  ;;  %v14668_v22 = vld [vmem:[%s20843_s1 + $0x8] sm:$0xff]   ;;  %v13898_v16 = vpack.i.bf16 %v16064_v39, %v16061_v38 }
  0x63   : > { %13144 = vmatpush3.bf16.msra.mxu0 %v14668_v22  ;;  %v409_v22 = vld [vmem:[%s15728_s13 + $0x1d1] sm:$0xff] }
  0x64   : > { %13145 = vmatprep.subr.bf16.mxu0 %v14669_v1  ;;  %v16098_v1 = vld [vmem:[%s15728_s13 + $0xf0] sm:$0xff] }
  0x65   : > { %13849 = vrot.lane.b32.xlu1 %v13848_v50, %s15615_s15 }
  0x66   : > { %13844 = vrot.lane.b32.xlu0 %v13843_v51, %s15615_s15  ;;  %v16081_v51 = vld [vmem:[%s15728_s13 + $0xd8] sm:$0xff] }
  0x67   : > { %13146 = vmatpush3.bf16.msra.mxu0 %v14670_v2  ;;  %v13918_v56 = vpack.i.bf16 %v16084_v55, %v16081_v51  ;;  %v16101_v2 = vld [vmem:[%s15728_s13 + $0xf8] sm:$0xff] }
  0x68   : > { %13443 = vmatprep.subr.bf16.mxu0 %v14705_v44 }
  0x69   : > { %13859 = vrot.lane.b32.xlu1 %v13858_v59, %s15615_s15  ;;  %v408_v59 = vld [vmem:[%s15728_s13 + $0x1c9] sm:$0xff] }
  0x6a   : > { %13854 = vrot.lane.b32.xlu0 %v15787_v28, %s15615_s15  ;;  %v11577_v28 = vld [vmem:[%s15728_s13 + $0x18a] sm:$0xff]  ;;  %v13923_v62 = vpack.i.bf16 %v409_v22, %v408_v59 }
  0x6b   : > { %v13883_v35 = vpack.i.bf16 %v11577_v28, %v11576_v21  ;;  %v16115_v28 = vld [vmem:[%s15728_s13 + $0x108] sm:$0xff] }
  0x6d   : > { %13869 = vrot.lane.b32.xlu1 %v13868_v4, %s15615_s15  ;;  %v13938_v4 = vpack.i.bf16 %v16101_v2, %v16098_v1 }
  0x6e   : > { %13864 = vrot.lane.b32.xlu0 %v13863_v6, %s15615_s15  ;;  %v11294_v6 = vld [vmem:[%s15728_s13 + $0x1f8] sm:$0xff] }
  0x71   : > { %13879 = vrot.lane.b32.xlu1 %v13878_v17, %s15615_s15  ;;  %v11295_v17 = vld [vmem:[%s15728_s13 + $0x200] sm:$0xff] }
  0x72   : > { %13874 = vrot.lane.b32.xlu0 %v15802_v34, %s15615_s15  ;;  %v406_v34 = vld [vmem:[%s15728_s13 + $0x1b1] sm:$0xff]  ;;  %v13948_v9 = vpack.i.bf16 %v11295_v17, %v11294_v6 }
  0x73   : > { %v13903_v50 = vpack.i.bf16 %v407_v43, %v406_v34  ;;  %v412_v34 = vld [vmem:[%s15728_s13 + $0x1f9] sm:$0xff]  ;;  %v413_v43 = vld [vmem:[%s15728_s13 + $0x201] sm:$0xff] }
  0x74   : > { %v13963_v22 = vpack.i.bf16 %v413_v43, %v412_v34  ;;  %v11299_v34 = vld [vmem:[%s15728_s13 + $0x230] sm:$0xff] }
  0x75   : > { %13889 = vrot.lane.b32.xlu1 %v13888_v33, %s15615_s15  ;;  %v16118_v33 = vld [vmem:[%s15728_s13 + $0x110] sm:$0xff] }
  0x76   : > { %13884 = vrot.lane.b32.xlu0 %v13883_v35, %s15615_s15  ;;  %v13958_v35 = vpack.i.bf16 %v16118_v33, %v16115_v28 }
  0x79   : > { %13899 = vrot.lane.b32.xlu1 %v13898_v16, %s15615_s15  ;;  %v11296_v16 = vld [vmem:[%s15728_s13 + $0x210] sm:$0xff] }
  0x7a   : > { %13894 = vrot.lane.b32.xlu0 %v15817_v40, %s15615_s15  ;;  %v11293_v40 = vld [vmem:[%s15728_s13 + $0x1e8] sm:$0xff] }
  0x7b   : > { %v13928_v60 = vpack.i.bf16 %v11293_v40, %v11292_v57  ;;  %v13968_v57 = vpack.i.bf16 %v11297_v41, %v11296_v16 }
  0x7d   : > { %13909 = vrot.lane.b32.xlu1 %v13908_v49, %s15615_s15 }
  0x7e   : > { %13904 = vrot.lane.b32.xlu0 %v13903_v50, %s15615_s15 }
  0x81   : > { %13919 = vrot.lane.b32.xlu1 %v13918_v56, %s15615_s15 }
  0x82   : > { %13914 = vrot.lane.b32.xlu0 %v15826_v46, %s15615_s15  ;;  %v410_v46 = vld [vmem:[%s15728_s13 + $0x1e1] sm:$0xff] }
  0x83   : > { %v13943_v21 = vpack.i.bf16 %v411_v8, %v410_v46 }
  0x85   : > { %13929 = vrot.lane.b32.xlu1 %v13928_v60, %s15615_s15  ;;  %v16136_v60 = vld [vmem:[%s15728_s13 + $0x120] sm:$0xff] }
  0x86   : > { %13924 = vrot.lane.b32.xlu0 %v13923_v62, %s15615_s15  ;;  %v16139_v62 = vld [vmem:[%s15728_s13 + $0x128] sm:$0xff] }
  0x89   : > { %13939 = vrot.lane.b32.xlu1 %v13938_v4, %s15615_s15 }
  0x8a   : > { %13934 = vrot.lane.b32.xlu0 %v15835_v52, %s15615_s15 }
  0x8d   : > { %13949 = vrot.lane.b32.xlu1 %v13948_v9, %s15615_s15 }
  0x8e   : > { %13944 = vrot.lane.b32.xlu0 %v13943_v21, %s15615_s15 }
  0x8f   : > { %v13675_v42 = vpop.permute.xlu1 %13674 }
  0x90   : > { %v13677_v52 = vunpack.i.h.bf16 %v13675_v42  ;;  %v13676_v44 = vunpack.i.l.bf16 %v13675_v42  ;;  %v13665_v49 = vpop.permute.xlu0 %13664  ;;  %v11298_v42 = vld [vmem:[%s15728_s13 + $0x228] sm:$0xff] }
  0x91   : > { %v13667_v50 = vunpack.i.h.bf16 %v13665_v49  ;;  %v13666_v56 = vunpack.i.l.bf16 %v13665_v49  ;;  %13959 = vrot.lane.b32.xlu1 %v13958_v35, %s15615_s15 }
  0x92   : > { %v3354_v40 = vsel %vm854_vm0, %v15744_v14, %v13676_v44  ;;  %v3355_v59 = vsel %vm854_vm0, %v15747_v15, %v13677_v52  ;;  %13954 = vrot.lane.b32.xlu0 %v15844_v58, %s15615_s15 }
  0x93   : > { %v12844_v4 = vpack.c.bf16 %v3354_v40, %v3354_v40  ;;  %v12845_v6 = vpack.c.bf16 %v3355_v59, %v3355_v59  ;;  %v3352_v17 = vsel %vm854_vm0, %v15884_v26, %v13666_v56  ;;  %v3353_v46 = vsel %vm854_vm0, %v15890_v29, %v13667_v50  ;;  %v13680_v14 = vpop.permute.xlu1 %13679  ;;  %v414_v56 = vld [vmem:[%s15728_s13 + $0x211] sm:$0xff] }
  0x94   : > { %v12842_v8 = vpack.c.bf16 %v3352_v17, %v3352_v17  ;;  %v12843_v15 = vpack.c.bf16 %v3353_v46, %v3353_v46  ;;  %v13682_v9 = vunpack.i.h.bf16 %v13680_v14  ;;  %v13681_v58 = vunpack.i.l.bf16 %v13680_v14  ;;  %v13670_v21 = vpop.permute.xlu0 %13669  ;;  %v16169_v14 = vld [vmem:[%s15728_s13 + $0x138] sm:$0xff] }
  0x95   : > { %3834 = vst [vmem:[#allocation2 + $0x30] sm:$0xf] %v12844_v4  ;;  %3835 = vst [vmem:[#allocation2 + $0x44] sm:$0xf] %v12845_v6  ;;  %v13672_v35 = vunpack.i.h.bf16 %v13670_v21  ;;  %v13671_v16 = vunpack.i.l.bf16 %v13670_v21  ;;  %13969 = vrot.lane.b32.xlu1 %v13968_v57, %s15615_s15  ;;  %v13978_v26 = vpack.i.bf16 %v16139_v62, %v16136_v60  ;;  %v415_v57 = vld [vmem:[%s15728_s13 + $0x219] sm:$0xff] }
  0x96   : > { %3832 = vst [vmem:[#allocation2 + $0x8] sm:$0xf] %v12842_v8  ;;  %3833 = vst [vmem:[#allocation2 + $0x1c] sm:$0xf] %v12843_v15  ;;  %v4508_v29 = vsel %vm854_vm0, %v15916_v47, %v13682_v9  ;;  %v4507_v41 = vsel %vm854_vm0, %v15913_v45, %v13681_v58  ;;  %13964 = vrot.lane.b32.xlu0 %v13963_v22, %s15615_s15  ;;  %v13983_v46 = vpack.i.bf16 %v415_v57, %v414_v56  ;;  %v16172_v8 = vld [vmem:[%s15728_s13 + $0x140] sm:$0xff] }
  0x97   : > { %v12941_v43 = vpack.c.bf16 %v4508_v29, %v4508_v29  ;;  %v12940_v52 = vpack.c.bf16 %v4507_v41, %v4507_v41  ;;  %v4506_v44 = vsel %vm854_vm0, %v15874_v13, %v13672_v35  ;;  %v4505_v49 = vsel %vm854_vm0, %v15871_v10, %v13671_v16  ;;  %v13690_v50 = vpop.permute.xlu1 %13689 }
  0x98   : > { %v12939_v40 = vpack.c.bf16 %v4506_v44, %v4506_v44  ;;  %v12938_v47 = vpack.c.bf16 %v4505_v49, %v4505_v49  ;;  %v13692_v59 = vunpack.i.h.bf16 %v13690_v50  ;;  %v13691_v45 = vunpack.i.l.bf16 %v13690_v50  ;;  %v13685_v22 = vpop.permute.xlu0 %13684 }
  0x99   : > { %4988 = vst [vmem:[#allocation2 + $0x48] sm:$0xf] %v12941_v43  ;;  %4987 = vst [vmem:[#allocation2 + $0x34] sm:$0xf] %v12940_v52  ;;  %v13687_v4 = vunpack.i.h.bf16 %v13685_v22  ;;  %v13686_v6 = vunpack.i.l.bf16 %v13685_v22  ;;  %13979 = vrot.lane.b32.xlu1 %v13978_v26, %s15615_s15  ;;  %v13988_v13 = vpack.i.bf16 %v11299_v34, %v11298_v42  ;;  %v11300_v34 = vld [vmem:[%s15728_s13 + $0x240] sm:$0xff]  ;;  %v11301_v43 = vld [vmem:[%s15728_s13 + $0x248] sm:$0xff] }
  0x9a   : > { %4986 = vst [vmem:[#allocation2 + $0x20] sm:$0xf] %v12939_v40  ;;  %4985 = vst [vmem:[#allocation2 + $0xc] sm:$0xf] %v12938_v47  ;;  %v4510_v10 = vsel %vm854_vm0, %v15959_v3, %v13692_v59  ;;  %v4509_v17 = vsel %vm854_vm0, %v15948_v63, %v13691_v45  ;;  %13974 = vrot.lane.b32.xlu0 %v15877_v20, %s15615_s15  ;;  %v416_v52 = vld [vmem:[%s15728_s13 + $0x229] sm:$0xff]  ;;  %v417_v40 = vld [vmem:[%s15728_s13 + $0x231] sm:$0xff] }
  0x9b   : > { %v12943_v15 = vpack.c.bf16 %v4510_v10, %v4510_v10  ;;  %v12942_v9 = vpack.c.bf16 %v4509_v17, %v4509_v17  ;;  %v3356_v58 = vsel %vm854_vm0, %v15738_v11, %v13686_v6  ;;  %v3357_v21 = vsel %vm854_vm0, %v15741_v12, %v13687_v4  ;;  %v13700_v3 = vpop.permute.xlu1 %13699  ;;  %v14643_v22 = vld [vmem:[%s20845_s3 + $0x38] sm:$0xff]   ;;  %v16198_v4 = vld [vmem:[%s15728_s13 + $0x150] sm:$0xff] }
  0x9c   : > { %v12846_v35 = vpack.c.bf16 %v3356_v58, %v3356_v58  ;;  %v12847_v63 = vpack.c.bf16 %v3357_v21, %v3357_v21  ;;  %v13702_v16 = vunpack.i.h.bf16 %v13700_v3  ;;  %v13701_v20 = vunpack.i.l.bf16 %v13700_v3  ;;  %v13695_v26 = vpop.permute.xlu0 %13694 }
  0x9d   : > { %4990 = vst [vmem:[#allocation2 + $0x70] sm:$0xf] %v12943_v15  ;;  %4989 = vst [vmem:[#allocation2 + $0x5c] sm:$0xf] %v12942_v9  ;;  %v13697_v29 = vunpack.i.h.bf16 %v13695_v26  ;;  %v13696_v41 = vunpack.i.l.bf16 %v13695_v26  ;;  %13989 = vrot.lane.b32.xlu1 %v13988_v13, %s15615_s15  ;;  %v13998_v11 = vpack.i.bf16 %v16172_v8, %v16169_v14  ;;  %v14008_v13 = vpack.i.bf16 %v11301_v43, %v11300_v34  ;;  %v16208_v9 = vld [vmem:[%s15728_s13 + $0x158] sm:$0xff]  ;;  %v11303_v34 = vld [vmem:[%s15728_s13 + $0x260] sm:$0xff] }
  0x9e   : > { %3836 = vst [vmem:[#allocation2 + $0x58] sm:$0xf] %v12846_v35  ;;  %3837 = vst [vmem:[#allocation2 + $0x6c] sm:$0xf] %v12847_v63  ;;  %v4512_v12 = vsel %vm854_vm0, %v15986_v32, %v13702_v16  ;;  %v4511_v42 = vsel %vm854_vm0, %v15980_v23, %v13701_v20  ;;  %13984 = vrot.lane.b32.xlu0 %v13983_v46, %s15615_s15  ;;  %v14003_v15 = vpack.i.bf16 %v417_v40, %v416_v52 }
  0x9f   : > { %v12945_v44 = vpack.c.bf16 %v4512_v12, %v4512_v12  ;;  %v12944_v49 = vpack.c.bf16 %v4511_v42, %v4511_v42  ;;  %v3358_v50 = vsel %vm854_vm0, %v15760_v18, %v13696_v41  ;;  %v3359_v56 = vsel %vm854_vm0, %v15763_v19, %v13697_v29  ;;  %v13710_v57 = vpop.permute.xlu1 %13709  ;;  %v14639_v19 = vld [vmem:[#allocation2 + $0x8] ss:$20 sps:$4 sm:$0xff]   ;;  %v14651_v12 = vld [vmem:[%s20845_s3 + $0x30] sm:$0xff]  }
  0xa0   : > { %v12848_v32 = vpack.c.bf16 %v3358_v50, %v3358_v50  ;;  %v12849_v47 = vpack.c.bf16 %v3359_v56, %v3359_v56  ;;  %v13712_v59 = vunpack.i.h.bf16 %v13710_v57  ;;  %v13711_v23 = vunpack.i.l.bf16 %v13710_v57  ;;  %v13705_v45 = vpop.permute.xlu0 %13704  ;;  %v11302_v42 = vld [vmem:[%s15728_s13 + $0x258] sm:$0xff]  ;;  %v419_v50 = vld [vmem:[%s15728_s13 + $0x249] sm:$0xff] }
  0xa1   : > { %4992 = vst [vmem:[#allocation2 + $0x98] sm:$0xf] %v12945_v44  ;;  %4991 = vst [vmem:[#allocation2 + $0x84] sm:$0xf] %v12944_v49  ;;  %v13707_v18 = vunpack.i.h.bf16 %v13705_v45  ;;  %v13706_v6 = vunpack.i.l.bf16 %v13705_v45  ;;  %13999 = vrot.lane.b32.xlu1 %v13998_v11, %s15615_s15  ;;  %v14641_v46 = vld [vmem:[#allocation2 + $0xc] ss:$20 sps:$4 sm:$0xff]  }
  0xa2   : > { %3838 = vst [vmem:[#allocation2 + $0x80] sm:$0xf] %v12848_v32  ;;  %3839 = vst [vmem:[#allocation2 + $0x94] sm:$0xf] %v12849_v47  ;;  %v4514_v10 = vsel %vm854_vm0, %v16018_v54, %v13712_v59  ;;  %v4513_v17 = vsel %vm854_vm0, %v16015_v53, %v13711_v23  ;;  %13994 = vrot.lane.b32.xlu0 %v15919_v48, %s15615_s15  ;;  %v14645_v54 = vld [vmem:[#allocation2 + $0x34] ss:$20 sps:$4 sm:$0xff]   ;;  %6785 = vmatprep.mubr.bf16.mxu1 %v14641_v46 }
  0xa3   : > { %v12947_v58 = vpack.c.bf16 %v4514_v10, %v4514_v10  ;;  %v12946_v21 = vpack.c.bf16 %v4513_v17, %v4513_v17  ;;  %v3360_v3 = vsel %vm854_vm0, %v15776_v24, %v13706_v6  ;;  %v3361_v35 = vsel %vm854_vm0, %v15779_v25, %v13707_v18  ;;  %v13720_v63 = vpop.permute.xlu1 %13719  ;;  %6786 = vmatmul.mubr.bf16.vlgmr.msra.gmra.mxu1 %v14639_v19  ;;  %v418_v49 = vld [vmem:[%s15728_s13 + $0x241] sm:$0xff]  ;;  %v16238_v23 = vld [vmem:[%s15728_s13 + $0x170] sm:$0xff]  ;;  %v16248_v6 = vld [vmem:[%s15728_s13 + $0x278] sm:$0xff] }
  0xa4   : > { %v12850_v16 = vpack.c.bf16 %v3360_v3, %v3360_v3  ;;  %v12851_v20 = vpack.c.bf16 %v3361_v35, %v3361_v35  ;;  %v13722_v53 = vunpack.i.h.bf16 %v13720_v63  ;;  %v13721_v26 = vunpack.i.l.bf16 %v13720_v63  ;;  %v13715_v29 = vpop.permute.xlu0 %13714  ;;  %8459 = vmatpush1.bf16.msra.mxu1 %v14643_v22  ;;  %6793 = vmatprep.mubr.bf16.mxu1 %v14645_v54  ;;  %v16235_v59 = vld [vmem:[%s15728_s13 + $0x168] sm:$0xff]  ;;  %v14655_v17 = vld [vmem:[#allocation2 + $0x5c] ss:$20 sps:$4 sm:$0xff]  }
  0xa5   : > { %4994 = vst [vmem:[#allocation2 + $0xc0] sm:$0xf] %v12947_v58  ;;  %4993 = vst [vmem:[#allocation2 + $0xac] sm:$0xf] %v12946_v21  ;;  %v13717_v48 = vunpack.i.h.bf16 %v13715_v29  ;;  %v13716_v41 = vunpack.i.l.bf16 %v13715_v29  ;;  %14009 = vrot.lane.b32.xlu1 %v14008_v13, %s15615_s15  ;;  %v14018_v24 = vpack.i.bf16 %v16208_v9, %v16198_v4  ;;  %8460 = vmatprep.subr.bf16.mxu1 %v20850_v61  ;;  %v14659_v18 = vld [vmem:[%s20845_s3 + $0x28] sm:$0xff]   ;;  %v16257_v46 = vld [vmem:[%s15728_s13 + $0x259] sm:$0xff] }
  0xa6   : > { %3840 = vst [vmem:[#allocation2 + $0xa8] sm:$0xf] %v12850_v16  ;;  %3841 = vst [vmem:[#allocation2 + $0xbc] sm:$0xf] %v12851_v20  ;;  %v4516_v25 = vsel %vm854_vm0, %v16047_v7, %v13722_v53  ;;  %v4515_v11 = vsel %vm854_vm0, %v16042_v5, %v13721_v26  ;;  %14004 = vrot.lane.b32.xlu0 %v14003_v15, %s15615_s15  ;;  %v14028_v22 = vpack.i.bf16 %v11303_v34, %v11302_v42  ;;  %v16260_v15 = vld [vmem:[%s15728_s13 + $0x261] sm:$0xff]  ;;  %v16291_v34 = vld [vmem:[%s15728_s13 + $0x171] sm:$0xff] }
  0xa7   : > { %v12949_v43 = vpack.c.bf16 %v4516_v25, %v4516_v25  ;;  %v12948_v52 = vpack.c.bf16 %v4515_v11, %v4515_v11  ;;  %v3362_v7 = vsel %vm854_vm0, %v15791_v30, %v13716_v41  ;;  %v3363_v5 = vsel %vm854_vm0, %v15794_v31, %v13717_v48  ;;  %v13730_v44 = vpop.permute.xlu1 %13729  ;;  %v16241_v30 = vld [vmem:[%s15728_s13 + $0x270] sm:$0xff]  ;;  %v16268_v53 = vld [vmem:[%s15728_s13 + $0x180] sm:$0xff]  ;;  %v16271_v26 = vld [vmem:[%s15728_s13 + $0x188] sm:$0xff] }
  0xa8   : > { %v12852_v56 = vpack.c.bf16 %v3362_v7, %v3362_v7  ;;  %v12853_v57 = vpack.c.bf16 %v3363_v5, %v3363_v5  ;;  %v13732_v40 = vunpack.i.h.bf16 %v13730_v44  ;;  %v13731_v32 = vunpack.i.l.bf16 %v13730_v44  ;;  %v13725_v47 = vpop.permute.xlu0 %13724  ;;  %8461 = vmatpush1.bf16.msra.mxu1 %v14651_v12  ;;  %v14650_v35 = vld [vmem:[#allocation2 + $0x30] ss:$20 sps:$4 sm:$0xff]   ;;  %v11466_v11 = vld [vmem:[%s15728_s13 + $0xd9] sm:$0xff] }
  0xa9   : > { %4996 = vst [vmem:[#allocation2 + $0xe8] sm:$0xf] %v12949_v43  ;;  %4995 = vst [vmem:[#allocation2 + $0xd4] sm:$0xf] %v12948_v52  ;;  %v13727_v31 = vunpack.i.h.bf16 %v13725_v47  ;;  %v13726_v45 = vunpack.i.l.bf16 %v13725_v47  ;;  %14019 = vrot.lane.b32.xlu1 %v14018_v24, %s15615_s15  ;;  %v14023_v10 = vpack.i.bf16 %v419_v50, %v418_v49  ;;  %8462 = vmatprep.subr.bf16.mxu1 %v20850_v61  ;;  %v16279_v41 = vld [vmem:[%s15728_s13 + $0x169] sm:$0xff]  ;;  %v11467_v12 = vld [vmem:[%s15728_s13 + $0xe1] sm:$0xff] }
  0xaa   : > { %3842 = vst [vmem:[#allocation2 + $0xd0] sm:$0xf] %v12852_v56  ;;  %3843 = vst [vmem:[#allocation2 + $0xe4] sm:$0xf] %v12853_v57  ;;  %v4518_v19 = vsel %vm854_vm0, %v16064_v39, %v13732_v40  ;;  %v4517_v13 = vsel %vm854_vm0, %v16061_v38, %v13731_v32  ;;  %14014 = vrot.lane.b32.xlu0 %v15951_v0, %s15615_s15  ;;  %v14038_v29 = vpack.i.bf16 %v16238_v23, %v16235_v59  ;;  %v16297_v43 = vld [vmem:[%s15728_s13 + $0x288] sm:$0xff]  ;;  %v16304_v56 = vld [vmem:[%s15728_s13 + $0x290] sm:$0xff] }
  0xab   : > { %v12951_v58 = vpack.c.bf16 %v4518_v19, %v4518_v19  ;;  %v12950_v21 = vpack.c.bf16 %v4517_v13, %v4517_v13  ;;  %v3364_v39 = vsel %vm854_vm0, %v15806_v36, %v13726_v45  ;;  %v3365_v38 = vsel %vm854_vm0, %v15809_v37, %v13727_v31  ;;  %v13740_v3 = vpop.permute.xlu1 %13739  ;;  %6794 = vmatmul.mubr.bf16.gmra.mxu1 %v14650_v35  ;;  %v15431_v7 = vld [vmem:[%s15728_s13 + $0xc1] sm:$0xff]  ;;  %v15432_v44 = vld [vmem:[%s15728_s13 + $0xc9] sm:$0xff]  ;;  %v16307_v57 = vld [vmem:[%s15728_s13 + $0x271] sm:$0xff] }
  0xac   : > { %v12854_v0 = vpack.c.bf16 %v3364_v39, %v3364_v39  ;;  %v12855_v63 = vpack.c.bf16 %v3365_v38, %v3365_v38  ;;  %v13742_v54 = vunpack.i.h.bf16 %v13740_v3  ;;  %v13741_v16 = vunpack.i.l.bf16 %v13740_v3  ;;  %v13735_v20 = vpop.permute.xlu0 %13734  ;;  %6801 = vmatprep.mubr.bf16.mxu1 %v14655_v17  ;;  %8463 = vmatpush1.bf16.msra.mxu1 %v14659_v18  ;;  %v16310_v40 = vld [vmem:[%s15728_s13 + $0x279] sm:$0xff]  ;;  %v16320_v18 = vld [vmem:[%s15728_s13 + $0x289] sm:$0xff] }
  0xad   : > { %4998 = vst [vmem:[#allocation2 + $0x110] sm:$0xf] %v12951_v58  ;;  %4997 = vst [vmem:[#allocation2 + $0xfc] sm:$0xf] %v12950_v21  ;;  %v13737_v36 = vunpack.i.h.bf16 %v13735_v20  ;;  %v13736_v37 = vunpack.i.l.bf16 %v13735_v20  ;;  %14029 = vrot.lane.b32.xlu1 %v14028_v22, %s15615_s15  ;;  %v14048_v48 = vpack.i.bf16 %v16248_v6, %v16241_v30  ;;  %v14043_v42 = vpack.i.bf16 %v16260_v15, %v16257_v46  ;;  %v16314_v45 = vld [vmem:[%s15728_s13 + $0x2a0] sm:$0xff]  ;;  %v16317_v22 = vld [vmem:[%s15728_s13 + $0x2a8] sm:$0xff] }
  0xae   : > { %3844 = vst [vmem:[#allocation2 + $0xf8] sm:$0xf] %v12854_v0  ;;  %3845 = vst [vmem:[#allocation2 + $0x10c] sm:$0xf] %v12855_v63  ;;  %v4520_v24 = vsel %vm854_vm0, %v16084_v55, %v13742_v54  ;;  %v4519_v25 = vsel %vm854_vm0, %v16081_v51, %v13741_v16  ;;  %14024 = vrot.lane.b32.xlu0 %v14023_v10, %s15615_s15  ;;  %v14667_v55 = vld [vmem:[%s20845_s3 + $0x20] sm:$0xff]   ;;  %8464 = vmatprep.subr.bf16.mxu1 %v20850_v61  ;;  %v1432_v17 = vld [vmem:[%s15728_s13 + $0xa] sm:$0xff] }
  0xaf   : > { %v12953_v51 = vpack.c.bf16 %v4520_v24, %v4520_v24  ;;  %v12952_v52 = vpack.c.bf16 %v4519_v25, %v4519_v25  ;;  %v3366_v5 = vsel %vm854_vm0, %v15431_v7, %v13736_v37  ;;  %v3367_v49 = vsel %vm854_vm0, %v15432_v44, %v13737_v36  ;;  %v13750_v50 = vpop.permute.xlu1 %13749  ;;  %v1431_v10 = vld [vmem:[%s15728_s13 + $0x2] sm:$0xff]  ;;  %v14658_v58 = vld [vmem:[#allocation2 + $0x58] ss:$20 sps:$4 sm:$0xff]  }
  0xb0   : > { %v12856_v32 = vpack.c.bf16 %v3366_v5, %v3366_v5  ;;  %v12857_v47 = vpack.c.bf16 %v3367_v49, %v3367_v49  ;;  %v13752_v59 = vunpack.i.h.bf16 %v13750_v50  ;;  %v13751_v23 = vunpack.i.l.bf16 %v13750_v50  ;;  %v13745_v31 = vpop.permute.xlu0 %13744  ;;  %v278_v35 = vld [vmem:[%s15728_s13] sm:$0xff]  ;;  %v279_v0 = vld [vmem:[%s15728_s13 + $0x8] sm:$0xff]  ;;  %v16342_v20 = vld [vmem:[%s15728_s13 + $0x291] sm:$0xff]  ;;  %8465 = vmatpush1.bf16.msra.mxu1 %v14667_v55 }
  0xb1   : > { %5000 = vst [vmem:[#allocation2 + $0x138] sm:$0xf] %v12953_v51  ;;  %4999 = vst [vmem:[#allocation2 + $0x124] sm:$0xf] %v12952_v52  ;;  %v13747_v19 = vunpack.i.h.bf16 %v13745_v31  ;;  %v13746_v13 = vunpack.i.l.bf16 %v13745_v31  ;;  %14039 = vrot.lane.b32.xlu1 %v14038_v29, %s15615_s15  ;;  %v14058_v21 = vpack.i.bf16 %v16271_v26, %v16268_v53  ;;  %v14053_v39 = vpack.i.bf16 %v16291_v34, %v16279_v41  ;;  %v14663_v63 = vld [vmem:[#allocation2 + $0x84] ss:$20 sps:$4 sm:$0xff]  }
  0xb2   : > { %3846 = vst [vmem:[#allocation2 + $0x120] sm:$0xf] %v12856_v32  ;;  %3847 = vst [vmem:[#allocation2 + $0x134] sm:$0xf] %v12857_v47  ;;  %v4522_v38 = vsel %vm854_vm0, %v16101_v2, %v13752_v59  ;;  %v4521_v3 = vsel %vm854_vm0, %v16098_v1, %v13751_v23  ;;  %14034 = vrot.lane.b32.xlu0 %v15983_v27, %s15615_s15  ;;  %v14068_v54 = vpack.i.bf16 %v16304_v56, %v16297_v43  ;;  %v14677_v27 = vld [vmem:[%s20845_s3 + $0x18] sm:$0xff]   ;;  %v16353_v25 = vld [vmem:[%s15728_s13 + $0x2c0] sm:$0xff] }
  0xb3   : > { %v14063_v16 = vpack.i.bf16 %v16310_v40, %v16307_v57  ;;  %v12955_v2 = vpack.c.bf16 %v4522_v38, %v4522_v38  ;;  %v12954_v36 = vpack.c.bf16 %v4521_v3, %v4521_v3  ;;  %v3368_v1 = vsel %vm854_vm0, %v11466_v11, %v13746_v13  ;;  %v13760_v29 = vpop.permute.xlu1 %13759  ;;  %v16350_v24 = vld [vmem:[%s15728_s13 + $0x2b8] sm:$0xff]  ;;  %8466 = vmatprep.subr.bf16.mxu1 %v20850_v61  ;;  %v16357_v11 = vld [vmem:[%s15728_s13 + $0x2a1] sm:$0xff]  ;;  %v14684_v49 = vld [vmem:[%s20845_s3 + $0x10] sm:$0xff]  }
  0xb4   : > { %v3369_v37 = vsel %vm854_vm0, %v11467_v12, %v13747_v19  ;;  %v12858_v51 = vpack.c.bf16 %v3368_v1, %v3368_v1  ;;  %v13762_v7 = vunpack.i.h.bf16 %v13760_v29  ;;  %v13761_v5 = vunpack.i.l.bf16 %v13760_v29  ;;  %v13755_v44 = vpop.permute.xlu0 %13754  ;;  %6802 = vmatmul.mubr.bf16.gmra.mxu1 %v14658_v58  ;;  %v16371_v47 = vld [vmem:[%s15728_s13 + $0x2a9] sm:$0xff]  ;;  %v11468_v6 = vld [vmem:[%s15728_s13 + $0xf1] sm:$0xff]  ;;  %v16389_v19 = vld [vmem:[%s15728_s13 + $0x2b9] sm:$0xff] }
  0xb5   : > { %v12859_v52 = vpack.c.bf16 %v3369_v37, %v3369_v37  ;;  %5002 = vst [vmem:[#allocation2 + $0x160] sm:$0xf] %v12955_v2  ;;  %5001 = vst [vmem:[#allocation2 + $0x14c] sm:$0xf] %v12954_v36  ;;  %v13757_v12 = vunpack.i.h.bf16 %v13755_v44  ;;  %v13756_v55 = vunpack.i.l.bf16 %v13755_v44  ;;  %14049 = vrot.lane.b32.xlu1 %v14048_v48, %s15615_s15  ;;  %v14078_v50 = vpack.i.bf16 %v16317_v22, %v16314_v45  ;;  %v16383_v23 = vld [vmem:[%s15728_s13 + $0x2d0] sm:$0xff]  ;;  %v16386_v31 = vld [vmem:[%s15728_s13 + $0x2d8] sm:$0xff] }
  0xb6   : > { %v14073_v32 = vpack.i.bf16 %v16342_v20, %v16320_v18  ;;  %3848 = vst [vmem:[#allocation2 + $0x148] sm:$0xf] %v12858_v51  ;;  %v2008_v59 = vsel %vm854_vm0, %v1431_v10, %v13761_v5  ;;  %v2009_v30 = vsel %vm854_vm0, %v1432_v17, %v13762_v7  ;;  %14044 = vrot.lane.b32.xlu0 %v14043_v42, %s15615_s15  ;;  %v16394_v17 = vld [vmem:[%s15728_s13 + $0x2c1] sm:$0xff]  ;;  %v16400_v38 = vld [vmem:[%s15728_s13 + $0x2f0] sm:$0xff]  ;;  %v11469_v1 = vld [vmem:[%s15728_s13 + $0xf9] sm:$0xff] }
  0xb7   : > { %3849 = vst [vmem:[#allocation2 + $0x15c] sm:$0xf] %v12859_v52  ;;  %6809 = vmatprep.mubr.bf16.mxu1 %v14663_v63  ;;  %v14088_v48 = vpack.i.bf16 %v16353_v25, %v16350_v24  ;;  %v12746_v13 = vpack.c.bf16 %v2008_v59, %v2008_v59  ;;  %v12747_v10 = vpack.c.bf16 %v2009_v30, %v2009_v30  ;;  %v13770_v42 = vpop.permute.xlu1 %13769  ;;  %v16397_v58 = vld [vmem:[%s15728_s13 + $0x2e8] sm:$0xff]  ;;  %v1433_v51 = vld [vmem:[%s15728_s13 + $0x1a] sm:$0xff]  ;;  %v11471_v43 = vld [vmem:[%s15728_s13 + $0x111] sm:$0xff] }
  0xb8   : > { %v855_v46 = vsel %vm854_vm0, %v278_v35, %v13756_v55  ;;  %v856_v15 = vsel %vm854_vm0, %v279_v0, %v13757_v12  ;;  %8467 = vmatpush1.bf16.msra.mxu1 %v14677_v27  ;;  %v13772_v2 = vunpack.i.h.bf16 %v13770_v42  ;;  %v13771_v36 = vunpack.i.l.bf16 %v13770_v42  ;;  %v13765_v37 = vpop.permute.xlu0 %13764  ;;  %v16405_v35 = vld [vmem:[%s15728_s13 + $0x2d1] sm:$0xff]  ;;  %v16408_v0 = vld [vmem:[%s15728_s13 + $0x2d9] sm:$0xff]  ;;  %v1434_v52 = vld [vmem:[%s15728_s13 + $0x22] sm:$0xff] }
  0xb9   : > { %v12650_v3 = vpack.c.bf16 %v855_v46, %v855_v46  ;;  %v12651_v63 = vpack.c.bf16 %v856_v15, %v856_v15  ;;  %8468 = vmatprep.subr.bf16.mxu1 %v20850_v61  ;;  %2488 = vst [vmem:[#allocation2 + $0x4] sm:$0xf] %v12746_v13  ;;  %2489 = vst [vmem:[#allocation2 + $0x18] sm:$0xf] %v12747_v10  ;;  %v13767_v29 = vunpack.i.h.bf16 %v13765_v37  ;;  %v13766_v27 = vunpack.i.l.bf16 %v13765_v37  ;;  %v14666_v7 = vld [vmem:[#allocation2 + $0x80] ss:$20 sps:$4 sm:$0xff]  }
  0xba   : > { %14059 = vrot.lane.b32.xlu1 %v14058_v21, %s15615_s15  ;;  %v14083_v5 = vpack.i.bf16 %v16371_v47, %v16357_v11  ;;  %v14098_v44 = vpack.i.bf16 %v16386_v31, %v16383_v23  ;;  %v4524_v12 = vsel %vm854_vm0, %v16118_v33, %v13772_v2  ;;  %v4523_v53 = vsel %vm854_vm0, %v16115_v28, %v13771_v36  ;;  %v14671_v26 = vld [vmem:[#allocation2 + $0xac] ss:$20 sps:$4 sm:$0xff]   ;;  %v16447_v46 = vld [vmem:[%s15728_s13 + $0x2f1] sm:$0xff] }
  0xbb   : > { %1335 = vst [vmem:[#allocation2] sm:$0xf] %v12650_v3  ;;  %1336 = vst [vmem:[#allocation2 + $0x14] sm:$0xf] %v12651_v63  ;;  %14054 = vrot.lane.b32.xlu0 %v14053_v39, %s15615_s15  ;;  %v16433_v59 = vld [vmem:[%s15728_s13 + $0x300] sm:$0xff]  ;;  %v16436_v33 = vld [vmem:[%s15728_s13 + $0x308] sm:$0xff]  ;;  %v12957_v30 = vpack.c.bf16 %v4524_v12, %v4524_v12  ;;  %v12956_v28 = vpack.c.bf16 %v4523_v53, %v4523_v53  ;;  %v3371_v13 = vsel %vm854_vm0, %v11469_v1, %v13767_v29  ;;  %v13780_v34 = vpop.permute.xlu1 %13779 }
  0xbc   : > { %v3370_v41 = vsel %vm854_vm0, %v11468_v6, %v13766_v27  ;;  %8469 = vmatpush1.bf16.msra.mxu1 %v14684_v49  ;;  %v14691_v39 = vld [vmem:[%s20845_s3 + $0x8] sm:$0xff]   ;;  %v12861_v15 = vpack.c.bf16 %v3371_v13, %v3371_v13  ;;  %v13782_v3 = vunpack.i.h.bf16 %v13780_v34  ;;  %v13781_v63 = vunpack.i.l.bf16 %v13780_v34  ;;  %v13775_v2 = vpop.permute.xlu0 %13774  ;;  %v280_v36 = vld [vmem:[%s15728_s13 + $0x18] sm:$0xff]  ;;  %v281_v1 = vld [vmem:[%s15728_s13 + $0x20] sm:$0xff] }
  0xbd   : > { %v16444_v10 = vld [vmem:[%s15728_s13 + $0x2e9] sm:$0xff]  ;;  %v12860_v42 = vpack.c.bf16 %v3370_v41, %v3370_v41  ;;  %8470 = vmatprep.subr.bf16.mxu1 %v20850_v61  ;;  %v16453_v49 = vld [vmem:[%s15728_s13 + $0x318] sm:$0xff]  ;;  %5004 = vst [vmem:[#allocation2 + $0x188] sm:$0xf] %v12957_v30  ;;  %5003 = vst [vmem:[#allocation2 + $0x174] sm:$0xf] %v12956_v28  ;;  %v13777_v6 = vunpack.i.h.bf16 %v13775_v2  ;;  %v13776_v37 = vunpack.i.l.bf16 %v13775_v2  ;;  %6810 = vmatmul.mubr.bf16.gmra.mxu1 %v14666_v7 }
  0xbe   : > { %v16458_v29 = vld [vmem:[%s20845_s3] sm:$0xff]   ;;  %14069 = vrot.lane.b32.xlu1 %v14068_v54, %s15615_s15  ;;  %3851 = vst [vmem:[#allocation2 + $0x184] sm:$0xf] %v12861_v15  ;;  %v2010_v7 = vsel %vm854_vm0, %v1433_v51, %v13781_v63  ;;  %v2011_v30 = vsel %vm854_vm0, %v1434_v52, %v13782_v3  ;;  %v11470_v28 = vld [vmem:[%s15728_s13 + $0x109] sm:$0xff]  ;;  %6817 = vmatprep.mubr.bf16.mxu1 %v14671_v26  ;;  %v16493_v40 = vld [vmem:[%s15728_s13 + $0x1d2] sm:$0xff] }
  0xbf   : > { %v16469_v53 = vld [vmem:[%s15728_s13 + $0x320] sm:$0xff]  ;;  %3850 = vst [vmem:[#allocation2 + $0x170] sm:$0xf] %v12860_v42  ;;  %14064 = vrot.lane.b32.xlu0 %v14063_v16, %s15615_s15  ;;  %v16485_v13 = vld [vmem:[%s15728_s13 + $0x309] sm:$0xff]  ;;  %v12748_v52 = vpack.c.bf16 %v2010_v7, %v2010_v7  ;;  %v12749_v41 = vpack.c.bf16 %v2011_v30, %v2011_v30  ;;  %v857_v26 = vsel %vm854_vm0, %v280_v36, %v13776_v37  ;;  %v13790_v57 = vpop.permute.xlu1 %13789  ;;  %v16499_v15 = vld [vmem:[%s15728_s13 + $0x338] sm:$0xff] }
  0xc0   : > { %v16482_v54 = vld [vmem:[%s15728_s13 + $0x301] sm:$0xff]  ;;  %v16488_v51 = vld [vmem:[%s15728_s13 + $0x1ca] sm:$0xff]  ;;  %v858_v34 = vsel %vm854_vm0, %v281_v1, %v13777_v6  ;;  %8471 = vmatpush1.bf16.msra.mxu1 %v14691_v39  ;;  %v12652_v42 = vpack.c.bf16 %v857_v26, %v857_v26  ;;  %v13792_v63 = vunpack.i.h.bf16 %v13790_v57  ;;  %v13791_v2 = vunpack.i.l.bf16 %v13790_v57  ;;  %v13785_v7 = vpop.permute.xlu0 %13784  ;;  %v16503_v36 = vld [vmem:[%s15728_s13 + $0x319] sm:$0xff] }
  0xc1   : > { %v16496_v16 = vld [vmem:[%s15728_s13 + $0x330] sm:$0xff]  ;;  %v12653_v3 = vpack.c.bf16 %v858_v34, %v858_v34  ;;  %v14676_v30 = vld [vmem:[#allocation2 + $0xa8] ss:$20 sps:$4 sm:$0xff]   ;;  %8472 = vmatprep.subr.bf16.mxu1 %v20850_v61  ;;  %2490 = vst [vmem:[#allocation2 + $0x2c] sm:$0xf] %v12748_v52  ;;  %v13787_v6 = vunpack.i.h.bf16 %v13785_v7  ;;  %v13786_v37 = vunpack.i.l.bf16 %v13785_v7 }
  0xc2   : > { %v16506_v1 = vld [vmem:[%s15728_s13 + $0x321] sm:$0xff]  ;;  %v16509_v39 = vld [vmem:[%s15728_s13 + $0x378] sm:$0xff]  ;;  %2491 = vst [vmem:[#allocation2 + $0x40] sm:$0xf] %v12749_v41  ;;  %14079 = vrot.lane.b32.xlu1 %v14078_v50, %s15615_s15  ;;  %1337 = vst [vmem:[#allocation2 + $0x28] sm:$0xf] %v12652_v42  ;;  %v4526_v7 = vsel %vm854_vm0, %v16139_v62, %v13792_v63  ;;  %v4525_v12 = vsel %vm854_vm0, %v16136_v60, %v13791_v2 }
  0xc3   : > { %v1435_v26 = vld [vmem:[%s15728_s13 + $0x32] sm:$0xff]  ;;  %v1436_v34 = vld [vmem:[%s15728_s13 + $0x3a] sm:$0xff]  ;;  %1338 = vst [vmem:[#allocation2 + $0x3c] sm:$0xf] %v12653_v3  ;;  %14074 = vrot.lane.b32.xlu0 %v14073_v32, %s15615_s15  ;;  %v12959_v60 = vpack.c.bf16 %v4526_v7, %v4526_v7  ;;  %v12958_v63 = vpack.c.bf16 %v4525_v12, %v4525_v12  ;;  %v3373_v2 = vsel %vm854_vm0, %v11471_v43, %v13787_v6  ;;  %v13800_v52 = vpop.permute.xlu1 %13799  ;;  %v16553_v32 = vld [vmem:[%s15728_s13 + $0x369] sm:$0xff] }
  0xc4   : > { %v14673_v57 = vld [vmem:[#allocation2] ss:$20 sps:$4 sm:$0xff]   ;;  %v14706_v56 = vld [vmem:[%s20845_s3 + $0x78] sm:$0xff]   ;;  %v3372_v41 = vsel %vm854_vm0, %v11470_v28, %v13786_v37  ;;  %8473 = vmatpush1.bf16.msra.mxu1 %v16458_v29  ;;  %v12863_v7 = vpack.c.bf16 %v3373_v2, %v3373_v2  ;;  %v13802_v62 = vunpack.i.h.bf16 %v13800_v52  ;;  %v13801_v43 = vunpack.i.l.bf16 %v13800_v52  ;;  %v13795_v6 = vpop.permute.xlu0 %13794  ;;  %v16560_v29 = vld [vmem:[%s15728_s13 + $0x1ea] sm:$0xff] }
  0xc5   : > { %v282_v45 = vld [vmem:[%s15728_s13 + $0x30] sm:$0xff]  ;;  %v283_v22 = vld [vmem:[%s15728_s13 + $0x38] sm:$0xff]  ;;  %v16537_v3 = vld [vmem:[%s15728_s13 + $0x380] sm:$0xff]  ;;  %v12862_v12 = vpack.c.bf16 %v3372_v41, %v3372_v41  ;;  %8474 = vmatprep.subr.bf16.mxu1 %v20850_v61  ;;  %5006 = vst [vmem:[#allocation2 + $0x1b0] sm:$0xf] %v12959_v60  ;;  %v13797_v42 = vunpack.i.h.bf16 %v13795_v6  ;;  %v13796_v2 = vunpack.i.l.bf16 %v13795_v6  ;;  %6818 = vmatmul.mubr.bf16.gmra.mxu1 %v14676_v30 }
  0xc6   : > { %v14675_v50 = vld [vmem:[#allocation2 + $0x4] ss:$20 sps:$4 sm:$0xff]   ;;  %v14678_v27 = vld [vmem:[#allocation2 + $0xd4] ss:$20 sps:$4 sm:$0xff]   ;;  %5005 = vst [vmem:[#allocation2 + $0x19c] sm:$0xf] %v12958_v63  ;;  %v2012_v55 = vsel %vm854_vm0, %v1435_v26, %v13801_v43  ;;  %v2013_v60 = vsel %vm854_vm0, %v1436_v34, %v13802_v62  ;;  %14089 = vrot.lane.b32.xlu1 %v14088_v48, %s15615_s15 }
  0xc7   : > { %v16547_v18 = vld [vmem:[%s20843_s1 + $0x130] sm:$0xff]   ;;  %v16550_v20 = vld [vmem:[%s15728_s13 + $0x361] sm:$0xff]  ;;  %6624 = vmatprep.mubr.bf16.mxu0 %v14675_v50  ;;  %3853 = vst [vmem:[#allocation2 + $0x1ac] sm:$0xf] %v12863_v7  ;;  %3852 = vst [vmem:[#allocation2 + $0x198] sm:$0xf] %v12862_v12  ;;  %6825 = vmatprep.mubr.bf16.mxu1 %v14678_v27  ;;  %v12750_v12 = vpack.c.bf16 %v2012_v55, %v2012_v55  ;;  %v12751_v34 = vpack.c.bf16 %v2013_v60, %v2013_v60  ;;  %v13810_v43 = vpop.permute.xlu1 %13809 }
  0xc8   : > { %v16557_v28 = vld [vmem:[%s15728_s13 + $0x1e2] sm:$0xff]  ;;  %6625 = vmatmul.mubr.bf16.vlgmr.msra.gmra.mxu0 %v14673_v57  ;;  %v14713_v30 = vld [vmem:[%s20845_s3 + $0x70] sm:$0xff]   ;;  %v859_v62 = vsel %vm854_vm0, %v282_v45, %v13796_v2  ;;  %v860_v27 = vsel %vm854_vm0, %v283_v22, %v13797_v42  ;;  %8475 = vmatpush2.bf16.msra.mxu1 %v14706_v56  ;;  %v16591_v24 = vld [vmem:[%s15728_s13 + $0x398] sm:$0xff]  ;;  %v13812_v55 = vunpack.i.h.bf16 %v13810_v43  ;;  %v13811_v60 = vunpack.i.l.bf16 %v13810_v43  ;;  %v13805_v45 = vpop.permute.xlu0 %13804 }
  0xc9   : > { %20919 = vst [vmem:[#allocation10_spill] sm:$0xff] %v16557_v28  ;;  %v16563_v37 = vld [vmem:[%s15728_s13 + $0x1e1] sm:$0xff]  ;;  %v16570_v50 = vld [vmem:[%s15728_s13 + $0x1e9] sm:$0xff]  ;;  %v16594_v25 = vld [vmem:[%s15728_s13 + $0x379] sm:$0xff]  ;;  %v12654_v6 = vpack.c.bf16 %v859_v62, %v859_v62  ;;  %v12655_v7 = vpack.c.bf16 %v860_v27, %v860_v27  ;;  %14084 = vrot.lane.b32.xlu0 %v14083_v5, %s15615_s15  ;;  %v13807_v43 = vunpack.i.h.bf16 %v13805_v45  ;;  %v13806_v41 = vunpack.i.l.bf16 %v13805_v45  ;;  %8476 = vmatprep.subr.bf16.mxu1 %v20850_v61 }
  0xca   : > { %v11472_v63 = vld [vmem:[%s15728_s13 + $0x121] sm:$0xff]  ;;  %v11473_v57 = vld [vmem:[%s15728_s13 + $0x129] sm:$0xff]  ;;  %v15433_v56 = vld [vmem:[%s20843_s1 + $0x138] sm:$0xff]   ;;  %2492 = vst [vmem:[#allocation2 + $0x54] sm:$0xf] %v12750_v12  ;;  %v4528_v12 = vsel %vm854_vm0, %v16172_v8, %v13812_v55  ;;  %14099 = vrot.lane.b32.xlu1 %v14098_v44, %s15615_s15 }
  0xcb   : > { %v16586_v26 = vld [vmem:[%s15728_s13 + $0x390] sm:$0xff]  ;;  %v16597_v48 = vld [vmem:[%s15728_s13 + $0x381] sm:$0xff]  ;;  %13444 = vmatpush3.bf16.msra.mxu0 %v15433_v56  ;;  %v16613_v62 = vld [vmem:[%s15728_s13 + $0x1f9] sm:$0xff]  ;;  %2493 = vst [vmem:[#allocation2 + $0x68] sm:$0xf] %v12751_v34  ;;  %v4527_v34 = vsel %vm854_vm0, %v16169_v14, %v13811_v60  ;;  %v3375_v8 = vsel %vm854_vm0, %v11473_v57, %v13807_v43  ;;  %v3374_v14 = vsel %vm854_vm0, %v11472_v63, %v13806_v41  ;;  %v13820_v55 = vpop.permute.xlu1 %13819 }
  0xcc   : > { %v14683_v2 = vld [vmem:[#allocation2 + $0xd0] ss:$20 sps:$4 sm:$0xff]   ;;  %v16607_v22 = vld [vmem:[%s15728_s13 + $0x1fa] sm:$0xff]  ;;  %13445 = vmatprep.subr.bf16.mxu0 %v16547_v18  ;;  %1339 = vst [vmem:[#allocation2 + $0x50] sm:$0xf] %v12654_v6  ;;  %v14163_v6 = vpack.i.bf16 %v16597_v48, %v16594_v25  ;;  %v12960_v47 = vpack.c.bf16 %v4527_v34, %v4527_v34  ;;  %v284_v61 = vld [vmem:[%s15728_s13 + $0x48] sm:$0xff]  ;;  %v12865_v23 = vpack.c.bf16 %v3375_v8, %v3375_v8  ;;  %v13822_v44 = vunpack.i.h.bf16 %v13820_v55  ;;  %v13815_v28 = vpop.permute.xlu0 %13814 }
  0xcd   : > { %v16610_v42 = vld [vmem:[%s15728_s13 + $0x202] sm:$0xff]  ;;  %v1437_v52 = vld [vmem:[%s15728_s13 + $0x4a] sm:$0xff]  ;;  %1340 = vst [vmem:[#allocation2 + $0x64] sm:$0xf] %v12655_v7  ;;  %v12961_v7 = vpack.c.bf16 %v4528_v12, %v4528_v12  ;;  %v1438_v60 = vld [vmem:[%s15728_s13 + $0x52] sm:$0xff]  ;;  %v12864_v31 = vpack.c.bf16 %v3374_v14, %v3374_v14  ;;  %v13821_v5 = vunpack.i.l.bf16 %v13820_v55  ;;  %v20920_v12 = vpack.i.bf16 %v16394_v17, %v16389_v19  ;;  %8477 = vmatpush2.bf16.msra.mxu1 %v14713_v30 }
  0xce   : > { %v16616_v27 = vld [vmem:[%s15728_s13 + $0x201] sm:$0xff]  ;;  %v14685_v56 = vld [vmem:[#allocation2 + $0xfc] ss:$20 sps:$4 sm:$0xff]   ;;  %5007 = vst [vmem:[#allocation2 + $0x1c4] sm:$0xf] %v12960_v47  ;;  %v13817_v43 = vunpack.i.h.bf16 %v13815_v28  ;;  %6826 = vmatmul.mubr.bf16.gmra.mxu1 %v14683_v2  ;;  %v2015_v30 = vsel %vm854_vm0, %v1438_v60, %v13822_v44 }
  0xcf   : > { %v14680_v11 = vld [vmem:[#allocation2 + $0x2c] ss:$20 sps:$4 sm:$0xff]   ;;  %v14682_v45 = vld [vmem:[#allocation2 + $0x28] ss:$20 sps:$4 sm:$0xff]   ;;  %v285_v21 = vld [vmem:[%s15728_s13 + $0x50] sm:$0xff]  ;;  %14094 = vrot.lane.b32.xlu0 %v20920_v12, %s15615_s15  ;;  %v14178_v34 = vpack.i.bf16 %v16616_v27, %v16613_v62  ;;  %v2014_v17 = vsel %vm854_vm0, %v1437_v52, %v13821_v5  ;;  %6833 = vmatprep.mubr.bf16.mxu1 %v14685_v56  ;;  %v12753_v52 = vpack.c.bf16 %v2015_v30, %v2015_v30  ;;  %v13830_v14 = vpop.permute.xlu1 %13829 }
  0xd0   : > { %6632 = vmatprep.mubr.bf16.mxu0 %v14680_v11  ;;  %v14721_v41 = vld [vmem:[%s20845_s3 + $0x68] sm:$0xff]   ;;  %v12026_v63 = vld [vmem:[%s15728_s13 + $0x32] sm:$0xff]  ;;  %v12027_v57 = vld [vmem:[%s15728_s13 + $0x3a] sm:$0xff]  ;;  %5008 = vst [vmem:[#allocation2 + $0x1d8] sm:$0xf] %v12961_v7  ;;  %v13816_v11 = vunpack.i.l.bf16 %v13815_v28  ;;  %v20921_v28 = vpack.i.bf16 %v16400_v38, %v16397_v58  ;;  %v12752_v8 = vpack.c.bf16 %v2014_v17, %v2014_v17  ;;  %v862_v56 = vsel %vm854_vm0, %v285_v21, %v13817_v43  ;;  %v13825_v12 = vpop.permute.xlu0 %13824 }
  0xd1   : > { %6633 = vmatmul.mubr.bf16.gmra.mxu0 %v14682_v45  ;;  %3855 = vst [vmem:[#allocation2 + $0x1d4] sm:$0xf] %v12865_v23  ;;  %3854 = vst [vmem:[#allocation2 + $0x1c0] sm:$0xf] %v12864_v31  ;;  %v11474_v7 = vld [vmem:[%s15728_s13 + $0x139] sm:$0xff]  ;;  %v16665_v2 = vld [vmem:[%s20843_s1 + $0x128] sm:$0xff]   ;;  %v12657_v23 = vpack.c.bf16 %v862_v56, %v862_v56  ;;  %v13832_v31 = vunpack.i.h.bf16 %v13830_v14  ;;  %v13831_v44 = vunpack.i.l.bf16 %v13830_v14  ;;  %v13827_v43 = vunpack.i.h.bf16 %v13825_v12 }
  0xd2   : > { %14109 = vrot.lane.b32.xlu1 %v20921_v28, %s15615_s15  ;;  %v5177_v47 = vsel %vm854_vm0, %v12026_v63, 0.0  ;;  %v5178_v45 = vsel %vm854_vm0, %v12027_v57, 0.0  ;;  %v861_v5 = vsel %vm854_vm0, %v284_v61, %v13816_v11  ;;  %v11475_v55 = vld [vmem:[%s15728_s13 + $0x141] sm:$0xff]  ;;  %v20922_v58 = vmov 0   ;;  %v12028_v38 = vld [vmem:[%s15728_s13 + $0x4a] sm:$0xff]  ;;  %v12029_v57 = vld [vmem:[%s15728_s13 + $0x52] sm:$0xff]  ;;  %13446 = vmatpush3.bf16.msra.mxu0 %v16547_v18 }
  0xd3   : > { %8478 = vmatprep.subr.bf16.mxu1 %v20922_v58  ;;  %v12656_v60 = vpack.c.bf16 %v861_v5, %v861_v5  ;;  %v14690_v63 = vld [vmem:[#allocation2 + $0xf8] ss:$20 sps:$4 sm:$0xff]   ;;  %v20923_v61 = vpack.i.bf16 %v16408_v0, %v16405_v35  ;;  %v14728_v21 = vld [vmem:[%s20845_s3 + $0x60] sm:$0xff]   ;;  %2494 = vst [vmem:[#allocation2 + $0x7c] sm:$0xf] %v12752_v8  ;;  %v13826_v11 = vunpack.i.l.bf16 %v13825_v12  ;;  %v13034_v0 = vpack.c.bf16 %v5177_v47, %v5177_v47 }
  0xd4   : > { %8479 = vmatpush2.bf16.msra.mxu1 %v14721_v41  ;;  %2495 = vst [vmem:[#allocation2 + $0x90] sm:$0xf] %v12753_v52  ;;  %v1439_v17 = vld [vmem:[%s15728_s13 + $0x62] sm:$0xff]  ;;  %v1440_v30 = vld [vmem:[%s15728_s13 + $0x6a] sm:$0xff]  ;;  %v13035_v41 = vpack.c.bf16 %v5178_v45, %v5178_v45  ;;  %1342 = vst [vmem:[#allocation2 + $0x8c] sm:$0xf] %v12657_v23  ;;  %v4530_v8 = vsel %vm854_vm0, %v16208_v9, %v13832_v31  ;;  %v4529_v52 = vsel %vm854_vm0, %v16198_v4, %v13831_v44  ;;  %v13840_v31 = vpop.permute.xlu1 %13839 }
  0xd5   : > { %14104 = vrot.lane.b32.xlu0 %v20923_v61, %s15615_s15  ;;  %v14687_v28 = vld [vmem:[#allocation2 + $0x54] ss:$20 sps:$4 sm:$0xff]   ;;  %8480 = vmatprep.subr.bf16.mxu1 %v20922_v58  ;;  %1341 = vst [vmem:[#allocation2 + $0x78] sm:$0xf] %v12656_v60  ;;  %v286_v5 = vld [vmem:[%s15728_s13 + $0x60] sm:$0xff]  ;;  %v20924_v18 = vpack.i.bf16 %v16436_v33, %v16433_v59  ;;  %v5179_v47 = vsel %vm854_vm0, %v12028_v38, 0.0  ;;  %v12963_v9 = vpack.c.bf16 %v4530_v8, %v4530_v8  ;;  %v13842_v38 = vunpack.i.h.bf16 %v13840_v31 }
  0xd6   : > { %v16687_v35 = vld [vmem:[%s15728_s13 + $0x3a8] sm:$0xff]  ;;  %v14689_v14 = vld [vmem:[#allocation2 + $0x50] ss:$20 sps:$4 sm:$0xff]   ;;  %13447 = vmatprep.subr.bf16.mxu0 %v16665_v2  ;;  %v5180_v45 = vsel %vm854_vm0, %v12029_v57, 0.0  ;;  %v12962_v60 = vpack.c.bf16 %v4529_v52, %v4529_v52  ;;  %v3377_v4 = vsel %vm854_vm0, %v11475_v55, %v13827_v43  ;;  %v3376_v23 = vsel %vm854_vm0, %v11474_v7, %v13826_v11  ;;  %6640 = vmatprep.mubr.bf16.mxu0 %v14687_v28  ;;  %v13835_v57 = vpop.permute.xlu0 %13834  ;;  %v14736_v7 = vld [vmem:[%s20845_s3 + $0x58] sm:$0xff]  }
  0xd7   : > { %v287_v56 = vld [vmem:[%s15728_s13 + $0x68] sm:$0xff]  ;;  %v14692_v12 = vld [vmem:[#allocation2 + $0x124] ss:$20 sps:$4 sm:$0xff]   ;;  %14119 = vrot.lane.b32.xlu1 %v20924_v18, %s15615_s15  ;;  %v16705_v44 = vld [vmem:[%s15728_s13 + $0x3b0] sm:$0xff]  ;;  %5657 = vst [vmem:[#allocation2 + $0x10] sm:$0xf] %v13034_v0  ;;  %v12867_v59 = vpack.c.bf16 %v3377_v4, %v3377_v4  ;;  %v12866_v33 = vpack.c.bf16 %v3376_v23, %v3376_v23  ;;  %v13841_v61 = vunpack.i.l.bf16 %v13840_v31  ;;  %v20925_v8 = vpack.i.bf16 %v16447_v46, %v16444_v10 }
  0xd8   : > { %5658 = vst [vmem:[#allocation2 + $0x24] sm:$0xf] %v13035_v41  ;;  %8481 = vmatpush2.bf16.msra.mxu1 %v14728_v21  ;;  %v16715_v55 = vld [vmem:[%s15728_s13 + $0x391] sm:$0xff]  ;;  %v16718_v43 = vld [vmem:[%s15728_s13 + $0x399] sm:$0xff]  ;;  %5010 = vst [vmem:[#allocation2 + $0x200] sm:$0xf] %v12963_v9  ;;  %v13837_v11 = vunpack.i.h.bf16 %v13835_v57  ;;  %v13836_v28 = vunpack.i.l.bf16 %v13835_v57  ;;  %v13036_v46 = vpack.c.bf16 %v5179_v47, %v5179_v47  ;;  %v13037_v21 = vpack.c.bf16 %v5180_v45, %v5180_v45 }
  0xd9   : > { %14114 = vrot.lane.b32.xlu0 %v20925_v8, %s15615_s15  ;;  %5009 = vst [vmem:[#allocation2 + $0x1ec] sm:$0xf] %v12962_v60  ;;  %6641 = vmatmul.mubr.bf16.gmra.mxu0 %v14689_v14  ;;  %v16721_v10 = vld [vmem:[%s15728_s13 + $0x211] sm:$0xff]  ;;  %3857 = vst [vmem:[#allocation2 + $0x1fc] sm:$0xf] %v12867_v59  ;;  %v2016_v0 = vsel %vm854_vm0, %v1439_v17, %v13841_v61  ;;  %v2017_v41 = vsel %vm854_vm0, %v1440_v30, %v13842_v38  ;;  %v11477_v18 = vld [vmem:[%s15728_s13 + $0x159] sm:$0xff] }
  0xda   : > { %6834 = vmatmul.mubr.bf16.gmra.mxu1 %v14690_v63  ;;  %3856 = vst [vmem:[#allocation2 + $0x1e8] sm:$0xf] %v12866_v33  ;;  %v11476_v52 = vld [vmem:[%s15728_s13 + $0x151] sm:$0xff]  ;;  %v20926_v14 = vpack.i.bf16 %v16469_v53, %v16453_v49  ;;  %v14188_v47 = vpack.i.bf16 %v16705_v44, %v16687_v35  ;;  %v16737_v17 = vld [vmem:[%s15728_s13 + $0x219] sm:$0xff]  ;;  %v12755_v45 = vpack.c.bf16 %v2017_v41, %v2017_v41  ;;  %v13850_v53 = vpop.permute.xlu1 %13849  ;;  %5659 = vst [vmem:[#allocation2 + $0x38] sm:$0xf] %v13036_v46 }
  0xdb   : > { %6841 = vmatprep.mubr.bf16.mxu1 %v14692_v12  ;;  %v14743_v63 = vld [vmem:[%s20845_s3 + $0x50] sm:$0xff]   ;;  %v16742_v30 = vld [vmem:[%s20843_s1 + $0x120] sm:$0xff]   ;;  %v12754_v12 = vpack.c.bf16 %v2016_v0, %v2016_v0  ;;  %v863_v9 = vsel %vm854_vm0, %v286_v5, %v13836_v28  ;;  %v864_v49 = vsel %vm854_vm0, %v287_v56, %v13837_v11  ;;  %8482 = vmatprep.subr.bf16.mxu1 %v20922_v58  ;;  %v13852_v59 = vunpack.i.h.bf16 %v13850_v53  ;;  %v13845_v5 = vpop.permute.xlu0 %13844  ;;  %v16761_v8 = vld [vmem:[%s15728_s13 + $0x3c8] sm:$0xff] }
  0xdc   : > { %14129 = vrot.lane.b32.xlu1 %v20926_v14, %s15615_s15  ;;  %v16748_v60 = vld [vmem:[%s15728_s13 + $0x212] sm:$0xff]  ;;  %v16751_v4 = vld [vmem:[%s15728_s13 + $0x21a] sm:$0xff]  ;;  %5660 = vst [vmem:[#allocation2 + $0x4c] sm:$0xf] %v13037_v21  ;;  %v12658_v23 = vpack.c.bf16 %v863_v9, %v863_v9  ;;  %v12659_v31 = vpack.c.bf16 %v864_v49, %v864_v49  ;;  %v13851_v33 = vunpack.i.l.bf16 %v13850_v53  ;;  %v20927_v61 = vpack.i.bf16 %v16485_v13, %v16482_v54  ;;  %v12030_v11 = vld [vmem:[%s15728_s13 + $0x62] sm:$0xff] }
  0xdd   : > { %v14697_v38 = vld [vmem:[#allocation2 + $0x120] ss:$20 sps:$4 sm:$0xff]   ;;  %8483 = vmatpush2.bf16.msra.mxu1 %v14736_v7  ;;  %2496 = vst [vmem:[#allocation2 + $0xa4] sm:$0xf] %v12754_v12  ;;  %2497 = vst [vmem:[#allocation2 + $0xb8] sm:$0xf] %v12755_v45  ;;  %v13847_v28 = vunpack.i.h.bf16 %v13845_v5  ;;  %v13846_v46 = vunpack.i.l.bf16 %v13845_v5  ;;  %13448 = vmatpush3.bf16.msra.mxu0 %v16665_v2  ;;  %v14183_v54 = vpack.i.bf16 %v16718_v43, %v16715_v55 }
  0xde   : > { %v14699_v56 = vld [vmem:[#allocation2 + $0x14c] ss:$20 sps:$4 sm:$0xff]   ;;  %14124 = vrot.lane.b32.xlu0 %v20927_v61, %s15615_s15  ;;  %v14694_v0 = vld [vmem:[#allocation2 + $0x7c] ss:$20 sps:$4 sm:$0xff]   ;;  %8484 = vmatprep.subr.bf16.mxu1 %v20922_v58  ;;  %v14198_v13 = vpack.i.bf16 %v16737_v17, %v16721_v10  ;;  %1343 = vst [vmem:[#allocation2 + $0xa0] sm:$0xf] %v12658_v23  ;;  %v20928_v45 = vpack.i.bf16 %v16499_v15, %v16496_v16 }
  0xdf   : > { %v16758_v57 = vld [vmem:[%s15728_s13 + $0x3c0] sm:$0xff]  ;;  %1344 = vst [vmem:[#allocation2 + $0xb4] sm:$0xf] %v12659_v31  ;;  %v15434_v7 = vld [vmem:[%s15728_s13 + $0x170] sm:$0xff]  ;;  %v15435_v14 = vld [vmem:[%s15728_s13 + $0x168] sm:$0xff]  ;;  %13449 = vmatprep.subr.bf16.mxu0 %v16742_v30  ;;  %v14213_v9 = vpack.i.bf16 %v16751_v4, %v16748_v60  ;;  %v3379_v23 = vsel %vm854_vm0, %v11477_v18, %v13847_v28  ;;  %v3378_v31 = vsel %vm854_vm0, %v11476_v52, %v13846_v46 }
  0xe0   : > { %v1441_v21 = vld [vmem:[%s15728_s13 + $0x7a] sm:$0xff]  ;;  %v4532_v41 = vsel %vm854_vm0, %v15434_v7, %v13852_v59  ;;  %v4531_v12 = vsel %vm854_vm0, %v15435_v14, %v13851_v33  ;;  %14139 = vrot.lane.b32.xlu1 %v20928_v45, %s15615_s15  ;;  %v13860_v59 = vpop.permute.xlu1 %13859  ;;  %v1442_v33 = vld [vmem:[%s15728_s13 + $0x82] sm:$0xff]  ;;  %6648 = vmatprep.mubr.bf16.mxu0 %v14694_v0  ;;  %v12031_v61 = vld [vmem:[%s15728_s13 + $0x6a] sm:$0xff]  ;;  %v12869_v7 = vpack.c.bf16 %v3379_v23, %v3379_v23  ;;  %v13855_v45 = vpop.permute.xlu0 %13854 }
  0xe1   : > { %v14696_v2 = vld [vmem:[#allocation2 + $0x78] ss:$20 sps:$4 sm:$0xff]   ;;  %v12965_v49 = vpack.c.bf16 %v4532_v41, %v4532_v41  ;;  %v12964_v53 = vpack.c.bf16 %v4531_v12, %v4531_v12  ;;  %v12868_v16 = vpack.c.bf16 %v3378_v31, %v3378_v31  ;;  %v13862_v15 = vunpack.i.h.bf16 %v13860_v59  ;;  %v289_v19 = vld [vmem:[%s15728_s13 + $0x80] sm:$0xff]  ;;  %8485 = vmatpush2.bf16.msra.mxu1 %v14743_v63  ;;  %13450 = vmatpush3.bf16.msra.mxu0 %v16742_v30  ;;  %v290_v30 = vld [vmem:[%s15728_s13 + $0x90] sm:$0xff] }
  0xe2   : > { %v288_v5 = vld [vmem:[%s15728_s13 + $0x78] sm:$0xff]  ;;  %v13861_v14 = vunpack.i.l.bf16 %v13860_v59  ;;  %v20929_v41 = vpack.i.bf16 %v16506_v1, %v16503_v36  ;;  %v14751_v52 = vld [vmem:[%s20845_s3 + $0x48] sm:$0xff]   ;;  %v13857_v18 = vunpack.i.h.bf16 %v13855_v45  ;;  %v13856_v28 = vunpack.i.l.bf16 %v13855_v45  ;;  %6649 = vmatmul.mubr.bf16.gmra.mxu0 %v14696_v2  ;;  %6842 = vmatmul.mubr.bf16.gmra.mxu1 %v14697_v38  ;;  %3859 = vst [vmem:[#allocation2 + $0x224] sm:$0xf] %v12869_v7 }
  0xe3   : > { %5012 = vst [vmem:[#allocation2 + $0x228] sm:$0xf] %v12965_v49  ;;  %5011 = vst [vmem:[#allocation2 + $0x214] sm:$0xf] %v12964_v53  ;;  %v14208_v46 = vpack.i.bf16 %v16761_v8, %v16758_v57  ;;  %v16800_v36 = vld [vmem:[%s20843_s1 + $0x118] sm:$0xff]   ;;  %v5181_v1 = vsel %vm854_vm0, %v12030_v11, 0.0  ;;  %v2019_v0 = vsel %vm854_vm0, %v1442_v33, %v13862_v15  ;;  %6849 = vmatprep.mubr.bf16.mxu1 %v14699_v56  ;;  %8486 = vmatprep.subr.bf16.mxu1 %v20922_v58 }
  0xe4   : > { %14134 = vrot.lane.b32.xlu0 %v20929_v41, %s15615_s15  ;;  %3858 = vst [vmem:[#allocation2 + $0x210] sm:$0xf] %v12868_v16  ;;  %v2018_v63 = vsel %vm854_vm0, %v1441_v21, %v13861_v14  ;;  %v20930_v38 = vpack.i.bf16 %v16537_v3, %v16509_v39  ;;  %v5182_v12 = vsel %vm854_vm0, %v12031_v61, 0.0  ;;  %v13038_v2 = vpack.c.bf16 %v5181_v1, %v5181_v1  ;;  %v12032_v49 = vld [vmem:[%s15728_s13 + $0x7a] sm:$0xff]  ;;  %v13870_v31 = vpop.permute.xlu1 %13869  ;;  %v12033_v56 = vld [vmem:[%s15728_s13 + $0x82] sm:$0xff]  ;;  %v13865_v61 = vpop.permute.xlu0 %13864  ;;  %v17078_v60 = vld [vmem:[%s15728_s13 + $0x3f1] sm:$0xff] }
  0xe5   : > { %v12756_v11 = vpack.c.bf16 %v2018_v63, %v2018_v63  ;;  %v12757_v53 = vpack.c.bf16 %v2019_v0, %v2019_v0  ;;  %v865_v23 = vsel %vm854_vm0, %v288_v5, %v13856_v28  ;;  %v866_v21 = vsel %vm854_vm0, %v289_v19, %v13857_v18  ;;  %8487 = vmatpush2.bf16.msra.mxu1 %v14751_v52  ;;  %v16820_v19 = vld [vmem:[%s15728_s13 + $0x3a9] sm:$0xff]  ;;  %v16823_v5 = vld [vmem:[%s15728_s13 + $0x3b1] sm:$0xff]  ;;  %v14758_v16 = vld [vmem:[%s20845_s3 + $0x40] sm:$0xff]  }
  0xe6   : > { %14149 = vrot.lane.b32.xlu1 %v20930_v38, %s15615_s15  ;;  %v12660_v59 = vpack.c.bf16 %v865_v23, %v865_v23  ;;  %v12661_v39 = vpack.c.bf16 %v866_v21, %v866_v21  ;;  %v13872_v3 = vunpack.i.h.bf16 %v13870_v31  ;;  %v13871_v33 = vunpack.i.l.bf16 %v13870_v31  ;;  %5661 = vst [vmem:[#allocation2 + $0x60] sm:$0xf] %v13038_v2  ;;  %v14701_v45 = vld [vmem:[#allocation2 + $0xa4] ss:$20 sps:$4 sm:$0xff]   ;;  %v16832_v41 = vld [vmem:[%s15728_s13 + $0x229] sm:$0xff]  ;;  %8488 = vmatprep.subr.bf16.mxu1 %v20922_v58 }
  0xe7   : > { %v20931_v7 = vpack.i.bf16 %v16553_v32, %v16550_v20  ;;  %2498 = vst [vmem:[#allocation2 + $0xcc] sm:$0xf] %v12756_v11  ;;  %2499 = vst [vmem:[#allocation2 + $0xe0] sm:$0xf] %v12757_v53  ;;  %v13867_v15 = vunpack.i.h.bf16 %v13865_v61  ;;  %v13866_v14 = vunpack.i.l.bf16 %v13865_v61  ;;  %v1443_v20 = vld [vmem:[%s15728_s13 + $0x92] sm:$0xff]  ;;  %v1444_v32 = vld [vmem:[%s15728_s13 + $0x9a] sm:$0xff]  ;;  %v13039_v18 = vpack.c.bf16 %v5182_v12, %v5182_v12  ;;  %13451 = vmatprep.subr.bf16.mxu0 %v16800_v36 }
  0xe8   : > { %v16835_v52 = vld [vmem:[%s15728_s13 + $0x231] sm:$0xff]  ;;  %v5183_v28 = vsel %vm854_vm0, %v12032_v49, 0.0  ;;  %1345 = vst [vmem:[#allocation2 + $0xc8] sm:$0xf] %v12660_v59  ;;  %1346 = vst [vmem:[#allocation2 + $0xdc] sm:$0xf] %v12661_v39  ;;  %v20932_v12 = vpack.i.bf16 %v16570_v50, %v16563_v37  ;;  %v13880_v50 = vpop.permute.xlu1 %13879  ;;  %6656 = vmatprep.mubr.bf16.mxu0 %v14701_v45  ;;  %13452 = vmatpush3.bf16.msra.mxu0 %v16800_v36 }
  0xe9   : > { %14144 = vrot.lane.b32.xlu0 %v20931_v7, %s15615_s15  ;;  %v15436_v1 = vld [vmem:[%s15728_s13 + $0x188] sm:$0xff]  ;;  %v15437_v0 = vld [vmem:[%s15728_s13 + $0x180] sm:$0xff]  ;;  %v291_v2 = vld [vmem:[%s15728_s13 + $0x98] sm:$0xff]  ;;  %v5184_v23 = vsel %vm854_vm0, %v12033_v56, 0.0  ;;  %v13040_v21 = vpack.c.bf16 %v5183_v28, %v5183_v28  ;;  %5662 = vst [vmem:[#allocation2 + $0x74] sm:$0xf] %v13039_v18  ;;  %v13882_v56 = vunpack.i.h.bf16 %v13880_v50  ;;  %v13881_v28 = vunpack.i.l.bf16 %v13880_v50  ;;  %8489 = vmatpush2.bf16.msra.mxu1 %v14758_v16 }
  0xea   : > { %v4534_v63 = vsel %vm854_vm0, %v15436_v1, %v13872_v3  ;;  %v4533_v38 = vsel %vm854_vm0, %v15437_v0, %v13871_v33  ;;  %v14703_v11 = vld [vmem:[#allocation2 + $0xa0] ss:$20 sps:$4 sm:$0xff]   ;;  %14159 = vrot.lane.b32.xlu1 %v20932_v12, %s15615_s15  ;;  %v14762_v49 = vld [vmem:[%s20845_s3 + $0x138] sm:$0xff]   ;;  %v15439_v33 = vld [vmem:[%s15728_s13 + $0x169] sm:$0xff]  ;;  %v20933_v0 = vpack.i.bf16 %v16493_v40, %v16488_v51  ;;  %v14203_v12 = vpack.i.bf16 %v16823_v5, %v16820_v19 }
  0xeb   : > { %v14707_v53 = vld [vmem:[#allocation2 + $0x174] ss:$20 sps:$4 sm:$0xff]   ;;  %v12967_v31 = vpack.c.bf16 %v4534_v63, %v4534_v63  ;;  %v12966_v59 = vpack.c.bf16 %v4533_v38, %v4533_v38  ;;  %v3380_v37 = vsel %vm854_vm0, %v15439_v33, %v13866_v14  ;;  %v13875_v63 = vpop.permute.xlu0 %13874  ;;  %v16869_v14 = vld [vmem:[%s15728_s13 + $0x3d8] sm:$0xff]  ;;  %5663 = vst [vmem:[#allocation2 + $0x88] sm:$0xf] %v13040_v21  ;;  %6657 = vmatmul.mubr.bf16.gmra.mxu0 %v14703_v11  ;;  %v11769_v40 = vld [vmem:[%s15728_s13 + $0x1a0] sm:$0xff] }
  0xec   : > { %v15438_v39 = vld [vmem:[%s15728_s13 + $0x171] sm:$0xff]  ;;  %v14704_v61 = vld [vmem:[#allocation2 + $0x148] ss:$20 sps:$4 sm:$0xff]   ;;  %v12870_v1 = vpack.c.bf16 %v3380_v37, %v3380_v37  ;;  %v13877_v45 = vunpack.i.h.bf16 %v13875_v63  ;;  %v13876_v18 = vunpack.i.l.bf16 %v13875_v63  ;;  %v13041_v21 = vpack.c.bf16 %v5184_v23, %v5184_v23  ;;  %v16891_v23 = vld [vmem:[%s15728_s13 + $0x3e0] sm:$0xff]  ;;  %13491 = vmatprep.subr.bf16.mxu1 %v14762_v49 }
  0xed   : > { %v3381_v3 = vsel %vm854_vm0, %v15438_v39, %v13867_v15  ;;  %14154 = vrot.lane.b32.xlu0 %v20933_v0, %s15615_s15  ;;  %v16863_v15 = vld [vmem:[%s15728_s13 + $0x22a] sm:$0xff]  ;;  %v16866_v38 = vld [vmem:[%s15728_s13 + $0x232] sm:$0xff]  ;;  %5014 = vst [vmem:[#allocation2 + $0x250] sm:$0xf] %v12967_v31  ;;  %5013 = vst [vmem:[#allocation2 + $0x23c] sm:$0xf] %v12966_v59  ;;  %6850 = vmatmul.mubr.bf16.gmra.mxu1 %v14704_v61  ;;  %v2020_v11 = vsel %vm854_vm0, %v1443_v20, %v13881_v28 }
  0xee   : > { %v12871_v7 = vpack.c.bf16 %v3381_v3, %v3381_v3  ;;  %v11768_v51 = vld [vmem:[%s15728_s13 + $0x198] sm:$0xff]  ;;  %v16878_v16 = vld [vmem:[%s20843_s1 + $0x110] sm:$0xff]   ;;  %3860 = vst [vmem:[#allocation2 + $0x238] sm:$0xf] %v12870_v1  ;;  %v2021_v31 = vsel %vm854_vm0, %v1444_v32, %v13882_v56  ;;  %v11480_v59 = vld [vmem:[%s15728_s13 + $0x181] sm:$0xff]  ;;  %6857 = vmatprep.mubr.bf16.mxu1 %v14707_v53  ;;  %v20934_v3 = vpack.i.bf16 %v16591_v24, %v16586_v26 }
  0xef   : > { %v11481_v39 = vld [vmem:[%s15728_s13 + $0x189] sm:$0xff]  ;;  %v14218_v33 = vpack.i.bf16 %v16835_v52, %v16832_v41  ;;  %v16894_v37 = vld [vmem:[%s15728_s13 + $0x3c1] sm:$0xff]  ;;  %v12758_v20 = vpack.c.bf16 %v2020_v11, %v2020_v11  ;;  %v12759_v32 = vpack.c.bf16 %v2021_v31, %v2021_v31  ;;  %v867_v53 = vsel %vm854_vm0, %v290_v30, %v13876_v18  ;;  %5664 = vst [vmem:[#allocation2 + $0x9c] sm:$0xf] %v13041_v21  ;;  %v13885_v0 = vpop.permute.xlu0 %13884  ;;  %v1446_v21 = vld [vmem:[%s15728_s13 + $0xb2] sm:$0xff] }
  0xf0   : > { %3861 = vst [vmem:[#allocation2 + $0x24c] sm:$0xf] %v12871_v7  ;;  %14169 = vrot.lane.b32.xlu1 %v20934_v3, %s15615_s15  ;;  %v16897_v50 = vld [vmem:[%s15728_s13 + $0x3c9] sm:$0xff]  ;;  %v868_v61 = vsel %vm854_vm0, %v291_v2, %v13877_v45  ;;  %v13890_v7 = vpop.permute.xlu1 %13889  ;;  %v16902_v26 = vld [vmem:[%s15728_s13 + $0x241] sm:$0xff]  ;;  %v12662_v1 = vpack.c.bf16 %v867_v53, %v867_v53  ;;  %v13887_v49 = vunpack.i.h.bf16 %v13885_v0  ;;  %v13886_v45 = vunpack.i.l.bf16 %v13885_v0  ;;  %13453 = vmatprep.subr.bf16.mxu0 %v16878_v16 }
  0xf1   : > { %v16905_v24 = vld [vmem:[%s15728_s13 + $0x249] sm:$0xff]  ;;  %v12663_v56 = vpack.c.bf16 %v868_v61, %v868_v61  ;;  %v13892_v28 = vunpack.i.h.bf16 %v13890_v7  ;;  %v13891_v63 = vunpack.i.l.bf16 %v13890_v7  ;;  %14164 = vrot.lane.b32.xlu0 %v14163_v6, %s15615_s15  ;;  %2500 = vst [vmem:[#allocation2 + $0xf4] sm:$0xf] %v12758_v20  ;;  %2501 = vst [vmem:[#allocation2 + $0x108] sm:$0xf] %v12759_v32  ;;  %v12034_v7 = vld [vmem:[%s15728_s13 + $0x92] sm:$0xff]  ;;  %13454 = vmatpush3.bf16.msra.mxu0 %v16878_v16 }
  0xf2   : > { %v14714_v11 = vld [vmem:[#allocation2 + $0x19c] ss:$20 sps:$4 sm:$0xff]   ;;  %v16912_v30 = vld [vmem:[%s15728_s13 + $0x242] sm:$0xff]  ;;  %1347 = vst [vmem:[#allocation2 + $0xf0] sm:$0xf] %v12662_v1 }
  0xf3   : > { %v16915_v2 = vld [vmem:[%s15728_s13 + $0x24a] sm:$0xff]  ;;  %1348 = vst [vmem:[#allocation2 + $0x104] sm:$0xf] %v12663_v56  ;;  %v4536_v6 = vsel %vm854_vm0, %v11769_v40, %v13892_v28  ;;  %v4535_v36 = vsel %vm854_vm0, %v11768_v51, %v13891_v63  ;;  %v3383_v40 = vsel %vm854_vm0, %v11481_v39, %v13887_v49  ;;  %v3382_v51 = vsel %vm854_vm0, %v11480_v59, %v13886_v45  ;;  %v12035_v63 = vld [vmem:[%s15728_s13 + $0x9a] sm:$0xff]  ;;  %v13895_v25 = vpop.permute.xlu0 %13894  ;;  %v1463_v49 = vld [vmem:[%s15728_s13 + $0x1b2] sm:$0xff] }
  0xf4   : > { %v1445_v18 = vld [vmem:[%s15728_s13 + $0xaa] sm:$0xff]  ;;  %14179 = vrot.lane.b32.xlu1 %v14178_v34, %s15615_s15  ;;  %v12969_v1 = vpack.c.bf16 %v4536_v6, %v4536_v6  ;;  %v12968_v56 = vpack.c.bf16 %v4535_v36, %v4535_v36  ;;  %v13900_v28 = vpop.permute.xlu1 %13899  ;;  %v12873_v62 = vpack.c.bf16 %v3383_v40, %v3383_v40  ;;  %v12872_v27 = vpack.c.bf16 %v3382_v51, %v3382_v51  ;;  %v20935_v61 = vld [vmem:[#allocation10_spill] sm:$0xff]  ;;  %v12037_v51 = vld [vmem:[%s15728_s13 + $0xb2] sm:$0xff] }
  0xf5   : > { %v14709_v31 = vld [vmem:[#allocation2 + $0xcc] ss:$20 sps:$4 sm:$0xff]   ;;  %v14712_v3 = vld [vmem:[#allocation2 + $0x170] ss:$20 sps:$4 sm:$0xff]   ;;  %v14711_v20 = vld [vmem:[#allocation2 + $0xc8] ss:$20 sps:$4 sm:$0xff]   ;;  %v13902_v34 = vunpack.i.h.bf16 %v13900_v28  ;;  %v13901_v0 = vunpack.i.l.bf16 %v13900_v28  ;;  %v20936_v6 = vpack.i.bf16 %v16560_v29, %v20935_v61  ;;  %v13897_v59 = vunpack.i.h.bf16 %v13895_v25 }
  0xf6   : > { %v16928_v48 = vld [vmem:[%s20843_s1 + $0x108] sm:$0xff]   ;;  %6664 = vmatprep.mubr.bf16.mxu0 %v14709_v31  ;;  %v293_v53 = vld [vmem:[%s15728_s13 + $0xb0] sm:$0xff]  ;;  %5016 = vst [vmem:[#allocation2 + $0x278] sm:$0xf] %v12969_v1  ;;  %5015 = vst [vmem:[#allocation2 + $0x264] sm:$0xf] %v12968_v56  ;;  %v13896_v39 = vunpack.i.l.bf16 %v13895_v25  ;;  %6858 = vmatmul.mubr.bf16.gmra.mxu1 %v14712_v3  ;;  %v14253_v45 = vpack.i.bf16 %v16915_v2, %v16912_v30 }
  0xf7   : > { %v292_v32 = vld [vmem:[%s15728_s13 + $0xa8] sm:$0xff]  ;;  %14174 = vrot.lane.b32.xlu0 %v20936_v6, %s15615_s15  ;;  %6665 = vmatmul.mubr.bf16.gmra.mxu0 %v14711_v20  ;;  %v16957_v31 = vld [vmem:[%s20843_s1 + $0x100] sm:$0xff]   ;;  %v5185_v29 = vsel %vm854_vm0, %v12034_v7, 0.0  ;;  %3863 = vst [vmem:[#allocation2 + $0x274] sm:$0xf] %v12873_v62  ;;  %v2022_v16 = vsel %vm854_vm0, %v1445_v18, %v13901_v0  ;;  %v2023_v3 = vsel %vm854_vm0, %v1446_v21, %v13902_v34  ;;  %v5186_v36 = vsel %vm854_vm0, %v12035_v63, 0.0  ;;  %v13905_v63 = vpop.permute.xlu0 %13904 }
  0xf8   : > { %3862 = vst [vmem:[#allocation2 + $0x260] sm:$0xf] %v12872_v27  ;;  %v1464_v25 = vld [vmem:[%s15728_s13 + $0x1ba] sm:$0xff]  ;;  %6865 = vmatprep.mubr.bf16.mxu1 %v14714_v11  ;;  %14189 = vrot.lane.b32.xlu1 %v14188_v47, %s15615_s15  ;;  %v13042_v20 = vpack.c.bf16 %v5185_v29, %v5185_v29  ;;  %v12036_v61 = vld [vmem:[%s15728_s13 + $0xaa] sm:$0xff]  ;;  %v12760_v7 = vpack.c.bf16 %v2022_v16, %v2022_v16  ;;  %v13910_v21 = vpop.permute.xlu1 %13909  ;;  %v13907_v27 = vunpack.i.h.bf16 %v13905_v63  ;;  %v13906_v34 = vunpack.i.l.bf16 %v13905_v63  ;;  %v1447_v0 = vld [vmem:[%s15728_s13 + $0xc2] sm:$0xff] }
  0xf9   : > { %v12761_v1 = vpack.c.bf16 %v2023_v3, %v2023_v3  ;;  %v869_v18 = vsel %vm854_vm0, %v292_v32, %v13896_v39  ;;  %v870_v56 = vsel %vm854_vm0, %v293_v53, %v13897_v59  ;;  %v310_v40 = vld [vmem:[%s15728_s13 + $0x1b0] sm:$0xff]  ;;  %v311_v11 = vld [vmem:[%s15728_s13 + $0x1b8] sm:$0xff]  ;;  %13455 = vmatprep.subr.bf16.mxu0 %v16928_v48  ;;  %v13912_v47 = vunpack.i.h.bf16 %v13910_v21  ;;  %v12038_v10 = vld [vmem:[%s15728_s13 + $0xc2] sm:$0xff] }
  0xfa   : > { %v12664_v35 = vpack.c.bf16 %v869_v18, %v869_v18  ;;  %v12665_v44 = vpack.c.bf16 %v870_v56, %v870_v56  ;;  %v13911_v28 = vunpack.i.l.bf16 %v13910_v21  ;;  %v14722_v62 = vld [vmem:[#allocation2 + $0x1c4] ss:$20 sps:$4 sm:$0xff]   ;;  %v16980_v53 = vld [vmem:[%s15728_s13 + $0x3f0] sm:$0xff]  ;;  %13456 = vmatpush3.bf16.msra.mxu0 %v16928_v48  ;;  %5665 = vst [vmem:[#allocation2 + $0xb0] sm:$0xf] %v13042_v20  ;;  %v13043_v39 = vpack.c.bf16 %v5186_v36, %v5186_v36  ;;  %v312_v8 = vld [vmem:[%s15728_s13 + $0x1c8] sm:$0xff] }
  0xfb   : > { %14184 = vrot.lane.b32.xlu0 %v14183_v54, %s15615_s15  ;;  %v16983_v32 = vld [vmem:[%s15728_s13 + $0x3f8] sm:$0xff]  ;;  %2502 = vst [vmem:[#allocation2 + $0x11c] sm:$0xf] %v12760_v7  ;;  %2503 = vst [vmem:[#allocation2 + $0x130] sm:$0xf] %v12761_v1  ;;  %v1448_v6 = vld [vmem:[%s15728_s13 + $0xca] sm:$0xff]  ;;  %13457 = vmatprep.subr.bf16.mxu0 %v16957_v31  ;;  %v2041_v54 = vsel %vm854_vm0, %v1464_v25, %v13912_v47  ;;  %v13915_v21 = vpop.permute.xlu0 %13914 }
  0xfc   : > { %v14716_v59 = vld [vmem:[#allocation2 + $0xf4] ss:$20 sps:$4 sm:$0xff]   ;;  %v5187_v55 = vsel %vm854_vm0, %v12036_v61, 0.0  ;;  %1349 = vst [vmem:[#allocation2 + $0x118] sm:$0xf] %v12664_v35  ;;  %v2040_v43 = vsel %vm854_vm0, %v1463_v49, %v13911_v28  ;;  %14199 = vrot.lane.b32.xlu1 %v14198_v13, %s15615_s15  ;;  %v16997_v29 = vld [vmem:[%s15728_s13 + $0x3d9] sm:$0xff]  ;;  %v12779_v20 = vpack.c.bf16 %v2041_v54, %v2041_v54  ;;  %v887_v49 = vsel %vm854_vm0, %v310_v40, %v13906_v34  ;;  %v13920_v25 = vpop.permute.xlu1 %13919 }
  0xfd   : > { %1350 = vst [vmem:[#allocation2 + $0x12c] sm:$0xf] %v12665_v44  ;;  %v14718_v48 = vld [vmem:[#allocation2 + $0xf0] ss:$20 sps:$4 sm:$0xff]   ;;  %v5188_v16 = vsel %vm854_vm0, %v12037_v51, 0.0  ;;  %v13044_v3 = vpack.c.bf16 %v5187_v55, %v5187_v55  ;;  %v12778_v36 = vpack.c.bf16 %v2040_v43, %v2040_v43  ;;  %v888_v61 = vsel %vm854_vm0, %v311_v11, %v13907_v27  ;;  %6672 = vmatprep.mubr.bf16.mxu0 %v14716_v59  ;;  %v295_v35 = vld [vmem:[%s15728_s13 + $0xc8] sm:$0xff] }
  0xfe   : > { %v14719_v7 = vld [vmem:[#allocation2 + $0x198] ss:$20 sps:$4 sm:$0xff]   ;;  %v17003_v1 = vld [vmem:[%s15728_s13 + $0x3e1] sm:$0xff]  ;;  %5666 = vst [vmem:[#allocation2 + $0xc4] sm:$0xf] %v13043_v39  ;;  %v12682_v17 = vpack.c.bf16 %v887_v49, %v887_v49  ;;  %v12683_v13 = vpack.c.bf16 %v888_v61, %v888_v61  ;;  %v13922_v18 = vunpack.i.h.bf16 %v13920_v25  ;;  %v13921_v56 = vunpack.i.l.bf16 %v13920_v25  ;;  %13458 = vmatpush3.bf16.msra.mxu0 %v16957_v31 }
  0xff   : > { %v294_v51 = vld [vmem:[%s15728_s13 + $0xc0] sm:$0xff]  ;;  %v20937_v40 = vpack.i.bf16 %v16610_v42, %v16607_v22  ;;  %5667 = vst [vmem:[#allocation2 + $0xd8] sm:$0xf] %v13044_v3  ;;  %2520 = vst [vmem:[#allocation2 + $0x284] sm:$0xf] %v12778_v36  ;;  %v13917_v11 = vunpack.i.h.bf16 %v13915_v21  ;;  %v13916_v44 = vunpack.i.l.bf16 %v13915_v21  ;;  %6673 = vmatmul.mubr.bf16.gmra.mxu0 %v14718_v48  ;;  %6866 = vmatmul.mubr.bf16.gmra.mxu1 %v14719_v7  ;;  %v12039_v34 = vld [vmem:[%s15728_s13 + $0xca] sm:$0xff] }
 0x100   : > { %2521 = vst [vmem:[#allocation2 + $0x298] sm:$0xf] %v12779_v20  ;;  %v14248_v47 = vpack.i.bf16 %v16983_v32, %v16980_v53  ;;  %v13045_v28 = vpack.c.bf16 %v5188_v16, %v5188_v16  ;;  %1367 = vst [vmem:[#allocation2 + $0x280] sm:$0xf] %v12682_v17  ;;  %v2024_v22 = vsel %vm854_vm0, %v1447_v0, %v13921_v56  ;;  %6873 = vmatprep.mubr.bf16.mxu1 %v14722_v62  ;;  %v17024_v63 = vld [vmem:[%s15728_s13 + $0x25a] sm:$0xff]  ;;  %v17027_v27 = vld [vmem:[%s15728_s13 + $0x262] sm:$0xff]  ;;  %v13930_v57 = vpop.permute.xlu1 %13929  ;;  %v13925_v16 = vpop.permute.xlu0 %13924 }
 0x101   : > { %14194 = vrot.lane.b32.xlu0 %v20937_v40, %s15615_s15  ;;  %1368 = vst [vmem:[#allocation2 + $0x294] sm:$0xf] %v12683_v13  ;;  %v2025_v42 = vsel %vm854_vm0, %v1448_v6, %v13922_v18  ;;  %14209 = vrot.lane.b32.xlu1 %v14208_v46, %s15615_s15  ;;  %v14243_v31 = vpack.i.bf16 %v17003_v1, %v16997_v29  ;;  %v5189_v59 = vsel %vm854_vm0, %v12038_v10, 0.0  ;;  %v313_v46 = vld [vmem:[%s15728_s13 + $0x1d0] sm:$0xff]  ;;  %v13932_v54 = vunpack.i.h.bf16 %v13930_v57  ;;  %v14729_v3 = vld [vmem:[#allocation2 + $0x1ec] ss:$20 sps:$4 sm:$0xff]  }
 0x102   : > { %v12762_v39 = vpack.c.bf16 %v2024_v22, %v2024_v22  ;;  %v12763_v0 = vpack.c.bf16 %v2025_v42, %v2025_v42  ;;  %v871_v62 = vsel %vm854_vm0, %v294_v51, %v13916_v44  ;;  %v872_v6 = vsel %vm854_vm0, %v295_v35, %v13917_v11  ;;  %8747 = vmatprep.subr.bf16.mxu0 %v20922_v58  ;;  %v17041_v36 = vld [vmem:[%s15728_s13 + $0x259] sm:$0xff]  ;;  %v17044_v20 = vld [vmem:[%s15728_s13 + $0x261] sm:$0xff]  ;;  %v15440_v5 = vld [vmem:[%s15728_s13 + $0x1ca] sm:$0xff] }
 0x103   : > { %5668 = vst [vmem:[#allocation2 + $0xec] sm:$0xf] %v13045_v28  ;;  %v12666_v55 = vpack.c.bf16 %v871_v62, %v871_v62  ;;  %v12667_v43 = vpack.c.bf16 %v872_v6, %v872_v6  ;;  %v13931_v48 = vunpack.i.l.bf16 %v13930_v57  ;;  %v13927_v49 = vunpack.i.h.bf16 %v13925_v16  ;;  %v1449_v25 = vld [vmem:[%s15728_s13 + $0xda] sm:$0xff]  ;;  %v1450_v7 = vld [vmem:[%s15728_s13 + $0xe2] sm:$0xff]  ;;  %v15441_v13 = vld [vmem:[%s15728_s13 + $0x1d2] sm:$0xff] }
 0x104   : > { %2504 = vst [vmem:[#allocation2 + $0x144] sm:$0xf] %v12762_v39  ;;  %2505 = vst [vmem:[#allocation2 + $0x158] sm:$0xf] %v12763_v0  ;;  %v13926_v61 = vunpack.i.l.bf16 %v13925_v16  ;;  %v14724_v10 = vld [vmem:[#allocation2 + $0x11c] ss:$20 sps:$4 sm:$0xff]   ;;  %v14273_v17 = vpack.i.bf16 %v17027_v27, %v17024_v63  ;;  %v2043_v18 = vsel %vm854_vm0, %v15441_v13, %v13932_v54  ;;  %v13046_v51 = vpack.c.bf16 %v5189_v59, %v5189_v59  ;;  %v13940_v42 = vpop.permute.xlu1 %13939 }
 0x105   : > { %14204 = vrot.lane.b32.xlu0 %v14203_v12, %s15615_s15  ;;  %v5190_v19 = vsel %vm854_vm0, %v12039_v34, 0.0  ;;  %1351 = vst [vmem:[#allocation2 + $0x140] sm:$0xf] %v12666_v55  ;;  %1352 = vst [vmem:[#allocation2 + $0x154] sm:$0xf] %v12667_v43  ;;  %v2042_v12 = vsel %vm854_vm0, %v15440_v5, %v13931_v48  ;;  %v296_v56 = vld [vmem:[%s15728_s13 + $0xd8] sm:$0xff]  ;;  %14219 = vrot.lane.b32.xlu1 %v14218_v33, %s15615_s15  ;;  %v12781_v44 = vpack.c.bf16 %v2043_v18, %v2043_v18  ;;  %v13935_v33 = vpop.permute.xlu0 %13934 }
 0x106   : > { %v14726_v21 = vld [vmem:[#allocation2 + $0x118] ss:$20 sps:$4 sm:$0xff]   ;;  %v13047_v35 = vpack.c.bf16 %v5190_v19, %v5190_v19  ;;  %v12780_v11 = vpack.c.bf16 %v2042_v12, %v2042_v12  ;;  %v889_v28 = vsel %vm854_vm0, %v312_v8, %v13926_v61  ;;  %v890_v22 = vsel %vm854_vm0, %v313_v46, %v13927_v49  ;;  %6680 = vmatprep.mubr.bf16.mxu0 %v14724_v10  ;;  %v14727_v34 = vld [vmem:[#allocation2 + $0x1c0] ss:$20 sps:$4 sm:$0xff]  }
 0x107   : > { %v12040_v40 = vld [vmem:[%s15728_s13 + $0xda] sm:$0xff]  ;;  %v12041_v39 = vld [vmem:[%s15728_s13 + $0xe2] sm:$0xff]  ;;  %v12684_v0 = vpack.c.bf16 %v889_v28, %v889_v28  ;;  %v12685_v62 = vpack.c.bf16 %v890_v22, %v890_v22  ;;  %v13942_v41 = vunpack.i.h.bf16 %v13940_v42  ;;  %v13941_v52 = vunpack.i.l.bf16 %v13940_v42  ;;  %v17073_v57 = vld [vmem:[%s15728_s13 + $0x410] sm:$0xff]  ;;  %5669 = vst [vmem:[#allocation2 + $0x100] sm:$0xf] %v13046_v51  ;;  %6681 = vmatmul.mubr.bf16.gmra.mxu0 %v14726_v21  ;;  %6874 = vmatmul.mubr.bf16.gmra.mxu1 %v14727_v34 }
 0x108   : > { %v297_v59 = vld [vmem:[%s15728_s13 + $0xe0] sm:$0xff]  ;;  %v17070_v6 = vld [vmem:[%s15728_s13 + $0x408] sm:$0xff]  ;;  %5670 = vst [vmem:[#allocation2 + $0x114] sm:$0xf] %v13047_v35  ;;  %2522 = vst [vmem:[#allocation2 + $0x2ac] sm:$0xf] %v12780_v11  ;;  %v13937_v8 = vunpack.i.h.bf16 %v13935_v33  ;;  %v13936_v46 = vunpack.i.l.bf16 %v13935_v33  ;;  %v14258_v55 = vpack.i.bf16 %v17044_v20, %v17041_v36  ;;  %6881 = vmatprep.mubr.bf16.mxu1 %v14729_v3  ;;  %v20938_v48 = vpack.i.bf16 %v16891_v23, %v16869_v14  ;;  %v13950_v5 = vpop.permute.xlu1 %13949 }
 0x109   : > { %14214 = vrot.lane.b32.xlu0 %v14213_v9, %s15615_s15  ;;  %2523 = vst [vmem:[#allocation2 + $0x2c0] sm:$0xf] %v12781_v44  ;;  %v5191_v4 = vsel %vm854_vm0, %v12040_v40, 0.0  ;;  %1369 = vst [vmem:[#allocation2 + $0x2a8] sm:$0xf] %v12684_v0  ;;  %v2026_v9 = vsel %vm854_vm0, %v1449_v25, %v13941_v52  ;;  %v2027_v43 = vsel %vm854_vm0, %v1450_v7, %v13942_v41  ;;  %v314_v54 = vld [vmem:[%s15728_s13 + $0x1e0] sm:$0xff]  ;;  %v13952_v13 = vunpack.i.h.bf16 %v13950_v5  ;;  %v13945_v21 = vpop.permute.xlu0 %13944 }
 0x10a   : > { %1370 = vst [vmem:[#allocation2 + $0x2bc] sm:$0xf] %v12685_v62  ;;  %14229 = vrot.lane.b32.xlu1 %v20938_v48, %s15615_s15  ;;  %v17089_v16 = vld [vmem:[%s15728_s13 + $0x3f9] sm:$0xff]  ;;  %v17092_v49 = vld [vmem:[%s15728_s13 + $0x271] sm:$0xff]  ;;  %v5192_v61 = vsel %vm854_vm0, %v12041_v39, 0.0  ;;  %v13048_v10 = vpack.c.bf16 %v5191_v4, %v5191_v4  ;;  %v12764_v25 = vpack.c.bf16 %v2026_v9, %v2026_v9  ;;  %v12765_v19 = vpack.c.bf16 %v2027_v43, %v2027_v43  ;;  %v315_v51 = vld [vmem:[%s15728_s13 + $0x1e8] sm:$0xff] }
 0x10b   : > { %v873_v7 = vsel %vm854_vm0, %v296_v56, %v13936_v46  ;;  %v874_v3 = vsel %vm854_vm0, %v297_v59, %v13937_v8  ;;  %v17098_v14 = vld [vmem:[%s15728_s13 + $0x279] sm:$0xff]  ;;  %v13951_v18 = vunpack.i.l.bf16 %v13950_v5  ;;  %v20939_v35 = vpack.i.bf16 %v16897_v50, %v16894_v37  ;;  %v17109_v40 = vld [vmem:[%s15728_s13 + $0x428] sm:$0xff]  ;;  %v298_v52 = vld [vmem:[%s15728_s13 + $0xf0] sm:$0xff] }
 0x10c   : > { %v12668_v23 = vpack.c.bf16 %v873_v7, %v873_v7  ;;  %v12669_v12 = vpack.c.bf16 %v874_v3, %v874_v3  ;;  %v17106_v56 = vld [vmem:[%s15728_s13 + $0x420] sm:$0xff]  ;;  %5671 = vst [vmem:[#allocation2 + $0x128] sm:$0xf] %v13048_v10  ;;  %2506 = vst [vmem:[#allocation2 + $0x16c] sm:$0xf] %v12764_v25  ;;  %v13947_v11 = vunpack.i.h.bf16 %v13945_v21  ;;  %v13946_v44 = vunpack.i.l.bf16 %v13945_v21  ;;  %v1451_v28 = vld [vmem:[%s15728_s13 + $0xf2] sm:$0xff]  ;;  %v13960_v25 = vpop.permute.xlu1 %13959 }
 0x10d   : > { %14224 = vrot.lane.b32.xlu0 %v20939_v35, %s15615_s15  ;;  %2507 = vst [vmem:[#allocation2 + $0x180] sm:$0xf] %v12765_v19  ;;  %v1452_v22 = vld [vmem:[%s15728_s13 + $0xfa] sm:$0xff]  ;;  %v14268_v37 = vpack.i.bf16 %v17073_v57, %v17070_v6  ;;  %v13049_v50 = vpack.c.bf16 %v5192_v61, %v5192_v61  ;;  %v15442_v39 = vld [vmem:[%s15728_s13 + $0x1e2] sm:$0xff]  ;;  %v15443_v62 = vld [vmem:[%s15728_s13 + $0x1ea] sm:$0xff]  ;;  %v20940_v8 = vpack.i.bf16 %v16905_v24, %v16902_v26  ;;  %v13962_v7 = vunpack.i.h.bf16 %v13960_v25  ;;  %v13955_v5 = vpop.permute.xlu0 %13954 }
 0x10e   : > { %v14731_v42 = vld [vmem:[#allocation2 + $0x144] ss:$20 sps:$4 sm:$0xff]   ;;  %v14734_v34 = vld [vmem:[#allocation2 + $0x1e8] ss:$20 sps:$4 sm:$0xff]   ;;  %1353 = vst [vmem:[#allocation2 + $0x168] sm:$0xf] %v12668_v23  ;;  %v2044_v0 = vsel %vm854_vm0, %v15442_v39, %v13951_v18  ;;  %v2045_v41 = vsel %vm854_vm0, %v15443_v62, %v13952_v13  ;;  %v14263_v46 = vpack.i.bf16 %v17089_v16, %v17078_v60  ;;  %v14278_v4 = vpack.i.bf16 %v17098_v14, %v17092_v49 }
 0x10f   : > { %1354 = vst [vmem:[#allocation2 + $0x17c] sm:$0xf] %v12669_v12  ;;  %v14733_v33 = vld [vmem:[#allocation2 + $0x140] ss:$20 sps:$4 sm:$0xff]   ;;  %14239 = vrot.lane.b32.xlu1 %v20940_v8, %s15615_s15  ;;  %v12782_v43 = vpack.c.bf16 %v2044_v0, %v2044_v0  ;;  %v12783_v48 = vpack.c.bf16 %v2045_v41, %v2045_v41  ;;  %v891_v61 = vsel %vm854_vm0, %v314_v54, %v13946_v44  ;;  %5672 = vst [vmem:[#allocation2 + $0x13c] sm:$0xf] %v13049_v50 }
 0x110   : > { %v14737_v59 = vld [vmem:[#allocation2 + $0x214] ss:$20 sps:$4 sm:$0xff]   ;;  %v892_v10 = vsel %vm854_vm0, %v315_v51, %v13947_v11  ;;  %6688 = vmatprep.mubr.bf16.mxu0 %v14731_v42  ;;  %v12043_v19 = vld [vmem:[%s15728_s13 + $0xfa] sm:$0xff]  ;;  %v12686_v26 = vpack.c.bf16 %v891_v61, %v891_v61  ;;  %v13961_v3 = vunpack.i.l.bf16 %v13960_v25  ;;  %v20941_v12 = vpack.i.bf16 %v16866_v38, %v16863_v15  ;;  %6882 = vmatmul.mubr.bf16.gmra.mxu1 %v14734_v34  ;;  %v13970_v39 = vpop.permute.xlu1 %13969  ;;  %v14742_v36 = vld [vmem:[#allocation2 + $0x210] ss:$20 sps:$4 sm:$0xff]  }
 0x111   : > { %v12042_v9 = vld [vmem:[%s15728_s13 + $0xf2] sm:$0xff]  ;;  %v12687_v24 = vpack.c.bf16 %v892_v10, %v892_v10  ;;  %2524 = vst [vmem:[#allocation2 + $0x2d4] sm:$0xf] %v12782_v43  ;;  %2525 = vst [vmem:[#allocation2 + $0x2e8] sm:$0xf] %v12783_v48  ;;  %v13957_v54 = vunpack.i.h.bf16 %v13955_v5  ;;  %v13956_v13 = vunpack.i.l.bf16 %v13955_v5  ;;  %6689 = vmatmul.mubr.bf16.gmra.mxu0 %v14733_v33  ;;  %v14288_v18 = vpack.i.bf16 %v17109_v40, %v17106_v56  ;;  %v317_v35 = vld [vmem:[%s15728_s13 + $0x200] sm:$0xff]  ;;  %v13965_v33 = vpop.permute.xlu0 %13964 }
 0x112   : > { %v299_v23 = vld [vmem:[%s15728_s13 + $0xf8] sm:$0xff]  ;;  %14234 = vrot.lane.b32.xlu0 %v20941_v12, %s15615_s15  ;;  %v5193_v21 = vsel %vm854_vm0, %v12042_v9, 0.0  ;;  %1371 = vst [vmem:[#allocation2 + $0x2d0] sm:$0xf] %v12686_v26  ;;  %v2028_v51 = vsel %vm854_vm0, %v1451_v28, %v13961_v3  ;;  %v2029_v15 = vsel %vm854_vm0, %v1452_v22, %v13962_v7  ;;  %6889 = vmatprep.mubr.bf16.mxu1 %v14737_v59  ;;  %v5194_v11 = vsel %vm854_vm0, %v12043_v19, 0.0  ;;  %v12044_v42 = vld [vmem:[%s15728_s13 + $0x10a] sm:$0xff] }
 0x113   : > { %1372 = vst [vmem:[#allocation2 + $0x2e4] sm:$0xf] %v12687_v24  ;;  %v316_v38 = vld [vmem:[%s15728_s13 + $0x1f8] sm:$0xff]  ;;  %14249 = vrot.lane.b32.xlu1 %v14248_v47, %s15615_s15  ;;  %v13050_v44 = vpack.c.bf16 %v5193_v21, %v5193_v21  ;;  %v12766_v34 = vpack.c.bf16 %v2028_v51, %v2028_v51  ;;  %v12767_v50 = vpack.c.bf16 %v2029_v15, %v2029_v15  ;;  %v17153_v0 = vld [vmem:[%s15728_s13 + $0x409] sm:$0xff]  ;;  %v13972_v47 = vunpack.i.h.bf16 %v13970_v39  ;;  %v17205_v2 = vld [vmem:[%s15728_s13 + $0x421] sm:$0xff] }
 0x114   : > { %v875_v28 = vsel %vm854_vm0, %v298_v52, %v13956_v13  ;;  %v876_v22 = vsel %vm854_vm0, %v299_v23, %v13957_v54  ;;  %v17156_v62 = vld [vmem:[%s15728_s13 + $0x411] sm:$0xff]  ;;  %v13971_v41 = vunpack.i.l.bf16 %v13970_v39  ;;  %v17163_v52 = vld [vmem:[%s15728_s13 + $0x289] sm:$0xff]  ;;  %v13967_v9 = vunpack.i.h.bf16 %v13965_v33  ;;  %v15444_v1 = vld [vmem:[%s15728_s13 + $0x1fa] sm:$0xff]  ;;  %v13980_v51 = vpop.permute.xlu1 %13979 }
 0x115   : > { %v12670_v53 = vpack.c.bf16 %v875_v28, %v875_v28  ;;  %v12671_v32 = vpack.c.bf16 %v876_v22, %v876_v22  ;;  %v14744_v59 = vld [vmem:[#allocation2 + $0x23c] ss:$20 sps:$4 sm:$0xff]   ;;  %5673 = vst [vmem:[#allocation2 + $0x150] sm:$0xf] %v13050_v44  ;;  %2508 = vst [vmem:[#allocation2 + $0x194] sm:$0xf] %v12766_v34  ;;  %v13966_v43 = vunpack.i.l.bf16 %v13965_v33  ;;  %v13051_v25 = vpack.c.bf16 %v5194_v11, %v5194_v11 }
 0x116   : > { %14244 = vrot.lane.b32.xlu0 %v14243_v31, %s15615_s15  ;;  %v17166_v8 = vld [vmem:[%s15728_s13 + $0x291] sm:$0xff]  ;;  %2509 = vst [vmem:[#allocation2 + $0x1a8] sm:$0xf] %v12767_v50  ;;  %v14739_v10 = vld [vmem:[#allocation2 + $0x16c] ss:$20 sps:$4 sm:$0xff]   ;;  %v5195_v29 = vsel %vm854_vm0, %v12044_v42, 0.0  ;;  %v2046_v31 = vsel %vm854_vm0, %v15444_v1, %v13971_v41  ;;  %v14283_v3 = vpack.i.bf16 %v17156_v62, %v17153_v0  ;;  %v894_v21 = vsel %vm854_vm0, %v317_v35, %v13967_v9  ;;  %v13975_v42 = vpop.permute.xlu0 %13974 }
 0x117   : > { %v1453_v48 = vld [vmem:[%s15728_s13 + $0x10a] sm:$0xff]  ;;  %v1454_v61 = vld [vmem:[%s15728_s13 + $0x112] sm:$0xff]  ;;  %1355 = vst [vmem:[#allocation2 + $0x190] sm:$0xf] %v12670_v53  ;;  %1356 = vst [vmem:[#allocation2 + $0x1a4] sm:$0xf] %v12671_v32  ;;  %14259 = vrot.lane.b32.xlu1 %v14258_v55, %s15615_s15  ;;  %v13052_v23 = vpack.c.bf16 %v5195_v29, %v5195_v29  ;;  %v12784_v12 = vpack.c.bf16 %v2046_v31, %v2046_v31  ;;  %v893_v13 = vsel %vm854_vm0, %v316_v38, %v13966_v43 }
 0x118   : > { %v15445_v19 = vld [vmem:[%s15728_s13 + $0x202] sm:$0xff]  ;;  %v12045_v5 = vld [vmem:[%s15728_s13 + $0x112] sm:$0xff]  ;;  %6696 = vmatprep.mubr.bf16.mxu0 %v14739_v10  ;;  %5674 = vst [vmem:[#allocation2 + $0x164] sm:$0xf] %v13051_v25  ;;  %v12688_v20 = vpack.c.bf16 %v893_v13, %v893_v13  ;;  %v12689_v55 = vpack.c.bf16 %v894_v21, %v894_v21  ;;  %v13982_v11 = vunpack.i.h.bf16 %v13980_v51  ;;  %v13981_v44 = vunpack.i.l.bf16 %v13980_v51  ;;  %v17194_v34 = vld [vmem:[%s15728_s13 + $0x27a] sm:$0xff]  ;;  %6890 = vmatmul.mubr.bf16.gmra.mxu1 %v14742_v36 }
 0x119   : > { %v2047_v26 = vsel %vm854_vm0, %v15445_v19, %v13972_v47  ;;  %v300_v24 = vld [vmem:[%s15728_s13 + $0x108] sm:$0xff]  ;;  %v301_v15 = vld [vmem:[%s15728_s13 + $0x110] sm:$0xff]  ;;  %v17197_v35 = vld [vmem:[%s15728_s13 + $0x438] sm:$0xff]  ;;  %5675 = vst [vmem:[#allocation2 + $0x178] sm:$0xf] %v13052_v23  ;;  %v13977_v28 = vunpack.i.h.bf16 %v13975_v42  ;;  %v13976_v22 = vunpack.i.l.bf16 %v13975_v42  ;;  %v14298_v30 = vpack.i.bf16 %v17166_v8, %v17163_v52  ;;  %6897 = vmatprep.mubr.bf16.mxu1 %v14744_v59 }
 0x11a   : > { %v14741_v7 = vld [vmem:[#allocation2 + $0x168] ss:$20 sps:$4 sm:$0xff]   ;;  %v12785_v54 = vpack.c.bf16 %v2047_v26, %v2047_v26  ;;  %14254 = vrot.lane.b32.xlu0 %v14253_v45, %s15615_s15  ;;  %v17191_v38 = vld [vmem:[%s15728_s13 + $0x272] sm:$0xff]  ;;  %v17200_v50 = vld [vmem:[%s15728_s13 + $0x440] sm:$0xff]  ;;  %2526 = vst [vmem:[#allocation2 + $0x2fc] sm:$0xf] %v12784_v12  ;;  %v2030_v39 = vsel %vm854_vm0, %v1453_v48, %v13981_v44  ;;  %v2031_v53 = vsel %vm854_vm0, %v1454_v61, %v13982_v11  ;;  %v13990_v61 = vpop.permute.xlu1 %13989  ;;  %v13985_v25 = vpop.permute.xlu0 %13984 }
 0x11b   : > { %6697 = vmatmul.mubr.bf16.gmra.mxu0 %v14741_v7  ;;  %v5196_v45 = vsel %vm854_vm0, %v12045_v5, 0.0  ;;  %1373 = vst [vmem:[#allocation2 + $0x2f8] sm:$0xf] %v12688_v20  ;;  %1374 = vst [vmem:[#allocation2 + $0x30c] sm:$0xf] %v12689_v55  ;;  %14269 = vrot.lane.b32.xlu1 %v14268_v37, %s15615_s15  ;;  %v17215_v32 = vld [vmem:[%s15728_s13 + $0x429] sm:$0xff]  ;;  %v12768_v9 = vpack.c.bf16 %v2030_v39, %v2030_v39  ;;  %v12769_v43 = vpack.c.bf16 %v2031_v53, %v2031_v53 }
 0x11c   : > { %2527 = vst [vmem:[#allocation2 + $0x310] sm:$0xf] %v12785_v54  ;;  %v17218_v47 = vld [vmem:[%s15728_s13 + $0x2a1] sm:$0xff]  ;;  %v17221_v41 = vld [vmem:[%s15728_s13 + $0x2a9] sm:$0xff]  ;;  %v13053_v33 = vpack.c.bf16 %v5196_v45, %v5196_v45  ;;  %v877_v48 = vsel %vm854_vm0, %v300_v24, %v13976_v22  ;;  %v878_v59 = vsel %vm854_vm0, %v301_v15, %v13977_v28  ;;  %v13992_v37 = vunpack.i.h.bf16 %v13990_v61  ;;  %v319_v1 = vld [vmem:[%s15728_s13 + $0x218] sm:$0xff] }
 0x11d   : > { %v12672_v6 = vpack.c.bf16 %v877_v48, %v877_v48  ;;  %v12673_v57 = vpack.c.bf16 %v878_v59, %v878_v59  ;;  %v13991_v10 = vunpack.i.l.bf16 %v13990_v61  ;;  %v318_v29 = vld [vmem:[%s15728_s13 + $0x210] sm:$0xff]  ;;  %2510 = vst [vmem:[#allocation2 + $0x1bc] sm:$0xf] %v12768_v9  ;;  %2511 = vst [vmem:[#allocation2 + $0x1d0] sm:$0xf] %v12769_v43  ;;  %v13987_v31 = vunpack.i.h.bf16 %v13985_v25  ;;  %v1455_v26 = vld [vmem:[%s15728_s13 + $0x122] sm:$0xff] }
 0x11e   : > { %14264 = vrot.lane.b32.xlu0 %v14263_v46, %s15615_s15  ;;  %5676 = vst [vmem:[#allocation2 + $0x18c] sm:$0xf] %v13053_v33  ;;  %v13986_v19 = vunpack.i.l.bf16 %v13985_v25  ;;  %v1456_v24 = vld [vmem:[%s15728_s13 + $0x12a] sm:$0xff]  ;;  %v14293_v5 = vpack.i.bf16 %v17194_v34, %v17191_v38  ;;  %v14308_v23 = vpack.i.bf16 %v17200_v50, %v17197_v35  ;;  %v15446_v60 = vld [vmem:[%s15728_s13 + $0x212] sm:$0xff]  ;;  %v15447_v46 = vld [vmem:[%s15728_s13 + $0x21a] sm:$0xff]  ;;  %v14303_v51 = vpack.i.bf16 %v17215_v32, %v17205_v2  ;;  %v14000_v44 = vpop.permute.xlu1 %13999  ;;  %v13995_v45 = vpop.permute.xlu0 %13994 }
 0x11f   : > { %v14746_v7 = vld [vmem:[#allocation2 + $0x194] ss:$20 sps:$4 sm:$0xff]   ;;  %1357 = vst [vmem:[#allocation2 + $0x1b8] sm:$0xf] %v12672_v6  ;;  %1358 = vst [vmem:[#allocation2 + $0x1cc] sm:$0xf] %v12673_v57  ;;  %v2048_v16 = vsel %vm854_vm0, %v15446_v60, %v13991_v10  ;;  %v2049_v12 = vsel %vm854_vm0, %v15447_v46, %v13992_v37  ;;  %14279 = vrot.lane.b32.xlu1 %v14278_v4, %s15615_s15  ;;  %v14318_v15 = vpack.i.bf16 %v17221_v41, %v17218_v47 }
 0x120   : > { %v302_v54 = vld [vmem:[%s15728_s13 + $0x120] sm:$0xff]  ;;  %v12786_v36 = vpack.c.bf16 %v2048_v16, %v2048_v16  ;;  %v12787_v20 = vpack.c.bf16 %v2049_v12, %v2049_v12  ;;  %v895_v55 = vsel %vm854_vm0, %v318_v29, %v13986_v19  ;;  %v896_v11 = vsel %vm854_vm0, %v319_v1, %v13987_v31  ;;  %v303_v42 = vld [vmem:[%s15728_s13 + $0x128] sm:$0xff]  ;;  %6704 = vmatprep.mubr.bf16.mxu0 %v14746_v7  ;;  %v321_v31 = vld [vmem:[%s15728_s13 + $0x230] sm:$0xff] }
 0x121   : > { %v14748_v13 = vld [vmem:[#allocation2 + $0x190] ss:$20 sps:$4 sm:$0xff]   ;;  %v14749_v49 = vld [vmem:[#allocation2 + $0x238] ss:$20 sps:$4 sm:$0xff]   ;;  %v12690_v14 = vpack.c.bf16 %v895_v55, %v895_v55  ;;  %v12691_v4 = vpack.c.bf16 %v896_v11, %v896_v11  ;;  %v14002_v28 = vunpack.i.h.bf16 %v14000_v44  ;;  %v14001_v22 = vunpack.i.l.bf16 %v14000_v44 }
 0x122   : > { %v14752_v21 = vld [vmem:[#allocation2 + $0x264] ss:$20 sps:$4 sm:$0xff]   ;;  %14274 = vrot.lane.b32.xlu0 %v14273_v17, %s15615_s15  ;;  %v12047_v53 = vld [vmem:[%s15728_s13 + $0x12a] sm:$0xff]  ;;  %2528 = vst [vmem:[#allocation2 + $0x324] sm:$0xf] %v12786_v36  ;;  %v13997_v9 = vunpack.i.h.bf16 %v13995_v45  ;;  %v13996_v43 = vunpack.i.l.bf16 %v13995_v45  ;;  %6898 = vmatmul.mubr.bf16.gmra.mxu1 %v14749_v49  ;;  %v14010_v29 = vpop.permute.xlu1 %14009 }
 0x123   : > { %v12046_v39 = vld [vmem:[%s15728_s13 + $0x122] sm:$0xff]  ;;  %v12048_v33 = vld [vmem:[%s15728_s13 + $0x13a] sm:$0xff]  ;;  %2529 = vst [vmem:[#allocation2 + $0x338] sm:$0xf] %v12787_v20  ;;  %6705 = vmatmul.mubr.bf16.gmra.mxu0 %v14748_v13  ;;  %v5198_v59 = vsel %vm854_vm0, %v12047_v53, 0.0  ;;  %v2032_v63 = vsel %vm854_vm0, %v1455_v26, %v14001_v22  ;;  %v2033_v27 = vsel %vm854_vm0, %v1456_v24, %v14002_v28  ;;  %6905 = vmatprep.mubr.bf16.mxu1 %v14752_v21  ;;  %v14011_v19 = vunpack.i.l.bf16 %v14010_v29  ;;  %v14005_v26 = vpop.permute.xlu0 %14004  ;;  %v17279_v24 = vld [vmem:[%s15728_s13 + $0x28a] sm:$0xff] }
 0x124   : > { %v5197_v48 = vsel %vm854_vm0, %v12046_v39, 0.0  ;;  %1375 = vst [vmem:[#allocation2 + $0x320] sm:$0xf] %v12690_v14  ;;  %1376 = vst [vmem:[#allocation2 + $0x334] sm:$0xf] %v12691_v4  ;;  %14289 = vrot.lane.b32.xlu1 %v14288_v18, %s15615_s15  ;;  %v12049_v61 = vld [vmem:[%s15728_s13 + $0x142] sm:$0xff]  ;;  %v12770_v57 = vpack.c.bf16 %v2032_v63, %v2032_v63  ;;  %v12771_v37 = vpack.c.bf16 %v2033_v27, %v2033_v27  ;;  %v14012_v18 = vunpack.i.h.bf16 %v14010_v29 }
 0x125   : > { %v13054_v17 = vpack.c.bf16 %v5197_v48, %v5197_v48  ;;  %v5199_v6 = vsel %vm854_vm0, %v12048_v33, 0.0  ;;  %v879_v10 = vsel %vm854_vm0, %v302_v54, %v13996_v43  ;;  %v880_v25 = vsel %vm854_vm0, %v303_v42, %v13997_v9  ;;  %v320_v1 = vld [vmem:[%s15728_s13 + $0x228] sm:$0xff]  ;;  %v17282_v7 = vld [vmem:[%s15728_s13 + $0x292] sm:$0xff]  ;;  %v1457_v54 = vld [vmem:[%s15728_s13 + $0x13a] sm:$0xff] }
 0x126   : > { %v12674_v56 = vpack.c.bf16 %v879_v10, %v879_v10  ;;  %v12675_v40 = vpack.c.bf16 %v880_v25, %v880_v25  ;;  %14284 = vrot.lane.b32.xlu0 %v14283_v3, %s15615_s15  ;;  %v17285_v60 = vld [vmem:[%s15728_s13 + $0x450] sm:$0xff]  ;;  %v17288_v16 = vld [vmem:[%s15728_s13 + $0x458] sm:$0xff]  ;;  %2512 = vst [vmem:[#allocation2 + $0x1e4] sm:$0xf] %v12770_v57  ;;  %2513 = vst [vmem:[#allocation2 + $0x1f8] sm:$0xf] %v12771_v37  ;;  %v14007_v46 = vunpack.i.h.bf16 %v14005_v26  ;;  %v14006_v12 = vunpack.i.l.bf16 %v14005_v26  ;;  %v14020_v53 = vpop.permute.xlu1 %14019 }
 0x127   : > { %5677 = vst [vmem:[#allocation2 + $0x1a0] sm:$0xf] %v13054_v17  ;;  %v1458_v0 = vld [vmem:[%s15728_s13 + $0x142] sm:$0xff]  ;;  %v14754_v62 = vld [vmem:[#allocation2 + $0x1bc] ss:$20 sps:$4 sm:$0xff]   ;;  %v13055_v3 = vpack.c.bf16 %v5198_v59, %v5198_v59  ;;  %v5200_v13 = vsel %vm854_vm0, %v12049_v61, 0.0  ;;  %v13056_v14 = vpack.c.bf16 %v5199_v6, %v5199_v6  ;;  %v14021_v48 = vunpack.i.l.bf16 %v14020_v53  ;;  %v14015_v59 = vpop.permute.xlu0 %14014 }
 0x128   : > { %1359 = vst [vmem:[#allocation2 + $0x1e0] sm:$0xf] %v12674_v56  ;;  %1360 = vst [vmem:[#allocation2 + $0x1f4] sm:$0xf] %v12675_v40  ;;  %v15448_v21 = vld [vmem:[%s15728_s13 + $0x22a] sm:$0xff]  ;;  %v15449_v20 = vld [vmem:[%s15728_s13 + $0x232] sm:$0xff]  ;;  %14299 = vrot.lane.b32.xlu1 %v14298_v30, %s15615_s15  ;;  %v13057_v4 = vpack.c.bf16 %v5200_v13, %v5200_v13  ;;  %v897_v45 = vsel %vm854_vm0, %v320_v1, %v14006_v12  ;;  %v898_v39 = vsel %vm854_vm0, %v321_v31, %v14007_v46 }
 0x129   : > { %v2050_v36 = vsel %vm854_vm0, %v15448_v21, %v14011_v19  ;;  %v2051_v55 = vsel %vm854_vm0, %v15449_v20, %v14012_v18  ;;  %v304_v11 = vld [vmem:[%s15728_s13 + $0x138] sm:$0xff]  ;;  %v305_v44 = vld [vmem:[%s15728_s13 + $0x140] sm:$0xff]  ;;  %6712 = vmatprep.mubr.bf16.mxu0 %v14754_v62  ;;  %5678 = vst [vmem:[#allocation2 + $0x1b4] sm:$0xf] %v13055_v3  ;;  %v12692_v52 = vpack.c.bf16 %v897_v45, %v897_v45  ;;  %v14022_v30 = vunpack.i.h.bf16 %v14020_v53  ;;  %v17325_v61 = vld [vmem:[%s15728_s13 + $0x2aa] sm:$0xff] }
 0x12a   : > { %v14756_v42 = vld [vmem:[#allocation2 + $0x1b8] ss:$20 sps:$4 sm:$0xff]   ;;  %v12788_v28 = vpack.c.bf16 %v2050_v36, %v2050_v36  ;;  %v12789_v22 = vpack.c.bf16 %v2051_v55, %v2051_v55  ;;  %v14757_v33 = vld [vmem:[#allocation2 + $0x260] ss:$20 sps:$4 sm:$0xff]   ;;  %v12693_v8 = vpack.c.bf16 %v898_v39, %v898_v39  ;;  %14294 = vrot.lane.b32.xlu0 %v14293_v5, %s15615_s15  ;;  %5679 = vst [vmem:[#allocation2 + $0x1c8] sm:$0xf] %v13056_v14  ;;  %v14017_v6 = vunpack.i.h.bf16 %v14015_v59  ;;  %v14030_v26 = vpop.permute.xlu1 %14029 }
 0x12b   : > { %v14761_v49 = vld [vmem:[#allocation2 + $0x284] ss:$20 sps:$4 sm:$0xff]   ;;  %5680 = vst [vmem:[#allocation2 + $0x1dc] sm:$0xf] %v13057_v4  ;;  %v14016_v57 = vunpack.i.l.bf16 %v14015_v59  ;;  %6713 = vmatmul.mubr.bf16.gmra.mxu0 %v14756_v42  ;;  %6906 = vmatmul.mubr.bf16.gmra.mxu1 %v14757_v33  ;;  %v14313_v5 = vpack.i.bf16 %v17282_v7, %v17279_v24  ;;  %v14328_v37 = vpack.i.bf16 %v17288_v16, %v17285_v60  ;;  %v17332_v10 = vld [vmem:[%s15728_s13 + $0x468] sm:$0xff]  ;;  %v17343_v31 = vld [vmem:[%s15728_s13 + $0x470] sm:$0xff]  ;;  %v14032_v12 = vunpack.i.h.bf16 %v14030_v26 }
 0x12c   : > { %v17306_v9 = vld [vmem:[%s15728_s13 + $0x439] sm:$0xff]  ;;  %v17309_v43 = vld [vmem:[%s15728_s13 + $0x441] sm:$0xff]  ;;  %2530 = vst [vmem:[#allocation2 + $0x34c] sm:$0xf] %v12788_v28  ;;  %2531 = vst [vmem:[#allocation2 + $0x360] sm:$0xf] %v12789_v22  ;;  %v2034_v25 = vsel %vm854_vm0, %v1457_v54, %v14021_v48  ;;  %v2035_v29 = vsel %vm854_vm0, %v1458_v0, %v14022_v30  ;;  %8490 = vmatprep.mubr.bf16.mxu1 %v14761_v49  ;;  %14309 = vrot.lane.b32.xlu1 %v14308_v23, %s15615_s15  ;;  %v14031_v54 = vunpack.i.l.bf16 %v14030_v26  ;;  %v14025_v0 = vpop.permute.xlu0 %14024 }
 0x12d   : > { %v17316_v63 = vld [vmem:[%s15728_s13 + $0x2b9] sm:$0xff]  ;;  %v17319_v27 = vld [vmem:[%s15728_s13 + $0x2c1] sm:$0xff]  ;;  %1377 = vst [vmem:[#allocation2 + $0x348] sm:$0xf] %v12692_v52  ;;  %1378 = vst [vmem:[#allocation2 + $0x35c] sm:$0xf] %v12693_v8  ;;  %v14323_v1 = vpack.i.bf16 %v17309_v43, %v17306_v9  ;;  %v12772_v56 = vpack.c.bf16 %v2034_v25, %v2034_v25  ;;  %v12773_v40 = vpack.c.bf16 %v2035_v29, %v2035_v29  ;;  %v14027_v13 = vunpack.i.h.bf16 %v14025_v0 }
 0x12e   : > { %v17322_v17 = vld [vmem:[%s15728_s13 + $0x2a2] sm:$0xff]  ;;  %v881_v18 = vsel %vm854_vm0, %v304_v11, %v14016_v57  ;;  %v882_v19 = vsel %vm854_vm0, %v305_v44, %v14017_v6  ;;  %v17348_v46 = vld [vmem:[%s15728_s13 + $0x451] sm:$0xff]  ;;  %v17351_v35 = vld [vmem:[%s15728_s13 + $0x459] sm:$0xff]  ;;  %14304 = vrot.lane.b32.xlu0 %v14303_v51, %s15615_s15  ;;  %v14026_v21 = vunpack.i.l.bf16 %v14025_v0  ;;  %v14338_v44 = vpack.i.bf16 %v17319_v27, %v17316_v63  ;;  %v14040_v48 = vpop.permute.xlu1 %14039 }
 0x12f   : > { %v12676_v50 = vpack.c.bf16 %v881_v18, %v881_v18  ;;  %v12677_v23 = vpack.c.bf16 %v882_v19, %v882_v19  ;;  %v322_v62 = vld [vmem:[%s15728_s13 + $0x240] sm:$0xff]  ;;  %v323_v3 = vld [vmem:[%s15728_s13 + $0x248] sm:$0xff]  ;;  %2514 = vst [vmem:[#allocation2 + $0x20c] sm:$0xf] %v12772_v56  ;;  %2515 = vst [vmem:[#allocation2 + $0x220] sm:$0xf] %v12773_v40  ;;  %v14333_v2 = vpack.i.bf16 %v17325_v61, %v17322_v17  ;;  %v14041_v59 = vunpack.i.l.bf16 %v14040_v48 }
 0x130   : > { %v1459_v36 = vld [vmem:[%s15728_s13 + $0x152] sm:$0xff]  ;;  %v1460_v20 = vld [vmem:[%s15728_s13 + $0x15a] sm:$0xff]  ;;  %v15450_v32 = vld [vmem:[%s15728_s13 + $0x242] sm:$0xff]  ;;  %14319 = vrot.lane.b32.xlu1 %v14318_v15, %s15615_s15  ;;  %v14348_v45 = vpack.i.bf16 %v17343_v31, %v17332_v10  ;;  %v14343_v39 = vpack.i.bf16 %v17351_v35, %v17348_v46  ;;  %v899_v52 = vsel %vm854_vm0, %v322_v62, %v14026_v21  ;;  %v900_v8 = vsel %vm854_vm0, %v323_v3, %v14027_v13  ;;  %v14035_v6 = vpop.permute.xlu0 %14034 }
 0x131   : > { %v14763_v55 = vld [vmem:[#allocation2 + $0x1e4] ss:$20 sps:$4 sm:$0xff]   ;;  %v17364_v11 = vld [vmem:[%s20845_s3 + $0x130] sm:$0xff]   ;;  %1361 = vst [vmem:[#allocation2 + $0x208] sm:$0xf] %v12676_v50  ;;  %v2052_v51 = vsel %vm854_vm0, %v15450_v32, %v14031_v54  ;;  %v12694_v47 = vpack.c.bf16 %v899_v52, %v899_v52  ;;  %v12695_v41 = vpack.c.bf16 %v900_v8, %v900_v8  ;;  %v14042_v15 = vunpack.i.h.bf16 %v14040_v48  ;;  %v308_v8 = vld [vmem:[%s15728_s13 + $0x168] sm:$0xff] }
 0x132   : > { %1362 = vst [vmem:[#allocation2 + $0x21c] sm:$0xf] %v12677_v23  ;;  %v15451_v42 = vld [vmem:[%s15728_s13 + $0x24a] sm:$0xff]  ;;  %v307_v4 = vld [vmem:[%s15728_s13 + $0x158] sm:$0xff]  ;;  %v14765_v28 = vld [vmem:[#allocation2 + $0x1e0] ss:$20 sps:$4 sm:$0xff]   ;;  %v12790_v53 = vpack.c.bf16 %v2052_v51, %v2052_v51  ;;  %6720 = vmatprep.mubr.bf16.mxu0 %v14763_v55  ;;  %14314 = vrot.lane.b32.xlu0 %v14313_v5, %s15615_s15  ;;  %v14037_v56 = vunpack.i.h.bf16 %v14035_v6  ;;  %v14036_v40 = vunpack.i.l.bf16 %v14035_v6  ;;  %v2036_v5 = vsel %vm854_vm0, %v1459_v36, %v14041_v59  ;;  %v14050_v21 = vpop.permute.xlu1 %14049 }
 0x133   : > { %v2053_v49 = vsel %vm854_vm0, %v15451_v42, %v14032_v12  ;;  %v306_v14 = vld [vmem:[%s15728_s13 + $0x150] sm:$0xff]  ;;  %v14767_v22 = vld [vmem:[#allocation2 + $0x2ac] ss:$20 sps:$4 sm:$0xff]   ;;  %6721 = vmatmul.mubr.bf16.gmra.mxu0 %v14765_v28  ;;  %1379 = vst [vmem:[#allocation2 + $0x370] sm:$0xf] %v12694_v47  ;;  %v2037_v26 = vsel %vm854_vm0, %v1460_v20, %v14042_v15  ;;  %v15452_v50 = vld [vmem:[%s20845_s3 + $0x138] sm:$0xff]   ;;  %v12774_v0 = vpack.c.bf16 %v2036_v5, %v2036_v5  ;;  %v14052_v51 = vunpack.i.h.bf16 %v14050_v21 }
 0x134   : > { %v12791_v33 = vpack.c.bf16 %v2053_v49, %v2053_v49  ;;  %v14759_v30 = vld [vmem:[#allocation2 + $0x280] ss:$20 sps:$4 sm:$0xff]   ;;  %v12052_v29 = vld [vmem:[%s15728_s13 + $0x16a] sm:$0xff]  ;;  %2532 = vst [vmem:[#allocation2 + $0x374] sm:$0xf] %v12790_v53  ;;  %v12775_v62 = vpack.c.bf16 %v2037_v26, %v2037_v26  ;;  %v883_v3 = vsel %vm854_vm0, %v306_v14, %v14036_v40  ;;  %v884_v13 = vsel %vm854_vm0, %v307_v4, %v14037_v56  ;;  %v324_v36 = vld [vmem:[%s15728_s13 + $0x258] sm:$0xff]  ;;  %v14045_v49 = vpop.permute.xlu0 %14044 }
 0x135   : > { %v12050_v57 = vld [vmem:[%s15728_s13 + $0x152] sm:$0xff]  ;;  %v12051_v25 = vld [vmem:[%s15728_s13 + $0x15a] sm:$0xff]  ;;  %8491 = vmatmul.mubr.bf16.vlgmr.msra.gmra.mxu1 %v14759_v30  ;;  %1380 = vst [vmem:[#allocation2 + $0x384] sm:$0xf] %v12695_v41  ;;  %v5203_v54 = vsel %vm854_vm0, %v12052_v29, 0.0  ;;  %v12678_v55 = vpack.c.bf16 %v883_v3, %v883_v3  ;;  %v12679_v32 = vpack.c.bf16 %v884_v13, %v884_v13  ;;  %v14051_v42 = vunpack.i.l.bf16 %v14050_v21  ;;  %14329 = vrot.lane.b32.xlu1 %v14328_v37, %s15615_s15  ;;  %v1461_v60 = vld [vmem:[%s15728_s13 + $0x16a] sm:$0xff] }
 0x136   : > { %2533 = vst [vmem:[#allocation2 + $0x388] sm:$0xf] %v12791_v33  ;;  %v5201_v18 = vsel %vm854_vm0, %v12050_v57, 0.0  ;;  %v5202_v19 = vsel %vm854_vm0, %v12051_v25, 0.0  ;;  %13492 = vmatpush3.bf16.msra.mxu1 %v15452_v50  ;;  %8498 = vmatprep.mubr.bf16.mxu1 %v14767_v22  ;;  %v12053_v12 = vld [vmem:[%s15728_s13 + $0x172] sm:$0xff]  ;;  %v325_v20 = vld [vmem:[%s15728_s13 + $0x260] sm:$0xff]  ;;  %v14047_v28 = vunpack.i.h.bf16 %v14045_v49  ;;  %v14046_v22 = vunpack.i.l.bf16 %v14045_v49  ;;  %v14060_v56 = vpop.permute.xlu1 %14059 }
 0x137   : > { %v13058_v23 = vpack.c.bf16 %v5201_v18, %v5201_v18  ;;  %13493 = vmatprep.subr.bf16.mxu1 %v17364_v11  ;;  %14324 = vrot.lane.b32.xlu0 %v14323_v1, %s15615_s15  ;;  %v17413_v14 = vld [vmem:[%s15728_s13 + $0x2d1] sm:$0xff]  ;;  %v17416_v4 = vld [vmem:[%s15728_s13 + $0x2d9] sm:$0xff]  ;;  %2516 = vst [vmem:[#allocation2 + $0x234] sm:$0xf] %v12774_v0  ;;  %2517 = vst [vmem:[#allocation2 + $0x248] sm:$0xf] %v12775_v62  ;;  %v13059_v53 = vpack.c.bf16 %v5202_v19, %v5202_v19  ;;  %v14062_v26 = vunpack.i.h.bf16 %v14060_v56 }
 0x138   : > { %v1462_v16 = vld [vmem:[%s15728_s13 + $0x172] sm:$0xff]  ;;  %v14769_v37 = vld [vmem:[#allocation2 + $0x20c] ss:$20 sps:$4 sm:$0xff]   ;;  %v5204_v9 = vsel %vm854_vm0, %v12053_v12, 0.0  ;;  %1363 = vst [vmem:[#allocation2 + $0x230] sm:$0xf] %v12678_v55  ;;  %v13060_v15 = vpack.c.bf16 %v5203_v54, %v5203_v54  ;;  %v901_v25 = vsel %vm854_vm0, %v324_v36, %v14046_v22  ;;  %v902_v29 = vsel %vm854_vm0, %v325_v20, %v14047_v28 }
 0x139   : > { %5681 = vst [vmem:[#allocation2 + $0x1f0] sm:$0xf] %v13058_v23  ;;  %1364 = vst [vmem:[#allocation2 + $0x244] sm:$0xf] %v12679_v32  ;;  %v15453_v43 = vld [vmem:[%s15728_s13 + $0x25a] sm:$0xff]  ;;  %v15454_v33 = vld [vmem:[%s15728_s13 + $0x262] sm:$0xff]  ;;  %v13061_v59 = vpack.c.bf16 %v5204_v9, %v5204_v9  ;;  %6728 = vmatprep.mubr.bf16.mxu0 %v14769_v37  ;;  %v12696_v19 = vpack.c.bf16 %v901_v25, %v901_v25  ;;  %v12697_v5 = vpack.c.bf16 %v902_v29, %v902_v29  ;;  %v14055_v23 = vpop.permute.xlu0 %14054 }
 0x13a   : > { %v2054_v1 = vsel %vm854_vm0, %v15453_v43, %v14051_v42  ;;  %v2055_v52 = vsel %vm854_vm0, %v15454_v33, %v14052_v51  ;;  %v309_v30 = vld [vmem:[%s15728_s13 + $0x170] sm:$0xff]  ;;  %v14771_v48 = vld [vmem:[#allocation2 + $0x208] ss:$20 sps:$4 sm:$0xff]   ;;  %13494 = vmatpush3.bf16.msra.mxu1 %v17364_v11  ;;  %5682 = vst [vmem:[#allocation2 + $0x204] sm:$0xf] %v13059_v53  ;;  %v14061_v50 = vunpack.i.l.bf16 %v14060_v56  ;;  %14339 = vrot.lane.b32.xlu1 %v14338_v44, %s15615_s15  ;;  %v17448_v12 = vld [vmem:[%s15728_s13 + $0x480] sm:$0xff]  ;;  %v14057_v0 = vunpack.i.h.bf16 %v14055_v23 }
 0x13b   : > { %v14773_v47 = vld [vmem:[#allocation2 + $0x2d4] ss:$20 sps:$4 sm:$0xff]   ;;  %v12792_v6 = vpack.c.bf16 %v2054_v1, %v2054_v1  ;;  %v12793_v57 = vpack.c.bf16 %v2055_v52, %v2055_v52  ;;  %v17434_v18 = vld [vmem:[%s15728_s13 + $0x2ba] sm:$0xff]  ;;  %14334 = vrot.lane.b32.xlu0 %v14333_v2, %s15615_s15  ;;  %5683 = vst [vmem:[#allocation2 + $0x218] sm:$0xf] %v13060_v15  ;;  %v14056_v63 = vunpack.i.l.bf16 %v14055_v23  ;;  %6729 = vmatmul.mubr.bf16.gmra.mxu0 %v14771_v48 }
 0x13c   : > { %v14820_v41 = vld [vmem:[%s20845_s3 + $0x128] sm:$0xff]   ;;  %5684 = vst [vmem:[#allocation2 + $0x22c] sm:$0xf] %v13061_v59  ;;  %v14358_v27 = vpack.i.bf16 %v17416_v4, %v17413_v14  ;;  %1381 = vst [vmem:[#allocation2 + $0x398] sm:$0xf] %v12696_v19  ;;  %v2038_v2 = vsel %vm854_vm0, %v1461_v60, %v14061_v50  ;;  %v2039_v62 = vsel %vm854_vm0, %v1462_v16, %v14062_v26  ;;  %v326_v3 = vld [vmem:[%s15728_s13 + $0x270] sm:$0xff]  ;;  %v14070_v14 = vpop.permute.xlu1 %14069 }
 0x13d   : > { %v14772_v40 = vld [vmem:[#allocation2 + $0x2a8] ss:$20 sps:$4 sm:$0xff]   ;;  %2534 = vst [vmem:[#allocation2 + $0x39c] sm:$0xf] %v12792_v6  ;;  %2535 = vst [vmem:[#allocation2 + $0x3b0] sm:$0xf] %v12793_v57  ;;  %13495 = vmatprep.subr.bf16.mxu1 %v14820_v41  ;;  %v12776_v32 = vpack.c.bf16 %v2038_v2, %v2038_v2  ;;  %v12777_v51 = vpack.c.bf16 %v2039_v62, %v2039_v62  ;;  %v885_v42 = vsel %vm854_vm0, %v308_v8, %v14056_v63  ;;  %v14065_v16 = vpop.permute.xlu0 %14064 }
 0x13e   : > { %v17437_v11 = vld [vmem:[%s15728_s13 + $0x2c2] sm:$0xff]  ;;  %8499 = vmatmul.mubr.bf16.gmra.mxu1 %v14772_v40  ;;  %1382 = vst [vmem:[#allocation2 + $0x3ac] sm:$0xf] %v12697_v5  ;;  %v327_v13 = vld [vmem:[%s15728_s13 + $0x278] sm:$0xff]  ;;  %v886_v49 = vsel %vm854_vm0, %v309_v30, %v14057_v0  ;;  %v12680_v4 = vpack.c.bf16 %v885_v42, %v885_v42  ;;  %14349 = vrot.lane.b32.xlu1 %v14348_v45, %s15615_s15  ;;  %v14072_v22 = vunpack.i.h.bf16 %v14070_v14  ;;  %v14071_v60 = vunpack.i.l.bf16 %v14070_v14  ;;  %v329_v26 = vld [vmem:[%s15728_s13 + $0x290] sm:$0xff] }
 0x13f   : > { %v17451_v54 = vld [vmem:[%s15728_s13 + $0x488] sm:$0xff]  ;;  %8506 = vmatprep.mubr.bf16.mxu1 %v14773_v47  ;;  %v14353_v21 = vpack.i.bf16 %v17437_v11, %v17434_v18  ;;  %v17465_v36 = vld [vmem:[%s15728_s13 + $0x471] sm:$0xff]  ;;  %13496 = vmatpush3.bf16.msra.mxu1 %v14820_v41  ;;  %v12681_v28 = vpack.c.bf16 %v886_v49, %v886_v49  ;;  %v17487_v53 = vld [vmem:[%s15728_s13 + $0x2da] sm:$0xff]  ;;  %2518 = vst [vmem:[#allocation2 + $0x25c] sm:$0xf] %v12776_v32  ;;  %v14067_v46 = vunpack.i.h.bf16 %v14065_v16  ;;  %v14066_v35 = vunpack.i.l.bf16 %v14065_v16 }
 0x140   : > { %v17456_v44 = vld [vmem:[%s15728_s13 + $0x469] sm:$0xff]  ;;  %v17471_v55 = vld [vmem:[%s15728_s13 + $0x2f1] sm:$0xff]  ;;  %14344 = vrot.lane.b32.xlu0 %v14343_v39, %s15615_s15  ;;  %v17493_v10 = vld [vmem:[%s15728_s13 + $0x4a0] sm:$0xff]  ;;  %2519 = vst [vmem:[#allocation2 + $0x270] sm:$0xf] %v12777_v51  ;;  %v14368_v45 = vpack.i.bf16 %v17451_v54, %v17448_v12  ;;  %v2056_v30 = vsel %vm854_vm0, %v17191_v38, %v14071_v60  ;;  %v2057_v48 = vsel %vm854_vm0, %v17194_v34, %v14072_v22  ;;  %v14080_v29 = vpop.permute.xlu1 %14079 }
 0x141   : > { %v17468_v20 = vld [vmem:[%s15728_s13 + $0x2e9] sm:$0xff]  ;;  %v17484_v37 = vld [vmem:[%s15728_s13 + $0x2d2] sm:$0xff]  ;;  %v17498_v39 = vld [vmem:[%s15728_s13 + $0x481] sm:$0xff]  ;;  %1365 = vst [vmem:[#allocation2 + $0x258] sm:$0xf] %v12680_v4  ;;  %v14363_v41 = vpack.i.bf16 %v17465_v36, %v17456_v44  ;;  %v12794_v6 = vpack.c.bf16 %v2056_v30, %v2056_v30  ;;  %v12795_v57 = vpack.c.bf16 %v2057_v48, %v2057_v48  ;;  %v903_v25 = vsel %vm854_vm0, %v326_v3, %v14066_v35  ;;  %v14075_v5 = vpop.permute.xlu0 %14074 }
 0x142   : > { %v17490_v9 = vld [vmem:[%s15728_s13 + $0x498] sm:$0xff]  ;;  %v14775_v31 = vld [vmem:[#allocation2 + $0x234] ss:$20 sps:$4 sm:$0xff]   ;;  %1366 = vst [vmem:[#allocation2 + $0x26c] sm:$0xf] %v12681_v28  ;;  %v14378_v15 = vpack.i.bf16 %v17471_v55, %v17468_v20  ;;  %v904_v38 = vsel %vm854_vm0, %v327_v13, %v14067_v46  ;;  %v12698_v56 = vpack.c.bf16 %v903_v25, %v903_v25  ;;  %14359 = vrot.lane.b32.xlu1 %v14358_v27, %s15615_s15  ;;  %v14082_v40 = vunpack.i.h.bf16 %v14080_v29  ;;  %v330_v60 = vld [vmem:[%s15728_s13 + $0x2a0] sm:$0xff] }
 0x143   : > { %v17501_v43 = vld [vmem:[%s15728_s13 + $0x489] sm:$0xff]  ;;  %v17504_v1 = vld [vmem:[%s15728_s13 + $0x301] sm:$0xff]  ;;  %6736 = vmatprep.mubr.bf16.mxu0 %v14775_v31  ;;  %v12699_v34 = vpack.c.bf16 %v904_v38, %v904_v38  ;;  %v14081_v19 = vunpack.i.l.bf16 %v14080_v29  ;;  %2536 = vst [vmem:[#allocation2 + $0x3c4] sm:$0xf] %v12794_v6  ;;  %2537 = vst [vmem:[#allocation2 + $0x3d8] sm:$0xf] %v12795_v57  ;;  %v14077_v23 = vunpack.i.h.bf16 %v14075_v5  ;;  %v14076_v12 = vunpack.i.l.bf16 %v14075_v5 }
 0x144   : > { %v17507_v33 = vld [vmem:[%s15728_s13 + $0x309] sm:$0xff]  ;;  %14354 = vrot.lane.b32.xlu0 %v14353_v21, %s15615_s15  ;;  %v14373_v54 = vpack.i.bf16 %v17487_v53, %v17484_v37  ;;  %v14388_v0 = vpack.i.bf16 %v17493_v10, %v17490_v9  ;;  %v17531_v63 = vld [vmem:[%s15728_s13 + $0x2f2] sm:$0xff]  ;;  %1383 = vst [vmem:[#allocation2 + $0x3c0] sm:$0xf] %v12698_v56  ;;  %v2059_v44 = vsel %vm854_vm0, %v17282_v7, %v14082_v40  ;;  %v12056_v42 = vld [vmem:[%s15728_s13 + $0x19a] sm:$0xff]  ;;  %v14090_v22 = vpop.permute.xlu1 %14089 }
 0x145   : > { %v14777_v52 = vld [vmem:[#allocation2 + $0x230] ss:$20 sps:$4 sm:$0xff]   ;;  %v328_v47 = vld [vmem:[%s15728_s13 + $0x288] sm:$0xff]  ;;  %1384 = vst [vmem:[#allocation2 + $0x3d4] sm:$0xf] %v12699_v34  ;;  %v2058_v27 = vsel %vm854_vm0, %v17279_v24, %v14081_v19  ;;  %v14383_v2 = vpack.i.bf16 %v17501_v43, %v17498_v39  ;;  %v14398_v62 = vpack.i.bf16 %v17507_v33, %v17504_v1  ;;  %v17545_v13 = vld [vmem:[%s15728_s13 + $0x4b8] sm:$0xff]  ;;  %v12797_v32 = vpack.c.bf16 %v2059_v44, %v2059_v44 }
 0x146   : > { %v14780_v8 = vld [vmem:[#allocation2 + $0x2fc] ss:$20 sps:$4 sm:$0xff]   ;;  %6737 = vmatmul.mubr.bf16.gmra.mxu0 %v14777_v52  ;;  %v12054_v21 = vld [vmem:[%s15728_s13 + $0x182] sm:$0xff]  ;;  %v12796_v36 = vpack.c.bf16 %v2058_v27, %v2058_v27  ;;  %v905_v24 = vsel %vm854_vm0, %v328_v47, %v14076_v12  ;;  %v906_v51 = vsel %vm854_vm0, %v329_v26, %v14077_v23  ;;  %14369 = vrot.lane.b32.xlu1 %v14368_v45, %s15615_s15  ;;  %v14092_v52 = vunpack.i.h.bf16 %v14090_v22  ;;  %v14786_v38 = vld [vmem:[#allocation2 + $0x2f8] ss:$20 sps:$4 sm:$0xff]  }
 0x147   : > { %v14779_v59 = vld [vmem:[#allocation2 + $0x2d0] ss:$20 sps:$4 sm:$0xff]   ;;  %v12700_v4 = vpack.c.bf16 %v905_v24, %v905_v24  ;;  %v12701_v28 = vpack.c.bf16 %v906_v51, %v906_v51  ;;  %v331_v16 = vld [vmem:[%s15728_s13 + $0x2a8] sm:$0xff]  ;;  %v5205_v46 = vsel %vm854_vm0, %v12054_v21, 0.0  ;;  %2539 = vst [vmem:[#allocation2 + $0x400] sm:$0xf] %v12797_v32 }
 0x148   : > { %v17524_v50 = vld [vmem:[%s15728_s13 + $0x2ea] sm:$0xff]  ;;  %8507 = vmatmul.mubr.bf16.gmra.mxu1 %v14779_v59  ;;  %v12057_v49 = vld [vmem:[%s15728_s13 + $0x1a2] sm:$0xff]  ;;  %14364 = vrot.lane.b32.xlu0 %v14363_v41, %s15615_s15  ;;  %2538 = vst [vmem:[#allocation2 + $0x3ec] sm:$0xf] %v12796_v36  ;;  %v13062_v48 = vpack.c.bf16 %v5205_v46, %v5205_v46  ;;  %v14085_v41 = vpop.permute.xlu0 %14084  ;;  %v5207_v57 = vsel %vm854_vm0, %v12056_v42, 0.0  ;;  %v2061_v56 = vsel %vm854_vm0, %v17325_v61, %v14092_v52  ;;  %v14100_v26 = vpop.permute.xlu1 %14099  ;;  %v332_v23 = vld [vmem:[%s15728_s13 + $0x2b8] sm:$0xff] }
 0x149   : > { %8514 = vmatprep.mubr.bf16.mxu1 %v14780_v8  ;;  %v17542_v3 = vld [vmem:[%s15728_s13 + $0x4b0] sm:$0xff]  ;;  %v14393_v31 = vpack.i.bf16 %v17531_v63, %v17524_v50  ;;  %v14091_v8 = vunpack.i.l.bf16 %v14090_v22  ;;  %v14784_v47 = vld [vmem:[#allocation2 + $0x258] ss:$20 sps:$4 sm:$0xff]   ;;  %1385 = vst [vmem:[#allocation2 + $0x3e8] sm:$0xf] %v12700_v4  ;;  %v5208_v25 = vsel %vm854_vm0, %v12057_v49, 0.0  ;;  %v14087_v34 = vunpack.i.h.bf16 %v14085_v41 }
 0x14a   : > { %v12055_v7 = vld [vmem:[%s15728_s13 + $0x18a] sm:$0xff]  ;;  %v14788_v45 = vld [vmem:[#allocation2 + $0x324] ss:$20 sps:$4 sm:$0xff]   ;;  %1386 = vst [vmem:[#allocation2 + $0x3fc] sm:$0xf] %v12701_v28  ;;  %v14408_v59 = vpack.i.bf16 %v17545_v13, %v17542_v3  ;;  %v14086_v40 = vunpack.i.l.bf16 %v14085_v41  ;;  %v12799_v5 = vpack.c.bf16 %v2061_v56, %v2061_v56  ;;  %14379 = vrot.lane.b32.xlu1 %v14378_v15, %s15615_s15  ;;  %v13064_v61 = vpack.c.bf16 %v5207_v57, %v5207_v57 }
 0x14b   : > { %v14790_v14 = vld [vmem:[#allocation2 + $0x10] ss:$20 sps:$4 sm:$0xff]   ;;  %v5206_v30 = vsel %vm854_vm0, %v12055_v7, 0.0  ;;  %v2060_v29 = vsel %vm854_vm0, %v17322_v17, %v14091_v8  ;;  %5685 = vst [vmem:[#allocation2 + $0x240] sm:$0xf] %v13062_v48  ;;  %v17577_v17 = vld [vmem:[%s15728_s13 + $0x499] sm:$0xff]  ;;  %v908_v44 = vsel %vm854_vm0, %v331_v16, %v14087_v34  ;;  %v14102_v21 = vunpack.i.h.bf16 %v14100_v26 }
 0x14c   : > { %v14782_v35 = vld [vmem:[#allocation2 + $0x25c] ss:$20 sps:$4 sm:$0xff]   ;;  %v13063_v6 = vpack.c.bf16 %v5206_v30, %v5206_v30  ;;  %v12798_v19 = vpack.c.bf16 %v2060_v29, %v2060_v29  ;;  %14374 = vrot.lane.b32.xlu0 %v14373_v54, %s15615_s15  ;;  %v333_v12 = vld [vmem:[%s15728_s13 + $0x2c0] sm:$0xff]  ;;  %v907_v27 = vsel %vm854_vm0, %v330_v60, %v14086_v40  ;;  %v14101_v36 = vunpack.i.l.bf16 %v14100_v26  ;;  %2541 = vst [vmem:[#allocation2 + $0x428] sm:$0xf] %v12799_v5  ;;  %v14095_v54 = vpop.permute.xlu0 %14094  ;;  %v14110_v16 = vpop.permute.xlu1 %14109  ;;  %v17624_v39 = vld [vmem:[%s15728_s13 + $0x4c8] sm:$0xff] }
 0x14d   : > { %6744 = vmatprep.mubr.bf16.mxu0 %v14782_v35  ;;  %v17582_v20 = vld [vmem:[%s15728_s13 + $0x4a1] sm:$0xff]  ;;  %v12702_v55 = vpack.c.bf16 %v907_v27, %v907_v27  ;;  %v12703_v15 = vpack.c.bf16 %v908_v44, %v908_v44  ;;  %v13065_v24 = vpack.c.bf16 %v5208_v25, %v5208_v25  ;;  %5687 = vst [vmem:[#allocation2 + $0x268] sm:$0xf] %v13064_v61  ;;  %v14097_v42 = vunpack.i.h.bf16 %v14095_v54  ;;  %v17595_v4 = vld [vmem:[%s15728_s13 + $0x319] sm:$0xff]  ;;  %v334_v46 = vld [vmem:[%s15728_s13 + $0x2d0] sm:$0xff] }
 0x14e   : > { %5686 = vst [vmem:[#allocation2 + $0x254] sm:$0xf] %v13063_v6  ;;  %6745 = vmatmul.mubr.bf16.gmra.mxu0 %v14784_v47  ;;  %2540 = vst [vmem:[#allocation2 + $0x414] sm:$0xf] %v12798_v19  ;;  %v17585_v32 = vld [vmem:[%s15728_s13 + $0x302] sm:$0xff]  ;;  %v2062_v51 = vsel %vm854_vm0, %v17434_v18, %v14101_v36  ;;  %v2063_v7 = vsel %vm854_vm0, %v17437_v11, %v14102_v21  ;;  %v14096_v49 = vunpack.i.l.bf16 %v14095_v54  ;;  %v14794_v18 = vld [vmem:[%s20845_s3 + $0xb8] sm:$0xff]   ;;  %14389 = vrot.lane.b32.xlu1 %v14388_v0, %s15615_s15 }
 0x14f   : > { %13459 = vmatprep.mubr.bf16.mxu0 %v14790_v14  ;;  %v17592_v14 = vld [vmem:[%s15728_s13 + $0x30a] sm:$0xff]  ;;  %v17598_v28 = vld [vmem:[%s15728_s13 + $0x321] sm:$0xff]  ;;  %1387 = vst [vmem:[#allocation2 + $0x410] sm:$0xf] %v12702_v55  ;;  %1388 = vst [vmem:[#allocation2 + $0x424] sm:$0xf] %v12703_v15  ;;  %v12800_v60 = vpack.c.bf16 %v2062_v51, %v2062_v51  ;;  %v12801_v11 = vpack.c.bf16 %v2063_v7, %v2063_v7  ;;  %v14403_v52 = vpack.i.bf16 %v17582_v20, %v17577_v17 }
 0x150   : > { %8515 = vmatmul.mubr.bf16.gmra.mxu1 %v14786_v38  ;;  %v14792_v22 = vld [vmem:[#allocation2 + $0x38] ss:$20 sps:$4 sm:$0xff]   ;;  %14384 = vrot.lane.b32.xlu0 %v14383_v2, %s15615_s15  ;;  %v17619_v30 = vld [vmem:[%s15728_s13 + $0x322] sm:$0xff]  ;;  %5688 = vst [vmem:[#allocation2 + $0x27c] sm:$0xf] %v13065_v24  ;;  %v909_v9 = vsel %vm854_vm0, %v332_v23, %v14096_v49  ;;  %v910_v10 = vsel %vm854_vm0, %v333_v12, %v14097_v42  ;;  %v14112_v0 = vunpack.i.h.bf16 %v14110_v16  ;;  %v14111_v47 = vunpack.i.l.bf16 %v14110_v16  ;;  %v17627_v43 = vld [vmem:[%s15728_s13 + $0x4d0] sm:$0xff]  ;;  %v14105_v6 = vpop.permute.xlu0 %14104 }
 0x151   : > { %8522 = vmatprep.mubr.bf16.mxu1 %v14788_v45  ;;  %v335_v35 = vld [vmem:[%s15728_s13 + $0x2d8] sm:$0xff]  ;;  %v14798_v48 = vld [vmem:[#allocation2 + $0x60] ss:$20 sps:$4 sm:$0xff]   ;;  %2542 = vst [vmem:[#allocation2 + $0x43c] sm:$0xf] %v12800_v60  ;;  %v12704_v45 = vpack.c.bf16 %v909_v9, %v909_v9  ;;  %v12705_v41 = vpack.c.bf16 %v910_v10, %v910_v10  ;;  %v14418_v57 = vpack.i.bf16 %v17598_v28, %v17595_v4  ;;  %v14107_v34 = vunpack.i.h.bf16 %v14105_v6  ;;  %v336_v36 = vld [vmem:[%s15728_s13 + $0x2e8] sm:$0xff] }
 0x152   : > { %v17616_v8 = vld [vmem:[%s15728_s13 + $0x31a] sm:$0xff]  ;;  %2543 = vst [vmem:[#allocation2 + $0x450] sm:$0xf] %v12801_v11  ;;  %v14413_v25 = vpack.i.bf16 %v17592_v14, %v17585_v32  ;;  %v2064_v29 = vsel %vm854_vm0, %v17484_v37, %v14111_v47  ;;  %v2065_v56 = vsel %vm854_vm0, %v17487_v53, %v14112_v0  ;;  %v14106_v40 = vunpack.i.l.bf16 %v14105_v6  ;;  %v14797_v19 = vld [vmem:[%s20845_s3 + $0xb0] sm:$0xff]   ;;  %14399 = vrot.lane.b32.xlu1 %v14398_v62, %s15615_s15  ;;  %v14120_v37 = vpop.permute.xlu1 %14119  ;;  %v339_v3 = vld [vmem:[%s15728_s13 + $0x308] sm:$0xff] }
 0x153   : > { %v14795_v2 = vld [vmem:[#allocation2 + $0x34c] ss:$20 sps:$4 sm:$0xff]   ;;  %1389 = vst [vmem:[#allocation2 + $0x438] sm:$0xf] %v12704_v45  ;;  %1390 = vst [vmem:[#allocation2 + $0x44c] sm:$0xf] %v12705_v41  ;;  %v12802_v5 = vpack.c.bf16 %v2064_v29, %v2064_v29  ;;  %v12803_v26 = vpack.c.bf16 %v2065_v56, %v2065_v56  ;;  %v14433_v23 = vpack.i.bf16 %v17619_v30, %v17616_v8  ;;  %v14122_v33 = vunpack.i.h.bf16 %v14120_v37 }
 0x154   : > { %v14793_v38 = vld [vmem:[#allocation2 + $0x320] ss:$20 sps:$4 sm:$0xff]   ;;  %14394 = vrot.lane.b32.xlu0 %v14393_v31, %s15615_s15  ;;  %v911_v12 = vsel %vm854_vm0, %v334_v46, %v14106_v40  ;;  %v912_v1 = vsel %vm854_vm0, %v335_v35, %v14107_v34  ;;  %v14121_v62 = vunpack.i.l.bf16 %v14120_v37  ;;  %v14115_v21 = vpop.permute.xlu0 %14114  ;;  %v14428_v15 = vpack.i.bf16 %v17627_v43, %v17624_v39  ;;  %v14805_v46 = vld [vmem:[#allocation2 + $0xb0] ss:$20 sps:$4 sm:$0xff]   ;;  %v14800_v17 = vld [vmem:[#allocation2 + $0x348] ss:$20 sps:$4 sm:$0xff]  }
 0x155   : > { %v17649_v53 = vld [vmem:[%s15728_s13 + $0x4b1] sm:$0xff]  ;;  %v17656_v61 = vld [vmem:[%s15728_s13 + $0x4b9] sm:$0xff]  ;;  %2544 = vst [vmem:[#allocation2 + $0x464] sm:$0xf] %v12802_v5  ;;  %2545 = vst [vmem:[#allocation2 + $0x478] sm:$0xf] %v12803_v26  ;;  %v12706_v27 = vpack.c.bf16 %v911_v12, %v911_v12  ;;  %v12707_v44 = vpack.c.bf16 %v912_v1, %v912_v1  ;;  %v2067_v51 = vsel %vm854_vm0, %v17531_v63, %v14122_v33  ;;  %v14117_v7 = vunpack.i.h.bf16 %v14115_v21 }
 0x156   : > { %13460 = vmatmul.mubr.bf16.vlgmr.msra.gmra.mxu0 %v14792_v22  ;;  %v14852_v31 = vld [vmem:[%s20845_s3 + $0x120] sm:$0xff]   ;;  %v337_v55 = vld [vmem:[%s15728_s13 + $0x2f0] sm:$0xff]  ;;  %v2066_v24 = vsel %vm854_vm0, %v17524_v50, %v14121_v62  ;;  %v14116_v42 = vunpack.i.l.bf16 %v14115_v21  ;;  %v14799_v22 = vld [vmem:[#allocation2 + $0x88] ss:$20 sps:$4 sm:$0xff]   ;;  %v12805_v11 = vpack.c.bf16 %v2067_v51, %v2067_v51  ;;  %14409 = vrot.lane.b32.xlu1 %v14408_v59, %s15615_s15  ;;  %v14130_v50 = vpop.permute.xlu1 %14129  ;;  %v14423_v16 = vpack.i.bf16 %v17656_v61, %v17649_v53 }
 0x157   : > { %8748 = vmatpush1.bf16.msra.mxu0 %v14794_v18  ;;  %v17666_v54 = vld [vmem:[%s15728_s13 + $0x331] sm:$0xff]  ;;  %13463 = vmatprep.mubr.bf16.mxu0 %v14798_v48  ;;  %v17674_v49 = vld [vmem:[%s15728_s13 + $0x339] sm:$0xff]  ;;  %v14801_v18 = vld [vmem:[%s20845_s3 + $0xa8] sm:$0xff]   ;;  %1391 = vst [vmem:[#allocation2 + $0x460] sm:$0xf] %v12706_v27  ;;  %v12804_v60 = vpack.c.bf16 %v2066_v24, %v2066_v24  ;;  %v914_v48 = vsel %vm854_vm0, %v337_v55, %v14117_v7  ;;  %v14132_v9 = vunpack.i.h.bf16 %v14130_v50  ;;  %v14131_v10 = vunpack.i.l.bf16 %v14130_v50 }
 0x158   : > { %8523 = vmatmul.mubr.bf16.gmra.mxu1 %v14793_v38  ;;  %8749 = vmatprep.subr.bf16.mxu0 %v20922_v58  ;;  %1392 = vst [vmem:[#allocation2 + $0x474] sm:$0xf] %v12707_v44  ;;  %v338_v63 = vld [vmem:[%s15728_s13 + $0x300] sm:$0xff]  ;;  %v913_v35 = vsel %vm854_vm0, %v336_v36, %v14116_v42  ;;  %v17697_v59 = vld [vmem:[%s15728_s13 + $0x4e8] sm:$0xff]  ;;  %2547 = vst [vmem:[#allocation2 + $0x4a0] sm:$0xf] %v12805_v11  ;;  %v12709_v0 = vpack.c.bf16 %v914_v48, %v914_v48  ;;  %v14125_v47 = vpop.permute.xlu0 %14124 }
 0x159   : > { %8530 = vmatprep.mubr.bf16.mxu1 %v14795_v2  ;;  %14404 = vrot.lane.b32.xlu0 %v14403_v52, %s15615_s15  ;;  %v17694_v13 = vld [vmem:[%s15728_s13 + $0x4e0] sm:$0xff]  ;;  %v14802_v20 = vld [vmem:[#allocation2 + $0x374] ss:$20 sps:$4 sm:$0xff]   ;;  %2546 = vst [vmem:[#allocation2 + $0x48c] sm:$0xf] %v12804_v60  ;;  %v12708_v52 = vpack.c.bf16 %v913_v35, %v913_v35  ;;  %v14438_v2 = vpack.i.bf16 %v17674_v49, %v17666_v54  ;;  %v14127_v38 = vunpack.i.h.bf16 %v14125_v47  ;;  %v14126_v29 = vunpack.i.l.bf16 %v14125_v47  ;;  %v340_v26 = vld [vmem:[%s15728_s13 + $0x318] sm:$0xff] }
 0x15a   : > { %13497 = vmatprep.subr.bf16.mxu1 %v14852_v31  ;;  %v17702_v45 = vld [vmem:[%s15728_s13 + $0x4c9] sm:$0xff]  ;;  %v2068_v41 = vsel %vm854_vm0, %v17585_v32, %v14131_v10  ;;  %v2069_v6 = vsel %vm854_vm0, %v17592_v14, %v14132_v9  ;;  %v17710_v56 = vld [vmem:[%s15728_s13 + $0x4d1] sm:$0xff]  ;;  %v14804_v34 = vld [vmem:[%s20845_s3 + $0xa0] sm:$0xff]   ;;  %1394 = vst [vmem:[#allocation2 + $0x49c] sm:$0xf] %v12709_v0  ;;  %14419 = vrot.lane.b32.xlu1 %v14418_v57, %s15615_s15  ;;  %v14140_v5 = vpop.permute.xlu1 %14139 }
 0x15b   : > { %8750 = vmatpush1.bf16.msra.mxu0 %v14797_v19  ;;  %13498 = vmatpush3.bf16.msra.mxu1 %v14852_v31  ;;  %1393 = vst [vmem:[#allocation2 + $0x488] sm:$0xf] %v12708_v52  ;;  %v12806_v40 = vpack.c.bf16 %v2068_v41, %v2068_v41  ;;  %v12807_v19 = vpack.c.bf16 %v2069_v6, %v2069_v6  ;;  %v14142_v4 = vunpack.i.h.bf16 %v14140_v5  ;;  %v14141_v28 = vunpack.i.l.bf16 %v14140_v5  ;;  %v341_v57 = vld [vmem:[%s15728_s13 + $0x320] sm:$0xff]  ;;  %v17730_v32 = vld [vmem:[%s15728_s13 + $0x349] sm:$0xff]  ;;  %v17733_v14 = vld [vmem:[%s15728_s13 + $0x351] sm:$0xff] }
 0x15c   : > { %8751 = vmatprep.subr.bf16.mxu0 %v20922_v58  ;;  %v14448_v37 = vpack.i.bf16 %v17697_v59, %v17694_v13  ;;  %v915_v12 = vsel %vm854_vm0, %v338_v63, %v14126_v29  ;;  %v916_v1 = vsel %vm854_vm0, %v339_v3, %v14127_v38  ;;  %v14135_v62 = vpop.permute.xlu0 %14134  ;;  %v1495_v31 = vld [vmem:[%s15728_s13 + $0x362] sm:$0xff]  ;;  %v14443_v27 = vpack.i.bf16 %v17710_v56, %v17702_v45  ;;  %v17739_v44 = vld [vmem:[%s15728_s13 + $0x37a] sm:$0xff]  ;;  %v17745_v36 = vld [vmem:[%s15728_s13 + $0x332] sm:$0xff] }
 0x15d   : > { %14414 = vrot.lane.b32.xlu0 %v14413_v25, %s15615_s15  ;;  %2548 = vst [vmem:[#allocation2 + $0x4b4] sm:$0xf] %v12806_v40  ;;  %2549 = vst [vmem:[#allocation2 + $0x4c8] sm:$0xf] %v12807_v19  ;;  %v12710_v25 = vpack.c.bf16 %v915_v12, %v915_v12  ;;  %v12711_v33 = vpack.c.bf16 %v916_v1, %v916_v1  ;;  %v17742_v21 = vld [vmem:[%s15728_s13 + $0x382] sm:$0xff]  ;;  %v2070_v55 = vsel %vm854_vm0, %v17616_v8, %v14141_v28  ;;  %v17753_v42 = vld [vmem:[%s15728_s13 + $0x33a] sm:$0xff] }
 0x15e   : > { %13464 = vmatmul.mubr.bf16.gmra.mxu0 %v14799_v22  ;;  %v2071_v24 = vsel %vm854_vm0, %v17619_v30, %v14142_v4  ;;  %v14137_v51 = vunpack.i.h.bf16 %v14135_v62  ;;  %v14136_v7 = vunpack.i.l.bf16 %v14135_v62  ;;  %v14806_v22 = vld [vmem:[#allocation2 + $0xd8] ss:$20 sps:$4 sm:$0xff]   ;;  %v12808_v60 = vpack.c.bf16 %v2070_v55, %v2070_v55  ;;  %14429 = vrot.lane.b32.xlu1 %v14428_v15, %s15615_s15  ;;  %v14150_v50 = vpop.permute.xlu1 %14149  ;;  %v14812_v48 = vld [vmem:[#allocation2 + $0x100] ss:$20 sps:$4 sm:$0xff]   ;;  %v14807_v61 = vld [vmem:[#allocation2 + $0x370] ss:$20 sps:$4 sm:$0xff]  }
 0x15f   : > { %8752 = vmatpush1.bf16.msra.mxu0 %v14801_v18  ;;  %13467 = vmatprep.mubr.bf16.mxu0 %v14805_v46  ;;  %v14808_v18 = vld [vmem:[%s20845_s3 + $0x98] sm:$0xff]   ;;  %1395 = vst [vmem:[#allocation2 + $0x4b0] sm:$0xf] %v12710_v25  ;;  %1396 = vst [vmem:[#allocation2 + $0x4c4] sm:$0xf] %v12711_v33  ;;  %v12809_v11 = vpack.c.bf16 %v2071_v24, %v2071_v24  ;;  %v1496_v63 = vld [vmem:[%s15728_s13 + $0x36a] sm:$0xff]  ;;  %v14458_v35 = vpack.i.bf16 %v17733_v14, %v17730_v32  ;;  %v14152_v39 = vunpack.i.h.bf16 %v14150_v50 }
 0x160   : > { %8531 = vmatmul.mubr.bf16.gmra.mxu1 %v14800_v17  ;;  %8753 = vmatprep.subr.bf16.mxu0 %v20922_v58  ;;  %v342_v46 = vld [vmem:[%s15728_s13 + $0x360] sm:$0xff]  ;;  %v917_v9 = vsel %vm854_vm0, %v340_v26, %v14136_v7  ;;  %v918_v10 = vsel %vm854_vm0, %v341_v57, %v14137_v51  ;;  %v14151_v43 = vunpack.i.l.bf16 %v14150_v50  ;;  %v343_v15 = vld [vmem:[%s15728_s13 + $0x368] sm:$0xff]  ;;  %v17774_v3 = vld [vmem:[%s15728_s13 + $0x391] sm:$0xff]  ;;  %2550 = vst [vmem:[#allocation2 + $0x4dc] sm:$0xf] %v12808_v60  ;;  %v14145_v52 = vpop.permute.xlu0 %14144 }
 0x161   : > { %8538 = vmatprep.mubr.bf16.mxu1 %v14802_v20  ;;  %14424 = vrot.lane.b32.xlu0 %v14423_v16, %s15615_s15  ;;  %v17777_v53 = vld [vmem:[%s15728_s13 + $0x399] sm:$0xff]  ;;  %2551 = vst [vmem:[#allocation2 + $0x4f0] sm:$0xf] %v12809_v11  ;;  %v12712_v17 = vpack.c.bf16 %v917_v9, %v917_v9  ;;  %v12713_v20 = vpack.c.bf16 %v918_v10, %v918_v10  ;;  %v14146_v40 = vunpack.i.l.bf16 %v14145_v52  ;;  %v14811_v5 = vld [vmem:[%s20845_s3 + $0x90] sm:$0xff]   ;;  %v11771_v1 = vld [vmem:[%s15728_s13 + $0x1e8] sm:$0xff] }
 0x162   : > { %v14809_v16 = vld [vmem:[#allocation2 + $0x39c] ss:$20 sps:$4 sm:$0xff]   ;;  %v11770_v0 = vld [vmem:[%s15728_s13 + $0x1e0] sm:$0xff]  ;;  %v14453_v47 = vpack.i.bf16 %v17753_v42, %v17745_v36  ;;  %v14463_v6 = vpack.i.bf16 %v17742_v21, %v17739_v44  ;;  %v2072_v38 = vsel %vm854_vm0, %v1495_v31, %v14151_v43  ;;  %v2073_v29 = vsel %vm854_vm0, %v1496_v63, %v14152_v39  ;;  %14439 = vrot.lane.b32.xlu1 %v14438_v2, %s15615_s15  ;;  %v14160_v4 = vpop.permute.xlu1 %14159 }
 0x163   : > { %8754 = vmatpush1.bf16.msra.mxu0 %v14804_v34  ;;  %v17783_v41 = vld [vmem:[%s15728_s13 + $0x392] sm:$0xff]  ;;  %v14147_v34 = vunpack.i.h.bf16 %v14145_v52  ;;  %v17791_v19 = vld [vmem:[%s15728_s13 + $0x39a] sm:$0xff]  ;;  %1397 = vst [vmem:[#allocation2 + $0x4d8] sm:$0xf] %v12712_v17  ;;  %1398 = vst [vmem:[#allocation2 + $0x4ec] sm:$0xf] %v12713_v20  ;;  %v12810_v26 = vpack.c.bf16 %v2072_v38, %v2072_v38  ;;  %v12811_v12 = vpack.c.bf16 %v2073_v29, %v2073_v29  ;;  %v14162_v49 = vunpack.i.h.bf16 %v14160_v4 }
 0x164   : > { %8755 = vmatprep.subr.bf16.mxu0 %v20922_v58  ;;  %v11482_v28 = vld [vmem:[%s15728_s13 + $0x1c9] sm:$0xff]  ;;  %v14468_v57 = vpack.i.bf16 %v17777_v53, %v17774_v3  ;;  %v919_v25 = vsel %vm854_vm0, %v342_v46, %v14146_v40  ;;  %v14161_v2 = vunpack.i.l.bf16 %v14160_v4  ;;  %v11483_v33 = vld [vmem:[%s15728_s13 + $0x1d1] sm:$0xff]  ;;  %v14155_v31 = vpop.permute.xlu0 %14154  ;;  %v14473_v51 = vpack.i.bf16 %v17791_v19, %v17783_v41  ;;  %v17826_v7 = vld [vmem:[%s15728_s13 + $0x3c1] sm:$0xff] }
 0x165   : > { %14434 = vrot.lane.b32.xlu0 %v14433_v23, %s15615_s15  ;;  %v920_v54 = vsel %vm854_vm0, %v343_v15, %v14147_v34  ;;  %v17812_v8 = vld [vmem:[%s15728_s13 + $0x3aa] sm:$0xff]  ;;  %v17815_v30 = vld [vmem:[%s15728_s13 + $0x3b2] sm:$0xff]  ;;  %2552 = vst [vmem:[#allocation2 + $0x504] sm:$0xf] %v12810_v26  ;;  %2553 = vst [vmem:[#allocation2 + $0x518] sm:$0xf] %v12811_v12  ;;  %v12714_v23 = vpack.c.bf16 %v919_v25, %v919_v25  ;;  %v14157_v11 = vunpack.i.h.bf16 %v14155_v31  ;;  %v14156_v50 = vunpack.i.l.bf16 %v14155_v31 }
 0x166   : > { %13468 = vmatmul.mubr.bf16.gmra.mxu0 %v14806_v22  ;;  %v12715_v62 = vpack.c.bf16 %v920_v54, %v920_v54  ;;  %v17818_v55 = vld [vmem:[%s15728_s13 + $0x3a9] sm:$0xff]  ;;  %v17821_v24 = vld [vmem:[%s15728_s13 + $0x3b1] sm:$0xff]  ;;  %v4537_v60 = vsel %vm854_vm0, %v11770_v0, %v14161_v2  ;;  %14449 = vrot.lane.b32.xlu1 %v14448_v37, %s15615_s15  ;;  %v14170_v39 = vpop.permute.xlu1 %14169  ;;  %v345_v15 = vld [vmem:[%s15728_s13 + $0x380] sm:$0xff] }
 0x167   : > { %8756 = vmatpush1.bf16.msra.mxu0 %v14808_v18  ;;  %13471 = vmatprep.mubr.bf16.mxu0 %v14812_v48  ;;  %v14813_v22 = vld [vmem:[#allocation2 + $0x128] ss:$20 sps:$4 sm:$0xff]   ;;  %v4538_v18 = vsel %vm854_vm0, %v11771_v1, %v14162_v49  ;;  %v14817_v9 = vld [vmem:[#allocation2 + $0x150] ss:$20 sps:$4 sm:$0xff]   ;;  %1399 = vst [vmem:[#allocation2 + $0x500] sm:$0xf] %v12714_v23  ;;  %v12970_v10 = vpack.c.bf16 %v4537_v60, %v4537_v60  ;;  %v14172_v13 = vunpack.i.h.bf16 %v14170_v39  ;;  %v14171_v59 = vunpack.i.l.bf16 %v14170_v39 }
 0x168   : > { %8539 = vmatmul.mubr.bf16.gmra.mxu1 %v14807_v61  ;;  %8757 = vmatprep.subr.bf16.mxu0 %v20922_v58  ;;  %v17832_v63 = vld [vmem:[%s15728_s13 + $0x3c9] sm:$0xff]  ;;  %1400 = vst [vmem:[#allocation2 + $0x514] sm:$0xf] %v12715_v62  ;;  %v12971_v48 = vpack.c.bf16 %v4538_v18, %v4538_v18  ;;  %v344_v43 = vld [vmem:[%s15728_s13 + $0x378] sm:$0xff]  ;;  %v14483_v61 = vpack.i.bf16 %v17815_v30, %v17812_v8  ;;  %v14165_v0 = vpop.permute.xlu0 %14164  ;;  %v14816_v4 = vld [vmem:[%s20845_s3 + $0x80] sm:$0xff]  }
 0x169   : > { %8546 = vmatprep.mubr.bf16.mxu1 %v14809_v16  ;;  %v14815_v46 = vld [vmem:[%s20845_s3 + $0x88] sm:$0xff]   ;;  %14444 = vrot.lane.b32.xlu0 %v14443_v27, %s15615_s15  ;;  %v14818_v17 = vld [vmem:[#allocation2 + $0x3c4] ss:$20 sps:$4 sm:$0xff]   ;;  %v3385_v20 = vsel %vm854_vm0, %v11483_v33, %v14157_v11  ;;  %v3384_v52 = vsel %vm854_vm0, %v11482_v28, %v14156_v50  ;;  %5017 = vst [vmem:[#allocation2 + $0x28c] sm:$0xf] %v12970_v10  ;;  %v14167_v26 = vunpack.i.h.bf16 %v14165_v0  ;;  %v14166_v12 = vunpack.i.l.bf16 %v14165_v0 }
 0x16a   : > { %v14814_v16 = vld [vmem:[#allocation2 + $0x398] ss:$20 sps:$4 sm:$0xff]   ;;  %v17852_v37 = vld [vmem:[%s15728_s13 + $0x3c2] sm:$0xff]  ;;  %5018 = vst [vmem:[#allocation2 + $0x2a0] sm:$0xf] %v12971_v48  ;;  %v12875_v56 = vpack.c.bf16 %v3385_v20, %v3385_v20  ;;  %v12874_v27 = vpack.c.bf16 %v3384_v52, %v3384_v52  ;;  %v14478_v38 = vpack.i.bf16 %v17821_v24, %v17818_v55  ;;  %v14488_v29 = vpack.i.bf16 %v17832_v63, %v17826_v7  ;;  %v14180_v2 = vpop.permute.xlu1 %14179 }
 0x16b   : > { %v17855_v45 = vld [vmem:[%s15728_s13 + $0x3ca] sm:$0xff]  ;;  %8758 = vmatpush1.bf16.msra.mxu0 %v14811_v5  ;;  %v17862_v34 = vld [vmem:[%s15728_s13 + $0x3da] sm:$0xff]  ;;  %v2074_v40 = vsel %vm854_vm0, %v17739_v44, %v14171_v59  ;;  %v2075_v5 = vsel %vm854_vm0, %v17742_v21, %v14172_v13  ;;  %v17870_v1 = vld [vmem:[%s15728_s13 + $0x3e2] sm:$0xff]  ;;  %14459 = vrot.lane.b32.xlu1 %v14458_v35, %s15615_s15  ;;  %v921_v23 = vsel %vm854_vm0, %v344_v43, %v14166_v12  ;;  %v14182_v14 = vunpack.i.h.bf16 %v14180_v2 }
 0x16c   : > { %8759 = vmatprep.subr.bf16.mxu0 %v20922_v58  ;;  %3865 = vst [vmem:[#allocation2 + $0x29c] sm:$0xf] %v12875_v56  ;;  %3864 = vst [vmem:[#allocation2 + $0x288] sm:$0xf] %v12874_v27  ;;  %v12812_v28 = vpack.c.bf16 %v2074_v40, %v2074_v40  ;;  %v12813_v25 = vpack.c.bf16 %v2075_v5, %v2075_v5  ;;  %v11772_v54 = vld [vmem:[%s15728_s13 + $0x1f8] sm:$0xff]  ;;  %v11773_v49 = vld [vmem:[%s15728_s13 + $0x200] sm:$0xff]  ;;  %v14493_v33 = vpack.i.bf16 %v17855_v45, %v17852_v37  ;;  %v14175_v60 = vpop.permute.xlu0 %14174 }
 0x16d   : > { %14454 = vrot.lane.b32.xlu0 %v14453_v47, %s15615_s15  ;;  %v922_v32 = vsel %vm854_vm0, %v345_v15, %v14167_v26  ;;  %v14181_v35 = vunpack.i.l.bf16 %v14180_v2  ;;  %v17890_v62 = vld [vmem:[%s15728_s13 + $0x3d9] sm:$0xff]  ;;  %v17893_v36 = vld [vmem:[%s15728_s13 + $0x3e1] sm:$0xff]  ;;  %v12716_v47 = vpack.c.bf16 %v921_v23, %v921_v23  ;;  %v11485_v18 = vld [vmem:[%s15728_s13 + $0x1e9] sm:$0xff]  ;;  %v14503_v50 = vpack.i.bf16 %v17870_v1, %v17862_v34 }
 0x16e   : > { %13472 = vmatmul.mubr.bf16.gmra.mxu0 %v14813_v22  ;;  %v14877_v42 = vld [vmem:[%s20845_s3 + $0x118] sm:$0xff]   ;;  %2554 = vst [vmem:[#allocation2 + $0x52c] sm:$0xf] %v12812_v28  ;;  %2555 = vst [vmem:[#allocation2 + $0x540] sm:$0xf] %v12813_v25  ;;  %v12717_v31 = vpack.c.bf16 %v922_v32, %v922_v32  ;;  %v11484_v22 = vld [vmem:[%s15728_s13 + $0x1e1] sm:$0xff]  ;;  %v14177_v48 = vunpack.i.h.bf16 %v14175_v60  ;;  %v14176_v10 = vunpack.i.l.bf16 %v14175_v60  ;;  %v14190_v52 = vpop.permute.xlu1 %14189  ;;  %v14498_v59 = vpack.i.bf16 %v17893_v36, %v17890_v62 }
 0x16f   : > { %8760 = vmatpush1.bf16.msra.mxu0 %v14815_v46  ;;  %13475 = vmatprep.mubr.bf16.mxu0 %v14817_v9  ;;  %v17901_v11 = vld [vmem:[%s15728_s13 + $0x3f2] sm:$0xff]  ;;  %v4540_v46 = vsel %vm854_vm0, %v11773_v49, %v14182_v14  ;;  %v4539_v9 = vsel %vm854_vm0, %v11772_v54, %v14181_v35  ;;  %v17909_v39 = vld [vmem:[%s15728_s13 + $0x3fa] sm:$0xff]  ;;  %1401 = vst [vmem:[#allocation2 + $0x528] sm:$0xf] %v12716_v47  ;;  %v14192_v40 = vunpack.i.h.bf16 %v14190_v52  ;;  %v14191_v5 = vunpack.i.l.bf16 %v14190_v52  ;;  %v17935_v12 = vld [vmem:[%s15728_s13 + $0x40a] sm:$0xff] }
 0x170   : > { %8547 = vmatmul.mubr.bf16.gmra.mxu1 %v14814_v16  ;;  %8761 = vmatprep.subr.bf16.mxu0 %v20922_v58  ;;  %v14821_v43 = vld [vmem:[#allocation2 + $0x178] ss:$20 sps:$4 sm:$0xff]   ;;  %v14825_v16 = vld [vmem:[#allocation2 + $0x1a0] ss:$20 sps:$4 sm:$0xff]   ;;  %1402 = vst [vmem:[#allocation2 + $0x53c] sm:$0xf] %v12717_v31  ;;  %v12973_v20 = vpack.c.bf16 %v4540_v46, %v4540_v46  ;;  %v3387_v27 = vsel %vm854_vm0, %v11485_v18, %v14177_v48  ;;  %v13259_v31 = vpop.f32.mrf.mxu1 }
 0x171   : > { %8554 = vmatprep.mubr.bf16.mxu1 %v14818_v17  ;;  %v14823_v15 = vld [vmem:[%s20845_s3 + $0xf8] sm:$0xff]   ;;  %v12972_v17 = vpack.c.bf16 %v4539_v9, %v4539_v9  ;;  %v346_v13 = vld [vmem:[%s15728_s13 + $0x390] sm:$0xff]  ;;  %14469 = vrot.lane.b32.xlu1 %v14468_v57, %s15615_s15  ;;  %v3386_v0 = vsel %vm854_vm0, %v11484_v22, %v14176_v10  ;;  %v14826_v44 = vld [vmem:[#allocation2 + $0x3ec] ss:$20 sps:$4 sm:$0xff]   ;;  %v12877_v21 = vpack.c.bf16 %v3387_v27, %v3387_v27 }
 0x172   : > { %14464 = vrot.lane.b32.xlu0 %v14463_v6, %s15615_s15  ;;  %v14822_v56 = vld [vmem:[#allocation2 + $0x3c0] ss:$20 sps:$4 sm:$0xff]   ;;  %13499 = vmatprep.subr.bf16.mxu1 %v14877_v42  ;;  %5020 = vst [vmem:[#allocation2 + $0x2c8] sm:$0xf] %v12973_v20  ;;  %v12876_v53 = vpack.c.bf16 %v3386_v0, %v3386_v0  ;;  %v14185_v6 = vpop.permute.xlu0 %14184  ;;  %v347_v57 = vld [vmem:[%s15728_s13 + $0x398] sm:$0xff]  ;;  %v14513_v28 = vpack.i.bf16 %v17909_v39, %v17901_v11  ;;  %v17967_v9 = vld [vmem:[%s15728_s13 + $0x409] sm:$0xff]  ;;  %v13260_v20 = vpop.f32.mrf.mxu1 }
 0x173   : > { %v17928_v26 = vld [vmem:[%s15728_s13 + $0x3f1] sm:$0xff]  ;;  %v17931_v3 = vld [vmem:[%s15728_s13 + $0x3f9] sm:$0xff]  ;;  %8762 = vmatpush1.bf16.msra.mxu0 %v14816_v4  ;;  %5019 = vst [vmem:[#allocation2 + $0x2b4] sm:$0xf] %v12972_v17  ;;  %13500 = vmatpush3.bf16.msra.mxu1 %v14877_v42  ;;  %v2076_v4 = vsel %vm854_vm0, %v17783_v41, %v14191_v5  ;;  %v2077_v25 = vsel %vm854_vm0, %v17791_v19, %v14192_v40  ;;  %v14187_v54 = vunpack.i.h.bf16 %v14185_v6  ;;  %v14186_v49 = vunpack.i.l.bf16 %v14185_v6  ;;  %v14200_v42 = vpop.permute.xlu1 %14199  ;;  %v17973_v10 = vld [vmem:[%s15728_s13 + $0x421] sm:$0xff] }
 0x174   : > { %8763 = vmatprep.subr.bf16.mxu0 %v20922_v58  ;;  %v17945_v2 = vld [vmem:[%s15728_s13 + $0x412] sm:$0xff]  ;;  %3867 = vst [vmem:[#allocation2 + $0x2c4] sm:$0xf] %v12877_v21  ;;  %3866 = vst [vmem:[#allocation2 + $0x2b0] sm:$0xf] %v12876_v53  ;;  %v12814_v23 = vpack.c.bf16 %v2076_v4, %v2076_v4  ;;  %v12815_v32 = vpack.c.bf16 %v2077_v25, %v2077_v25  ;;  %v14508_v47 = vpack.i.bf16 %v17931_v3, %v17928_v26  ;;  %v14830_v0 = vld [vmem:[%s20845_s3 + $0xe8] sm:$0xff]   ;;  %v13262_v21 = vpop.f32.mrf.mxu1 }
 0x175   : > { %v11774_v14 = vld [vmem:[%s15728_s13 + $0x210] sm:$0xff]  ;;  %v11775_v35 = vld [vmem:[%s15728_s13 + $0x218] sm:$0xff]  ;;  %14479 = vrot.lane.b32.xlu1 %v14478_v38, %s15615_s15  ;;  %v923_v55 = vsel %vm854_vm0, %v346_v13, %v14186_v49  ;;  %v924_v24 = vsel %vm854_vm0, %v347_v57, %v14187_v54  ;;  %v14202_v38 = vunpack.i.h.bf16 %v14200_v42  ;;  %v14201_v41 = vunpack.i.l.bf16 %v14200_v42  ;;  %v348_v49 = vld [vmem:[%s15728_s13 + $0x3a8] sm:$0xff] }
 0x176   : > { %14474 = vrot.lane.b32.xlu0 %v14473_v51, %s15615_s15  ;;  %13476 = vmatmul.mubr.bf16.gmra.mxu0 %v14821_v43  ;;  %v14824_v22 = vld [vmem:[%s20845_s3 + $0xf0] sm:$0xff]   ;;  %v11486_v19 = vld [vmem:[%s15728_s13 + $0x1f9] sm:$0xff]  ;;  %v11487_v51 = vld [vmem:[%s15728_s13 + $0x201] sm:$0xff]  ;;  %2556 = vst [vmem:[#allocation2 + $0x554] sm:$0xf] %v12814_v23  ;;  %v12718_v18 = vpack.c.bf16 %v923_v55, %v923_v55  ;;  %v12719_v60 = vpack.c.bf16 %v924_v24, %v924_v24  ;;  %v14195_v46 = vpop.permute.xlu0 %14194  ;;  %v13263_v42 = vpop.f32.mrf.mxu1 }
 0x177   : > { %8764 = vmatpush2.bf16.msra.mxu0 %v14823_v15  ;;  %13479 = vmatprep.mubr.bf16.mxu0 %v14825_v16  ;;  %2557 = vst [vmem:[#allocation2 + $0x568] sm:$0xf] %v12815_v32  ;;  %v17970_v48 = vld [vmem:[%s15728_s13 + $0x411] sm:$0xff]  ;;  %v14523_v43 = vpack.i.bf16 %v17945_v2, %v17935_v12  ;;  %v4542_v15 = vsel %vm854_vm0, %v11775_v35, %v14202_v38  ;;  %v14197_v17 = vunpack.i.h.bf16 %v14195_v46  ;;  %v14196_v52 = vunpack.i.l.bf16 %v14195_v46  ;;  %v17981_v13 = vld [vmem:[%s15728_s13 + $0x429] sm:$0xff]  ;;  %v18005_v35 = vld [vmem:[%s15728_s13 + $0x439] sm:$0xff] }
 0x178   : > { %8555 = vmatmul.mubr.bf16.gmra.mxu1 %v14822_v56  ;;  %8765 = vmatprep.subr.bf16.mxu0 %v20922_v58  ;;  %v4541_v16 = vsel %vm854_vm0, %v11774_v14, %v14201_v41  ;;  %v17983_v56 = vadd.f32 %v13260_v20, %v13259_v31  ;;  %v14828_v27 = vld [vmem:[#allocation2 + $0x1c8] ss:$20 sps:$4 sm:$0xff]   ;;  %1403 = vst [vmem:[#allocation2 + $0x550] sm:$0xf] %v12718_v18  ;;  %1404 = vst [vmem:[#allocation2 + $0x564] sm:$0xf] %v12719_v60 }
 0x179   : > { %8562 = vmatprep.mubr.bf16.mxu1 %v14826_v44  ;;  %v12975_v40 = vpack.c.bf16 %v4542_v15, %v4542_v15  ;;  %v12974_v5 = vpack.c.bf16 %v4541_v16, %v4541_v16  ;;  %v14210_v44 = vpop.permute.xlu1 %14209  ;;  %14489 = vrot.lane.b32.xlu1 %v14488_v29, %s15615_s15  ;;  %v14829_v53 = vld [vmem:[#allocation2 + $0x3e8] ss:$20 sps:$4 sm:$0xff]   ;;  %v14832_v6 = vld [vmem:[#allocation2 + $0x1f0] ss:$20 sps:$4 sm:$0xff]   ;;  %v3389_v57 = vsel %vm854_vm0, %v11487_v51, %v14197_v17 }
 0x17a   : > { %14484 = vrot.lane.b32.xlu0 %v14483_v61, %s15615_s15  ;;  %v3388_v4 = vsel %vm854_vm0, %v11486_v19, %v14196_v52  ;;  %v14212_v25 = vunpack.i.h.bf16 %v14210_v44  ;;  %v14211_v54 = vunpack.i.l.bf16 %v14210_v44  ;;  %v14833_v7 = vld [vmem:[#allocation2 + $0x414] ss:$20 sps:$4 sm:$0xff]   ;;  %v12879_v63 = vpack.c.bf16 %v3389_v57, %v3389_v57  ;;  %v14205_v61 = vpop.permute.xlu0 %14204  ;;  %v11489_v17 = vld [vmem:[%s15728_s13 + $0x219] sm:$0xff] }
 0x17b   : > { %8766 = vmatpush2.bf16.msra.mxu0 %v14824_v22  ;;  %5022 = vst [vmem:[#allocation2 + $0x2f0] sm:$0xf] %v12975_v40  ;;  %5021 = vst [vmem:[#allocation2 + $0x2dc] sm:$0xf] %v12974_v5  ;;  %v12878_v29 = vpack.c.bf16 %v3388_v4, %v3388_v4  ;;  %v349_v23 = vld [vmem:[%s15728_s13 + $0x3b0] sm:$0xff]  ;;  %v14518_v32 = vpack.i.bf16 %v17970_v48, %v17967_v9  ;;  %v14528_v14 = vpack.i.bf16 %v17981_v13, %v17973_v10  ;;  %v18013_v38 = vld [vmem:[%s15728_s13 + $0x441] sm:$0xff] }
 0x17c   : > { %8767 = vmatprep.subr.bf16.mxu0 %v20922_v58  ;;  %v2078_v31 = vsel %vm854_vm0, %v17812_v8, %v14211_v54  ;;  %v2079_v22 = vsel %vm854_vm0, %v17815_v30, %v14212_v25  ;;  %v14207_v55 = vunpack.i.h.bf16 %v14205_v61  ;;  %v14206_v24 = vunpack.i.l.bf16 %v14205_v61  ;;  %3869 = vst [vmem:[#allocation2 + $0x2ec] sm:$0xf] %v12879_v63  ;;  %v11776_v18 = vld [vmem:[%s15728_s13 + $0x228] sm:$0xff]  ;;  %v11777_v60 = vld [vmem:[%s15728_s13 + $0x230] sm:$0xff]  ;;  %v13265_v8 = vpop.f32.mrf.mxu1  ;;  %v14831_v30 = vld [vmem:[%s20845_s3 + $0xe0] sm:$0xff]  }
 0x17d   : > { %v18015_v41 = vadd.f32 %v13263_v42, %v13262_v21  ;;  %3868 = vst [vmem:[#allocation2 + $0x2d8] sm:$0xf] %v12878_v29  ;;  %v12816_v19 = vpack.c.bf16 %v2078_v31, %v2078_v31  ;;  %v12817_v51 = vpack.c.bf16 %v2079_v22, %v2079_v22  ;;  %v14220_v46 = vpop.permute.xlu1 %14219  ;;  %14499 = vrot.lane.b32.xlu1 %v14498_v59, %s15615_s15  ;;  %v11488_v16 = vld [vmem:[%s15728_s13 + $0x211] sm:$0xff]  ;;  %v14851_v10 = vld [vmem:[#allocation2 + $0x28c] ss:$20 sps:$4 sm:$0xff]  }
 0x17e   : > { %14494 = vrot.lane.b32.xlu0 %v14493_v33, %s15615_s15  ;;  %13480 = vmatmul.mubr.bf16.gmra.mxu0 %v14828_v27  ;;  %v925_v20 = vsel %vm854_vm0, %v348_v49, %v14206_v24  ;;  %v926_v62 = vsel %vm854_vm0, %v349_v23, %v14207_v55  ;;  %v14222_v36 = vunpack.i.h.bf16 %v14220_v46  ;;  %v14221_v59 = vunpack.i.l.bf16 %v14220_v46  ;;  %v14215_v52 = vpop.permute.xlu0 %14214  ;;  %v18035_v27 = vld [vmem:[%s15728_s13 + $0x422] sm:$0xff]  ;;  %v13266_v5 = vpop.f32.mrf.mxu1  ;;  %v14835_v44 = vld [vmem:[#allocation2 + $0x218] ss:$20 sps:$4 sm:$0xff]   ;;  %v14902_v29 = vld [vmem:[%s20845_s3 + $0x110] sm:$0xff]  }
 0x17f   : > { %8768 = vmatpush2.bf16.msra.mxu0 %v14830_v0  ;;  %13483 = vmatprep.mubr.bf16.mxu0 %v14832_v6  ;;  %2558 = vst [vmem:[#allocation2 + $0x57c] sm:$0xf] %v12816_v19  ;;  %2559 = vst [vmem:[#allocation2 + $0x590] sm:$0xf] %v12817_v51  ;;  %v12720_v33 = vpack.c.bf16 %v925_v20, %v925_v20  ;;  %v12721_v15 = vpack.c.bf16 %v926_v62, %v926_v62  ;;  %v14216_v6 = vunpack.i.l.bf16 %v14215_v52  ;;  %v18043_v57 = vld [vmem:[%s15728_s13 + $0x42a] sm:$0xff]  ;;  %v14837_v25 = vld [vmem:[%s20845_s3 + $0xd8] sm:$0xff]  }
 0x180   : > { %8563 = vmatmul.mubr.bf16.gmra.mxu1 %v14829_v53  ;;  %v14538_v40 = vpack.i.bf16 %v18013_v38, %v18005_v35  ;;  %8769 = vmatprep.subr.bf16.mxu0 %v20922_v58  ;;  %v4544_v0 = vsel %vm854_vm0, %v11777_v60, %v14222_v36  ;;  %v4543_v21 = vsel %vm854_vm0, %v11776_v18, %v14221_v59  ;;  %v14217_v53 = vunpack.i.h.bf16 %v14215_v52  ;;  %v14839_v54 = vld [vmem:[#allocation2 + $0x240] ss:$20 sps:$4 sm:$0xff]   ;;  %v13268_v61 = vpop.f32.mrf.mxu1  ;;  %v14836_v23 = vld [vmem:[#allocation2 + $0x410] ss:$20 sps:$4 sm:$0xff]   ;;  %v351_v19 = vld [vmem:[%s15728_s13 + $0x3c8] sm:$0xff] }
 0x181   : > { %8570 = vmatprep.mubr.bf16.mxu1 %v14833_v7  ;;  %v18045_v4 = vadd.f32 %v13266_v5, %v13265_v8  ;;  %1405 = vst [vmem:[#allocation2 + $0x578] sm:$0xf] %v12720_v33  ;;  %1406 = vst [vmem:[#allocation2 + $0x58c] sm:$0xf] %v12721_v15  ;;  %v12977_v49 = vpack.c.bf16 %v4544_v0, %v4544_v0  ;;  %v12976_v7 = vpack.c.bf16 %v4543_v21, %v4543_v21  ;;  %v14230_v63 = vpop.permute.xlu1 %14229  ;;  %v14840_v42 = vld [vmem:[#allocation2 + $0x43c] ss:$20 sps:$4 sm:$0xff]  }
 0x182   : > { %14509 = vrot.lane.b32.xlu1 %v14508_v47, %s15615_s15  ;;  %14504 = vrot.lane.b32.xlu0 %v14503_v50, %s15615_s15  ;;  %v3391_v31 = vsel %vm854_vm0, %v11489_v17, %v14217_v53  ;;  %v3390_v26 = vsel %vm854_vm0, %v11488_v16, %v14216_v6  ;;  %v14232_v3 = vunpack.i.h.bf16 %v14230_v63  ;;  %v14231_v47 = vunpack.i.l.bf16 %v14230_v63  ;;  %v14225_v55 = vpop.permute.xlu0 %14224  ;;  %v350_v24 = vld [vmem:[%s15728_s13 + $0x3c0] sm:$0xff]  ;;  %v18068_v18 = vld [vmem:[%s15728_s13 + $0x451] sm:$0xff]  ;;  %v13269_v60 = vpop.f32.mrf.mxu1 }
 0x183   : > { %8770 = vmatpush2.bf16.msra.mxu0 %v14831_v30  ;;  %5024 = vst [vmem:[#allocation2 + $0x318] sm:$0xf] %v12977_v49  ;;  %5023 = vst [vmem:[#allocation2 + $0x304] sm:$0xf] %v12976_v7  ;;  %v12881_v50 = vpack.c.bf16 %v3391_v31, %v3391_v31  ;;  %v12880_v22 = vpack.c.bf16 %v3390_v26, %v3390_v26  ;;  %v14533_v51 = vpack.i.bf16 %v18043_v57, %v18035_v27  ;;  %v18076_v62 = vld [vmem:[%s15728_s13 + $0x459] sm:$0xff]  ;;  %v11779_v16 = vld [vmem:[%s15728_s13 + $0x248] sm:$0xff] }
 0x184   : > { %13501 = vmatprep.subr.bf16.mxu1 %v14902_v29  ;;  %8771 = vmatprep.subr.bf16.mxu0 %v20922_v58  ;;  %v2080_v46 = vsel %vm854_vm0, %v17852_v37, %v14231_v47  ;;  %v2081_v8 = vsel %vm854_vm0, %v17855_v45, %v14232_v3  ;;  %v14227_v30 = vunpack.i.h.bf16 %v14225_v55  ;;  %v14226_v20 = vunpack.i.l.bf16 %v14225_v55  ;;  %v11778_v15 = vld [vmem:[%s15728_s13 + $0x240] sm:$0xff]  ;;  %v13271_v37 = vpop.f32.mrf.mxu1  ;;  %v14838_v45 = vld [vmem:[%s20845_s3 + $0xd0] sm:$0xff]   ;;  %v14842_v26 = vld [vmem:[#allocation2 + $0x268] ss:$20 sps:$4 sm:$0xff]  }
 0x185   : > { %13502 = vmatpush3.bf16.msra.mxu1 %v14902_v29  ;;  %v18078_v36 = vadd.f32 %v13269_v60, %v13268_v61  ;;  %3871 = vst [vmem:[#allocation2 + $0x314] sm:$0xf] %v12881_v50  ;;  %3870 = vst [vmem:[#allocation2 + $0x300] sm:$0xf] %v12880_v22  ;;  %v12818_v59 = vpack.c.bf16 %v2080_v46, %v2080_v46  ;;  %v12819_v33 = vpack.c.bf16 %v2081_v8, %v2081_v8  ;;  %v14240_v17 = vpop.permute.xlu1 %14239  ;;  %v11490_v5 = vld [vmem:[%s15728_s13 + $0x229] sm:$0xff]  ;;  %v11491_v0 = vld [vmem:[%s15728_s13 + $0x231] sm:$0xff] }
 0x186   : > { %14519 = vrot.lane.b32.xlu1 %v14518_v32, %s15615_s15  ;;  %14514 = vrot.lane.b32.xlu0 %v14513_v28, %s15615_s15  ;;  %v927_v52 = vsel %vm854_vm0, %v350_v24, %v14226_v20  ;;  %v928_v9 = vsel %vm854_vm0, %v351_v19, %v14227_v30  ;;  %v14242_v48 = vunpack.i.h.bf16 %v14240_v17  ;;  %v14241_v32 = vunpack.i.l.bf16 %v14240_v17  ;;  %v14235_v21 = vpop.permute.xlu0 %14234  ;;  %v18098_v53 = vld [vmem:[%s15728_s13 + $0x43a] sm:$0xff]  ;;  %v18101_v6 = vld [vmem:[%s15728_s13 + $0x442] sm:$0xff]  ;;  %v13272_v63 = vpop.f32.mrf.mxu1 }
 0x187   : > { %13484 = vmatmul.mubr.bf16.gmra.mxu0 %v14835_v44  ;;  %2560 = vst [vmem:[#allocation2 + $0x5a4] sm:$0xf] %v12818_v59  ;;  %2561 = vst [vmem:[#allocation2 + $0x5b8] sm:$0xf] %v12819_v33  ;;  %v12722_v28 = vpack.c.bf16 %v927_v52, %v927_v52  ;;  %v12723_v44 = vpack.c.bf16 %v928_v9, %v928_v9  ;;  %v14548_v49 = vpack.i.bf16 %v18076_v62, %v18068_v18  ;;  %v18106_v7 = vld [vmem:[%s15728_s13 + $0x469] sm:$0xff]  ;;  %v352_v30 = vld [vmem:[%s15728_s13 + $0x3d8] sm:$0xff] }
 0x188   : > { %8571 = vmatmul.mubr.bf16.gmra.mxu1 %v14836_v23  ;;  %8772 = vmatpush2.bf16.msra.mxu0 %v14837_v25  ;;  %v4546_v25 = vsel %vm854_vm0, %v11779_v16, %v14242_v48  ;;  %v14237_v29 = vunpack.i.h.bf16 %v14235_v21  ;;  %v14236_v61 = vunpack.i.l.bf16 %v14235_v21  ;;  %v18112_v23 = vld [vmem:[%s15728_s13 + $0x471] sm:$0xff]  ;;  %v18114_v31 = vadd.f32 %v13272_v63, %v13271_v37  ;;  %v14844_v3 = vld [vmem:[%s20845_s3 + $0xc8] sm:$0xff]   ;;  %v13274_v22 = vpop.f32.mrf.mxu1  ;;  %v353_v20 = vld [vmem:[%s15728_s13 + $0x3e0] sm:$0xff] }
 0x189   : > { %13487 = vmatprep.mubr.bf16.mxu0 %v14839_v54  ;;  %8773 = vmatprep.subr.bf16.mxu0 %v20922_v58  ;;  %v4545_v54 = vsel %vm854_vm0, %v11778_v15, %v14241_v32  ;;  %1407 = vst [vmem:[#allocation2 + $0x5a0] sm:$0xf] %v12722_v28  ;;  %1408 = vst [vmem:[#allocation2 + $0x5b4] sm:$0xf] %v12723_v44  ;;  %v12979_v47 = vpack.c.bf16 %v4546_v25, %v4546_v25  ;;  %v14250_v50 = vpop.permute.xlu1 %14249  ;;  %v14843_v55 = vld [vmem:[#allocation2 + $0x438] ss:$20 sps:$4 sm:$0xff]  }
 0x18a   : > { %8578 = vmatprep.mubr.bf16.mxu1 %v14840_v42  ;;  %v12978_v42 = vpack.c.bf16 %v4545_v54, %v4545_v54  ;;  %14529 = vrot.lane.b32.xlu1 %v14528_v14, %s15615_s15  ;;  %v14848_v24 = vld [vmem:[#allocation2 + $0x464] ss:$20 sps:$4 sm:$0xff]   ;;  %v3393_v19 = vsel %vm854_vm0, %v11491_v0, %v14237_v29  ;;  %v3392_v60 = vsel %vm854_vm0, %v11490_v5, %v14236_v61  ;;  %v14252_v46 = vunpack.i.h.bf16 %v14250_v50  ;;  %v13275_v16 = vpop.f32.mrf.mxu1  ;;  %v11493_v25 = vld [vmem:[%s15728_s13 + $0x249] sm:$0xff] }
 0x18b   : > { %14524 = vrot.lane.b32.xlu0 %v14523_v43, %s15615_s15  ;;  %v14251_v8 = vunpack.i.l.bf16 %v14250_v50  ;;  %5026 = vst [vmem:[#allocation2 + $0x340] sm:$0xf] %v12979_v47  ;;  %v12883_v13 = vpack.c.bf16 %v3393_v19, %v3393_v19  ;;  %v12882_v14 = vpack.c.bf16 %v3392_v60, %v3392_v60  ;;  %v14245_v43 = vpop.permute.xlu0 %14244  ;;  %v18132_v59 = vld [vmem:[%s15728_s13 + $0x452] sm:$0xff]  ;;  %v14543_v33 = vpack.i.bf16 %v18101_v6, %v18098_v53  ;;  %v18144_v9 = vld [vmem:[%s15728_s13 + $0x45a] sm:$0xff]  ;;  %v18166_v61 = vld [vmem:[%s15728_s13 + $0x46a] sm:$0xff] }
 0x18c   : > { %8774 = vmatpush2.bf16.msra.mxu0 %v14838_v45  ;;  %5025 = vst [vmem:[#allocation2 + $0x32c] sm:$0xf] %v12978_v42  ;;  %v14558_v15 = vpack.i.bf16 %v18112_v23, %v18106_v7  ;;  %v2083_v37 = vsel %vm854_vm0, %v17870_v1, %v14252_v46  ;;  %v14247_v45 = vunpack.i.h.bf16 %v14245_v43  ;;  %v14246_v52 = vunpack.i.l.bf16 %v14245_v43  ;;  %v11780_v0 = vld [vmem:[%s15728_s13 + $0x258] sm:$0xff]  ;;  %v11781_v28 = vld [vmem:[%s15728_s13 + $0x260] sm:$0xff]  ;;  %v18180_v19 = vld [vmem:[%s15728_s13 + $0x489] sm:$0xff] }
 0x18d   : > { %8775 = vmatprep.subr.bf16.mxu0 %v20922_v58  ;;  %v2082_v17 = vsel %vm854_vm0, %v17862_v34, %v14251_v8  ;;  %v18146_v48 = vadd.f32 %v13275_v16, %v13274_v22  ;;  %3873 = vst [vmem:[#allocation2 + $0x33c] sm:$0xf] %v12883_v13  ;;  %3872 = vst [vmem:[#allocation2 + $0x328] sm:$0xf] %v12882_v14  ;;  %v12821_v5 = vpack.c.bf16 %v2083_v37, %v2083_v37  ;;  %v14260_v44 = vpop.permute.xlu1 %14259  ;;  %v13277_v34 = vpop.f32.mrf.mxu1  ;;  %v14845_v1 = vld [vmem:[%s20845_s3 + $0xc0] sm:$0xff]   ;;  %v354_v37 = vld [vmem:[%s15728_s13 + $0x3f0] sm:$0xff] }
 0x18e   : > { %v12820_v32 = vpack.c.bf16 %v2082_v17, %v2082_v17  ;;  %14539 = vrot.lane.b32.xlu1 %v14538_v40, %s15615_s15  ;;  %v929_v21 = vsel %vm854_vm0, %v352_v30, %v14246_v52  ;;  %v930_v35 = vsel %vm854_vm0, %v353_v20, %v14247_v45  ;;  %v14262_v38 = vunpack.i.h.bf16 %v14260_v44  ;;  %v11492_v63 = vld [vmem:[%s15728_s13 + $0x241] sm:$0xff]  ;;  %v355_v45 = vld [vmem:[%s15728_s13 + $0x3f8] sm:$0xff] }
 0x18f   : > { %14534 = vrot.lane.b32.xlu0 %v14533_v51, %s15615_s15  ;;  %13488 = vmatmul.mubr.bf16.gmra.mxu0 %v14842_v26  ;;  %v14261_v40 = vunpack.i.l.bf16 %v14260_v44  ;;  %2563 = vst [vmem:[#allocation2 + $0x5e0] sm:$0xf] %v12821_v5  ;;  %v12724_v51 = vpack.c.bf16 %v929_v21, %v929_v21  ;;  %v12725_v54 = vpack.c.bf16 %v930_v35, %v930_v35  ;;  %v14255_v29 = vpop.permute.xlu0 %14254  ;;  %v18169_v26 = vld [vmem:[%s15728_s13 + $0x472] sm:$0xff]  ;;  %v18174_v42 = vld [vmem:[%s15728_s13 + $0x481] sm:$0xff]  ;;  %v13278_v50 = vpop.f32.mrf.mxu1 }
 0x190   : > { %8579 = vmatmul.mubr.bf16.gmra.mxu1 %v14843_v55  ;;  %8776 = vmatpush2.bf16.msra.mxu0 %v14844_v3  ;;  %2562 = vst [vmem:[#allocation2 + $0x5cc] sm:$0xf] %v12820_v32  ;;  %v14553_v47 = vpack.i.bf16 %v18144_v9, %v18132_v59  ;;  %v4548_v3 = vsel %vm854_vm0, %v11781_v28, %v14262_v38  ;;  %v14257_v55 = vunpack.i.h.bf16 %v14255_v29  ;;  %v14846_v46 = vld [vmem:[#allocation2 + $0x460] ss:$20 sps:$4 sm:$0xff]   ;;  %v14849_v14 = vld [vmem:[#allocation2 + $0x288] ss:$20 sps:$4 sm:$0xff]  }
 0x191   : > { %8586 = vmatprep.mubr.bf16.mxu1 %v14848_v24  ;;  %8777 = vmatprep.subr.bf16.mxu0 %v20922_v58  ;;  %v4547_v22 = vsel %vm854_vm0, %v11780_v0, %v14261_v40  ;;  %v14256_v24 = vunpack.i.l.bf16 %v14255_v29  ;;  %v18182_v60 = vadd.f32 %v13278_v50, %v13277_v34  ;;  %v14855_v8 = vld [vmem:[#allocation2 + $0x48c] ss:$20 sps:$4 sm:$0xff]   ;;  %1409 = vst [vmem:[#allocation2 + $0x5c8] sm:$0xf] %v12724_v51  ;;  %1410 = vst [vmem:[#allocation2 + $0x5dc] sm:$0xf] %v12725_v54  ;;  %v14270_v58 = vpop.permute.xlu1 %14269 }
 0x192   : > { %8779 = vmatprep.mubr.bf16.mxu0 %v14851_v10  ;;  %v12981_v30 = vpack.c.bf16 %v4548_v3, %v4548_v3  ;;  %v12980_v13 = vpack.c.bf16 %v4547_v22, %v4547_v22  ;;  %14549 = vrot.lane.b32.xlu1 %v14548_v49, %s15615_s15  ;;  %v13280_v10 = vpop.f32.mrf.mxu1  ;;  %v3395_v43 = vsel %vm854_vm0, %v11493_v25, %v14257_v55  ;;  %v14272_v16 = vunpack.i.h.bf16 %v14270_v58  ;;  %v14856_v52 = vld [vmem:[#allocation2 + $0x2b4] ss:$20 sps:$4 sm:$0xff]   ;;  %v11783_v32 = vld [vmem:[%s15728_s13 + $0x278] sm:$0xff] }
 0x193   : > { %14544 = vrot.lane.b32.xlu0 %v14543_v33, %s15615_s15  ;;  %v3394_v20 = vsel %vm854_vm0, %v11492_v63, %v14256_v24  ;;  %v14271_v17 = vunpack.i.l.bf16 %v14270_v58  ;;  %v12885_v18 = vpack.c.bf16 %v3395_v43, %v3395_v43  ;;  %v14265_v49 = vpop.permute.xlu0 %14264  ;;  %v11782_v33 = vld [vmem:[%s15728_s13 + $0x270] sm:$0xff]  ;;  %v14568_v5 = vpack.i.bf16 %v18180_v19, %v18174_v42  ;;  %v18200_v28 = vld [vmem:[%s15728_s13 + $0x499] sm:$0xff]  ;;  %v18207_v38 = vld [vmem:[%s15728_s13 + $0x4a1] sm:$0xff] }
 0x194   : > { %8778 = vmatpush2.bf16.msra.mxu0 %v14845_v1  ;;  %5028 = vst [vmem:[#allocation2 + $0x368] sm:$0xf] %v12981_v30  ;;  %5027 = vst [vmem:[#allocation2 + $0x354] sm:$0xf] %v12980_v13  ;;  %v12884_v62 = vpack.c.bf16 %v3394_v20, %v3394_v20  ;;  %v14563_v0 = vpack.i.bf16 %v18169_v26, %v18166_v61  ;;  %v13281_v44 = vpop.f32.mrf.mxu1  ;;  %v2085_v1 = vsel %vm854_vm0, %v17909_v39, %v14272_v16  ;;  %v11494_v54 = vld [vmem:[%s15728_s13 + $0x259] sm:$0xff]  ;;  %v11495_v29 = vld [vmem:[%s15728_s13 + $0x261] sm:$0xff] }
 0x195   : > { %v2084_v34 = vsel %vm854_vm0, %v17901_v11, %v14271_v17  ;;  %v14267_v21 = vunpack.i.h.bf16 %v14265_v49  ;;  %v14266_v35 = vunpack.i.l.bf16 %v14265_v49  ;;  %v18209_v40 = vadd.f32 %v13281_v44, %v13280_v10  ;;  %3875 = vst [vmem:[#allocation2 + $0x364] sm:$0xf] %v12885_v18  ;;  %v14280_v51 = vpop.permute.xlu1 %14279  ;;  %v13147_v11 = vpop.f32.mrf.mxu0  ;;  %v18221_v55 = vld [vmem:[%s15728_s13 + $0x482] sm:$0xff]  ;;  %v18229_v19 = vld [vmem:[%s15728_s13 + $0x4b1] sm:$0xff]  ;;  %v18237_v43 = vld [vmem:[%s15728_s13 + $0x4b9] sm:$0xff] }
 0x196   : > { %3874 = vst [vmem:[#allocation2 + $0x350] sm:$0xf] %v12884_v62  ;;  %v12822_v63 = vpack.c.bf16 %v2084_v34, %v2084_v34  ;;  %v12823_v25 = vpack.c.bf16 %v2085_v1, %v2085_v1  ;;  %14559 = vrot.lane.b32.xlu1 %v14558_v15, %s15615_s15  ;;  %v13283_v39 = vpop.f32.mrf.mxu1  ;;  %v14282_v3 = vunpack.i.h.bf16 %v14280_v51  ;;  %v14281_v22 = vunpack.i.l.bf16 %v14280_v51  ;;  %v14853_v17 = vld [vmem:[#allocation2 + $0x488] ss:$20 sps:$4 sm:$0xff]   ;;  %v14858_v49 = vld [vmem:[#allocation2 + $0x2b0] ss:$20 sps:$4 sm:$0xff]  }
 0x197   : > { %14554 = vrot.lane.b32.xlu0 %v14553_v47, %s15615_s15  ;;  %8780 = vmatmul.mubr.bf16.vlgmr.msra.gmra.mxu0 %v14849_v14  ;;  %v931_v42 = vsel %vm854_vm0, %v354_v37, %v14266_v35  ;;  %v932_v50 = vsel %vm854_vm0, %v355_v45, %v14267_v21  ;;  %v14275_v15 = vpop.permute.xlu0 %14274  ;;  %v18224_v47 = vld [vmem:[%s15728_s13 + $0x48a] sm:$0xff]  ;;  %v14578_v24 = vpack.i.bf16 %v18207_v38, %v18200_v28  ;;  %v13148_v30 = vpop.f32.mrf.mxu0 }
 0x198   : > { %8587 = vmatmul.mubr.bf16.gmra.mxu1 %v14846_v46  ;;  %8787 = vmatprep.mubr.bf16.mxu0 %v14856_v52  ;;  %2564 = vst [vmem:[#allocation2 + $0x5f4] sm:$0xf] %v12822_v63  ;;  %2565 = vst [vmem:[#allocation2 + $0x608] sm:$0xf] %v12823_v25  ;;  %v12726_v7 = vpack.c.bf16 %v931_v42, %v931_v42  ;;  %v12727_v23 = vpack.c.bf16 %v932_v50, %v932_v50  ;;  %v14927_v46 = vld [vmem:[%s20845_s3 + $0x108] sm:$0xff]   ;;  %v14277_v10 = vunpack.i.h.bf16 %v14275_v15  ;;  %v357_v63 = vld [vmem:[%s15728_s13 + $0x410] sm:$0xff] }
 0x199   : > { %8594 = vmatprep.mubr.bf16.mxu1 %v14855_v8  ;;  %v13284_v8 = vpop.f32.mrf.mxu1  ;;  %v4550_v13 = vsel %vm854_vm0, %v11783_v32, %v14282_v3  ;;  %v4549_v58 = vsel %vm854_vm0, %v11782_v33, %v14281_v22  ;;  %v14276_v14 = vunpack.i.l.bf16 %v14275_v15  ;;  %v18239_v20 = vadd.f32 %v13148_v30, %v13147_v11  ;;  %v14290_v52 = vpop.permute.xlu1 %14289  ;;  %v14861_v33 = vld [vmem:[#allocation2 + $0x4b4] ss:$20 sps:$4 sm:$0xff]   ;;  %13503 = vmatprep.subr.bf16.mxu1 %v14927_v46  ;;  %v14862_v21 = vld [vmem:[#allocation2 + $0x2dc] ss:$20 sps:$4 sm:$0xff]  }
 0x19a   : > { %v18241_v16 = vadd.f32 %v13284_v8, %v13283_v39  ;;  %1411 = vst [vmem:[#allocation2 + $0x5f0] sm:$0xf] %v12726_v7  ;;  %1412 = vst [vmem:[#allocation2 + $0x604] sm:$0xf] %v12727_v23  ;;  %v12983_v37 = vpack.c.bf16 %v4550_v13, %v4550_v13  ;;  %v12982_v45 = vpack.c.bf16 %v4549_v58, %v4549_v58  ;;  %14569 = vrot.lane.b32.xlu1 %v14568_v5, %s15615_s15  ;;  %v13150_v18 = vpop.f32.mrf.mxu0  ;;  %v356_v1 = vld [vmem:[%s15728_s13 + $0x408] sm:$0xff]  ;;  %v18250_v25 = vld [vmem:[%s15728_s13 + $0x49a] sm:$0xff] }
 0x19b   : > { %v13286_v62 = vpop.f32.mrf.mxu1  ;;  %v3397_v32 = vsel %vm854_vm0, %v11495_v29, %v14277_v10  ;;  %v3396_v28 = vsel %vm854_vm0, %v11494_v54, %v14276_v14  ;;  %v14292_v44 = vunpack.i.h.bf16 %v14290_v52  ;;  %v14291_v34 = vunpack.i.l.bf16 %v14290_v52  ;;  %14564 = vrot.lane.b32.xlu0 %v14563_v0, %s15615_s15  ;;  %v14285_v38 = vpop.permute.xlu0 %14284  ;;  %13504 = vmatpush3.bf16.msra.mxu1 %v14927_v46  ;;  %v18261_v3 = vld [vmem:[%s15728_s13 + $0x4a2] sm:$0xff]  ;;  %v11785_v46 = vld [vmem:[%s15728_s13 + $0x290] sm:$0xff] }
 0x19c   : > { %5030 = vst [vmem:[#allocation2 + $0x390] sm:$0xf] %v12983_v37  ;;  %5029 = vst [vmem:[#allocation2 + $0x37c] sm:$0xf] %v12982_v45  ;;  %v12887_v5 = vpack.c.bf16 %v3397_v32, %v3397_v32  ;;  %v12886_v35 = vpack.c.bf16 %v3396_v28, %v3396_v28  ;;  %v14573_v51 = vpack.i.bf16 %v18224_v47, %v18221_v55  ;;  %v13151_v0 = vpop.f32.mrf.mxu0  ;;  %v14287_v42 = vunpack.i.h.bf16 %v14285_v38  ;;  %v11497_v37 = vld [vmem:[%s15728_s13 + $0x279] sm:$0xff]  ;;  %v11924_v52 = vld [vmem:[%s15728_s13 + $0x4c9] sm:$0xff] }
 0x19d   : > { %v14588_v54 = vpack.i.bf16 %v18237_v43, %v18229_v19  ;;  %v13287_v29 = vpop.f32.mrf.mxu1  ;;  %v2086_v11 = vsel %vm854_vm0, %v17935_v12, %v14291_v34  ;;  %v2087_v39 = vsel %vm854_vm0, %v17945_v2, %v14292_v44  ;;  %v14286_v50 = vunpack.i.l.bf16 %v14285_v38  ;;  %v11784_v19 = vld [vmem:[%s15728_s13 + $0x288] sm:$0xff]  ;;  %v14300_v30 = vpop.permute.xlu1 %14299  ;;  %v11925_v44 = vld [vmem:[%s15728_s13 + $0x4d1] sm:$0xff] }
 0x19e   : > { %v18263_v22 = vadd.f32 %v13151_v0, %v13150_v18  ;;  %v18265_v7 = vadd.f32 %v13287_v29, %v13286_v62  ;;  %3877 = vst [vmem:[#allocation2 + $0x38c] sm:$0xf] %v12887_v5  ;;  %3876 = vst [vmem:[#allocation2 + $0x378] sm:$0xf] %v12886_v35  ;;  %v12824_v23 = vpack.c.bf16 %v2086_v11, %v2086_v11  ;;  %14579 = vrot.lane.b32.xlu1 %v14578_v24, %s15615_s15  ;;  %v13153_v12 = vpop.f32.mrf.mxu0  ;;  %v11496_v24 = vld [vmem:[%s15728_s13 + $0x271] sm:$0xff] }
 0x19f   : > { %v12825_v15 = vpack.c.bf16 %v2087_v39, %v2087_v39  ;;  %v13289_v2 = vpop.f32.mrf.mxu1  ;;  %8788 = vmatmul.mubr.bf16.gmra.mxu0 %v14858_v49  ;;  %v933_v8 = vsel %vm854_vm0, %v356_v1, %v14286_v50  ;;  %v934_v13 = vsel %vm854_vm0, %v357_v63, %v14287_v42  ;;  %v14302_v58 = vunpack.i.h.bf16 %v14300_v30  ;;  %v14295_v45 = vpop.permute.xlu0 %14294  ;;  %14574 = vrot.lane.b32.xlu0 %v14573_v51, %s15615_s15  ;;  %v14859_v0 = vld [vmem:[#allocation2 + $0x4b0] ss:$20 sps:$4 sm:$0xff]   ;;  %v14864_v29 = vld [vmem:[#allocation2 + $0x2d8] ss:$20 sps:$4 sm:$0xff]  }
 0x1a0   : > { %8595 = vmatmul.mubr.bf16.gmra.mxu1 %v14853_v17  ;;  %v14301_v10 = vunpack.i.l.bf16 %v14300_v30  ;;  %8795 = vmatprep.mubr.bf16.mxu0 %v14862_v21  ;;  %2566 = vst [vmem:[#allocation2 + $0x61c] sm:$0xf] %v12824_v23  ;;  %v12728_v14 = vpack.c.bf16 %v933_v8, %v933_v8  ;;  %v12729_v43 = vpack.c.bf16 %v934_v13, %v934_v13  ;;  %v13154_v18 = vpop.f32.mrf.mxu0  ;;  %v14296_v28 = vunpack.i.l.bf16 %v14295_v45  ;;  %v14867_v11 = vld [vmem:[#allocation2 + $0x4dc] ss:$20 sps:$4 sm:$0xff]   ;;  %v14868_v23 = vld [vmem:[#allocation2 + $0x304] ss:$20 sps:$4 sm:$0xff]  }
 0x1a1   : > { %8602 = vmatprep.mubr.bf16.mxu1 %v14861_v33  ;;  %2567 = vst [vmem:[#allocation2 + $0x630] sm:$0xf] %v12825_v15  ;;  %v14583_v17 = vpack.i.bf16 %v18261_v3, %v18250_v25  ;;  %v13290_v62 = vpop.f32.mrf.mxu1  ;;  %v4552_v49 = vsel %vm854_vm0, %v11785_v46, %v14302_v58  ;;  %v14297_v33 = vunpack.i.h.bf16 %v14295_v45  ;;  %v18281_v34 = vadd.f32 %v13154_v18, %v13153_v12  ;;  %v14310_v35 = vpop.permute.xlu1 %14309  ;;  %v358_v46 = vld [vmem:[%s15728_s13 + $0x420] sm:$0xff]  ;;  %v359_v30 = vld [vmem:[%s15728_s13 + $0x428] sm:$0xff] }
 0x1a2   : > { %v4551_v32 = vsel %vm854_vm0, %v11784_v19, %v14301_v10  ;;  %v18283_v1 = vadd.f32 %v13290_v62, %v13289_v2  ;;  %1413 = vst [vmem:[#allocation2 + $0x618] sm:$0xf] %v12728_v14  ;;  %1414 = vst [vmem:[#allocation2 + $0x62c] sm:$0xf] %v12729_v43  ;;  %v12985_v21 = vpack.c.bf16 %v4552_v49, %v4552_v49  ;;  %14589 = vrot.lane.b32.xlu1 %v14588_v54, %s15615_s15  ;;  %v13156_v38 = vpop.f32.mrf.mxu0  ;;  %v11786_v43 = vld [vmem:[%s15728_s13 + $0x2a0] sm:$0xff]  ;;  %v11787_v18 = vld [vmem:[%s15728_s13 + $0x2a8] sm:$0xff] }
 0x1a3   : > { %v12984_v5 = vpack.c.bf16 %v4551_v32, %v4551_v32  ;;  %v13292_v63 = vpop.f32.mrf.mxu1  ;;  %v3399_v51 = vsel %vm854_vm0, %v11497_v37, %v14297_v33  ;;  %v3398_v39 = vsel %vm854_vm0, %v11496_v24, %v14296_v28  ;;  %v14312_v42 = vunpack.i.h.bf16 %v14310_v35  ;;  %v14305_v54 = vpop.permute.xlu0 %14304  ;;  %14584 = vrot.lane.b32.xlu0 %v14583_v17, %s15615_s15  ;;  %v11499_v49 = vld [vmem:[%s15728_s13 + $0x291] sm:$0xff] }
 0x1a4   : > { %v14311_v50 = vunpack.i.l.bf16 %v14310_v35  ;;  %5032 = vst [vmem:[#allocation2 + $0x3b8] sm:$0xf] %v12985_v21  ;;  %v12889_v15 = vpack.c.bf16 %v3399_v51, %v3399_v51  ;;  %v12888_v19 = vpack.c.bf16 %v3398_v39, %v3398_v39  ;;  %v14598_v12 = vpack.i.bf16 %v11925_v44, %v11924_v52  ;;  %v13157_v2 = vpop.f32.mrf.mxu0  ;;  %v18307_v21 = vld [vmem:[%s15728_s13 + $0x4b2] sm:$0xff] }
 0x1a5   : > { %5031 = vst [vmem:[#allocation2 + $0x3a4] sm:$0xf] %v12984_v5  ;;  %v13293_v8 = vpop.f32.mrf.mxu1  ;;  %v2089_v58 = vsel %vm854_vm0, %v18043_v57, %v14312_v42  ;;  %v14307_v10 = vunpack.i.h.bf16 %v14305_v54  ;;  %v14306_v14 = vunpack.i.l.bf16 %v14305_v54  ;;  %v18296_v24 = vadd.f32 %v13157_v2, %v13156_v38  ;;  %v14320_v62 = vpop.permute.xlu1 %14319  ;;  %v14865_v42 = vld [vmem:[#allocation2 + $0x4d8] ss:$20 sps:$4 sm:$0xff]  }
 0x1a6   : > { %v2088_v13 = vsel %vm854_vm0, %v18035_v27, %v14311_v50  ;;  %v18298_v37 = vadd.f32 %v13293_v8, %v13292_v63  ;;  %3879 = vst [vmem:[#allocation2 + $0x3b4] sm:$0xf] %v12889_v15  ;;  %3878 = vst [vmem:[#allocation2 + $0x3a0] sm:$0xf] %v12888_v19  ;;  %v12827_v52 = vpack.c.bf16 %v2089_v58, %v2089_v58  ;;  %v11498_v27 = vld [vmem:[%s15728_s13 + $0x289] sm:$0xff]  ;;  %14599 = vrot.lane.b32.xlu1 %v14598_v12, %s15615_s15  ;;  %v13159_v57 = vpop.f32.mrf.mxu0  ;;  %v18310_v63 = vld [vmem:[%s15728_s13 + $0x4ba] sm:$0xff] }
 0x1a7   : > { %v12826_v45 = vpack.c.bf16 %v2088_v13, %v2088_v13  ;;  %v13295_v32 = vpop.f32.mrf.mxu1  ;;  %8796 = vmatmul.mubr.bf16.gmra.mxu0 %v14864_v29  ;;  %v935_v17 = vsel %vm854_vm0, %v358_v46, %v14306_v14  ;;  %v936_v33 = vsel %vm854_vm0, %v359_v30, %v14307_v10  ;;  %v14322_v28 = vunpack.i.h.bf16 %v14320_v62  ;;  %v14315_v38 = vpop.permute.xlu0 %14314  ;;  %v14952_v29 = vld [vmem:[%s20845_s3 + $0x100] sm:$0xff]   ;;  %v11927_v19 = vld [vmem:[%s15728_s13 + $0x4e9] sm:$0xff]  ;;  %v360_v13 = vld [vmem:[%s15728_s13 + $0x438] sm:$0xff] }
 0x1a8   : > { %8603 = vmatmul.mubr.bf16.gmra.mxu1 %v14859_v0  ;;  %v14321_v44 = vunpack.i.l.bf16 %v14320_v62  ;;  %8803 = vmatprep.mubr.bf16.mxu0 %v14868_v23  ;;  %2569 = vst [vmem:[#allocation2 + $0x658] sm:$0xf] %v12827_v52  ;;  %v12730_v5 = vpack.c.bf16 %v935_v17, %v935_v17  ;;  %v12731_v35 = vpack.c.bf16 %v936_v33, %v936_v33  ;;  %v11926_v0 = vld [vmem:[%s15728_s13 + $0x4e1] sm:$0xff]  ;;  %v13160_v51 = vpop.f32.mrf.mxu0  ;;  %v14317_v23 = vunpack.i.h.bf16 %v14315_v38  ;;  %v18325_v58 = vld [vmem:[%s15728_s13 + $0x4ca] sm:$0xff]  ;;  %v18330_v52 = vld [vmem:[%s15728_s13 + $0x4d2] sm:$0xff] }
 0x1a9   : > { %8610 = vmatprep.mubr.bf16.mxu1 %v14867_v11  ;;  %2568 = vst [vmem:[#allocation2 + $0x644] sm:$0xf] %v12826_v45  ;;  %v13296_v39 = vpop.f32.mrf.mxu1  ;;  %v4554_v11 = vsel %vm854_vm0, %v11787_v18, %v14322_v28  ;;  %v14316_v15 = vunpack.i.l.bf16 %v14315_v38  ;;  %v18319_v54 = vadd.f32 %v13160_v51, %v13159_v57  ;;  %v14870_v30 = vld [vmem:[#allocation2 + $0x300] ss:$20 sps:$4 sm:$0xff]   ;;  %v14873_v12 = vld [vmem:[#allocation2 + $0x504] ss:$20 sps:$4 sm:$0xff]   ;;  %13505 = vmatprep.subr.bf16.mxu1 %v14952_v29  ;;  %v14330_v28 = vpop.permute.xlu1 %14329 }
 0x1aa   : > { %v4553_v50 = vsel %vm854_vm0, %v11786_v43, %v14321_v44  ;;  %v18321_v46 = vadd.f32 %v13296_v39, %v13295_v32  ;;  %1415 = vst [vmem:[#allocation2 + $0x640] sm:$0xf] %v12730_v5  ;;  %1416 = vst [vmem:[#allocation2 + $0x654] sm:$0xf] %v12731_v35  ;;  %v12987_v2 = vpack.c.bf16 %v4554_v11, %v4554_v11  ;;  %v13162_v10 = vpop.f32.mrf.mxu0  ;;  %v18335_v62 = vld [vmem:[%s15728_s13 + $0x4f9] sm:$0xff]  ;;  %v11929_v57 = vld [vmem:[%s15728_s13 + $0x501] sm:$0xff]  ;;  %13506 = vmatpush3.bf16.msra.mxu1 %v14952_v29 }
 0x1ab   : > { %v12986_v8 = vpack.c.bf16 %v4553_v50, %v4553_v50  ;;  %v13298_v14 = vpop.f32.mrf.mxu1  ;;  %v3401_v43 = vsel %vm854_vm0, %v11499_v49, %v14317_v23  ;;  %v3400_v45 = vsel %vm854_vm0, %v11498_v27, %v14316_v15  ;;  %v14593_v18 = vpack.i.bf16 %v18310_v63, %v18307_v21  ;;  %v14876_v32 = vld [vmem:[#allocation2 + $0x32c] ss:$20 sps:$4 sm:$0xff]   ;;  %v14325_v49 = vpop.permute.xlu0 %14324  ;;  %v11788_v23 = vld [vmem:[%s15728_s13 + $0x2b8] sm:$0xff] }
 0x1ac   : > { %5034 = vst [vmem:[#allocation2 + $0x3e0] sm:$0xf] %v12987_v2  ;;  %v12891_v17 = vpack.c.bf16 %v3401_v43, %v3401_v43  ;;  %v12890_v33 = vpack.c.bf16 %v3400_v45, %v3400_v45  ;;  %v14608_v27 = vpack.i.bf16 %v11927_v19, %v11926_v0  ;;  %v18341_v44 = vld [vmem:[%s20844_s2] ss:$0 sm:$0xff]  ;;  %v13163_v5 = vpop.f32.mrf.mxu0  ;;  %v14332_v38 = vunpack.i.h.bf16 %v14330_v28 }
 0x1ad   : > { %5033 = vst [vmem:[#allocation2 + $0x3cc] sm:$0xf] %v12986_v8  ;;  %v13299_v35 = vpop.f32.mrf.mxu1  ;;  %v14331_v29 = vunpack.i.l.bf16 %v14330_v28  ;;  %v14327_v51 = vunpack.i.h.bf16 %v14325_v49  ;;  %v14326_v39 = vunpack.i.l.bf16 %v14325_v49  ;;  %14594 = vrot.lane.b32.xlu0 %v14593_v18, %s15615_s15  ;;  %v18344_v11 = vadd.f32 %v13163_v5, %v13162_v10  ;;  %v361_v0 = vld [vmem:[%s15728_s13 + $0x440] sm:$0xff]  ;;  %v11501_v18 = vld [vmem:[%s15728_s13 + $0x2a9] sm:$0xff] }
 0x1ae   : > { %v18346_v50 = vadd.f32 %v13299_v35, %v13298_v14  ;;  %3881 = vst [vmem:[#allocation2 + $0x3dc] sm:$0xf] %v12891_v17  ;;  %3880 = vst [vmem:[#allocation2 + $0x3c8] sm:$0xf] %v12890_v33  ;;  %v11789_v15 = vld [vmem:[%s15728_s13 + $0x2c0] sm:$0xff]  ;;  %14609 = vrot.lane.b32.xlu1 %v14608_v27, %s15615_s15  ;;  %v14603_v19 = vpack.i.bf16 %v18330_v52, %v18325_v58  ;;  %v14618_v2 = vpack.i.bf16 %v11929_v57, %v18335_v62  ;;  %v13165_v8 = vpop.f32.mrf.mxu0  ;;  %v11641_v49 = vld [vmem:[%s15728_s13 + $0x4ea] sm:$0xff] }
 0x1af   : > { %v13301_v10 = vpop.f32.mrf.mxu1  ;;  %8804 = vmatmul.mubr.bf16.gmra.mxu0 %v14870_v30  ;;  %v2090_v14 = vsel %vm854_vm0, %v18098_v53, %v14331_v29  ;;  %v2091_v43 = vsel %vm854_vm0, %v18101_v6, %v14332_v38  ;;  %v937_v45 = vsel %vm854_vm0, %v360_v13, %v14326_v39  ;;  %v11640_v17 = vld [vmem:[%s15728_s13 + $0x4e2] sm:$0xff]  ;;  %v18364_v33 = vadd.f32 %v18281_v34, %v18341_v44  ;;  %v14335_v28 = vpop.permute.xlu0 %14334 }
 0x1b0   : > { %20942 = vst [vmem:[#allocation10_spill] sm:$0xff] %v18346_v50  ;;  %8611 = vmatmul.mubr.bf16.gmra.mxu1 %v14865_v42  ;;  %8811 = vmatprep.mubr.bf16.mxu0 %v14876_v32  ;;  %v12828_v62 = vpack.c.bf16 %v2090_v14, %v2090_v14  ;;  %v12829_v57 = vpack.c.bf16 %v2091_v43, %v2091_v43  ;;  %v14340_v42 = vpop.permute.xlu1 %14339  ;;  %v11500_v30 = vld [vmem:[%s15728_s13 + $0x2a1] sm:$0xff]  ;;  %v13166_v53 = vpop.f32.mrf.mxu0  ;;  %v14337_v14 = vunpack.i.h.bf16 %v14335_v28 }
 0x1b1   : > { %8618 = vmatprep.mubr.bf16.mxu1 %v14873_v12  ;;  %v13302_v27 = vpop.f32.mrf.mxu1  ;;  %v14874_v5 = vld [vmem:[#allocation2 + $0x328] ss:$20 sps:$4 sm:$0xff]   ;;  %v938_v6 = vsel %vm854_vm0, %v361_v0, %v14327_v51  ;;  %v12732_v13 = vpack.c.bf16 %v937_v45, %v937_v45  ;;  %v14342_v35 = vunpack.i.h.bf16 %v14340_v42  ;;  %v14341_v38 = vunpack.i.l.bf16 %v14340_v42  ;;  %14604 = vrot.lane.b32.xlu0 %v14603_v19, %s15615_s15  ;;  %v14880_v32 = vld [vmem:[#allocation2 + $0x52c] ss:$20 sps:$4 sm:$0xff]  }
 0x1b2   : > { %v18370_v34 = vadd.f32 %v13166_v53, %v13165_v8  ;;  %v18372_v12 = vadd.f32 %v13302_v27, %v13301_v10  ;;  %v14883_v29 = vld [vmem:[#allocation2 + $0x354] ss:$20 sps:$4 sm:$0xff]   ;;  %2570 = vst [vmem:[#allocation2 + $0x66c] sm:$0xf] %v12828_v62  ;;  %2571 = vst [vmem:[#allocation2 + $0x680] sm:$0xf] %v12829_v57  ;;  %v12733_v39 = vpack.c.bf16 %v938_v6, %v938_v6  ;;  %14619 = vrot.lane.b32.xlu1 %v14618_v2, %s15615_s15  ;;  %v13168_v43 = vpop.f32.mrf.mxu0 }
 0x1b3   : > { %v13304_v50 = vpop.f32.mrf.mxu1  ;;  %1417 = vst [vmem:[#allocation2 + $0x668] sm:$0xf] %v12732_v13  ;;  %v4556_v51 = vsel %vm854_vm0, %v11789_v15, %v14342_v35  ;;  %v4555_v0 = vsel %vm854_vm0, %v11788_v23, %v14341_v38  ;;  %v14336_v19 = vunpack.i.l.bf16 %v14335_v28  ;;  %v14613_v8 = vpack.i.bf16 %v11641_v49, %v11640_v17  ;;  %v14345_v57 = vpop.permute.xlu0 %14344  ;;  %v14871_v53 = vld [vmem:[#allocation2 + $0x500] ss:$20 sps:$4 sm:$0xff]   ;;  %v363_v38 = vld [vmem:[%s15728_s13 + $0x458] sm:$0xff] }
 0x1b4   : > { %1418 = vst [vmem:[#allocation2 + $0x67c] sm:$0xf] %v12733_v39  ;;  %v12989_v10 = vpack.c.bf16 %v4556_v51, %v4556_v51  ;;  %v12988_v45 = vpack.c.bf16 %v4555_v0, %v4555_v0  ;;  %v3403_v42 = vsel %vm854_vm0, %v11501_v18, %v14337_v14  ;;  %v14350_v62 = vpop.permute.xlu1 %14349  ;;  %v13169_v2 = vpop.f32.mrf.mxu0  ;;  %v14347_v28 = vunpack.i.h.bf16 %v14345_v57  ;;  %v362_v49 = vld [vmem:[%s15728_s13 + $0x450] sm:$0xff] }
 0x1b5   : > { %v13305_v27 = vpop.f32.mrf.mxu1  ;;  %v12893_v6 = vpack.c.bf16 %v3403_v42, %v3403_v42  ;;  %v3402_v13 = vsel %vm854_vm0, %v11500_v30, %v14336_v19  ;;  %v14352_v15 = vunpack.i.h.bf16 %v14350_v62  ;;  %v14351_v35 = vunpack.i.l.bf16 %v14350_v62  ;;  %14614 = vrot.lane.b32.xlu0 %v14613_v8, %s15615_s15  ;;  %v11790_v8 = vld [vmem:[%s15728_s13 + $0x2d0] sm:$0xff] }
 0x1b6   : > { %v18380_v23 = vadd.f32 %v13169_v2, %v13168_v43  ;;  %v18382_v17 = vadd.f32 %v13305_v27, %v13304_v50  ;;  %5036 = vst [vmem:[#allocation2 + $0x408] sm:$0xf] %v12989_v10  ;;  %5035 = vst [vmem:[#allocation2 + $0x3f4] sm:$0xf] %v12988_v45  ;;  %v12892_v18 = vpack.c.bf16 %v3402_v13, %v3402_v13  ;;  %v13171_v39 = vpop.f32.mrf.mxu0  ;;  %v14346_v43 = vunpack.i.l.bf16 %v14345_v57  ;;  %v11791_v10 = vld [vmem:[%s15728_s13 + $0x2d8] sm:$0xff]  ;;  %v11503_v27 = vld [vmem:[%s15728_s13 + $0x2c1] sm:$0xff] }
 0x1b7   : > { %v13307_v14 = vpop.f32.mrf.mxu1  ;;  %8812 = vmatmul.mubr.bf16.gmra.mxu0 %v14874_v5  ;;  %3883 = vst [vmem:[#allocation2 + $0x404] sm:$0xf] %v12893_v6  ;;  %v2092_v30 = vsel %vm854_vm0, %v18132_v59, %v14351_v35  ;;  %v2093_v50 = vsel %vm854_vm0, %v18144_v9, %v14352_v15  ;;  %v18392_v51 = vadd.f32 %v18045_v4, %v18364_v33  ;;  %v14355_v45 = vpop.permute.xlu0 %14354  ;;  %v11502_v2 = vld [vmem:[%s15728_s13 + $0x2b9] sm:$0xff]  ;;  %v14881_v15 = vld [vmem:[#allocation2 + $0x350] ss:$20 sps:$4 sm:$0xff]  }
 0x1b8   : > { %8619 = vmatmul.mubr.bf16.gmra.mxu1 %v14871_v53  ;;  %v6627_v0 = vadd.f32 %v18239_v20, %v18341_v44  ;;  %8819 = vmatprep.mubr.bf16.mxu0 %v14883_v29  ;;  %3882 = vst [vmem:[#allocation2 + $0x3f0] sm:$0xf] %v12892_v18  ;;  %v12830_v19 = vpack.c.bf16 %v2092_v30, %v2092_v30  ;;  %v14360_v59 = vpop.permute.xlu1 %14359  ;;  %v13172_v9 = vpop.f32.mrf.mxu0 }
 0x1b9   : > { %20943 = vst [vmem:[#allocation11_spill] sm:$0xff] %v18392_v51  ;;  %8626 = vmatprep.mubr.bf16.mxu1 %v14880_v32  ;;  %v12831_v5 = vpack.c.bf16 %v2093_v50, %v2093_v50  ;;  %v13308_v42 = vpop.f32.mrf.mxu1  ;;  %v939_v62 = vsel %vm854_vm0, %v362_v49, %v14346_v43  ;;  %v940_v4 = vsel %vm854_vm0, %v363_v38, %v14347_v28  ;;  %v14362_v33 = vunpack.i.h.bf16 %v14360_v59 }
 0x1ba   : > { %v14361_v57 = vunpack.i.l.bf16 %v14360_v59  ;;  %v18400_v20 = vadd.f32 %v13172_v9, %v13171_v39  ;;  %v18402_v32 = vadd.f32 %v13308_v42, %v13307_v14  ;;  %2572 = vst [vmem:[#allocation2 + $0x694] sm:$0xf] %v12830_v19  ;;  %v12734_v29 = vpack.c.bf16 %v939_v62, %v939_v62  ;;  %v13174_v6 = vpop.f32.mrf.mxu0  ;;  %v14886_v39 = vld [vmem:[#allocation2 + $0x554] ss:$20 sps:$4 sm:$0xff]   ;;  %v14889_v14 = vld [vmem:[#allocation2 + $0x37c] ss:$20 sps:$4 sm:$0xff]  }
 0x1bb   : > { %2573 = vst [vmem:[#allocation2 + $0x6a8] sm:$0xf] %v12831_v5  ;;  %v12735_v53 = vpack.c.bf16 %v940_v4, %v940_v4  ;;  %v13310_v13 = vpop.f32.mrf.mxu1  ;;  %v4558_v35 = vsel %vm854_vm0, %v11791_v10, %v14362_v33  ;;  %v14357_v28 = vunpack.i.h.bf16 %v14355_v45  ;;  %v14356_v49 = vunpack.i.l.bf16 %v14355_v45  ;;  %v14365_v19 = vpop.permute.xlu0 %14364 }
 0x1bc   : > { %v4557_v18 = vsel %vm854_vm0, %v11790_v8, %v14361_v57  ;;  %v18410_v38 = vadd.f32 %v18263_v22, %v18341_v44  ;;  %1419 = vst [vmem:[#allocation2 + $0x690] sm:$0xf] %v12734_v29  ;;  %v12991_v30 = vpack.c.bf16 %v4558_v35, %v4558_v35  ;;  %v14370_v43 = vpop.permute.xlu1 %14369  ;;  %v18413_v5 = vadd.f32 %v17983_v56, %v6627_v0  ;;  %v14878_v8 = vld [vmem:[#allocation2 + $0x528] ss:$20 sps:$4 sm:$0xff]   ;;  %v13175_v10 = vpop.f32.mrf.mxu0  ;;  %v365_v56 = vld [vmem:[%s15728_s13 + $0x470] sm:$0xff] }
 0x1bd   : > { %1420 = vst [vmem:[#allocation2 + $0x6a4] sm:$0xf] %v12735_v53  ;;  %v12990_v50 = vpack.c.bf16 %v4557_v18, %v4557_v18  ;;  %v13311_v59 = vpop.f32.mrf.mxu1  ;;  %v3405_v45 = vsel %vm854_vm0, %v11503_v27, %v14357_v28  ;;  %v3404_v22 = vsel %vm854_vm0, %v11502_v2, %v14356_v49  ;;  %v14372_v9 = vunpack.i.h.bf16 %v14370_v43  ;;  %v364_v29 = vld [vmem:[%s15728_s13 + $0x468] sm:$0xff] }
 0x1be   : > { %20944 = vst [vmem:[#allocation12_spill] sm:$0xff] %v18413_v5  ;;  %v14371_v42 = vunpack.i.l.bf16 %v14370_v43  ;;  %v18417_v62 = vadd.f32 %v13175_v10, %v13174_v6  ;;  %v18419_v4 = vadd.f32 %v13311_v59, %v13310_v13  ;;  %5038 = vst [vmem:[#allocation2 + $0x430] sm:$0xf] %v12991_v30  ;;  %v12895_v33 = vpack.c.bf16 %v3405_v45, %v3405_v45  ;;  %v13177_v0 = vpop.f32.mrf.mxu0  ;;  %v11792_v49 = vld [vmem:[%s15728_s13 + $0x2e8] sm:$0xff]  ;;  %v11504_v45 = vld [vmem:[%s15728_s13 + $0x2d1] sm:$0xff] }
 0x1bf   : > { %5037 = vst [vmem:[#allocation2 + $0x41c] sm:$0xf] %v12990_v50  ;;  %v12894_v57 = vpack.c.bf16 %v3404_v22, %v3404_v22  ;;  %v13313_v53 = vpop.f32.mrf.mxu1  ;;  %8820 = vmatmul.mubr.bf16.gmra.mxu0 %v14881_v15  ;;  %v2095_v27 = vsel %vm854_vm0, %v18169_v26, %v14372_v9  ;;  %v14367_v6 = vunpack.i.h.bf16 %v14365_v19  ;;  %v14366_v13 = vunpack.i.l.bf16 %v14365_v19  ;;  %v11793_v15 = vld [vmem:[%s15728_s13 + $0x2f0] sm:$0xff]  ;;  %v11505_v22 = vld [vmem:[%s15728_s13 + $0x2d9] sm:$0xff] }
 0x1c0   : > { %8627 = vmatmul.mubr.bf16.gmra.mxu1 %v14878_v8  ;;  %v2094_v2 = vsel %vm854_vm0, %v18166_v61, %v14371_v42  ;;  %v6638_v35 = vadd.f32 %v18296_v24, %v18341_v44  ;;  %8827 = vmatprep.mubr.bf16.mxu0 %v14889_v14  ;;  %3885 = vst [vmem:[#allocation2 + $0x42c] sm:$0xf] %v12895_v33  ;;  %v14380_v30 = vpop.permute.xlu1 %14379  ;;  %v14375_v61 = vpop.permute.xlu0 %14374  ;;  %v14887_v33 = vld [vmem:[#allocation2 + $0x378] ss:$20 sps:$4 sm:$0xff]  }
 0x1c1   : > { %8634 = vmatprep.mubr.bf16.mxu1 %v14886_v39  ;;  %3884 = vst [vmem:[#allocation2 + $0x418] sm:$0xf] %v12894_v57  ;;  %v12832_v18 = vpack.c.bf16 %v2094_v2, %v2094_v2  ;;  %v12833_v28 = vpack.c.bf16 %v2095_v27, %v2095_v27  ;;  %v13178_v50 = vpop.f32.mrf.mxu0  ;;  %v13314_v43 = vpop.f32.mrf.mxu1  ;;  %v941_v26 = vsel %vm854_vm0, %v364_v29, %v14366_v13  ;;  %v14382_v8 = vunpack.i.h.bf16 %v14380_v30  ;;  %v14895_v27 = vld [vmem:[#allocation2 + $0x3a4] ss:$20 sps:$4 sm:$0xff]  }
 0x1c2   : > { %v942_v19 = vsel %vm854_vm0, %v365_v56, %v14367_v6  ;;  %v14381_v24 = vunpack.i.l.bf16 %v14380_v30  ;;  %v18433_v39 = vadd.f32 %v13178_v50, %v13177_v0  ;;  %v18435_v14 = vadd.f32 %v13314_v43, %v13313_v53  ;;  %v14892_v53 = vld [vmem:[#allocation2 + $0x57c] ss:$20 sps:$4 sm:$0xff]  }
 0x1c3   : > { %2574 = vst [vmem:[#allocation2 + $0x6bc] sm:$0xf] %v12832_v18  ;;  %2575 = vst [vmem:[#allocation2 + $0x6d0] sm:$0xf] %v12833_v28  ;;  %v12736_v10 = vpack.c.bf16 %v941_v26, %v941_v26  ;;  %v12737_v59 = vpack.c.bf16 %v942_v19, %v942_v19  ;;  %v13180_v9 = vpop.f32.mrf.mxu0  ;;  %v13316_v42 = vpop.f32.mrf.mxu1  ;;  %v4560_v57 = vsel %vm854_vm0, %v11793_v15, %v14382_v8  ;;  %v14377_v56 = vunpack.i.h.bf16 %v14375_v61 }
 0x1c4   : > { %v4559_v29 = vsel %vm854_vm0, %v11792_v49, %v14381_v24  ;;  %v14376_v2 = vunpack.i.l.bf16 %v14375_v61  ;;  %v18443_v0 = vadd.f32 %v18319_v54, %v18341_v44  ;;  %v12993_v6 = vpack.c.bf16 %v4560_v57, %v4560_v57  ;;  %v14390_v18 = vpop.permute.xlu1 %14389  ;;  %v14385_v28 = vpop.permute.xlu0 %14384  ;;  %v14884_v49 = vld [vmem:[#allocation2 + $0x550] ss:$20 sps:$4 sm:$0xff]  }
 0x1c5   : > { %1421 = vst [vmem:[#allocation2 + $0x6b8] sm:$0xf] %v12736_v10  ;;  %1422 = vst [vmem:[#allocation2 + $0x6cc] sm:$0xf] %v12737_v59  ;;  %v12992_v13 = vpack.c.bf16 %v4559_v29, %v4559_v29  ;;  %v18446_v15 = vadd.f32 %v18078_v36, %v6638_v35  ;;  %v13181_v30 = vpop.f32.mrf.mxu0  ;;  %v13317_v61 = vpop.f32.mrf.mxu1  ;;  %v3407_v50 = vsel %vm854_vm0, %v11505_v22, %v14377_v56  ;;  %v14392_v43 = vunpack.i.h.bf16 %v14390_v18  ;;  %v366_v59 = vld [vmem:[%s15728_s13 + $0x480] sm:$0xff]  ;;  %v367_v36 = vld [vmem:[%s15728_s13 + $0x488] sm:$0xff] }
 0x1c6   : > { %v3406_v54 = vsel %vm854_vm0, %v11504_v45, %v14376_v2  ;;  %v14391_v26 = vunpack.i.l.bf16 %v14390_v18  ;;  %v18450_v19 = vadd.f32 %v13181_v30, %v13180_v9  ;;  %v18452_v8 = vadd.f32 %v13317_v61, %v13316_v42  ;;  %5040 = vst [vmem:[#allocation2 + $0x458] sm:$0xf] %v12993_v6  ;;  %v11794_v6 = vld [vmem:[%s15728_s13 + $0x300] sm:$0xff] }
 0x1c7   : > { %20945 = vst [vmem:[#allocation13_spill] sm:$0xff] %v18446_v15  ;;  %5039 = vst [vmem:[#allocation2 + $0x444] sm:$0xf] %v12992_v13  ;;  %v12897_v24 = vpack.c.bf16 %v3407_v50, %v3407_v50  ;;  %v12896_v10 = vpack.c.bf16 %v3406_v54, %v3406_v54  ;;  %v13183_v35 = vpop.f32.mrf.mxu0  ;;  %v13319_v57 = vpop.f32.mrf.mxu1  ;;  %8828 = vmatmul.mubr.bf16.gmra.mxu0 %v14887_v33  ;;  %v2097_v22 = vsel %vm854_vm0, %v18224_v47, %v14392_v43  ;;  %v11795_v33 = vld [vmem:[%s15728_s13 + $0x308] sm:$0xff]  ;;  %v11507_v43 = vld [vmem:[%s15728_s13 + $0x2f1] sm:$0xff] }
 0x1c8   : > { %8635 = vmatmul.mubr.bf16.gmra.mxu1 %v14884_v49  ;;  %v2096_v45 = vsel %vm854_vm0, %v18221_v55, %v14391_v26  ;;  %v14387_v9 = vunpack.i.h.bf16 %v14385_v28  ;;  %v14386_v42 = vunpack.i.l.bf16 %v14385_v28  ;;  %v18462_v29 = vadd.f32 %v18344_v11, %v18341_v44  ;;  %8835 = vmatprep.mubr.bf16.mxu0 %v14895_v27  ;;  %v14400_v55 = vpop.permute.xlu1 %14399  ;;  %v14395_v13 = vpop.permute.xlu0 %14394  ;;  %v11506_v54 = vld [vmem:[%s15728_s13 + $0x2e9] sm:$0xff]  ;;  %v11514_v15 = vld [vmem:[%s15728_s13 + $0x379] sm:$0xff] }
 0x1c9   : > { %8642 = vmatprep.mubr.bf16.mxu1 %v14892_v53  ;;  %3887 = vst [vmem:[#allocation2 + $0x454] sm:$0xf] %v12897_v24  ;;  %3886 = vst [vmem:[#allocation2 + $0x440] sm:$0xf] %v12896_v10  ;;  %v12834_v56 = vpack.c.bf16 %v2096_v45, %v2096_v45  ;;  %v12835_v2 = vpack.c.bf16 %v2097_v22, %v2097_v22  ;;  %v13184_v18 = vpop.f32.mrf.mxu0  ;;  %v13320_v47 = vpop.f32.mrf.mxu1  ;;  %v14402_v11 = vunpack.i.h.bf16 %v14400_v55  ;;  %v14401_v30 = vunpack.i.l.bf16 %v14400_v55  ;;  %v14893_v10 = vld [vmem:[#allocation2 + $0x3a0] ss:$20 sps:$4 sm:$0xff]  }
 0x1ca   : > { %v943_v28 = vsel %vm854_vm0, %v366_v59, %v14386_v42  ;;  %v944_v49 = vsel %vm854_vm0, %v367_v36, %v14387_v9  ;;  %v18468_v53 = vadd.f32 %v13184_v18, %v13183_v35  ;;  %v18470_v27 = vadd.f32 %v13320_v47, %v13319_v57  ;;  %v14898_v57 = vld [vmem:[#allocation2 + $0x5a4] ss:$20 sps:$4 sm:$0xff]   ;;  %v14901_v9 = vld [vmem:[#allocation2 + $0x3cc] ss:$20 sps:$4 sm:$0xff]  }
 0x1cb   : > { %2576 = vst [vmem:[#allocation2 + $0x6e4] sm:$0xf] %v12834_v56  ;;  %2577 = vst [vmem:[#allocation2 + $0x6f8] sm:$0xf] %v12835_v2  ;;  %v12738_v61 = vpack.c.bf16 %v943_v28, %v943_v28  ;;  %v12739_v50 = vpack.c.bf16 %v944_v49, %v944_v49  ;;  %v13186_v26 = vpop.f32.mrf.mxu0  ;;  %v13322_v24 = vpop.f32.mrf.mxu1  ;;  %v4562_v45 = vsel %vm854_vm0, %v11795_v33, %v14402_v11  ;;  %v14397_v36 = vunpack.i.h.bf16 %v14395_v13 }
 0x1cc   : > { %v4561_v59 = vsel %vm854_vm0, %v11794_v6, %v14401_v30  ;;  %v14396_v22 = vunpack.i.l.bf16 %v14395_v13  ;;  %v18478_v35 = vadd.f32 %v18370_v34, %v18341_v44  ;;  %v12995_v42 = vpack.c.bf16 %v4562_v45, %v4562_v45  ;;  %v14410_v2 = vpop.permute.xlu1 %14409  ;;  %v14405_v55 = vpop.permute.xlu0 %14404  ;;  %v14890_v6 = vld [vmem:[#allocation2 + $0x578] ss:$20 sps:$4 sm:$0xff]  }
 0x1cd   : > { %1423 = vst [vmem:[#allocation2 + $0x6e0] sm:$0xf] %v12738_v61  ;;  %1424 = vst [vmem:[#allocation2 + $0x6f4] sm:$0xf] %v12739_v50  ;;  %v12994_v56 = vpack.c.bf16 %v4561_v59, %v4561_v59  ;;  %v18482_v33 = vadd.f32 %v18015_v41, %v18410_v38  ;;  %v13187_v13 = vpop.f32.mrf.mxu0  ;;  %v13323_v18 = vpop.f32.mrf.mxu1  ;;  %v3409_v34 = vsel %vm854_vm0, %v11507_v43, %v14397_v36  ;;  %v14412_v28 = vunpack.i.h.bf16 %v14410_v2  ;;  %v368_v45 = vld [vmem:[%s15728_s13 + $0x498] sm:$0xff]  ;;  %v369_v41 = vld [vmem:[%s15728_s13 + $0x4a0] sm:$0xff] }
 0x1ce   : > { %v3408_v47 = vsel %vm854_vm0, %v11506_v54, %v14396_v22  ;;  %v14411_v49 = vunpack.i.l.bf16 %v14410_v2  ;;  %v18486_v11 = vadd.f32 %v13187_v13, %v13186_v26  ;;  %v18488_v30 = vadd.f32 %v13323_v18, %v13322_v24  ;;  %5042 = vst [vmem:[#allocation2 + $0x480] sm:$0xf] %v12995_v42 }
 0x1cf   : > { %20946 = vst [vmem:[#allocation14_spill] sm:$0xff] %v18482_v33  ;;  %5041 = vst [vmem:[#allocation2 + $0x46c] sm:$0xf] %v12994_v56  ;;  %v12899_v61 = vpack.c.bf16 %v3409_v34, %v3409_v34  ;;  %v12898_v50 = vpack.c.bf16 %v3408_v47, %v3408_v47  ;;  %v13189_v38 = vpop.f32.mrf.mxu0  ;;  %v13325_v59 = vpop.f32.mrf.mxu1  ;;  %8836 = vmatmul.mubr.bf16.gmra.mxu0 %v14893_v10  ;;  %v2099_v43 = vsel %vm854_vm0, %v18261_v3, %v14412_v28  ;;  %v11796_v56 = vld [vmem:[%s15728_s13 + $0x318] sm:$0xff]  ;;  %v11797_v10 = vld [vmem:[%s15728_s13 + $0x320] sm:$0xff] }
 0x1d0   : > { %8643 = vmatmul.mubr.bf16.gmra.mxu1 %v14890_v6  ;;  %v2098_v54 = vsel %vm854_vm0, %v18250_v25, %v14411_v49  ;;  %v14407_v26 = vunpack.i.h.bf16 %v14405_v55  ;;  %v14406_v24 = vunpack.i.l.bf16 %v14405_v55  ;;  %v18498_v36 = vadd.f32 %v18380_v23, %v18341_v44  ;;  %8843 = vmatprep.mubr.bf16.mxu0 %v14901_v9  ;;  %v14420_v25 = vpop.permute.xlu1 %14419  ;;  %v14415_v2 = vpop.permute.xlu0 %14414  ;;  %v11508_v28 = vld [vmem:[%s15728_s13 + $0x301] sm:$0xff]  ;;  %v11509_v49 = vld [vmem:[%s15728_s13 + $0x309] sm:$0xff] }
 0x1d1   : > { %8650 = vmatprep.mubr.bf16.mxu1 %v14898_v57  ;;  %3889 = vst [vmem:[#allocation2 + $0x47c] sm:$0xf] %v12899_v61  ;;  %3888 = vst [vmem:[#allocation2 + $0x468] sm:$0xf] %v12898_v50  ;;  %v12836_v22 = vpack.c.bf16 %v2098_v54, %v2098_v54  ;;  %v12837_v42 = vpack.c.bf16 %v2099_v43, %v2099_v43  ;;  %v13190_v6 = vpop.f32.mrf.mxu0  ;;  %v13326_v3 = vpop.f32.mrf.mxu1  ;;  %v14422_v23 = vunpack.i.h.bf16 %v14420_v25  ;;  %v14421_v18 = vunpack.i.l.bf16 %v14420_v25  ;;  %v14899_v54 = vld [vmem:[#allocation2 + $0x3c8] ss:$20 sps:$4 sm:$0xff]  }
 0x1d2   : > { %v945_v55 = vsel %vm854_vm0, %v368_v45, %v14406_v24  ;;  %v946_v13 = vsel %vm854_vm0, %v369_v41, %v14407_v26  ;;  %v18504_v57 = vadd.f32 %v13190_v6, %v13189_v38  ;;  %v18506_v9 = vadd.f32 %v13326_v3, %v13325_v59  ;;  %v14905_v59 = vld [vmem:[#allocation2 + $0x5cc] ss:$20 sps:$4 sm:$0xff]   ;;  %v14908_v24 = vld [vmem:[#allocation2 + $0x3f4] ss:$20 sps:$4 sm:$0xff]  }
 0x1d3   : > { %2578 = vst [vmem:[#allocation2 + $0x70c] sm:$0xf] %v12836_v22  ;;  %2579 = vst [vmem:[#allocation2 + $0x720] sm:$0xf] %v12837_v42  ;;  %v12740_v34 = vpack.c.bf16 %v945_v55, %v945_v55  ;;  %v12741_v47 = vpack.c.bf16 %v946_v13, %v946_v13  ;;  %v13192_v61 = vpop.f32.mrf.mxu0  ;;  %v13328_v50 = vpop.f32.mrf.mxu1  ;;  %v4564_v43 = vsel %vm854_vm0, %v11797_v10, %v14422_v23  ;;  %v14417_v41 = vunpack.i.h.bf16 %v14415_v2 }
 0x1d4   : > { %v4563_v45 = vsel %vm854_vm0, %v11796_v56, %v14421_v18  ;;  %v14416_v26 = vunpack.i.l.bf16 %v14415_v2  ;;  %v18514_v38 = vadd.f32 %v18400_v20, %v18341_v44  ;;  %v12997_v22 = vpack.c.bf16 %v4564_v43, %v4564_v43  ;;  %v14430_v25 = vpop.permute.xlu1 %14429  ;;  %v14425_v6 = vpop.permute.xlu0 %14424  ;;  %v14896_v56 = vld [vmem:[#allocation2 + $0x5a0] ss:$20 sps:$4 sm:$0xff]  }
 0x1d5   : > { %1425 = vst [vmem:[#allocation2 + $0x708] sm:$0xf] %v12740_v34  ;;  %1426 = vst [vmem:[#allocation2 + $0x71c] sm:$0xf] %v12741_v47  ;;  %v12996_v42 = vpack.c.bf16 %v4563_v45, %v4563_v45  ;;  %v18518_v10 = vadd.f32 %v18182_v60, %v18478_v35  ;;  %v13193_v2 = vpop.f32.mrf.mxu0  ;;  %v13329_v3 = vpop.f32.mrf.mxu1  ;;  %v3411_v20 = vsel %vm854_vm0, %v11509_v49, %v14417_v41  ;;  %v14432_v13 = vunpack.i.h.bf16 %v14430_v25  ;;  %v370_v45 = vld [vmem:[%s15728_s13 + $0x4b0] sm:$0xff]  ;;  %v371_v60 = vld [vmem:[%s15728_s13 + $0x4b8] sm:$0xff] }
 0x1d6   : > { %v3410_v55 = vsel %vm854_vm0, %v11508_v28, %v14416_v26  ;;  %v14431_v23 = vunpack.i.l.bf16 %v14430_v25  ;;  %v18522_v18 = vadd.f32 %v13193_v2, %v13192_v61  ;;  %v18524_v34 = vadd.f32 %v13329_v3, %v13328_v50  ;;  %5044 = vst [vmem:[#allocation2 + $0x4a8] sm:$0xf] %v12997_v22 }
 0x1d7   : > { %20947 = vst [vmem:[#allocation15_spill] sm:$0xff] %v18518_v10  ;;  %5043 = vst [vmem:[#allocation2 + $0x494] sm:$0xf] %v12996_v42  ;;  %v12901_v47 = vpack.c.bf16 %v3411_v20, %v3411_v20  ;;  %v12900_v43 = vpack.c.bf16 %v3410_v55, %v3410_v55  ;;  %v13195_v35 = vpop.f32.mrf.mxu0  ;;  %v13331_v10 = vpop.f32.mrf.mxu1  ;;  %8844 = vmatmul.mubr.bf16.gmra.mxu0 %v14899_v54  ;;  %v2101_v49 = vsel %vm854_vm0, %v18310_v63, %v14432_v13  ;;  %v11798_v42 = vld [vmem:[%s15728_s13 + $0x330] sm:$0xff]  ;;  %v11799_v54 = vld [vmem:[%s15728_s13 + $0x338] sm:$0xff] }
 0x1d8   : > { %8651 = vmatmul.mubr.bf16.gmra.mxu1 %v14896_v56  ;;  %v2100_v28 = vsel %vm854_vm0, %v18307_v21, %v14431_v23  ;;  %v14427_v61 = vunpack.i.h.bf16 %v14425_v6  ;;  %v14426_v50 = vunpack.i.l.bf16 %v14425_v6  ;;  %v18534_v41 = vadd.f32 %v18417_v62, %v18341_v44  ;;  %8851 = vmatprep.mubr.bf16.mxu0 %v14908_v24  ;;  %v14440_v21 = vpop.permute.xlu1 %14439  ;;  %v14435_v25 = vpop.permute.xlu0 %14434  ;;  %v11510_v13 = vld [vmem:[%s15728_s13 + $0x319] sm:$0xff]  ;;  %v11511_v23 = vld [vmem:[%s15728_s13 + $0x321] sm:$0xff] }
 0x1d9   : > { %8658 = vmatprep.mubr.bf16.mxu1 %v14905_v59  ;;  %3891 = vst [vmem:[#allocation2 + $0x4a4] sm:$0xf] %v12901_v47  ;;  %3890 = vst [vmem:[#allocation2 + $0x490] sm:$0xf] %v12900_v43  ;;  %v12838_v26 = vpack.c.bf16 %v2100_v28, %v2100_v28  ;;  %v12839_v22 = vpack.c.bf16 %v2101_v49, %v2101_v49  ;;  %v13196_v56 = vpop.f32.mrf.mxu0  ;;  %v13332_v63 = vpop.f32.mrf.mxu1  ;;  %v14442_v62 = vunpack.i.h.bf16 %v14440_v21  ;;  %v14441_v3 = vunpack.i.l.bf16 %v14440_v21  ;;  %v14906_v28 = vld [vmem:[#allocation2 + $0x3f0] ss:$20 sps:$4 sm:$0xff]  }
 0x1da   : > { %v947_v6 = vsel %vm854_vm0, %v370_v45, %v14426_v50  ;;  %v948_v2 = vsel %vm854_vm0, %v371_v60, %v14427_v61  ;;  %v18540_v59 = vadd.f32 %v13196_v56, %v13195_v35  ;;  %v18542_v24 = vadd.f32 %v13332_v63, %v13331_v10  ;;  %v14911_v10 = vld [vmem:[#allocation2 + $0x5f4] ss:$20 sps:$4 sm:$0xff]   ;;  %v14914_v50 = vld [vmem:[#allocation2 + $0x41c] ss:$20 sps:$4 sm:$0xff]  }
 0x1db   : > { %2580 = vst [vmem:[#allocation2 + $0x734] sm:$0xf] %v12838_v26  ;;  %2581 = vst [vmem:[#allocation2 + $0x748] sm:$0xf] %v12839_v22  ;;  %v12742_v20 = vpack.c.bf16 %v947_v6, %v947_v6  ;;  %v12743_v55 = vpack.c.bf16 %v948_v2, %v948_v2  ;;  %v13198_v47 = vpop.f32.mrf.mxu0  ;;  %v13334_v43 = vpop.f32.mrf.mxu1  ;;  %v4566_v49 = vsel %vm854_vm0, %v11799_v54, %v14442_v62  ;;  %v14437_v60 = vunpack.i.h.bf16 %v14435_v25 }
 0x1dc   : > { %v4565_v45 = vsel %vm854_vm0, %v11798_v42, %v14441_v3  ;;  %v14436_v61 = vunpack.i.l.bf16 %v14435_v25  ;;  %v18550_v35 = vadd.f32 %v18433_v39, %v18341_v44  ;;  %v12999_v26 = vpack.c.bf16 %v4566_v49, %v4566_v49  ;;  %v14450_v21 = vpop.permute.xlu1 %14449  ;;  %v14445_v56 = vpop.permute.xlu0 %14444  ;;  %v14903_v42 = vld [vmem:[#allocation2 + $0x5c8] ss:$20 sps:$4 sm:$0xff]  }
 0x1dd   : > { %1427 = vst [vmem:[#allocation2 + $0x730] sm:$0xf] %v12742_v20  ;;  %1428 = vst [vmem:[#allocation2 + $0x744] sm:$0xf] %v12743_v55  ;;  %v12998_v22 = vpack.c.bf16 %v4565_v45, %v4565_v45  ;;  %v18554_v54 = vadd.f32 %v18114_v31, %v18443_v0  ;;  %v13199_v25 = vpop.f32.mrf.mxu0  ;;  %v13335_v63 = vpop.f32.mrf.mxu1  ;;  %v3413_v39 = vsel %vm854_vm0, %v11511_v23, %v14437_v60  ;;  %v14452_v2 = vunpack.i.h.bf16 %v14450_v21  ;;  %v372_v45 = vld [vmem:[%s15728_s13 + $0x4c8] sm:$0xff]  ;;  %v373_v31 = vld [vmem:[%s15728_s13 + $0x4d0] sm:$0xff] }
 0x1de   : > { %v3412_v6 = vsel %vm854_vm0, %v11510_v13, %v14436_v61  ;;  %v14451_v62 = vunpack.i.l.bf16 %v14450_v21  ;;  %v18558_v3 = vadd.f32 %v13199_v25, %v13198_v47  ;;  %v18560_v20 = vadd.f32 %v13335_v63, %v13334_v43  ;;  %5046 = vst [vmem:[#allocation2 + $0x4d0] sm:$0xf] %v12999_v26 }
 0x1df   : > { %20948 = vst [vmem:[#allocation16_spill] sm:$0xff] %v18554_v54  ;;  %5045 = vst [vmem:[#allocation2 + $0x4bc] sm:$0xf] %v12998_v22  ;;  %v12903_v55 = vpack.c.bf16 %v3413_v39, %v3413_v39  ;;  %v12902_v49 = vpack.c.bf16 %v3412_v6, %v3412_v6  ;;  %v13201_v0 = vpop.f32.mrf.mxu0  ;;  %v13337_v54 = vpop.f32.mrf.mxu1  ;;  %8852 = vmatmul.mubr.bf16.gmra.mxu0 %v14906_v28  ;;  %v2103_v23 = vsel %vm854_vm0, %v18330_v52, %v14452_v2  ;;  %v11800_v22 = vld [vmem:[%s15728_s13 + $0x348] sm:$0xff]  ;;  %v11801_v28 = vld [vmem:[%s15728_s13 + $0x350] sm:$0xff] }
 0x1e0   : > { %20949 = vst [vmem:[#allocation17_spill] sm:$0xff] %v18560_v20  ;;  %8659 = vmatmul.mubr.bf16.gmra.mxu1 %v14903_v42  ;;  %v2102_v13 = vsel %vm854_vm0, %v18325_v58, %v14451_v62  ;;  %v14447_v47 = vunpack.i.h.bf16 %v14445_v56  ;;  %v14446_v43 = vunpack.i.l.bf16 %v14445_v56  ;;  %v18570_v60 = vadd.f32 %v18450_v19, %v18341_v44  ;;  %8859 = vmatprep.mubr.bf16.mxu0 %v14914_v50  ;;  %v14460_v58 = vpop.permute.xlu1 %14459  ;;  %v14455_v21 = vpop.permute.xlu0 %14454  ;;  %v11512_v2 = vld [vmem:[%s15728_s13 + $0x331] sm:$0xff]  ;;  %v11513_v62 = vld [vmem:[%s15728_s13 + $0x339] sm:$0xff] }
 0x1e1   : > { %8666 = vmatprep.mubr.bf16.mxu1 %v14911_v10  ;;  %3893 = vst [vmem:[#allocation2 + $0x4cc] sm:$0xf] %v12903_v55  ;;  %3892 = vst [vmem:[#allocation2 + $0x4b8] sm:$0xf] %v12902_v49  ;;  %v12840_v61 = vpack.c.bf16 %v2102_v13, %v2102_v13  ;;  %v12841_v26 = vpack.c.bf16 %v2103_v23, %v2103_v23  ;;  %v13202_v52 = vpop.f32.mrf.mxu0  ;;  %v13338_v42 = vpop.f32.mrf.mxu1  ;;  %v14462_v25 = vunpack.i.h.bf16 %v14460_v58  ;;  %v14461_v10 = vunpack.i.l.bf16 %v14460_v58  ;;  %v11802_v55 = vld [vmem:[%s15728_s13 + $0x390] sm:$0xff] }
 0x1e2   : > { %v949_v56 = vsel %vm854_vm0, %v372_v45, %v14446_v43  ;;  %v950_v19 = vsel %vm854_vm0, %v373_v31, %v14447_v47  ;;  %v18576_v50 = vadd.f32 %v13202_v52, %v13201_v0  ;;  %v18578_v63 = vadd.f32 %v13338_v42, %v13337_v54  ;;  %v14912_v23 = vld [vmem:[#allocation2 + $0x418] ss:$20 sps:$4 sm:$0xff]   ;;  %v14917_v43 = vld [vmem:[#allocation2 + $0x61c] ss:$20 sps:$4 sm:$0xff]  }
 0x1e3   : > { %2582 = vst [vmem:[#allocation2 + $0x75c] sm:$0xf] %v12840_v61  ;;  %2583 = vst [vmem:[#allocation2 + $0x770] sm:$0xf] %v12841_v26  ;;  %v12744_v39 = vpack.c.bf16 %v949_v56, %v949_v56  ;;  %v12745_v6 = vpack.c.bf16 %v950_v19, %v950_v19  ;;  %v13204_v49 = vpop.f32.mrf.mxu0  ;;  %v13340_v13 = vpop.f32.mrf.mxu1  ;;  %v4568_v45 = vsel %vm854_vm0, %v11801_v28, %v14462_v25  ;;  %v14457_v47 = vunpack.i.h.bf16 %v14455_v21  ;;  %v14920_v61 = vld [vmem:[#allocation2 + $0x444] ss:$20 sps:$4 sm:$0xff]  }
 0x1e4   : > { %v4567_v31 = vsel %vm854_vm0, %v11800_v22, %v14461_v10  ;;  %v14456_v0 = vunpack.i.l.bf16 %v14455_v21  ;;  %v18587_v54 = vadd.f32 %v18468_v53, %v18341_v44  ;;  %v13001_v26 = vpack.c.bf16 %v4568_v45, %v4568_v45  ;;  %v11803_v52 = vld [vmem:[%s15728_s13 + $0x398] sm:$0xff]  ;;  %v14470_v42 = vpop.permute.xlu1 %14469  ;;  %v14465_v56 = vpop.permute.xlu0 %14464  ;;  %v14909_v28 = vld [vmem:[#allocation2 + $0x5f0] ss:$20 sps:$4 sm:$0xff]  }
 0x1e5   : > { %1429 = vst [vmem:[#allocation2 + $0x758] sm:$0xf] %v12744_v39  ;;  %1430 = vst [vmem:[#allocation2 + $0x76c] sm:$0xf] %v12745_v6  ;;  %v13000_v58 = vpack.c.bf16 %v4567_v31, %v4567_v31  ;;  %v18592_v22 = vadd.f32 %v18209_v40, %v18498_v36  ;;  %v13205_v21 = vpop.f32.mrf.mxu0  ;;  %v13341_v19 = vpop.f32.mrf.mxu1  ;;  %v3415_v44 = vsel %vm854_vm0, %v11513_v62, %v14457_v47  ;;  %v14472_v25 = vunpack.i.h.bf16 %v14470_v42  ;;  %v11515_v40 = vld [vmem:[%s15728_s13 + $0x381] sm:$0xff] }
 0x1e6   : > { %v3414_v53 = vsel %vm854_vm0, %v11512_v2, %v14456_v0  ;;  %v14471_v10 = vunpack.i.l.bf16 %v14470_v42  ;;  %v18596_v39 = vadd.f32 %v13205_v21, %v13204_v49  ;;  %v18598_v6 = vadd.f32 %v13341_v19, %v13340_v13  ;;  %5048 = vst [vmem:[#allocation2 + $0x4f8] sm:$0xf] %v13001_v26  ;;  %v18607_v13 = vld [vmem:[%s20844_s2] ss:$0 sm:$0xff] }
 0x1e7   : > { %20950 = vst [vmem:[#allocation18_spill] sm:$0xff] %v18592_v22  ;;  %5047 = vst [vmem:[#allocation2 + $0x4e4] sm:$0xf] %v13000_v58  ;;  %v12905_v45 = vpack.c.bf16 %v3415_v44, %v3415_v44  ;;  %v12904_v31 = vpack.c.bf16 %v3414_v53, %v3414_v53  ;;  %v13207_v36 = vpop.f32.mrf.mxu0  ;;  %v13343_v22 = vpop.f32.mrf.mxu1  ;;  %8860 = vmatmul.mubr.bf16.gmra.mxu0 %v14912_v23  ;;  %v4570_v2 = vsel %vm854_vm0, %v11803_v52, %v14472_v25  ;;  %v11804_v58 = vld [vmem:[%s15728_s13 + $0x3a8] sm:$0xff]  ;;  %v11805_v52 = vld [vmem:[%s15728_s13 + $0x3b0] sm:$0xff] }
 0x1e8   : > { %8667 = vmatmul.mubr.bf16.gmra.mxu1 %v14909_v28  ;;  %v4569_v62 = vsel %vm854_vm0, %v11802_v55, %v14471_v10  ;;  %v14467_v49 = vunpack.i.h.bf16 %v14465_v56  ;;  %v14466_v47 = vunpack.i.l.bf16 %v14465_v56  ;;  %v18611_v0 = vadd.f32 %v18607_v13, %v18486_v11  ;;  %8867 = vmatprep.mubr.bf16.mxu0 %v14920_v61  ;;  %v14480_v55 = vpop.permute.xlu1 %14479  ;;  %v14475_v42 = vpop.permute.xlu0 %14474  ;;  %v15006_v61 = vld [vmem:[%s20847_s5 + $0x38] sm:$0xff]  }
 0x1e9   : > { %8674 = vmatprep.mubr.bf16.mxu1 %v14917_v43  ;;  %3895 = vst [vmem:[#allocation2 + $0x4f4] sm:$0xf] %v12905_v45  ;;  %3894 = vst [vmem:[#allocation2 + $0x4e0] sm:$0xf] %v12904_v31  ;;  %v13003_v23 = vpack.c.bf16 %v4570_v2, %v4570_v2  ;;  %v13002_v26 = vpack.c.bf16 %v4569_v62, %v4569_v62  ;;  %v13208_v56 = vpop.f32.mrf.mxu0  ;;  %v13344_v28 = vpop.f32.mrf.mxu1  ;;  %v14482_v19 = vunpack.i.h.bf16 %v14480_v55  ;;  %v14481_v43 = vunpack.i.l.bf16 %v14480_v55  ;;  %v11516_v45 = vld [vmem:[%s15728_s13 + $0x391] sm:$0xff]  ;;  %v11517_v31 = vld [vmem:[%s15728_s13 + $0x399] sm:$0xff] }
 0x1ea   : > { %v3417_v21 = vsel %vm854_vm0, %v11515_v40, %v14467_v49  ;;  %v3416_v11 = vsel %vm854_vm0, %v11514_v15, %v14466_v47  ;;  %v18620_v44 = vadd.f32 %v13208_v56, %v13207_v36  ;;  %v18622_v53 = vadd.f32 %v13344_v28, %v13343_v22  ;;  %v11806_v2 = vld [vmem:[%s15728_s13 + $0x3c0] sm:$0xff]  ;;  %13571 = vmatprep.subr.bf16.mxu0 %v15006_v61 }
 0x1eb   : > { %5050 = vst [vmem:[#allocation2 + $0x520] sm:$0xf] %v13003_v23  ;;  %5049 = vst [vmem:[#allocation2 + $0x50c] sm:$0xf] %v13002_v26  ;;  %v12907_v25 = vpack.c.bf16 %v3417_v21, %v3417_v21  ;;  %v12906_v10 = vpack.c.bf16 %v3416_v11, %v3416_v11  ;;  %v13210_v40 = vpop.f32.mrf.mxu0  ;;  %v13346_v15 = vpop.f32.mrf.mxu1  ;;  %v14918_v62 = vld [vmem:[#allocation2 + $0x440] ss:$20 sps:$4 sm:$0xff]   ;;  %v4572_v49 = vsel %vm854_vm0, %v11805_v52, %v14482_v19  ;;  %v14477_v55 = vunpack.i.h.bf16 %v14475_v42 }
 0x1ec   : > { %20951 = vst [vmem:[#allocation19_spill] sm:$0xff] %v18622_v53  ;;  %v4571_v47 = vsel %vm854_vm0, %v11804_v58, %v14481_v43  ;;  %v14476_v36 = vunpack.i.l.bf16 %v14475_v42  ;;  %v18631_v22 = vadd.f32 %v18607_v13, %v18504_v57  ;;  %v14923_v23 = vld [vmem:[#allocation2 + $0x644] ss:$20 sps:$4 sm:$0xff]   ;;  %v14926_v26 = vld [vmem:[#allocation2 + $0x46c] ss:$20 sps:$4 sm:$0xff]   ;;  %v13005_v56 = vpack.c.bf16 %v4572_v49, %v4572_v49  ;;  %v14490_v11 = vpop.permute.xlu1 %14489  ;;  %v14485_v33 = vpop.permute.xlu0 %14484  ;;  %13572 = vmatpush3.bf16.msra.mxu0 %v15006_v61 }
 0x1ed   : > { %3897 = vst [vmem:[#allocation2 + $0x51c] sm:$0xf] %v12907_v25  ;;  %3896 = vst [vmem:[#allocation2 + $0x508] sm:$0xf] %v12906_v10  ;;  %v13004_v28 = vpack.c.bf16 %v4571_v47, %v4571_v47  ;;  %v11807_v21 = vld [vmem:[%s15728_s13 + $0x3c8] sm:$0xff]  ;;  %v18636_v58 = vadd.f32 %v18146_v48, %v18462_v29  ;;  %v13211_v42 = vpop.f32.mrf.mxu0  ;;  %v13347_v57 = vpop.f32.mrf.mxu1  ;;  %v3419_v19 = vsel %vm854_vm0, %v11517_v31, %v14477_v55  ;;  %v14492_v25 = vunpack.i.h.bf16 %v14490_v11 }
 0x1ee   : > { %v14915_v52 = vld [vmem:[#allocation2 + $0x618] ss:$20 sps:$4 sm:$0xff]   ;;  %v3418_v43 = vsel %vm854_vm0, %v11516_v45, %v14476_v36  ;;  %v14491_v10 = vunpack.i.l.bf16 %v14490_v11  ;;  %v18640_v49 = vadd.f32 %v13211_v42, %v13210_v40  ;;  %v18642_v47 = vadd.f32 %v13347_v57, %v13346_v15  ;;  %5052 = vst [vmem:[#allocation2 + $0x548] sm:$0xf] %v13005_v56  ;;  %v11809_v11 = vld [vmem:[%s15728_s13 + $0x3e0] sm:$0xff] }
 0x1ef   : > { %20952 = vst [vmem:[#allocation20_spill] sm:$0xff] %v18636_v58  ;;  %5051 = vst [vmem:[#allocation2 + $0x534] sm:$0xf] %v13004_v28  ;;  %v12909_v53 = vpack.c.bf16 %v3419_v19, %v3419_v19  ;;  %v12908_v48 = vpack.c.bf16 %v3418_v43, %v3418_v43  ;;  %v11518_v29 = vld [vmem:[%s15728_s13 + $0x3a9] sm:$0xff]  ;;  %v11519_v58 = vld [vmem:[%s15728_s13 + $0x3b1] sm:$0xff]  ;;  %v13213_v61 = vpop.f32.mrf.mxu0  ;;  %v13349_v51 = vpop.f32.mrf.mxu1  ;;  %8868 = vmatmul.mubr.bf16.gmra.mxu0 %v14918_v62  ;;  %v4574_v45 = vsel %vm854_vm0, %v11807_v21, %v14492_v25 }
 0x1f0   : > { %20953 = vst [vmem:[#allocation21_spill] sm:$0xff] %v18642_v47  ;;  %8675 = vmatmul.mubr.bf16.gmra.mxu1 %v14915_v52  ;;  %v4573_v31 = vsel %vm854_vm0, %v11806_v2, %v14491_v10  ;;  %v14487_v40 = vunpack.i.h.bf16 %v14485_v33  ;;  %v14486_v55 = vunpack.i.l.bf16 %v14485_v33  ;;  %v18650_v15 = vadd.f32 %v18607_v13, %v18522_v18  ;;  %8875 = vmatprep.mubr.bf16.mxu0 %v14926_v26  ;;  %v11808_v28 = vld [vmem:[%s15728_s13 + $0x3d8] sm:$0xff]  ;;  %v14500_v62 = vpop.permute.xlu1 %14499  ;;  %v14495_v21 = vpop.permute.xlu0 %14494  ;;  %v12058_v26 = vld [vmem:[%s15728_s13 + $0x1e2] sm:$0xff] }
 0x1f1   : > { %8682 = vmatprep.mubr.bf16.mxu1 %v14923_v23  ;;  %3899 = vst [vmem:[#allocation2 + $0x544] sm:$0xf] %v12909_v53  ;;  %3898 = vst [vmem:[#allocation2 + $0x530] sm:$0xf] %v12908_v48  ;;  %v13007_v36 = vpack.c.bf16 %v4574_v45, %v4574_v45  ;;  %v13006_v56 = vpack.c.bf16 %v4573_v31, %v4573_v31  ;;  %v13214_v2 = vpop.f32.mrf.mxu0  ;;  %v13350_v33 = vpop.f32.mrf.mxu1  ;;  %v14502_v23 = vunpack.i.h.bf16 %v14500_v62  ;;  %v14501_v42 = vunpack.i.l.bf16 %v14500_v62  ;;  %v11520_v25 = vld [vmem:[%s15728_s13 + $0x3c1] sm:$0xff]  ;;  %v11521_v10 = vld [vmem:[%s15728_s13 + $0x3c9] sm:$0xff] }
 0x1f2   : > { %v3421_v52 = vsel %vm854_vm0, %v11519_v58, %v14487_v40  ;;  %v3420_v18 = vsel %vm854_vm0, %v11518_v29, %v14486_v55  ;;  %v18657_v53 = vadd.f32 %v13214_v2, %v13213_v61  ;;  %v18659_v57 = vadd.f32 %v13350_v33, %v13349_v51  ;;  %v11810_v48 = vld [vmem:[%s15728_s13 + $0x3f0] sm:$0xff]  ;;  %v14924_v58 = vld [vmem:[#allocation2 + $0x468] ss:$20 sps:$4 sm:$0xff]   ;;  %v14930_v62 = vld [vmem:[#allocation2 + $0x66c] ss:$20 sps:$4 sm:$0xff]  }
 0x1f3   : > { %5054 = vst [vmem:[#allocation2 + $0x570] sm:$0xf] %v13007_v36  ;;  %5053 = vst [vmem:[#allocation2 + $0x55c] sm:$0xf] %v13006_v56  ;;  %v12911_v19 = vpack.c.bf16 %v3421_v52, %v3421_v52  ;;  %v12910_v43 = vpack.c.bf16 %v3420_v18, %v3420_v18  ;;  %v13216_v45 = vpop.f32.mrf.mxu0  ;;  %v13352_v31 = vpop.f32.mrf.mxu1  ;;  %v4576_v29 = vsel %vm854_vm0, %v11809_v11, %v14502_v23  ;;  %v14497_v55 = vunpack.i.h.bf16 %v14495_v21  ;;  %v14933_v51 = vld [vmem:[#allocation2 + $0x494] ss:$20 sps:$4 sm:$0xff]  }
 0x1f4   : > { %20954 = vst [vmem:[#allocation22_spill] sm:$0xff] %v18659_v57  ;;  %v4575_v40 = vsel %vm854_vm0, %v11808_v28, %v14501_v42  ;;  %v14496_v61 = vunpack.i.l.bf16 %v14495_v21  ;;  %v13009_v36 = vpack.c.bf16 %v4576_v29, %v4576_v29  ;;  %v11811_v2 = vld [vmem:[%s15728_s13 + $0x3f8] sm:$0xff]  ;;  %v14510_v33 = vpop.permute.xlu1 %14509  ;;  %v14505_v52 = vpop.permute.xlu0 %14504  ;;  %v18669_v18 = vadd.f32 %v18283_v1, %v18550_v35  ;;  %v14921_v28 = vld [vmem:[#allocation2 + $0x640] ss:$20 sps:$4 sm:$0xff]  }
 0x1f5   : > { %3901 = vst [vmem:[#allocation2 + $0x56c] sm:$0xf] %v12911_v19  ;;  %3900 = vst [vmem:[#allocation2 + $0x558] sm:$0xf] %v12910_v43  ;;  %v13008_v56 = vpack.c.bf16 %v4575_v40, %v4575_v40  ;;  %v18672_v11 = vsel %vm854_vm0, %v12058_v26, 0.0  ;;  %v13217_v21 = vpop.f32.mrf.mxu0  ;;  %v13353_v23 = vpop.f32.mrf.mxu1  ;;  %v3423_v42 = vsel %vm854_vm0, %v11521_v10, %v14497_v55  ;;  %v14512_v43 = vunpack.i.h.bf16 %v14510_v33  ;;  %v12059_v40 = vld [vmem:[%s15728_s13 + $0x1ea] sm:$0xff] }
 0x1f6   : > { %20955 = vst [vmem:[#allocation23_spill] sm:$0xff] %v18669_v18  ;;  %v3422_v19 = vsel %vm854_vm0, %v11520_v25, %v14496_v61  ;;  %v14511_v29 = vunpack.i.l.bf16 %v14510_v33  ;;  %v18677_v47 = vadd.f32 %v13217_v21, %v13216_v45  ;;  %v18679_v57 = vadd.f32 %v13353_v23, %v13352_v31  ;;  %5056 = vst [vmem:[#allocation2 + $0x598] sm:$0xf] %v13009_v36  ;;  %v11522_v26 = vld [vmem:[%s15728_s13 + $0x3d9] sm:$0xff]  ;;  %v11523_v18 = vld [vmem:[%s15728_s13 + $0x3e1] sm:$0xff] }
 0x1f7   : > { %5055 = vst [vmem:[#allocation2 + $0x584] sm:$0xf] %v13008_v56  ;;  %v12913_v1 = vpack.c.bf16 %v3423_v42, %v3423_v42  ;;  %v12912_v35 = vpack.c.bf16 %v3422_v19, %v3422_v19  ;;  %v13219_v5 = vpop.f32.mrf.mxu0  ;;  %v18683_v20 = vpop.f32.mrf.mxu1  ;;  %8876 = vmatmul.mubr.bf16.gmra.mxu0 %v14924_v58  ;;  %v4578_v25 = vsel %vm854_vm0, %v11811_v2, %v14512_v43  ;;  %v14507_v55 = vunpack.i.h.bf16 %v14505_v52  ;;  %v11812_v42 = vld [vmem:[%s15728_s13 + $0x408] sm:$0xff]  ;;  %v11813_v19 = vld [vmem:[%s15728_s13 + $0x410] sm:$0xff]  ;;  %v11525_v43 = vld [vmem:[%s15728_s13 + $0x3f9] sm:$0xff] }
 0x1f8   : > { %8683 = vmatmul.mubr.bf16.gmra.mxu1 %v14921_v28  ;;  %v4577_v10 = vsel %vm854_vm0, %v11810_v48, %v14511_v29  ;;  %v14506_v45 = vunpack.i.l.bf16 %v14505_v52  ;;  %v18689_v31 = vadd.f32 %v18607_v13, %v18540_v59  ;;  %v18693_v61 = vadd.f32 %v18607_v13, %v18558_v3  ;;  %8883 = vmatprep.mubr.bf16.mxu0 %v14933_v51  ;;  %v14520_v36 = vpop.permute.xlu1 %14519  ;;  %v14515_v48 = vpop.permute.xlu0 %14514 }
 0x1f9   : > { %8690 = vmatprep.mubr.bf16.mxu1 %v14930_v62  ;;  %3903 = vst [vmem:[#allocation2 + $0x594] sm:$0xf] %v12913_v1  ;;  %3902 = vst [vmem:[#allocation2 + $0x580] sm:$0xf] %v12912_v35  ;;  %v13011_v58 = vpack.c.bf16 %v4578_v25, %v4578_v25  ;;  %v18696_v56 = vsel %vm854_vm0, %v12059_v40, 0.0  ;;  %v13220_v2 = vpop.f32.mrf.mxu0  ;;  %v8494_v59 = vpop.f32.mrf.mxu1  ;;  %v13010_v33 = vpack.c.bf16 %v4577_v10, %v4577_v10  ;;  %v14517_v1 = vunpack.i.h.bf16 %v14515_v48  ;;  %v11524_v25 = vld [vmem:[%s15728_s13 + $0x3f1] sm:$0xff] }
 0x1fa   : > { %v3425_v52 = vsel %vm854_vm0, %v11523_v18, %v14507_v55  ;;  %v3424_v3 = vsel %vm854_vm0, %v11522_v26, %v14506_v45  ;;  %v18702_v62 = vadd.f32 %v18241_v16, %v18514_v38  ;;  %v18704_v51 = vadd.f32 %v13220_v2, %v13219_v5  ;;  %v14931_v40 = vld [vmem:[#allocation2 + $0x490] ss:$20 sps:$4 sm:$0xff]   ;;  %v14936_v35 = vld [vmem:[#allocation2 + $0x694] ss:$20 sps:$4 sm:$0xff]  }
 0x1fb   : > { %5058 = vst [vmem:[#allocation2 + $0x5c0] sm:$0xf] %v13011_v58  ;;  %v12915_v28 = vpack.c.bf16 %v3425_v52, %v3425_v52  ;;  %v12914_v21 = vpack.c.bf16 %v3424_v3, %v3424_v3  ;;  %v18708_v23 = vadd.f32 %v18298_v37, %v18570_v60  ;;  %v13222_v18 = vpop.f32.mrf.mxu0  ;;  %v18713_v29 = vpop.f32.mrf.mxu1  ;;  %5057 = vst [vmem:[#allocation2 + $0x5ac] sm:$0xf] %v13010_v33  ;;  %v14522_v5 = vunpack.i.h.bf16 %v14520_v36  ;;  %v14939_v26 = vld [vmem:[#allocation2 + $0x4bc] ss:$20 sps:$4 sm:$0xff]  }
 0x1fc   : > { %v18717_v16 = vadd.f32 %v18265_v7, %v18534_v41  ;;  %v14521_v38 = vunpack.i.l.bf16 %v14520_v36  ;;  %v18721_v37 = vadd.f32 %v18607_v13, %v18576_v50  ;;  %v18725_v60 = vadd.f32 %v18607_v13, %v18596_v39  ;;  %v14530_v10 = vpop.permute.xlu1 %14529  ;;  %v14928_v50 = vld [vmem:[#allocation2 + $0x668] ss:$20 sps:$4 sm:$0xff]  }
 0x1fd   : > { %3905 = vst [vmem:[#allocation2 + $0x5bc] sm:$0xf] %v12915_v28  ;;  %3904 = vst [vmem:[#allocation2 + $0x5a8] sm:$0xf] %v12914_v21  ;;  %v14516_v7 = vunpack.i.l.bf16 %v14515_v48  ;;  %v18730_v41 = vadd.f32 %v18372_v12, %v18631_v22  ;;  %v13223_v55 = vpop.f32.mrf.mxu0  ;;  %v8497_v45 = vpop.f32.mrf.mxu1  ;;  %v4580_v39 = vsel %vm854_vm0, %v11813_v19, %v14522_v5  ;;  %v3427_v36 = vsel %vm854_vm0, %v11525_v43, %v14517_v1  ;;  %v12060_v48 = vld [vmem:[%s15728_s13 + $0x1fa] sm:$0xff]  ;;  %v12061_v59 = vld [vmem:[%s15728_s13 + $0x202] sm:$0xff] }
 0x1fe   : > { %v4579_v58 = vsel %vm854_vm0, %v11812_v42, %v14521_v38  ;;  %v18737_v2 = vadd.f32 %v18321_v46, %v18587_v54  ;;  %v18741_v33 = vadd.f32 %v13223_v55, %v13222_v18  ;;  %v13013_v12 = vpack.c.bf16 %v4580_v39, %v4580_v39  ;;  %v11815_v3 = vld [vmem:[%s15728_s13 + $0x428] sm:$0xff]  ;;  %v14525_v28 = vpop.permute.xlu0 %14524  ;;  %v20956_v42 = vld [vmem:[#allocation10_spill] sm:$0xff] }
 0x1ff   : > { %v13012_v22 = vpack.c.bf16 %v4579_v58, %v4579_v58  ;;  %v12917_v52 = vpack.c.bf16 %v3427_v36, %v3427_v36  ;;  %v13225_v21 = vpop.f32.mrf.mxu0  ;;  %v18744_v19 = vpop.f32.mrf.mxu1  ;;  %8884 = vmatmul.mubr.bf16.gmra.mxu0 %v14931_v40  ;;  %v3426_v46 = vsel %vm854_vm0, %v11524_v25, %v14516_v7  ;;  %v18749_v54 = vadd.f32 %v18382_v17, %v18650_v15  ;;  %v11814_v18 = vld [vmem:[%s15728_s13 + $0x420] sm:$0xff]  ;;  %v11526_v40 = vld [vmem:[%s15728_s13 + $0x409] sm:$0xff] }
 0x200   : > { %8691 = vmatmul.mubr.bf16.gmra.mxu1 %v14928_v50  ;;  %v18753_v43 = vadd.f32 %v20956_v42, %v18611_v0  ;;  %v14532_v5 = vunpack.i.h.bf16 %v14530_v10  ;;  %8891 = vmatprep.mubr.bf16.mxu0 %v14939_v26  ;;  %5060 = vst [vmem:[#allocation2 + $0x5e8] sm:$0xf] %v13013_v12  ;;  %v12916_v38 = vpack.c.bf16 %v3426_v46, %v3426_v46  ;;  %v14531_v1 = vunpack.i.l.bf16 %v14530_v10  ;;  %v11527_v50 = vld [vmem:[%s15728_s13 + $0x411] sm:$0xff]  ;;  %v14540_v36 = vpop.permute.xlu1 %14539 }
 0x201   : > { %8698 = vmatprep.mubr.bf16.mxu1 %v14936_v35  ;;  %5059 = vst [vmem:[#allocation2 + $0x5d4] sm:$0xf] %v13012_v22  ;;  %3907 = vst [vmem:[#allocation2 + $0x5e4] sm:$0xf] %v12917_v52  ;;  %v5211_v25 = vsel %vm854_vm0, %v12060_v48, 0.0  ;;  %v5212_v17 = vsel %vm854_vm0, %v12061_v59, 0.0  ;;  %v13226_v15 = vpop.f32.mrf.mxu0  ;;  %v8502_v7 = vpop.f32.mrf.mxu1  ;;  %v14527_v55 = vunpack.i.h.bf16 %v14525_v28  ;;  %v14526_v45 = vunpack.i.l.bf16 %v14525_v28 }
 0x202   : > { %v4582_v0 = vsel %vm854_vm0, %v11815_v3, %v14532_v5  ;;  %v13066_v35 = vpack.c.bf16 %v18672_v11, %v18672_v11  ;;  %v13227_v26 = vadd.f32 %v13226_v15, %v13225_v21  ;;  %3906 = vst [vmem:[#allocation2 + $0x5d0] sm:$0xf] %v12916_v38  ;;  %v4581_v10 = vsel %vm854_vm0, %v11814_v18, %v14531_v1  ;;  %v14937_v12 = vld [vmem:[#allocation2 + $0x4b8] ss:$20 sps:$4 sm:$0xff]   ;;  %v14942_v21 = vld [vmem:[#allocation2 + $0x6bc] ss:$20 sps:$4 sm:$0xff]  }
 0x203   : > { %v13015_v39 = vpack.c.bf16 %v4582_v0, %v4582_v0  ;;  %v13067_v58 = vpack.c.bf16 %v18696_v56, %v18696_v56  ;;  %v13228_v48 = vpop.f32.mrf.mxu0  ;;  %v18766_v59 = vpop.f32.mrf.mxu1  ;;  %v13014_v22 = vpack.c.bf16 %v4581_v10, %v4581_v10  ;;  %v3429_v52 = vsel %vm854_vm0, %v11527_v50, %v14527_v55  ;;  %v14945_v46 = vld [vmem:[#allocation2 + $0x4e4] ss:$20 sps:$4 sm:$0xff]  }
 0x204   : > { %v3428_v3 = vsel %vm854_vm0, %v11526_v40, %v14526_v45  ;;  %5689 = vst [vmem:[#allocation2 + $0x290] sm:$0xf] %v13066_v35  ;;  %v18772_v11 = vadd.f32 %v18435_v14, %v18721_v37  ;;  %v18776_v28 = vadd.f32 %v18607_v13, %v18620_v44  ;;  %v18780_v56 = vadd.f32 %v18607_v13, %v18640_v49  ;;  %v11817_v5 = vld [vmem:[%s15728_s13 + $0x440] sm:$0xff]  ;;  %v14535_v14 = vpop.permute.xlu0 %14534  ;;  %v12062_v15 = vld [vmem:[%s15728_s13 + $0x212] sm:$0xff] }
 0x205   : > { %5062 = vst [vmem:[#allocation2 + $0x610] sm:$0xf] %v13015_v39  ;;  %v12919_v42 = vpack.c.bf16 %v3429_v52, %v3429_v52  ;;  %v12918_v18 = vpack.c.bf16 %v3428_v3, %v3428_v3  ;;  %5690 = vst [vmem:[#allocation2 + $0x2a4] sm:$0xf] %v13067_v58  ;;  %v14934_v37 = vld [vmem:[#allocation2 + $0x690] ss:$20 sps:$4 sm:$0xff]   ;;  %v13229_v38 = vpop.f32.mrf.mxu0  ;;  %v8505_v44 = vpop.f32.mrf.mxu1  ;;  %v13068_v1 = vpack.c.bf16 %v5211_v25, %v5211_v25  ;;  %v14541_v45 = vunpack.i.l.bf16 %v14540_v36 }
 0x206   : > { %5061 = vst [vmem:[#allocation2 + $0x5fc] sm:$0xf] %v13014_v22  ;;  %v13069_v49 = vpack.c.bf16 %v5212_v17, %v5212_v17  ;;  %v18785_v40 = vadd.f32 %v18402_v32, %v18689_v31  ;;  %v18789_v50 = vadd.f32 %v18452_v8, %v18725_v60  ;;  %v12063_v7 = vld [vmem:[%s15728_s13 + $0x21a] sm:$0xff]  ;;  %v18793_v0 = vadd.f32 %v13229_v38, %v13228_v48  ;;  %v11529_v32 = vld [vmem:[%s15728_s13 + $0x429] sm:$0xff] }
 0x207   : > { %3909 = vst [vmem:[#allocation2 + $0x60c] sm:$0xf] %v12919_v42  ;;  %3908 = vst [vmem:[#allocation2 + $0x5f8] sm:$0xf] %v12918_v18  ;;  %v18797_v55 = vadd.f32 %v18419_v4, %v18693_v61  ;;  %v11816_v25 = vld [vmem:[%s15728_s13 + $0x438] sm:$0xff]  ;;  %v14542_v17 = vunpack.i.h.bf16 %v14540_v36  ;;  %v11528_v35 = vld [vmem:[%s15728_s13 + $0x421] sm:$0xff]  ;;  %v6715_v31 = vadd.f32 %v18607_v13, %v18657_v53  ;;  %v6718_v8 = vadd.f32 %v18607_v13, %v18677_v47  ;;  %v13231_v60 = vpop.f32.mrf.mxu0 }
 0x208   : > { %v18806_v39 = vpop.f32.mrf.mxu1  ;;  %8699 = vmatmul.mubr.bf16.gmra.mxu1 %v14934_v37  ;;  %8892 = vmatmul.mubr.bf16.gmra.mxu0 %v14937_v12  ;;  %5691 = vst [vmem:[#allocation2 + $0x2b8] sm:$0xf] %v13068_v1  ;;  %5692 = vst [vmem:[#allocation2 + $0x2cc] sm:$0xf] %v13069_v49  ;;  %v14537_v4 = vunpack.i.h.bf16 %v14535_v14  ;;  %v14536_v61 = vunpack.i.l.bf16 %v14535_v14  ;;  %v18809_v10 = vadd.f32 %v18607_v13, %v13227_v26  ;;  %v5213_v58 = vsel %vm854_vm0, %v12062_v15, 0.0  ;;  %v12064_v36 = vld [vmem:[%s15728_s13 + $0x22a] sm:$0xff]  ;;  %v14550_v37 = vpop.permute.xlu1 %14549 }
 0x209   : > { %8706 = vmatprep.mubr.bf16.mxu1 %v14942_v21  ;;  %8899 = vmatprep.mubr.bf16.mxu0 %v14945_v46  ;;  %v4584_v53 = vsel %vm854_vm0, %v11817_v5, %v14542_v17  ;;  %v5214_v47 = vsel %vm854_vm0, %v12063_v7, 0.0  ;;  %v15027_v48 = vld [vmem:[%s20847_s5 + $0x30] sm:$0xff]   ;;  %v13232_v12 = vpop.f32.mrf.mxu0  ;;  %v4583_v3 = vsel %vm854_vm0, %v11816_v25, %v14541_v45  ;;  %v18824_v38 = vpop.permute.xlu0 %14544  ;;  %v13070_v15 = vpack.c.bf16 %v5213_v58, %v5213_v58  ;;  %v11819_v45 = vld [vmem:[%s15728_s13 + $0x458] sm:$0xff] }
 0x20a   : > { %v8510_v22 = vpop.f32.mrf.mxu1  ;;  %v13017_v52 = vpack.c.bf16 %v4584_v53, %v4584_v53  ;;  %v3431_v26 = vsel %vm854_vm0, %v11529_v32, %v14537_v4  ;;  %v3430_v21 = vsel %vm854_vm0, %v11528_v35, %v14536_v61  ;;  %v12065_v46 = vld [vmem:[%s15728_s13 + $0x232] sm:$0xff]  ;;  %v18822_v42 = vadd.f32 %v13232_v12, %v13231_v60  ;;  %13573 = vmatprep.subr.bf16.mxu0 %v15027_v48  ;;  %v12066_v35 = vld [vmem:[%s15728_s13 + $0x242] sm:$0xff]  ;;  %v12067_v32 = vld [vmem:[%s15728_s13 + $0x24a] sm:$0xff] }
 0x20b   : > { %v13016_v18 = vpack.c.bf16 %v4583_v3, %v4583_v3  ;;  %v12921_v5 = vpack.c.bf16 %v3431_v26, %v3431_v26  ;;  %v12920_v14 = vpack.c.bf16 %v3430_v21, %v3430_v21  ;;  %v13234_v44 = vpop.f32.mrf.mxu0  ;;  %v14943_v49 = vld [vmem:[#allocation2 + $0x4e0] ss:$20 sps:$4 sm:$0xff]   ;;  %v13071_v7 = vpack.c.bf16 %v5214_v47, %v5214_v47  ;;  %13574 = vmatpush3.bf16.msra.mxu0 %v15027_v48  ;;  %v14948_v4 = vld [vmem:[#allocation2 + $0x6e4] ss:$20 sps:$4 sm:$0xff]  }
 0x20c   : > { %v18826_v1 = vpop.f32.mrf.mxu1  ;;  %5064 = vst [vmem:[#allocation2 + $0x638] sm:$0xf] %v13017_v52  ;;  %v18829_v25 = vadd.f32 %v18506_v9, %v6715_v31  ;;  %v5215_v17 = vsel %vm854_vm0, %v12064_v36, 0.0  ;;  %v18837_v60 = vadd.f32 %v18607_v13, %v18704_v51  ;;  %v14951_v61 = vld [vmem:[#allocation2 + $0x50c] ss:$20 sps:$4 sm:$0xff]   ;;  %v5216_v53 = vsel %vm854_vm0, %v12065_v46, 0.0 }
 0x20d   : > { %5063 = vst [vmem:[#allocation2 + $0x624] sm:$0xf] %v13016_v18  ;;  %3911 = vst [vmem:[#allocation2 + $0x634] sm:$0xf] %v12921_v5  ;;  %v13072_v9 = vpack.c.bf16 %v5215_v17, %v5215_v17  ;;  %v11818_v31 = vld [vmem:[%s15728_s13 + $0x450] sm:$0xff]  ;;  %v11530_v58 = vld [vmem:[%s15728_s13 + $0x439] sm:$0xff]  ;;  %v13235_v12 = vpop.f32.mrf.mxu0  ;;  %v13073_v48 = vpack.c.bf16 %v5216_v53, %v5216_v53  ;;  %v18845_v51 = vadd.f32 %v18470_v27, %v18776_v28  ;;  %v14552_v21 = vunpack.i.h.bf16 %v14550_v37 }
 0x20e   : > { %3910 = vst [vmem:[#allocation2 + $0x620] sm:$0xf] %v12920_v14  ;;  %v12068_v47 = vld [vmem:[%s15728_s13 + $0x25a] sm:$0xff]  ;;  %v8513_v22 = vpop.f32.mrf.mxu1  ;;  %5693 = vst [vmem:[#allocation2 + $0x2e0] sm:$0xf] %v13070_v15  ;;  %v18848_v52 = vadd.f32 %v18524_v34, %v6718_v8  ;;  %v18852_v3 = vadd.f32 %v18488_v30, %v18780_v56  ;;  %v18854_v26 = vadd.f32 %v13235_v12, %v13234_v44  ;;  %v14551_v46 = vunpack.i.l.bf16 %v14550_v37  ;;  %v12069_v37 = vld [vmem:[%s15728_s13 + $0x262] sm:$0xff] }
 0x20f   : > { %v14940_v36 = vld [vmem:[#allocation2 + $0x6b8] ss:$20 sps:$4 sm:$0xff]   ;;  %5694 = vst [vmem:[#allocation2 + $0x2f4] sm:$0xf] %v13071_v7  ;;  %5695 = vst [vmem:[#allocation2 + $0x308] sm:$0xf] %v13072_v9  ;;  %v14547_v5 = vunpack.i.h.bf16 %v18824_v38  ;;  %v6726_v27 = vadd.f32 %v18607_v13, %v18741_v33  ;;  %v6734_v34 = vadd.f32 %v18607_v13, %v18793_v0  ;;  %v13237_v28 = vpop.f32.mrf.mxu0  ;;  %v14546_v30 = vunpack.i.l.bf16 %v18824_v38  ;;  %v14560_v9 = vpop.permute.xlu1 %14559 }
 0x210   : > { %v11531_v18 = vld [vmem:[%s15728_s13 + $0x441] sm:$0xff]  ;;  %v18862_v8 = vpop.f32.mrf.mxu1  ;;  %8707 = vmatmul.mubr.bf16.gmra.mxu1 %v14940_v36  ;;  %8900 = vmatmul.mubr.bf16.gmra.mxu0 %v14943_v49  ;;  %5696 = vst [vmem:[#allocation2 + $0x31c] sm:$0xf] %v13073_v48  ;;  %v18867_v56 = vadd.f32 %v18578_v63, %v18809_v10  ;;  %v4586_v14 = vsel %vm854_vm0, %v11819_v45, %v14552_v21  ;;  %v5217_v33 = vsel %vm854_vm0, %v12066_v35, 0.0  ;;  %v5218_v0 = vsel %vm854_vm0, %v12067_v32, 0.0  ;;  %v11821_v32 = vld [vmem:[%s15728_s13 + $0x470] sm:$0xff]  ;;  %v14555_v36 = vpop.permute.xlu0 %14554 }
 0x211   : > { %8714 = vmatprep.mubr.bf16.mxu1 %v14948_v4  ;;  %8907 = vmatprep.mubr.bf16.mxu0 %v14951_v61  ;;  %v5219_v44 = vsel %vm854_vm0, %v12068_v47, 0.0  ;;  %v13238_v49 = vpop.f32.mrf.mxu0  ;;  %v13019_v15 = vpack.c.bf16 %v4586_v14, %v4586_v14  ;;  %v4585_v63 = vsel %vm854_vm0, %v11818_v31, %v14551_v46  ;;  %v3433_v10 = vsel %vm854_vm0, %v11531_v18, %v14547_v5  ;;  %v14955_v45 = vld [vmem:[#allocation2 + $0x70c] ss:$20 sps:$4 sm:$0xff]   ;;  %v12070_v47 = vld [vmem:[%s15728_s13 + $0x272] sm:$0xff]  ;;  %v14949_v48 = vld [vmem:[#allocation2 + $0x508] ss:$20 sps:$4 sm:$0xff]  }
 0x212   : > { %v8518_v38 = vpop.f32.mrf.mxu1  ;;  %v3432_v7 = vsel %vm854_vm0, %v11530_v58, %v14546_v30  ;;  %v13239_v17 = vadd.f32 %v13238_v49, %v13237_v28  ;;  %v13018_v4 = vpack.c.bf16 %v4585_v63, %v4585_v63  ;;  %v12923_v35 = vpack.c.bf16 %v3433_v10, %v3433_v10  ;;  %v11820_v53 = vld [vmem:[%s15728_s13 + $0x468] sm:$0xff]  ;;  %v14946_v30 = vld [vmem:[#allocation2 + $0x6e0] ss:$20 sps:$4 sm:$0xff]  }
 0x213   : > { %v12922_v61 = vpack.c.bf16 %v3432_v7, %v3432_v7  ;;  %v13240_v12 = vpop.f32.mrf.mxu0  ;;  %5066 = vst [vmem:[#allocation2 + $0x660] sm:$0xf] %v13019_v15  ;;  %v13074_v31 = vpack.c.bf16 %v5217_v33, %v5217_v33  ;;  %v13075_v21 = vpack.c.bf16 %v5218_v0, %v5218_v0  ;;  %v5220_v46 = vsel %vm854_vm0, %v12069_v37, 0.0  ;;  %v14958_v18 = vld [vmem:[#allocation2 + $0x534] ss:$20 sps:$4 sm:$0xff]   ;;  %v20957_v0 = vld [vmem:[#allocation17_spill] sm:$0xff] }
 0x214   : > { %v18880_v22 = vpop.f32.mrf.mxu1  ;;  %v13076_v58 = vpack.c.bf16 %v5219_v44, %v5219_v44  ;;  %5065 = vst [vmem:[#allocation2 + $0x64c] sm:$0xf] %v13018_v4  ;;  %3913 = vst [vmem:[#allocation2 + $0x65c] sm:$0xf] %v12923_v35  ;;  %v13077_v5 = vpack.c.bf16 %v5220_v46, %v5220_v46  ;;  %v18885_v28 = vadd.f32 %v18542_v24, %v18837_v60  ;;  %v14562_v44 = vunpack.i.h.bf16 %v14560_v9  ;;  %v12071_v15 = vld [vmem:[%s15728_s13 + $0x27a] sm:$0xff]  ;;  %v11532_v60 = vld [vmem:[%s15728_s13 + $0x451] sm:$0xff] }
 0x215   : > { %3912 = vst [vmem:[#allocation2 + $0x648] sm:$0xf] %v12922_v61  ;;  %v13241_v14 = vpop.f32.mrf.mxu0  ;;  %5697 = vst [vmem:[#allocation2 + $0x330] sm:$0xf] %v13074_v31  ;;  %v18888_v33 = vadd.f32 %v18598_v6, %v6734_v34  ;;  %v18891_v37 = vadd.f32 %v20957_v0, %v6726_v27  ;;  %v14561_v38 = vunpack.i.l.bf16 %v14560_v9  ;;  %v6747_v63 = vadd.f32 %v18607_v13, %v13239_v17  ;;  %v11533_v10 = vld [vmem:[%s15728_s13 + $0x459] sm:$0xff] }
 0x216   : > { %v8521_v49 = vpop.f32.mrf.mxu1  ;;  %5698 = vst [vmem:[#allocation2 + $0x344] sm:$0xf] %v13075_v21  ;;  %5699 = vst [vmem:[#allocation2 + $0x358] sm:$0xf] %v13076_v58  ;;  %v13242_v24 = vadd.f32 %v13241_v14, %v13240_v12  ;;  %v14557_v7 = vunpack.i.h.bf16 %v14555_v36  ;;  %v4588_v6 = vsel %vm854_vm0, %v11821_v32, %v14562_v44  ;;  %v14556_v34 = vunpack.i.l.bf16 %v14555_v36  ;;  %v12072_v32 = vld [vmem:[%s15728_s13 + $0x28a] sm:$0xff]  ;;  %v12073_v31 = vld [vmem:[%s15728_s13 + $0x292] sm:$0xff]  ;;  %v14565_v14 = vpop.permute.xlu0 %14564 }
 0x217   : > { %5700 = vst [vmem:[#allocation2 + $0x36c] sm:$0xf] %v13077_v5  ;;  %v13461_v4 = vpop.f32.mrf.mxu0  ;;  %v4587_v27 = vsel %vm854_vm0, %v11820_v53, %v14561_v38  ;;  %v5221_v61 = vsel %vm854_vm0, %v12070_v47, 0.0  ;;  %v6739_v17 = vadd.f32 %v18607_v13, %v18822_v42  ;;  %v6742_v9 = vadd.f32 %v18607_v13, %v18854_v26  ;;  %v20958_v58 = vld [vmem:[#allocation12_spill] sm:$0xff]  ;;  %v12074_v49 = vld [vmem:[%s15728_s13 + $0x2a2] sm:$0xff] }
 0x218   : > { %v18897_v35 = vpop.f32.mrf.mxu1  ;;  %8715 = vmatmul.mubr.bf16.gmra.mxu1 %v14946_v30  ;;  %8908 = vmatmul.mubr.bf16.gmra.mxu0 %v14949_v48  ;;  %v6750_v12 = vadd.f32 %v18607_v13, %v13242_v24  ;;  %v5222_v48 = vsel %vm854_vm0, %v12071_v15, 0.0  ;;  %v13021_v21 = vpack.c.bf16 %v4588_v6, %v4588_v6  ;;  %v13020_v47 = vpack.c.bf16 %v4587_v27, %v4587_v27  ;;  %v14570_v30 = vpop.permute.xlu1 %14569  ;;  %v14953_v38 = vld [vmem:[#allocation2 + $0x708] ss:$20 sps:$4 sm:$0xff]   ;;  %v14956_v15 = vld [vmem:[#allocation2 + $0x530] ss:$20 sps:$4 sm:$0xff]  }
 0x219   : > { %8722 = vmatprep.mubr.bf16.mxu1 %v14955_v45  ;;  %8915 = vmatprep.mubr.bf16.mxu0 %v14958_v18  ;;  %v6948_v53 = vpop.f32.mrf.mxu0  ;;  %v3435_v46 = vsel %vm854_vm0, %v11533_v10, %v14557_v7  ;;  %v3434_v42 = vsel %vm854_vm0, %v11532_v60, %v14556_v34  ;;  %v13078_v45 = vpack.c.bf16 %v5221_v61, %v5221_v61  ;;  %v11823_v18 = vld [vmem:[%s15728_s13 + $0x488] sm:$0xff]  ;;  %v20961_v60 = vld [vmem:[#allocation22_spill] sm:$0xff]  ;;  %v5223_v7 = vsel %vm854_vm0, %v12072_v32, 0.0 }
 0x21a   : > { %v8526_v36 = vpop.f32.mrf.mxu1  ;;  %v18913_v26 = vadd.f32 %v6948_v53, %v20958_v58  ;;  %v12925_v13 = vpack.c.bf16 %v3435_v46, %v3435_v46  ;;  %v12924_v5 = vpack.c.bf16 %v3434_v42, %v3434_v42  ;;  %5068 = vst [vmem:[#allocation2 + $0x688] sm:$0xf] %v13021_v21  ;;  %5067 = vst [vmem:[#allocation2 + $0x674] sm:$0xf] %v13020_v47  ;;  %v5224_v6 = vsel %vm854_vm0, %v12073_v31, 0.0  ;;  %v12075_v27 = vld [vmem:[%s15728_s13 + $0x2aa] sm:$0xff] }
 0x21b   : > { %v13462_v0 = vpop.f32.mrf.mxu0  ;;  %v13079_v24 = vpack.c.bf16 %v5222_v48, %v5222_v48  ;;  %v18920_v10 = vadd.f32 %v20961_v60, %v6747_v63  ;;  %v12076_v34 = vld [vmem:[%s15728_s13 + $0x2ba] sm:$0xff]  ;;  %v12077_v61 = vld [vmem:[%s15728_s13 + $0x2c2] sm:$0xff]  ;;  %5701 = vst [vmem:[#allocation2 + $0x380] sm:$0xf] %v13078_v45  ;;  %v13080_v63 = vpack.c.bf16 %v5223_v7, %v5223_v7  ;;  %v13081_v48 = vpack.c.bf16 %v5224_v6, %v5224_v6 }
 0x21c   : > { %20959 = vst [vmem:[#allocation10_spill] sm:$0xff] %v18913_v26  ;;  %v18917_v44 = vpop.f32.mrf.mxu1  ;;  %v20962_v53 = vld [vmem:[#allocation11_spill] sm:$0xff]  ;;  %9389 = vrot.lane.b32.xlu0 %v18913_v26, %s15615_s15  ;;  %3915 = vst [vmem:[#allocation2 + $0x684] sm:$0xf] %v12925_v13  ;;  %v14964_v21 = vld [vmem:[#allocation2 + $0x55c] ss:$20 sps:$4 sm:$0xff]   ;;  %v14572_v13 = vunpack.i.h.bf16 %v14570_v30  ;;  %v14571_v6 = vunpack.i.l.bf16 %v14570_v30  ;;  %v14566_v26 = vunpack.i.l.bf16 %v14565_v14 }
 0x21d   : > { %20960 = vst [vmem:[#allocation17_spill] sm:$0xff] %v18917_v44  ;;  %v18928_v36 = vadd.f32 %v13461_v4, %v20962_v53  ;;  %v14961_v46 = vld [vmem:[#allocation2 + $0x734] ss:$20 sps:$4 sm:$0xff]   ;;  %3914 = vst [vmem:[#allocation2 + $0x670] sm:$0xf] %v12924_v5  ;;  %v6951_v32 = vpop.f32.mrf.mxu0  ;;  %v18936_v4 = vadd.f32 %v18679_v57, %v6750_v12  ;;  %v20965_v58 = vld [vmem:[#allocation21_spill] sm:$0xff] }
 0x21e   : > { %v8529_v31 = vpop.f32.mrf.mxu1  ;;  %5702 = vst [vmem:[#allocation2 + $0x394] sm:$0xf] %v13079_v24  ;;  %v20964_v47 = vld [vmem:[#allocation19_spill] sm:$0xff]  ;;  %v18939_v60 = vadd.f32 %v20965_v58, %v6742_v9  ;;  %v20966_v5 = vld [vmem:[#allocation14_spill] sm:$0xff]  ;;  %5703 = vst [vmem:[#allocation2 + $0x3a8] sm:$0xf] %v13080_v63  ;;  %v14567_v24 = vunpack.i.h.bf16 %v14565_v14  ;;  %v4590_v63 = vsel %vm854_vm0, %v11823_v18, %v14572_v13 }
 0x21f   : > { %20963 = vst [vmem:[#allocation12_spill] sm:$0xff] %v18928_v36  ;;  %v18933_v42 = vadd.f32 %v20964_v47, %v6739_v17  ;;  %v18942_v45 = vadd.f32 %v6951_v32, %v20966_v5  ;;  %5704 = vst [vmem:[#allocation2 + $0x3bc] sm:$0xf] %v13081_v48  ;;  %v11822_v7 = vld [vmem:[%s15728_s13 + $0x480] sm:$0xff]  ;;  %v11534_v53 = vld [vmem:[%s15728_s13 + $0x469] sm:$0xff]  ;;  %v18947_v17 = vpop.permute.xlu1 %14579  ;;  %v13465_v12 = vpop.f32.mrf.mxu0  ;;  %v5225_v30 = vsel %vm854_vm0, %v12074_v49, 0.0  ;;  %v13023_v14 = vpack.c.bf16 %v4590_v63, %v4590_v63 }
 0x220   : > { %v11535_v31 = vld [vmem:[%s15728_s13 + $0x471] sm:$0xff]  ;;  %v18952_v9 = vpop.f32.mrf.mxu1  ;;  %8723 = vmatmul.mubr.bf16.gmra.mxu1 %v14953_v38  ;;  %8916 = vmatmul.mubr.bf16.gmra.mxu0 %v14956_v15  ;;  %v5227_v48 = vsel %vm854_vm0, %v12076_v34, 0.0  ;;  %v5228_v38 = vsel %vm854_vm0, %v12077_v61, 0.0  ;;  %v4589_v18 = vsel %vm854_vm0, %v11822_v7, %v14571_v6  ;;  %v3436_v58 = vsel %vm854_vm0, %v11534_v53, %v14566_v26  ;;  %v11825_v5 = vld [vmem:[%s15728_s13 + $0x4a0] sm:$0xff]  ;;  %v14575_v7 = vpop.permute.xlu0 %14574 }
 0x221   : > { %20967 = vst [vmem:[#allocation22_spill] sm:$0xff] %v18942_v45  ;;  %v20968_v47 = vld [vmem:[#allocation13_spill] sm:$0xff]  ;;  %20970 = vst [vmem:[#allocation19_spill] sm:$0xff] %v18952_v9  ;;  %9391 = vrot.lane.b32.xlu1 %v18942_v45, %s15615_s15  ;;  %9393 = vrot.lane.b32.xlu0 %v18928_v36, %s15615_s15  ;;  %v6964_v15 = vpop.f32.mrf.mxu0  ;;  %v3437_v49 = vsel %vm854_vm0, %v11535_v31, %v14567_v24  ;;  %v20971_v34 = vld [vmem:[#allocation16_spill] sm:$0xff]  ;;  %v13022_v63 = vpack.c.bf16 %v4589_v18, %v4589_v18 }
 0x222   : > { %v18950_v57 = vadd.f32 %v13462_v0, %v20968_v47  ;;  %v5226_v0 = vsel %vm854_vm0, %v12075_v27, 0.0  ;;  %v8534_v32 = vpop.f32.mrf.mxu1  ;;  %8730 = vmatprep.mubr.bf16.mxu1 %v14961_v46  ;;  %8923 = vmatprep.mubr.bf16.mxu0 %v14964_v21  ;;  %v11824_v13 = vld [vmem:[%s15728_s13 + $0x498] sm:$0xff]  ;;  %v14582_v27 = vunpack.i.h.bf16 %v18947_v17  ;;  %v18970_v47 = vadd.f32 %v6964_v15, %v20971_v34  ;;  %5070 = vst [vmem:[#allocation2 + $0x6b0] sm:$0xf] %v13023_v14  ;;  %v11537_v36 = vld [vmem:[%s15728_s13 + $0x489] sm:$0xff] }
 0x223   : > { %v14962_v61 = vld [vmem:[#allocation2 + $0x558] ss:$20 sps:$4 sm:$0xff]   ;;  %v12927_v46 = vpack.c.bf16 %v3437_v49, %v3437_v49  ;;  %v12926_v21 = vpack.c.bf16 %v3436_v58, %v3436_v58  ;;  %v11536_v32 = vld [vmem:[%s15728_s13 + $0x481] sm:$0xff]  ;;  %v18975_v31 = vpop.permute.xlu1 %14589  ;;  %v13466_v26 = vpop.f32.mrf.mxu0  ;;  %v13082_v24 = vpack.c.bf16 %v5225_v30, %v5225_v30  ;;  %v13083_v45 = vpack.c.bf16 %v5226_v0, %v5226_v0  ;;  %v14967_v14 = vld [vmem:[#allocation2 + $0x75c] ss:$20 sps:$4 sm:$0xff]  }
 0x224   : > { %20969 = vst [vmem:[#allocation11_spill] sm:$0xff] %v18950_v57  ;;  %20972 = vst [vmem:[#allocation21_spill] sm:$0xff] %v18970_v47  ;;  %v12078_v6 = vld [vmem:[%s15728_s13 + $0x2d2] sm:$0xff]  ;;  %v18977_v53 = vpop.f32.mrf.mxu1  ;;  %v13084_v9 = vpack.c.bf16 %v5227_v48, %v5227_v48  ;;  %v13085_v15 = vpack.c.bf16 %v5228_v38, %v5228_v38  ;;  %v12079_v34 = vld [vmem:[%s15728_s13 + $0x2da] sm:$0xff]  ;;  %v4592_v18 = vsel %vm854_vm0, %v11825_v5, %v14582_v27  ;;  %v14581_v30 = vunpack.i.l.bf16 %v18947_v17 }
 0x225   : > { %v14959_v44 = vld [vmem:[#allocation2 + $0x730] ss:$20 sps:$4 sm:$0xff]   ;;  %9395 = vrot.lane.b32.xlu1 %v18950_v57, %s15615_s15  ;;  %9397 = vrot.lane.b32.xlu0 %v18970_v47, %s15615_s15  ;;  %5069 = vst [vmem:[#allocation2 + $0x69c] sm:$0xf] %v13022_v63  ;;  %3917 = vst [vmem:[#allocation2 + $0x6ac] sm:$0xf] %v12927_v46  ;;  %v6967_v0 = vpop.f32.mrf.mxu0  ;;  %v13025_v49 = vpack.c.bf16 %v4592_v18, %v4592_v18  ;;  %v14577_v58 = vunpack.i.h.bf16 %v14575_v7  ;;  %v14576_v57 = vunpack.i.l.bf16 %v14575_v7  ;;  %v14592_v27 = vunpack.i.h.bf16 %v18975_v31 }
 0x226   : > { %3916 = vst [vmem:[#allocation2 + $0x698] sm:$0xf] %v12926_v21  ;;  %v8537_v48 = vpop.f32.mrf.mxu1  ;;  %v14970_v38 = vld [vmem:[#allocation2 + $0x584] ss:$20 sps:$4 sm:$0xff]   ;;  %5705 = vst [vmem:[#allocation2 + $0x3d0] sm:$0xf] %v13082_v24  ;;  %v4591_v17 = vsel %vm854_vm0, %v11824_v13, %v14581_v30  ;;  %v18995_v24 = vpop.permute.xlu0 %14584 }
 0x227   : > { %5706 = vst [vmem:[#allocation2 + $0x3e4] sm:$0xf] %v13083_v45  ;;  %5707 = vst [vmem:[#allocation2 + $0x3f8] sm:$0xf] %v13084_v9  ;;  %v20973_v47 = vld [vmem:[#allocation15_spill] sm:$0xff]  ;;  %v20975_v46 = vld [vmem:[#allocation20_spill] sm:$0xff]  ;;  %v13469_v45 = vpop.f32.mrf.mxu0  ;;  %v13024_v7 = vpack.c.bf16 %v4591_v17, %v4591_v17 }
 0x228   : > { %5708 = vst [vmem:[#allocation2 + $0x40c] sm:$0xf] %v13085_v15  ;;  %v18987_v63 = vadd.f32 %v13465_v12, %v20973_v47  ;;  %v18990_v21 = vadd.f32 %v6967_v0, %v20975_v46  ;;  %v12080_v5 = vld [vmem:[%s15728_s13 + $0x2ea] sm:$0xff]  ;;  %v18997_v9 = vpop.f32.mrf.mxu1  ;;  %8731 = vmatmul.mubr.bf16.gmra.mxu1 %v14959_v44  ;;  %8924 = vmatmul.mubr.bf16.gmra.mxu0 %v14962_v61  ;;  %5072 = vst [vmem:[#allocation2 + $0x6d8] sm:$0xf] %v13025_v49  ;;  %v5229_v15 = vsel %vm854_vm0, %v12078_v6, 0.0 }
 0x229   : > { %v3439_v12 = vsel %vm854_vm0, %v11537_v36, %v14577_v58  ;;  %v3438_v47 = vsel %vm854_vm0, %v11536_v32, %v14576_v57  ;;  %v12081_v18 = vld [vmem:[%s15728_s13 + $0x2f2] sm:$0xff]  ;;  %v20977_v30 = vld [vmem:[#allocation18_spill] sm:$0xff]  ;;  %v5230_v36 = vsel %vm854_vm0, %v12079_v34, 0.0  ;;  %v19012_v57 = vpop.permute.xlu1 %14599  ;;  %v6980_v61 = vpop.f32.mrf.mxu0  ;;  %8738 = vmatprep.mubr.bf16.mxu1 %v14967_v14  ;;  %8931 = vmatprep.mubr.bf16.mxu0 %v14970_v38  ;;  %5071 = vst [vmem:[#allocation2 + $0x6c4] sm:$0xf] %v13024_v7  ;;  %v5231_v49 = vsel %vm854_vm0, %v12080_v5, 0.0 }
 0x22a   : > { %20974 = vst [vmem:[#allocation14_spill] sm:$0xff] %v18987_v63  ;;  %20976 = vst [vmem:[#allocation13_spill] sm:$0xff] %v18990_v21  ;;  %v11827_v13 = vld [vmem:[%s15728_s13 + $0x4b8] sm:$0xff]  ;;  %v19005_v0 = vadd.f32 %v13466_v26, %v20977_v30  ;;  %9399 = vrot.lane.b32.xlu1 %v18990_v21, %s15615_s15  ;;  %9401 = vrot.lane.b32.xlu0 %v18987_v63, %s15615_s15  ;;  %v12929_v44 = vpack.c.bf16 %v3439_v12, %v3439_v12  ;;  %v8542_v32 = vpop.f32.mrf.mxu1  ;;  %v11826_v58 = vld [vmem:[%s15728_s13 + $0x4b0] sm:$0xff]  ;;  %v5232_v12 = vsel %vm854_vm0, %v12081_v18, 0.0 }
 0x22b   : > { %v12928_v6 = vpack.c.bf16 %v3438_v47, %v3438_v47  ;;  %v13086_v26 = vpack.c.bf16 %v5229_v15, %v5229_v15  ;;  %v13087_v48 = vpack.c.bf16 %v5230_v36, %v5230_v36  ;;  %v11538_v46 = vld [vmem:[%s15728_s13 + $0x499] sm:$0xff]  ;;  %v11539_v17 = vld [vmem:[%s15728_s13 + $0x4a1] sm:$0xff]  ;;  %v19019_v34 = vadd.f32 %v6980_v61, %v18702_v62  ;;  %v12083_v7 = vld [vmem:[%s15728_s13 + $0x30a] sm:$0xff]  ;;  %v19026_v15 = vpop.permute.xlu0 %14594  ;;  %v13470_v36 = vpop.f32.mrf.mxu0 }
 0x22c   : > { %20978 = vst [vmem:[#allocation16_spill] sm:$0xff] %v19005_v0  ;;  %3919 = vst [vmem:[#allocation2 + $0x6d4] sm:$0xf] %v12929_v44  ;;  %v13088_v30 = vpack.c.bf16 %v5231_v49, %v5231_v49  ;;  %v4594_v14 = vsel %vm854_vm0, %v11827_v13, %v14592_v27  ;;  %v12082_v38 = vld [vmem:[%s15728_s13 + $0x302] sm:$0xff]  ;;  %v12084_v47 = vld [vmem:[%s15728_s13 + $0x31a] sm:$0xff]  ;;  %v19028_v5 = vpop.f32.mrf.mxu1  ;;  %v13089_v62 = vpack.c.bf16 %v5232_v12, %v5232_v12  ;;  %v14591_v18 = vunpack.i.l.bf16 %v18975_v31 }
 0x22d   : > { %20979 = vst [vmem:[#allocation15_spill] sm:$0xff] %v19019_v34  ;;  %v14965_v32 = vld [vmem:[#allocation2 + $0x758] ss:$20 sps:$4 sm:$0xff]   ;;  %v14968_v63 = vld [vmem:[#allocation2 + $0x580] ss:$20 sps:$4 sm:$0xff]   ;;  %v13027_v44 = vpack.c.bf16 %v4594_v14, %v4594_v14  ;;  %v14587_v27 = vunpack.i.h.bf16 %v18995_v24 }
 0x22e   : > { %3918 = vst [vmem:[#allocation2 + $0x6c0] sm:$0xf] %v12928_v6  ;;  %5709 = vst [vmem:[#allocation2 + $0x420] sm:$0xf] %v13086_v26  ;;  %v12085_v13 = vld [vmem:[%s15728_s13 + $0x322] sm:$0xff]  ;;  %9403 = vrot.lane.b32.xlu1 %v19005_v0, %s15615_s15  ;;  %9405 = vrot.lane.b32.xlu0 %v19019_v34, %s15615_s15  ;;  %v14586_v6 = vunpack.i.l.bf16 %v18995_v24  ;;  %v14602_v26 = vunpack.i.h.bf16 %v19012_v57  ;;  %v8545_v31 = vpop.f32.mrf.mxu1 }
 0x22f   : > { %5710 = vst [vmem:[#allocation2 + $0x434] sm:$0xf] %v13087_v48  ;;  %v20980_v61 = vld [vmem:[#allocation23_spill] sm:$0xff]  ;;  %5711 = vst [vmem:[#allocation2 + $0x448] sm:$0xf] %v13088_v30  ;;  %v6983_v48 = vpop.f32.mrf.mxu0  ;;  %v3441_v14 = vsel %vm854_vm0, %v11539_v17, %v14587_v27  ;;  %v14597_v30 = vunpack.i.h.bf16 %v19026_v15  ;;  %v5234_v17 = vsel %vm854_vm0, %v12083_v7, 0.0 }
 0x230   : > { %v19034_v49 = vadd.f32 %v13469_v45, %v20980_v61  ;;  %v14973_v21 = vld [vmem:[#allocation2 + $0x5ac] ss:$20 sps:$4 sm:$0xff]   ;;  %v14974_v12 = vld [vmem:[#allocation2 + $0x290] ss:$20 sps:$4 sm:$0xff]   ;;  %5712 = vst [vmem:[#allocation2 + $0x45c] sm:$0xf] %v13089_v62  ;;  %v4593_v45 = vsel %vm854_vm0, %v11826_v58, %v14591_v18  ;;  %v14601_v61 = vunpack.i.l.bf16 %v19012_v57  ;;  %v19047_v24 = vadd.f32 %v6983_v48, %v18717_v16  ;;  %8739 = vmatmul.mubr.bf16.gmra.mxu1 %v14965_v32 }
 0x231   : > { %5074 = vst [vmem:[#allocation2 + $0x700] sm:$0xf] %v13027_v44  ;;  %v13026_v34 = vpack.c.bf16 %v4593_v45, %v4593_v45  ;;  %v12931_v0 = vpack.c.bf16 %v3441_v14, %v3441_v14  ;;  %v3440_v31 = vsel %vm854_vm0, %v11538_v46, %v14586_v6  ;;  %v13473_v62 = vpop.f32.mrf.mxu0  ;;  %v19050_v44 = vpop.f32.mrf.mxu1  ;;  %8932 = vmatmul.mubr.bf16.gmra.mxu0 %v14968_v63  ;;  %v5233_v57 = vsel %vm854_vm0, %v12082_v38, 0.0  ;;  %v11828_v16 = vld [vmem:[%s15728_s13 + $0x4c8] sm:$0xff]  ;;  %v11829_v27 = vld [vmem:[%s15728_s13 + $0x4d0] sm:$0xff]  ;;  %v11541_v48 = vld [vmem:[%s15728_s13 + $0x4b9] sm:$0xff] }
 0x232   : > { %20981 = vst [vmem:[#allocation20_spill] sm:$0xff] %v19034_v49  ;;  %20982 = vst [vmem:[#allocation18_spill] sm:$0xff] %v19047_v24  ;;  %v12930_v58 = vpack.c.bf16 %v3440_v31, %v3440_v31  ;;  %v5235_v18 = vsel %vm854_vm0, %v12084_v47, 0.0  ;;  %v19059_v45 = vadd.f32 %v13470_v36, %v18708_v23  ;;  %9407 = vrot.lane.b32.xlu1 %v19047_v24, %s15615_s15  ;;  %9409 = vrot.lane.b32.xlu0 %v19034_v49, %s15615_s15  ;;  %v12086_v38 = vld [vmem:[%s15728_s13 + $0x332] sm:$0xff]  ;;  %v12087_v7 = vld [vmem:[%s15728_s13 + $0x33a] sm:$0xff]  ;;  %v19068_v47 = vpop.permute.xlu1 %14609 }
 0x233   : > { %5073 = vst [vmem:[#allocation2 + $0x6ec] sm:$0xf] %v13026_v34  ;;  %3921 = vst [vmem:[#allocation2 + $0x6fc] sm:$0xf] %v12931_v0  ;;  %v13090_v63 = vpack.c.bf16 %v5233_v57, %v5233_v57  ;;  %v5236_v46 = vsel %vm854_vm0, %v12085_v13, 0.0  ;;  %v6996_v23 = vpop.f32.mrf.mxu0  ;;  %v8550_v36 = vpop.f32.mrf.mxu1  ;;  %8939 = vmatprep.mubr.bf16.mxu0 %v14973_v21  ;;  %13507 = vmatprep.mubr.bf16.mxu1 %v14974_v12  ;;  %v13091_v32 = vpack.c.bf16 %v5234_v17, %v5234_v17  ;;  %v11540_v31 = vld [vmem:[%s15728_s13 + $0x4b1] sm:$0xff] }
 0x234   : > { %20983 = vst [vmem:[#allocation23_spill] sm:$0xff] %v19059_v45  ;;  %3920 = vst [vmem:[#allocation2 + $0x6e8] sm:$0xf] %v12930_v58  ;;  %v13092_v6 = vpack.c.bf16 %v5235_v18, %v5235_v18  ;;  %v13093_v14 = vpack.c.bf16 %v5236_v46, %v5236_v46  ;;  %v12088_v34 = vld [vmem:[%s15728_s13 + $0x34a] sm:$0xff]  ;;  %v12089_v49 = vld [vmem:[%s15728_s13 + $0x352] sm:$0xff]  ;;  %v19074_v0 = vadd.f32 %v6996_v23, %v18737_v2 }
 0x235   : > { %v14971_v57 = vld [vmem:[#allocation2 + $0x5a8] ss:$20 sps:$4 sm:$0xff]   ;;  %5713 = vst [vmem:[#allocation2 + $0x470] sm:$0xf] %v13090_v63  ;;  %v4596_v13 = vsel %vm854_vm0, %v11829_v27, %v14602_v26  ;;  %v4595_v24 = vsel %vm854_vm0, %v11828_v16, %v14601_v61  ;;  %v3443_v21 = vsel %vm854_vm0, %v11541_v48, %v14597_v30  ;;  %v13474_v12 = vpop.f32.mrf.mxu0  ;;  %v19079_v58 = vpop.f32.mrf.mxu1  ;;  %v14975_v17 = vld [vmem:[#allocation2 + $0x2b8] ss:$20 sps:$4 sm:$0xff]   ;;  %v19082_v23 = vadd.f32 %v13473_v62, %v18730_v41 }
 0x236   : > { %20984 = vst [vmem:[#allocation24_spill] sm:$0xff] %v19074_v0  ;;  %5714 = vst [vmem:[#allocation2 + $0x484] sm:$0xf] %v13091_v32  ;;  %v13029_v18 = vpack.c.bf16 %v4596_v13, %v4596_v13  ;;  %v13028_v46 = vpack.c.bf16 %v4595_v24, %v4595_v24  ;;  %v12933_v2 = vpack.c.bf16 %v3443_v21, %v3443_v21  ;;  %9411 = vrot.lane.b32.xlu1 %v19059_v45, %s15615_s15  ;;  %v14978_v26 = vld [vmem:[#allocation2 + $0x5d4] ss:$20 sps:$4 sm:$0xff]   ;;  %v14605_v27 = vpop.permute.xlu0 %14604  ;;  %v11830_v21 = vld [vmem:[%s15728_s13 + $0x4e0] sm:$0xff] }
 0x237   : > { %5715 = vst [vmem:[#allocation2 + $0x498] sm:$0xf] %v13092_v6  ;;  %5716 = vst [vmem:[#allocation2 + $0x4ac] sm:$0xf] %v13093_v14  ;;  %9413 = vrot.lane.b32.xlu0 %v19074_v0, %s15615_s15  ;;  %v14596_v61 = vunpack.i.l.bf16 %v19026_v15  ;;  %v11831_v30 = vld [vmem:[%s15728_s13 + $0x4e8] sm:$0xff]  ;;  %v14612_v16 = vunpack.i.h.bf16 %v19068_v47  ;;  %v6999_v24 = vpop.f32.mrf.mxu0  ;;  %v8553_v48 = vpop.f32.mrf.mxu1  ;;  %v5237_v41 = vsel %vm854_vm0, %v12086_v38, 0.0 }
 0x238   : > { %20985 = vst [vmem:[#allocation25_spill] sm:$0xff] %v19082_v23  ;;  %v14979_v63 = vld [vmem:[#allocation2 + $0x2e0] ss:$20 sps:$4 sm:$0xff]   ;;  %5076 = vst [vmem:[#allocation2 + $0x728] sm:$0xf] %v13029_v18  ;;  %v5238_v62 = vsel %vm854_vm0, %v12087_v7, 0.0  ;;  %v19096_v32 = vadd.f32 %v6999_v24, %v18753_v43  ;;  %v13094_v14 = vpack.c.bf16 %v5237_v41, %v5237_v41  ;;  %13508 = vmatmul.mubr.bf16.vlgmr.msra.gmra.mxu1 %v14975_v17  ;;  %v14611_v43 = vunpack.i.l.bf16 %v19068_v47 }
 0x239   : > { %5075 = vst [vmem:[#allocation2 + $0x714] sm:$0xf] %v13028_v46  ;;  %3923 = vst [vmem:[#allocation2 + $0x724] sm:$0xf] %v12933_v2  ;;  %v5239_v36 = vsel %vm854_vm0, %v12088_v34, 0.0  ;;  %v5240_v15 = vsel %vm854_vm0, %v12089_v49, 0.0  ;;  %v3442_v6 = vsel %vm854_vm0, %v11540_v31, %v14596_v61  ;;  %v13095_v13 = vpack.c.bf16 %v5238_v62, %v5238_v62  ;;  %v19101_v46 = vpop.f32.mrf.mxu0  ;;  %v19103_v38 = vpop.f32.mrf.mxu1  ;;  %8940 = vmatmul.mubr.bf16.gmra.mxu0 %v14971_v57 }
 0x23a   : > { %20986 = vst [vmem:[#allocation26_spill] sm:$0xff] %v19096_v32  ;;  %v12090_v18 = vld [vmem:[%s15728_s13 + $0x392] sm:$0xff]  ;;  %v12932_v7 = vpack.c.bf16 %v3442_v6, %v3442_v6  ;;  %v13096_v49 = vpack.c.bf16 %v5239_v36, %v5239_v36  ;;  %v13097_v34 = vpack.c.bf16 %v5240_v15, %v5240_v15  ;;  %v11542_v2 = vld [vmem:[%s15728_s13 + $0x4c9] sm:$0xff]  ;;  %v19109_v31 = vadd.f32 %v13474_v12, %v18749_v54  ;;  %v12091_v61 = vld [vmem:[%s15728_s13 + $0x39a] sm:$0xff] }
 0x23b   : > { %v11543_v24 = vld [vmem:[%s15728_s13 + $0x4d1] sm:$0xff]  ;;  %9415 = vrot.lane.b32.xlu1 %v19096_v32, %s15615_s15  ;;  %9417 = vrot.lane.b32.xlu0 %v19082_v23, %s15615_s15  ;;  %5717 = vst [vmem:[#allocation2 + $0x4c0] sm:$0xf] %v13094_v14  ;;  %5718 = vst [vmem:[#allocation2 + $0x4d4] sm:$0xf] %v13095_v13  ;;  %v4598_v57 = vsel %vm854_vm0, %v11831_v30, %v14612_v16  ;;  %v14607_v17 = vunpack.i.h.bf16 %v14605_v27  ;;  %v7012_v47 = vpop.f32.mrf.mxu0  ;;  %v8558_v41 = vpop.f32.mrf.mxu1  ;;  %v4597_v12 = vsel %vm854_vm0, %v11830_v21, %v14611_v43 }
 0x23c   : > { %20987 = vst [vmem:[#allocation27_spill] sm:$0xff] %v19109_v31  ;;  %v12092_v48 = vld [vmem:[%s15728_s13 + $0x3aa] sm:$0xff]  ;;  %8947 = vmatprep.mubr.bf16.mxu0 %v14978_v26  ;;  %13511 = vmatprep.mubr.bf16.mxu1 %v14979_v63  ;;  %3922 = vst [vmem:[#allocation2 + $0x710] sm:$0xf] %v12932_v7  ;;  %v13031_v54 = vpack.c.bf16 %v4598_v57, %v4598_v57  ;;  %v14606_v62 = vunpack.i.l.bf16 %v14605_v27  ;;  %v5241_v36 = vsel %vm854_vm0, %v12090_v18, 0.0  ;;  %v12093_v15 = vld [vmem:[%s15728_s13 + $0x3b2] sm:$0xff]  ;;  %v14620_v26 = vpop.permute.xlu1 %14619 }
 0x23d   : > { %5719 = vst [vmem:[#allocation2 + $0x4e8] sm:$0xf] %v13096_v49  ;;  %5720 = vst [vmem:[#allocation2 + $0x4fc] sm:$0xf] %v13097_v34  ;;  %v19122_v6 = vadd.f32 %v7012_v47, %v18785_v40  ;;  %v14976_v30 = vld [vmem:[#allocation2 + $0x5d0] ss:$20 sps:$4 sm:$0xff]   ;;  %v13030_v16 = vpack.c.bf16 %v4597_v12, %v4597_v12  ;;  %v3445_v14 = vsel %vm854_vm0, %v11543_v24, %v14607_v17  ;;  %v13478_v63 = vpop.f32.mrf.mxu0  ;;  %v19125_v7 = vpop.f32.mrf.mxu1 }
 0x23e   : > { %v13098_v13 = vpack.c.bf16 %v5241_v36, %v5241_v36  ;;  %v14980_v49 = vld [vmem:[#allocation2 + $0x308] ss:$20 sps:$4 sm:$0xff]   ;;  %5078 = vst [vmem:[#allocation2 + $0x750] sm:$0xf] %v13031_v54  ;;  %v12935_v27 = vpack.c.bf16 %v3445_v14, %v3445_v14  ;;  %v3444_v21 = vsel %vm854_vm0, %v11542_v2, %v14606_v62  ;;  %v5242_v18 = vsel %vm854_vm0, %v12091_v61, 0.0  ;;  %v11833_v57 = vld [vmem:[%s15728_s13 + $0x500] sm:$0xff]  ;;  %v14615_v2 = vpop.permute.xlu0 %14614 }
 0x23f   : > { %20988 = vst [vmem:[#allocation28_spill] sm:$0xff] %v19122_v6  ;;  %v5243_v40 = vsel %vm854_vm0, %v12092_v48, 0.0  ;;  %9419 = vrot.lane.b32.xlu1 %v19109_v31, %s15615_s15  ;;  %9421 = vrot.lane.b32.xlu0 %v19122_v6, %s15615_s15  ;;  %5077 = vst [vmem:[#allocation2 + $0x73c] sm:$0xf] %v13030_v16  ;;  %v12934_v34 = vpack.c.bf16 %v3444_v21, %v3444_v21  ;;  %v5244_v43 = vsel %vm854_vm0, %v12093_v15, 0.0  ;;  %v11832_v24 = vld [vmem:[%s15728_s13 + $0x4f8] sm:$0xff]  ;;  %v7015_v17 = vpop.f32.mrf.mxu0  ;;  %v8561_v61 = vpop.f32.mrf.mxu1  ;;  %v14622_v62 = vunpack.i.h.bf16 %v14620_v26 }
 0x240   : > { %5721 = vst [vmem:[#allocation2 + $0x510] sm:$0xf] %v13098_v13  ;;  %v14983_v48 = vld [vmem:[#allocation2 + $0x5fc] ss:$20 sps:$4 sm:$0xff]   ;;  %3925 = vst [vmem:[#allocation2 + $0x74c] sm:$0xf] %v12935_v27  ;;  %v13099_v41 = vpack.c.bf16 %v5242_v18, %v5242_v18  ;;  %v13100_v54 = vpack.c.bf16 %v5243_v40, %v5243_v40  ;;  %v13101_v12 = vpack.c.bf16 %v5244_v43, %v5244_v43  ;;  %v14621_v14 = vunpack.i.l.bf16 %v14620_v26 }
 0x241   : > { %v14984_v47 = vld [vmem:[#allocation2 + $0x330] ss:$20 sps:$4 sm:$0xff]   ;;  %v19140_v16 = vadd.f32 %v19101_v46, %v18772_v11  ;;  %v19143_v15 = vadd.f32 %v7015_v17, %v18797_v55  ;;  %3924 = vst [vmem:[#allocation2 + $0x738] sm:$0xf] %v12934_v34  ;;  %v13481_v27 = vpop.f32.mrf.mxu0  ;;  %v19148_v18 = vpop.f32.mrf.mxu1  ;;  %8948 = vmatmul.mubr.bf16.gmra.mxu0 %v14976_v30  ;;  %13512 = vmatmul.mubr.bf16.gmra.mxu1 %v14980_v49  ;;  %v14617_v46 = vunpack.i.h.bf16 %v14615_v2  ;;  %v14616_v55 = vunpack.i.l.bf16 %v14615_v2  ;;  %v12096_v40 = vld [vmem:[%s15728_s13 + $0x3da] sm:$0xff] }
 0x242   : > { %v11544_v36 = vld [vmem:[%s15728_s13 + $0x4e1] sm:$0xff]  ;;  %v11545_v13 = vld [vmem:[%s15728_s13 + $0x4e9] sm:$0xff]  ;;  %5722 = vst [vmem:[#allocation2 + $0x524] sm:$0xf] %v13099_v41  ;;  %5723 = vst [vmem:[#allocation2 + $0x538] sm:$0xf] %v13100_v54  ;;  %v4600_v11 = vsel %vm854_vm0, %v11833_v57, %v14622_v62  ;;  %v19153_v26 = vadd.f32 %v13478_v63, %v18789_v50  ;;  %8955 = vmatprep.mubr.bf16.mxu0 %v14983_v48  ;;  %13515 = vmatprep.mubr.bf16.mxu1 %v14984_v47 }
 0x243   : > { %20989 = vst [vmem:[#allocation29_spill] sm:$0xff] %v19140_v16  ;;  %20990 = vst [vmem:[#allocation30_spill] sm:$0xff] %v19143_v15  ;;  %v12094_v21 = vld [vmem:[%s15728_s13 + $0x3c2] sm:$0xff]  ;;  %v12095_v61 = vld [vmem:[%s15728_s13 + $0x3ca] sm:$0xff]  ;;  %9423 = vrot.lane.b32.xlu1 %v19143_v15, %s15615_s15  ;;  %9425 = vrot.lane.b32.xlu0 %v19140_v16, %s15615_s15  ;;  %v13033_v30 = vpack.c.bf16 %v4600_v11, %v4600_v11  ;;  %v7028_v34 = vpop.f32.mrf.mxu0  ;;  %v8566_v43 = vpop.f32.mrf.mxu1  ;;  %v4599_v57 = vsel %vm854_vm0, %v11832_v24, %v14621_v14 }
 0x244   : > { %5724 = vst [vmem:[#allocation2 + $0x54c] sm:$0xf] %v13101_v12  ;;  %20991 = vst [vmem:[#allocation31_spill] sm:$0xff] %v19153_v26  ;;  %v12097_v49 = vld [vmem:[%s15728_s13 + $0x3e2] sm:$0xff]  ;;  %v3447_v2 = vsel %vm854_vm0, %v11545_v13, %v14617_v46  ;;  %v3446_v50 = vsel %vm854_vm0, %v11544_v36, %v14616_v55  ;;  %v5245_v63 = vsel %vm854_vm0, %v12094_v21, 0.0  ;;  %v12098_v17 = vld [vmem:[%s15728_s13 + $0x3f2] sm:$0xff]  ;;  %v19167_v54 = vadd.f32 %v7028_v34, %v18845_v51 }
 0x245   : > { %v12099_v41 = vld [vmem:[%s15728_s13 + $0x3fa] sm:$0xff]  ;;  %5080 = vst [vmem:[#allocation2 + $0x778] sm:$0xf] %v13033_v30  ;;  %v13032_v11 = vpack.c.bf16 %v4599_v57, %v4599_v57  ;;  %v12937_v48 = vpack.c.bf16 %v3447_v2, %v3447_v2  ;;  %v12936_v47 = vpack.c.bf16 %v3446_v50, %v3446_v50  ;;  %v12100_v43 = vld [vmem:[%s15728_s13 + $0x40a] sm:$0xff]  ;;  %v13482_v36 = vpop.f32.mrf.mxu0  ;;  %v19173_v14 = vpop.f32.mrf.mxu1  ;;  %v5246_v13 = vsel %vm854_vm0, %v12095_v61, 0.0  ;;  %v12101_v55 = vld [vmem:[%s15728_s13 + $0x412] sm:$0xff] }
 0x246   : > { %20992 = vst [vmem:[#allocation32_spill] sm:$0xff] %v19167_v54  ;;  %v14981_v12 = vld [vmem:[#allocation2 + $0x5f8] ss:$20 sps:$4 sm:$0xff]   ;;  %v13102_v51 = vpack.c.bf16 %v5245_v63, %v5245_v63  ;;  %v5247_v21 = vsel %vm854_vm0, %v12096_v40, 0.0  ;;  %v5248_v46 = vsel %vm854_vm0, %v12097_v49, 0.0  ;;  %v13103_v30 = vpack.c.bf16 %v5246_v13, %v5246_v13  ;;  %v12102_v57 = vld [vmem:[%s15728_s13 + $0x422] sm:$0xff] }
 0x247   : > { %v14985_v62 = vld [vmem:[#allocation2 + $0x358] ss:$20 sps:$4 sm:$0xff]   ;;  %9427 = vrot.lane.b32.xlu1 %v19153_v26, %s15615_s15  ;;  %9429 = vrot.lane.b32.xlu0 %v19167_v54, %s15615_s15  ;;  %5079 = vst [vmem:[#allocation2 + $0x764] sm:$0xf] %v13032_v11  ;;  %3927 = vst [vmem:[#allocation2 + $0x774] sm:$0xf] %v12937_v48  ;;  %v7031_v2 = vpop.f32.mrf.mxu0  ;;  %v8569_v40 = vpop.f32.mrf.mxu1  ;;  %v13104_v63 = vpack.c.bf16 %v5247_v21, %v5247_v21  ;;  %v13105_v16 = vpack.c.bf16 %v5248_v46, %v5248_v46 }
 0x248   : > { %v15039_v24 = vld [vmem:[%s20847_s5 + $0x28] sm:$0xff]   ;;  %3926 = vst [vmem:[#allocation2 + $0x760] sm:$0xf] %v12936_v47  ;;  %v5249_v34 = vsel %vm854_vm0, %v12098_v17, 0.0  ;;  %v14988_v50 = vld [vmem:[#allocation2 + $0x624] ss:$20 sps:$4 sm:$0xff]   ;;  %v19188_v11 = vadd.f32 %v13481_v27, %v18829_v25  ;;  %v19191_v17 = vadd.f32 %v7031_v2, %v18852_v3 }
 0x249   : > { %v12103_v61 = vld [vmem:[%s15728_s13 + $0x42a] sm:$0xff]  ;;  %v14989_v49 = vld [vmem:[#allocation2 + $0x380] ss:$20 sps:$4 sm:$0xff]   ;;  %5725 = vst [vmem:[#allocation2 + $0x560] sm:$0xf] %v13102_v51  ;;  %v5250_v26 = vsel %vm854_vm0, %v12099_v41, 0.0  ;;  %v13106_v15 = vpack.c.bf16 %v5249_v34, %v5249_v34  ;;  %13575 = vmatprep.subr.bf16.mxu0 %v15039_v24  ;;  %v13485_v13 = vpop.f32.mrf.mxu0  ;;  %v19194_v51 = vpop.f32.mrf.mxu1  ;;  %8956 = vmatmul.mubr.bf16.gmra.mxu0 %v14981_v12  ;;  %v19200_v41 = vadd.f32 %v13482_v36, %v18848_v52 }
 0x24a   : > { %20993 = vst [vmem:[#allocation33_spill] sm:$0xff] %v19188_v11  ;;  %20994 = vst [vmem:[#allocation34_spill] sm:$0xff] %v19191_v17  ;;  %v13107_v48 = vpack.c.bf16 %v5250_v26, %v5250_v26  ;;  %v12104_v47 = vld [vmem:[%s15728_s13 + $0x43a] sm:$0xff]  ;;  %13576 = vmatpush3.bf16.msra.mxu0 %v15039_v24  ;;  %13516 = vmatmul.mubr.bf16.gmra.mxu1 %v14985_v62  ;;  %v5251_v25 = vsel %vm854_vm0, %v12100_v43, 0.0  ;;  %v5252_v27 = vsel %vm854_vm0, %v12101_v55, 0.0  ;;  %v12105_v3 = vld [vmem:[%s15728_s13 + $0x442] sm:$0xff] }
 0x24b   : > { %5726 = vst [vmem:[#allocation2 + $0x574] sm:$0xf] %v13103_v30  ;;  %5727 = vst [vmem:[#allocation2 + $0x588] sm:$0xf] %v13104_v63  ;;  %9431 = vrot.lane.b32.xlu1 %v19191_v17, %s15615_s15  ;;  %9433 = vrot.lane.b32.xlu0 %v19188_v11, %s15615_s15  ;;  %v13108_v26 = vpack.c.bf16 %v5251_v25, %v5251_v25  ;;  %v12107_v12 = vld [vmem:[%s15728_s13 + $0x45a] sm:$0xff]  ;;  %v7044_v62 = vpop.f32.mrf.mxu0  ;;  %v8574_v43 = vpop.f32.mrf.mxu1  ;;  %v13109_v52 = vpack.c.bf16 %v5252_v27, %v5252_v27  ;;  %v5254_v24 = vsel %vm854_vm0, %v12103_v61, 0.0 }
 0x24c   : > { %5728 = vst [vmem:[#allocation2 + $0x59c] sm:$0xf] %v13105_v16  ;;  %5729 = vst [vmem:[#allocation2 + $0x5b0] sm:$0xf] %v13106_v15  ;;  %v5253_v16 = vsel %vm854_vm0, %v12102_v57, 0.0  ;;  %v12106_v15 = vld [vmem:[%s15728_s13 + $0x452] sm:$0xff]  ;;  %8963 = vmatprep.mubr.bf16.mxu0 %v14988_v50  ;;  %13519 = vmatprep.mubr.bf16.mxu1 %v14989_v49  ;;  %v19213_v55 = vadd.f32 %v7044_v62, %v18885_v28  ;;  %v13111_v34 = vpack.c.bf16 %v5254_v24, %v5254_v24 }
 0x24d   : > { %20995 = vst [vmem:[#allocation35_spill] sm:$0xff] %v19200_v41  ;;  %5730 = vst [vmem:[#allocation2 + $0x5c4] sm:$0xf] %v13107_v48  ;;  %v13110_v36 = vpack.c.bf16 %v5253_v16, %v5253_v16  ;;  %v5255_v21 = vsel %vm854_vm0, %v12104_v47, 0.0  ;;  %v12108_v46 = vld [vmem:[%s15728_s13 + $0x46a] sm:$0xff]  ;;  %v5256_v57 = vsel %vm854_vm0, %v12105_v3, 0.0  ;;  %v13486_v50 = vpop.f32.mrf.mxu0  ;;  %v19218_v49 = vpop.f32.mrf.mxu1 }
 0x24e   : > { %20996 = vst [vmem:[#allocation36_spill] sm:$0xff] %v19213_v55  ;;  %v14986_v30 = vld [vmem:[#allocation2 + $0x620] ss:$20 sps:$4 sm:$0xff]   ;;  %5731 = vst [vmem:[#allocation2 + $0x5d8] sm:$0xf] %v13108_v26  ;;  %v13112_v2 = vpack.c.bf16 %v5255_v21, %v5255_v21  ;;  %v13113_v47 = vpack.c.bf16 %v5256_v57, %v5256_v57  ;;  %v5257_v28 = vsel %vm854_vm0, %v12106_v15, 0.0  ;;  %v19233_v57 = vadd.f32 %v13485_v13, %v18867_v56 }
 0x24f   : > { %v12109_v40 = vld [vmem:[%s15728_s13 + $0x472] sm:$0xff]  ;;  %v12110_v63 = vld [vmem:[%s15728_s13 + $0x482] sm:$0xff]  ;;  %5732 = vst [vmem:[#allocation2 + $0x5ec] sm:$0xf] %v13109_v52  ;;  %5733 = vst [vmem:[#allocation2 + $0x600] sm:$0xf] %v13110_v36  ;;  %9435 = vrot.lane.b32.xlu1 %v19200_v41, %s15615_s15  ;;  %9437 = vrot.lane.b32.xlu0 %v19213_v55, %s15615_s15  ;;  %v13114_v3 = vpack.c.bf16 %v5257_v28, %v5257_v28  ;;  %v7047_v62 = vpop.f32.mrf.mxu0  ;;  %v8577_v15 = vpop.f32.mrf.mxu1 }
 0x250   : > { %v14990_v61 = vld [vmem:[#allocation2 + $0x3a8] ss:$20 sps:$4 sm:$0xff]   ;;  %v14993_v48 = vld [vmem:[#allocation2 + $0x64c] ss:$20 sps:$4 sm:$0xff]   ;;  %v5258_v25 = vsel %vm854_vm0, %v12107_v12, 0.0  ;;  %v5259_v26 = vsel %vm854_vm0, %v12108_v46, 0.0 }
 0x251   : > { %v14994_v27 = vld [vmem:[#allocation2 + $0x3d0] ss:$20 sps:$4 sm:$0xff]   ;;  %5734 = vst [vmem:[#allocation2 + $0x614] sm:$0xf] %v13111_v34  ;;  %5735 = vst [vmem:[#allocation2 + $0x628] sm:$0xf] %v13112_v2  ;;  %v13115_v12 = vpack.c.bf16 %v5258_v25, %v5258_v25  ;;  %v13116_v52 = vpack.c.bf16 %v5259_v26, %v5259_v26  ;;  %v19236_v34 = vadd.f32 %v7047_v62, %v18891_v37  ;;  %v19239_v25 = vpop.f32.mrf.mxu1  ;;  %8964 = vmatmul.mubr.bf16.gmra.mxu0 %v14986_v30 }
 0x252   : > { %v12111_v16 = vld [vmem:[%s15728_s13 + $0x48a] sm:$0xff]  ;;  %5736 = vst [vmem:[#allocation2 + $0x63c] sm:$0xf] %v13113_v47  ;;  %v5260_v43 = vsel %vm854_vm0, %v12109_v40, 0.0  ;;  %v5261_v24 = vsel %vm854_vm0, %v12110_v63, 0.0  ;;  %v12112_v36 = vld [vmem:[%s15728_s13 + $0x49a] sm:$0xff]  ;;  %v13489_v47 = vpop.f32.mrf.mxu0  ;;  %13520 = vmatmul.mubr.bf16.gmra.mxu1 %v14990_v61  ;;  %8971 = vmatprep.mubr.bf16.mxu0 %v14993_v48 }
 0x253   : > { %v12113_v21 = vld [vmem:[%s15728_s13 + $0x4a2] sm:$0xff]  ;;  %20997 = vst [vmem:[#allocation37_spill] sm:$0xff] %v19233_v57  ;;  %20998 = vst [vmem:[#allocation38_spill] sm:$0xff] %v19236_v34  ;;  %v13117_v46 = vpack.c.bf16 %v5260_v43, %v5260_v43  ;;  %v13118_v2 = vpack.c.bf16 %v5261_v24, %v5261_v24  ;;  %v12114_v28 = vld [vmem:[%s15728_s13 + $0x4b2] sm:$0xff]  ;;  %9439 = vrot.lane.b32.xlu1 %v19236_v34, %s15615_s15  ;;  %9441 = vrot.lane.b32.xlu0 %v19233_v57, %s15615_s15  ;;  %v5262_v37 = vsel %vm854_vm0, %v12111_v16, 0.0  ;;  %v8582_v63 = vpop.f32.mrf.mxu1 }
 0x254   : > { %5737 = vst [vmem:[#allocation2 + $0x650] sm:$0xf] %v13114_v3  ;;  %5738 = vst [vmem:[#allocation2 + $0x664] sm:$0xf] %v13115_v12  ;;  %v19244_v56 = vld [vmem:[%s20846_s4] ss:$0 sm:$0xff]  ;;  %v7060_v40 = vpop.f32.mrf.mxu0  ;;  %13523 = vmatprep.mubr.bf16.mxu1 %v14994_v27  ;;  %v13119_v3 = vpack.c.bf16 %v5262_v37, %v5262_v37  ;;  %v19258_v16 = vadd.f32 %v13486_v50, %v18888_v33 }
 0x255   : > { %5739 = vst [vmem:[#allocation2 + $0x678] sm:$0xf] %v13116_v52  ;;  %5740 = vst [vmem:[#allocation2 + $0x68c] sm:$0xf] %v13117_v46  ;;  %v5263_v13 = vsel %vm854_vm0, %v12112_v36, 0.0  ;;  %v12115_v30 = vld [vmem:[%s15728_s13 + $0x4ba] sm:$0xff]  ;;  %v19261_v52 = vadd.f32 %v7060_v40, %v18933_v42  ;;  %v19264_v48 = vpop.f32.mrf.mxu1 }
 0x256   : > { %5741 = vst [vmem:[#allocation2 + $0x6a0] sm:$0xf] %v13118_v2  ;;  %v14991_v61 = vld [vmem:[#allocation2 + $0x648] ss:$20 sps:$4 sm:$0xff]   ;;  %v5264_v26 = vsel %vm854_vm0, %v12113_v21, 0.0  ;;  %v13120_v62 = vpack.c.bf16 %v5263_v13, %v5263_v13  ;;  %v5265_v15 = vsel %vm854_vm0, %v12114_v28, 0.0  ;;  %v13490_v2 = vpop.f32.mrf.mxu0  ;;  %v8493_v21 = vadd.f32 %v19244_v56, %v18683_v20 }
 0x257   : > { %v12116_v12 = vld [vmem:[%s15728_s13 + $0x4ca] sm:$0xff]  ;;  %v12117_v43 = vld [vmem:[%s15728_s13 + $0x4d2] sm:$0xff]  ;;  %20999 = vst [vmem:[#allocation39_spill] sm:$0xff] %v19258_v16  ;;  %21000 = vst [vmem:[#allocation40_spill] sm:$0xff] %v19261_v52  ;;  %v13121_v24 = vpack.c.bf16 %v5264_v26, %v5264_v26  ;;  %v13122_v36 = vpack.c.bf16 %v5265_v15, %v5265_v15  ;;  %9443 = vrot.lane.b32.xlu1 %v19258_v16, %s15615_s15  ;;  %9445 = vrot.lane.b32.xlu0 %v19261_v52, %s15615_s15  ;;  %v5266_v42 = vsel %vm854_vm0, %v12115_v30, 0.0  ;;  %v8585_v13 = vpop.f32.mrf.mxu1 }
 0x258   : > { %v12118_v46 = vld [vmem:[%s15728_s13 + $0x4e2] sm:$0xff]  ;;  %v14995_v27 = vld [vmem:[#allocation2 + $0x3f8] ss:$20 sps:$4 sm:$0xff]   ;;  %5742 = vst [vmem:[#allocation2 + $0x6b4] sm:$0xf] %v13119_v3  ;;  %v5267_v50 = vsel %vm854_vm0, %v12116_v12, 0.0  ;;  %v7063_v28 = vpop.f32.mrf.mxu0  ;;  %v13123_v40 = vpack.c.bf16 %v5266_v42, %v5266_v42  ;;  %v19279_v15 = vadd.f32 %v13489_v47, %v18920_v10  ;;  %v8496_v42 = vadd.f32 %v19244_v56, %v18713_v29 }
 0x259   : > { %v14998_v37 = vld [vmem:[#allocation2 + $0x674] ss:$20 sps:$4 sm:$0xff]   ;;  %5743 = vst [vmem:[#allocation2 + $0x6c8] sm:$0xf] %v13120_v62  ;;  %5744 = vst [vmem:[#allocation2 + $0x6dc] sm:$0xf] %v13121_v24  ;;  %v13124_v20 = vpack.c.bf16 %v5267_v50, %v5267_v50  ;;  %v19282_v24 = vadd.f32 %v7063_v28, %v18939_v60  ;;  %v19285_v12 = vpop.f32.mrf.mxu1  ;;  %8972 = vmatmul.mubr.bf16.gmra.mxu0 %v14991_v61  ;;  %v19299_v50 = vadd.f32 %v13490_v2, %v18936_v4 }
 0x25a   : > { %v14999_v33 = vld [vmem:[#allocation2 + $0x420] ss:$20 sps:$4 sm:$0xff]   ;;  %5745 = vst [vmem:[#allocation2 + $0x6f0] sm:$0xf] %v13122_v36  ;;  %v5268_v63 = vsel %vm854_vm0, %v12117_v43, 0.0  ;;  %v12119_v3 = vld [vmem:[%s15728_s13 + $0x4ea] sm:$0xff]  ;;  %v8781_v13 = vpop.f32.mrf.mxu0  ;;  %13524 = vmatmul.mubr.bf16.gmra.mxu1 %v14995_v27  ;;  %8979 = vmatprep.mubr.bf16.mxu0 %v14998_v37  ;;  %v8501_v4 = vadd.f32 %v19244_v56, %v18744_v19 }
 0x25b   : > { %v5269_v26 = vsel %vm854_vm0, %v12118_v46, 0.0  ;;  %v12120_v62 = vld [vmem:[%s15728_s13 + $0x4fa] sm:$0xff]  ;;  %21001 = vst [vmem:[#allocation41_spill] sm:$0xff] %v19279_v15  ;;  %21002 = vst [vmem:[#allocation42_spill] sm:$0xff] %v19282_v24  ;;  %v13125_v30 = vpack.c.bf16 %v5268_v63, %v5268_v63  ;;  %v12121_v52 = vld [vmem:[%s15728_s13 + $0x502] sm:$0xff]  ;;  %v19287_v43 = vadd.f32 %v8781_v13, %v8493_v21  ;;  %9447 = vrot.lane.b32.xlu1 %v19282_v24, %s15615_s15  ;;  %9449 = vrot.lane.b32.xlu0 %v19279_v15, %s15615_s15  ;;  %v8590_v47 = vpop.f32.mrf.mxu1 }
 0x25c   : > { %v13126_v36 = vpack.c.bf16 %v5269_v26, %v5269_v26  ;;  %5746 = vst [vmem:[#allocation2 + $0x704] sm:$0xf] %v13123_v40  ;;  %5747 = vst [vmem:[#allocation2 + $0x718] sm:$0xf] %v13124_v20  ;;  %v5270_v10 = vsel %vm854_vm0, %v12119_v3, 0.0  ;;  %v5271_v60 = vsel %vm854_vm0, %v12120_v62, 0.0  ;;  %v8783_v46 = vpop.f32.mrf.mxu0  ;;  %13527 = vmatprep.mubr.bf16.mxu1 %v14999_v33 }
 0x25d   : > { %21003 = vst [vmem:[#allocation43_spill] sm:$0xff] %v19287_v43  ;;  %5748 = vst [vmem:[#allocation2 + $0x72c] sm:$0xf] %v13125_v30  ;;  %v13127_v61 = vpack.c.bf16 %v5270_v10, %v5270_v10  ;;  %v5272_v27 = vsel %vm854_vm0, %v12121_v52, 0.0  ;;  %v13128_v21 = vpack.c.bf16 %v5271_v60, %v5271_v60  ;;  %v14996_v28 = vld [vmem:[#allocation2 + $0x670] ss:$20 sps:$4 sm:$0xff]   ;;  %v19301_v63 = vpop.f32.mrf.mxu1  ;;  %v8504_v60 = vadd.f32 %v19244_v56, %v18766_v59 }
 0x25e   : > { %5749 = vst [vmem:[#allocation2 + $0x740] sm:$0xf] %v13126_v36  ;;  %21004 = vst [vmem:[#allocation44_spill] sm:$0xff] %v19299_v50  ;;  %v13129_v40 = vpack.c.bf16 %v5272_v27, %v5272_v27  ;;  %v8784_v20 = vpop.f32.mrf.mxu0  ;;  %v15000_v3 = vld [vmem:[#allocation2 + $0x448] ss:$20 sps:$4 sm:$0xff]   ;;  %v15042_v36 = vld [vmem:[%s20847_s5 + $0x20] sm:$0xff]  }
 0x25f   : > { %5750 = vst [vmem:[#allocation2 + $0x754] sm:$0xf] %v13127_v61  ;;  %5751 = vst [vmem:[#allocation2 + $0x768] sm:$0xf] %v13128_v21  ;;  %v19303_v37 = vadd.f32 %v8784_v20, %v8496_v42  ;;  %9451 = vrot.lane.b32.xlu1 %v19299_v50, %s15615_s15  ;;  %v15003_v52 = vld [vmem:[#allocation2 + $0x69c] ss:$20 sps:$4 sm:$0xff]   ;;  %v8593_v29 = vpop.f32.mrf.mxu1  ;;  %13577 = vmatprep.subr.bf16.mxu0 %v15042_v36  ;;  %v8509_v20 = vadd.f32 %v19244_v56, %v18806_v39 }
 0x260   : > { %v15004_v33 = vld [vmem:[#allocation2 + $0x470] ss:$20 sps:$4 sm:$0xff]   ;;  %5752 = vst [vmem:[#allocation2 + $0x77c] sm:$0xf] %v13129_v40  ;;  %v8786_v26 = vpop.f32.mrf.mxu0  ;;  %v15001_v46 = vld [vmem:[#allocation2 + $0x698] ss:$20 sps:$4 sm:$0xff]   ;;  %13578 = vmatpush3.bf16.msra.mxu0 %v15042_v36 }
 0x261   : > { %21005 = vst [vmem:[#allocation45_spill] sm:$0xff] %v19303_v37  ;;  %v19309_v2 = vpop.f32.mrf.mxu1  ;;  %8980 = vmatmul.mubr.bf16.gmra.mxu0 %v14996_v28  ;;  %v15005_v61 = vld [vmem:[#allocation2 + $0x498] ss:$20 sps:$4 sm:$0xff]   ;;  %v15010_v42 = vld [vmem:[#allocation2 + $0x4c0] ss:$20 sps:$4 sm:$0xff]  }
 0x262   : > { %v8789_v62 = vpop.f32.mrf.mxu0  ;;  %13528 = vmatmul.mubr.bf16.gmra.mxu1 %v15000_v3  ;;  %8987 = vmatprep.mubr.bf16.mxu0 %v15003_v52  ;;  %v15009_v21 = vld [vmem:[#allocation2 + $0x6c4] ss:$20 sps:$4 sm:$0xff]   ;;  %v15007_v36 = vld [vmem:[#allocation2 + $0x6c0] ss:$20 sps:$4 sm:$0xff]  }
 0x263   : > { %v19311_v30 = vadd.f32 %v8789_v62, %v8501_v4  ;;  %13531 = vmatprep.mubr.bf16.mxu1 %v15004_v33  ;;  %v8598_v13 = vpop.f32.mrf.mxu1  ;;  %v15043_v33 = vld [vmem:[%s20847_s5 + $0x18] sm:$0xff]   ;;  %v8512_v4 = vadd.f32 %v19244_v56, %v18826_v1 }
 0x264   : > { %v8791_v10 = vpop.f32.mrf.mxu0  ;;  %13579 = vmatprep.subr.bf16.mxu0 %v15043_v33  ;;  %v15011_v13 = vld [vmem:[#allocation2 + $0x4e8] ss:$20 sps:$4 sm:$0xff]  }
 0x265   : > { %21006 = vst [vmem:[#allocation46_spill] sm:$0xff] %v19311_v30  ;;  %v19318_v19 = vpop.f32.mrf.mxu1  ;;  %13580 = vmatpush3.bf16.msra.mxu0 %v15043_v33 }
 0x266   : > { %v8792_v47 = vpop.f32.mrf.mxu0 }
 0x267   : > { %v19320_v27 = vadd.f32 %v8792_v47, %v8504_v60  ;;  %v8601_v28 = vpop.f32.mrf.mxu1  ;;  %v15014_v60 = vld [vmem:[#allocation2 + $0x6ec] ss:$20 sps:$4 sm:$0xff]   ;;  %v15015_v47 = vld [vmem:[#allocation2 + $0x510] ss:$20 sps:$4 sm:$0xff]  }
 0x268   : > { %v8794_v40 = vpop.f32.mrf.mxu0 }
 0x269   : > { %21007 = vst [vmem:[#allocation47_spill] sm:$0xff] %v19320_v27  ;;  %v19324_v3 = vpop.f32.mrf.mxu1  ;;  %8988 = vmatmul.mubr.bf16.gmra.mxu0 %v15001_v46 }
 0x26a   : > { %v8797_v52 = vpop.f32.mrf.mxu0  ;;  %13532 = vmatmul.mubr.bf16.gmra.mxu1 %v15005_v61  ;;  %8995 = vmatprep.mubr.bf16.mxu0 %v15009_v21  ;;  %v8517_v21 = vadd.f32 %v19244_v56, %v18862_v8 }
 0x26b   : > { %v19326_v59 = vadd.f32 %v8797_v52, %v8509_v20  ;;  %13535 = vmatprep.mubr.bf16.mxu1 %v15010_v42  ;;  %v8606_v29 = vpop.f32.mrf.mxu1  ;;  %v8520_v52 = vadd.f32 %v19244_v56, %v18880_v22 }
 0x26c   : > { %v8799_v26 = vpop.f32.mrf.mxu0 }
 0x26d   : > { %21008 = vst [vmem:[#allocation48_spill] sm:$0xff] %v19326_v59  ;;  %v19333_v39 = vpop.f32.mrf.mxu1  ;;  %v15012_v26 = vld [vmem:[#allocation2 + $0x6e8] ss:$20 sps:$4 sm:$0xff]   ;;  %v15031_v59 = vld [vmem:[#allocation2 + $0x600] ss:$20 sps:$4 sm:$0xff]  }
 0x26e   : > { %v8800_v62 = vpop.f32.mrf.mxu0 }
 0x26f   : > { %v19335_v10 = vadd.f32 %v8800_v62, %v8512_v4  ;;  %v8609_v46 = vpop.f32.mrf.mxu1  ;;  %v15016_v4 = vld [vmem:[#allocation2 + $0x538] ss:$20 sps:$4 sm:$0xff]   ;;  %v15019_v62 = vld [vmem:[#allocation2 + $0x714] ss:$20 sps:$4 sm:$0xff]  }
 0x270   : > { %v8802_v61 = vpop.f32.mrf.mxu0  ;;  %v15020_v46 = vld [vmem:[#allocation2 + $0x560] ss:$20 sps:$4 sm:$0xff]  }
 0x271   : > { %21009 = vst [vmem:[#allocation49_spill] sm:$0xff] %v19335_v10  ;;  %v19339_v42 = vpop.f32.mrf.mxu1  ;;  %8996 = vmatmul.mubr.bf16.gmra.mxu0 %v15007_v36  ;;  %v15024_v10 = vld [vmem:[#allocation2 + $0x73c] ss:$20 sps:$4 sm:$0xff]  }
 0x272   : > { %v8805_v28 = vpop.f32.mrf.mxu0  ;;  %13536 = vmatmul.mubr.bf16.gmra.mxu1 %v15011_v13  ;;  %9003 = vmatprep.mubr.bf16.mxu0 %v15014_v60  ;;  %v8525_v60 = vadd.f32 %v19244_v56, %v18897_v35 }
 0x273   : > { %v19341_v1 = vadd.f32 %v8805_v28, %v8517_v21  ;;  %13539 = vmatprep.mubr.bf16.mxu1 %v15015_v47  ;;  %v8614_v40 = vpop.f32.mrf.mxu1 }
 0x274   : > { %v8807_v20 = vpop.f32.mrf.mxu0  ;;  %v21013_v40 = vld [vmem:[#allocation17_spill] sm:$0xff] }
 0x275   : > { %21010 = vst [vmem:[#allocation50_spill] sm:$0xff] %v19341_v1  ;;  %v19345_v33 = vpop.f32.mrf.mxu1  ;;  %v8528_v20 = vadd.f32 %v19244_v56, %v21013_v40 }
 0x276   : > { %v8808_v29 = vpop.f32.mrf.mxu0 }
 0x277   : > { %v19347_v8 = vadd.f32 %v8808_v29, %v8520_v52  ;;  %v8617_v36 = vpop.f32.mrf.mxu1 }
 0x278   : > { %v8810_v13 = vpop.f32.mrf.mxu0  ;;  %v15017_v36 = vld [vmem:[#allocation2 + $0x710] ss:$20 sps:$4 sm:$0xff]  }
 0x279   : > { %21011 = vst [vmem:[#allocation51_spill] sm:$0xff] %v19347_v8  ;;  %v19351_v47 = vpop.f32.mrf.mxu1  ;;  %9004 = vmatmul.mubr.bf16.gmra.mxu0 %v15012_v26  ;;  %v15021_v13 = vld [vmem:[#allocation2 + $0x588] ss:$20 sps:$4 sm:$0xff]   ;;  %v15025_v8 = vld [vmem:[#allocation2 + $0x5b0] ss:$20 sps:$4 sm:$0xff]  }
 0x27a   : > { %v8813_v61 = vpop.f32.mrf.mxu0  ;;  %13540 = vmatmul.mubr.bf16.gmra.mxu1 %v15016_v4  ;;  %9011 = vmatprep.mubr.bf16.mxu0 %v15019_v62 }
 0x27b   : > { %v19353_v22 = vadd.f32 %v8813_v61, %v8525_v60  ;;  %13543 = vmatprep.mubr.bf16.mxu1 %v15020_v46  ;;  %v8622_v21 = vpop.f32.mrf.mxu1  ;;  %v21015_v60 = vld [vmem:[#allocation19_spill] sm:$0xff] }
 0x27c   : > { %v8815_v28 = vpop.f32.mrf.mxu0  ;;  %v8533_v62 = vadd.f32 %v19244_v56, %v21015_v60 }
 0x27d   : > { %21012 = vst [vmem:[#allocation52_spill] sm:$0xff] %v19353_v22  ;;  %v19357_v52 = vpop.f32.mrf.mxu1  ;;  %v15030_v22 = vld [vmem:[#allocation2 + $0x764] ss:$20 sps:$4 sm:$0xff]  }
 0x27e   : > { %v8816_v29 = vpop.f32.mrf.mxu0 }
 0x27f   : > { %v19359_v35 = vadd.f32 %v8816_v29, %v8528_v20  ;;  %v8625_v26 = vpop.f32.mrf.mxu1  ;;  %v8536_v20 = vadd.f32 %v19244_v56, %v18977_v53 }
 0x280   : > { %v8818_v4 = vpop.f32.mrf.mxu0 }
 0x281   : > { %21014 = vst [vmem:[#allocation17_spill] sm:$0xff] %v19359_v35  ;;  %v19363_v46 = vpop.f32.mrf.mxu1  ;;  %9012 = vmatmul.mubr.bf16.gmra.mxu0 %v15017_v36  ;;  %v15022_v4 = vld [vmem:[#allocation2 + $0x738] ss:$20 sps:$4 sm:$0xff]  }
 0x282   : > { %v8821_v61 = vpop.f32.mrf.mxu0  ;;  %13544 = vmatmul.mubr.bf16.gmra.mxu1 %v15021_v13  ;;  %9019 = vmatprep.mubr.bf16.mxu0 %v15024_v10  ;;  %v15026_v35 = vld [vmem:[#allocation2 + $0x5d8] ss:$20 sps:$4 sm:$0xff]   ;;  %v8541_v10 = vadd.f32 %v19244_v56, %v18997_v9 }
 0x283   : > { %v19365_v21 = vadd.f32 %v8821_v61, %v8533_v62  ;;  %13547 = vmatprep.mubr.bf16.mxu1 %v15025_v8  ;;  %v8630_v28 = vpop.f32.mrf.mxu1 }
 0x284   : > { %v8823_v40 = vpop.f32.mrf.mxu0 }
 0x285   : > { %21016 = vst [vmem:[#allocation19_spill] sm:$0xff] %v19365_v21  ;;  %v19369_v29 = vpop.f32.mrf.mxu1  ;;  %v8544_v40 = vadd.f32 %v19244_v56, %v19028_v5 }
 0x286   : > { %v8824_v26 = vpop.f32.mrf.mxu0 }
 0x287   : > { %v19371_v60 = vadd.f32 %v8824_v26, %v8536_v20  ;;  %v8633_v36 = vpop.f32.mrf.mxu1 }
 0x288   : > { %v8826_v13 = vpop.f32.mrf.mxu0  ;;  %v15028_v36 = vld [vmem:[#allocation2 + $0x760] ss:$20 sps:$4 sm:$0xff]  }
 0x289   : > { %21017 = vst [vmem:[#allocation53_spill] sm:$0xff] %v19371_v60  ;;  %v19375_v8 = vpop.f32.mrf.mxu1  ;;  %9020 = vmatmul.mubr.bf16.gmra.mxu0 %v15022_v4  ;;  %v15032_v13 = vld [vmem:[#allocation2 + $0x628] ss:$20 sps:$4 sm:$0xff]   ;;  %v15033_v60 = vld [vmem:[#allocation2 + $0x650] ss:$20 sps:$4 sm:$0xff]  }
 0x28a   : > { %v8829_v62 = vpop.f32.mrf.mxu0  ;;  %13548 = vmatmul.mubr.bf16.gmra.mxu1 %v15026_v35  ;;  %9027 = vmatprep.mubr.bf16.mxu0 %v15030_v22  ;;  %v8549_v35 = vadd.f32 %v19244_v56, %v19050_v44  ;;  %v15035_v44 = vld [vmem:[#allocation2 + $0x6a0] ss:$20 sps:$4 sm:$0xff]  }
 0x28b   : > { %v19377_v53 = vadd.f32 %v8829_v62, %v8541_v10  ;;  %13551 = vmatprep.mubr.bf16.mxu1 %v15031_v59  ;;  %v8638_v61 = vpop.f32.mrf.mxu1 }
 0x28c   : > { %v8831_v28 = vpop.f32.mrf.mxu0  ;;  %v8552_v61 = vadd.f32 %v19244_v56, %v19079_v58 }
 0x28d   : > { %21018 = vst [vmem:[#allocation54_spill] sm:$0xff] %v19377_v53  ;;  %v19381_v20 = vpop.f32.mrf.mxu1  ;;  %v15037_v53 = vld [vmem:[#allocation2 + $0x6f0] ss:$20 sps:$4 sm:$0xff]  }
 0x28e   : > { %v8832_v26 = vpop.f32.mrf.mxu0 }
 0x28f   : > { %v19383_v9 = vadd.f32 %v8832_v26, %v8544_v40  ;;  %v8641_v21 = vpop.f32.mrf.mxu1  ;;  %v15034_v40 = vld [vmem:[#allocation2 + $0x678] ss:$20 sps:$4 sm:$0xff]  }
 0x290   : > { %v8834_v4 = vpop.f32.mrf.mxu0 }
 0x291   : > { %21019 = vst [vmem:[#allocation55_spill] sm:$0xff] %v19383_v9  ;;  %v19387_v22 = vpop.f32.mrf.mxu1  ;;  %9028 = vmatmul.mubr.bf16.gmra.mxu0 %v15028_v36  ;;  %v8557_v36 = vadd.f32 %v19244_v56, %v19103_v38  ;;  %v15036_v38 = vld [vmem:[#allocation2 + $0x6c8] ss:$20 sps:$4 sm:$0xff]  }
 0x292   : > { %v8837_v59 = vpop.f32.mrf.mxu0  ;;  %13552 = vmatmul.mubr.bf16.gmra.mxu1 %v15032_v13  ;;  %v19399_v13 = vpop.permute.xlu0 %9389 }
 0x293   : > { %v19389_v10 = vadd.f32 %v8837_v59, %v8549_v35  ;;  %13555 = vmatprep.mubr.bf16.mxu1 %v15033_v60  ;;  %v8646_v5 = vpop.f32.mrf.mxu1  ;;  %v19403_v59 = vpop.permute.xlu1 %9391 }
 0x294   : > { %v8839_v62 = vpop.f32.mrf.mxu0 }
 0x295   : > { %21020 = vst [vmem:[#allocation56_spill] sm:$0xff] %v19389_v10  ;;  %v19393_v28 = vpop.f32.mrf.mxu1 }
 0x296   : > { %v8840_v21 = vpop.f32.mrf.mxu0 }
 0x297   : > { %v19395_v26 = vadd.f32 %v8840_v21, %v8552_v61  ;;  %v8649_v4 = vpop.f32.mrf.mxu1  ;;  %v8560_v61 = vadd.f32 %v19244_v56, %v19125_v7 }
 0x298   : > { %v8842_v9 = vpop.f32.mrf.mxu0  ;;  %v9394_v4 = vpop.permute.xlu0 %9393 }
 0x299   : > { %21021 = vst [vmem:[#allocation57_spill] sm:$0xff] %v19395_v26  ;;  %v19401_v60 = vpop.f32.mrf.mxu1 }
 0x29a   : > { %v8845_v35 = vpop.f32.mrf.mxu0  ;;  %13556 = vmatmul.mubr.bf16.gmra.mxu1 %v15034_v40 }
 0x29b   : > { %v19405_v58 = vadd.f32 %v8845_v35, %v8557_v36  ;;  %13559 = vmatprep.mubr.bf16.mxu1 %v15035_v44  ;;  %v8654_v5 = vpop.f32.mrf.mxu1  ;;  %v8565_v36 = vadd.f32 %v19244_v56, %v19148_v18  ;;  %v19415_v35 = vpop.permute.xlu1 %9395 }
 0x29c   : > { %v8847_v62 = vpop.f32.mrf.mxu0 }
 0x29d   : > { %21022 = vst [vmem:[#allocation58_spill] sm:$0xff] %v19405_v58  ;;  %v19409_v9 = vpop.f32.mrf.mxu1  ;;  %v15044_v62 = vld [vmem:[%s20847_s5 + $0x10] sm:$0xff]   ;;  %v15038_v58 = vld [vmem:[#allocation2 + $0x718] ss:$20 sps:$4 sm:$0xff]  }
 0x29e   : > { %v8848_v21 = vpop.f32.mrf.mxu0  ;;  %13581 = vmatprep.subr.bf16.mxu0 %v15044_v62 }
 0x29f   : > { %v19411_v26 = vadd.f32 %v8848_v21, %v8560_v61  ;;  %v8657_v10 = vpop.f32.mrf.mxu1  ;;  %13582 = vmatpush3.bf16.msra.mxu0 %v15044_v62 }
 0x2a0   : > { %v8850_v40 = vpop.f32.mrf.mxu0  ;;  %v8568_v10 = vadd.f32 %v19244_v56, %v19173_v14 }
 0x2a1   : > { %21023 = vst [vmem:[#allocation59_spill] sm:$0xff] %v19411_v26  ;;  %v19417_v44 = vpop.f32.mrf.mxu1  ;;  %v19426_v40 = vpop.permute.xlu0 %9397 }
 0x2a2   : > { %v8853_v5 = vpop.f32.mrf.mxu0  ;;  %13560 = vmatmul.mubr.bf16.gmra.mxu1 %v15036_v38  ;;  %v19430_v38 = vpop.permute.xlu1 %9399 }
 0x2a3   : > { %v19419_v7 = vadd.f32 %v8853_v5, %v8565_v36  ;;  %13563 = vmatprep.mubr.bf16.mxu1 %v15037_v53  ;;  %v8662_v61 = vpop.f32.mrf.mxu1  ;;  %v15040_v36 = vld [vmem:[#allocation2 + $0x740] ss:$20 sps:$4 sm:$0xff]  }
 0x2a4   : > { %v8855_v21 = vpop.f32.mrf.mxu0  ;;  %v8573_v61 = vadd.f32 %v19244_v56, %v19194_v51  ;;  %v15041_v51 = vld [vmem:[#allocation2 + $0x768] ss:$20 sps:$4 sm:$0xff]  }
 0x2a5   : > { %21024 = vst [vmem:[#allocation60_spill] sm:$0xff] %v19419_v7  ;;  %v19428_v18 = vpop.f32.mrf.mxu1  ;;  %v19438_v1 = vpop.permute.xlu0 %9401 }
 0x2a6   : > { %v8856_v26 = vpop.f32.mrf.mxu0 }
 0x2a7   : > { %v19432_v53 = vadd.f32 %v8856_v26, %v8568_v10  ;;  %v8665_v5 = vpop.f32.mrf.mxu1  ;;  %v8576_v26 = vadd.f32 %v19244_v56, %v19218_v49  ;;  %v19444_v10 = vpop.permute.xlu1 %9403 }
 0x2a8   : > { %v8858_v7 = vpop.f32.mrf.mxu0 }
 0x2a9   : > { %21025 = vst [vmem:[#allocation61_spill] sm:$0xff] %v19432_v53  ;;  %v19436_v21 = vpop.f32.mrf.mxu1 }
 0x2aa   : > { %v8861_v14 = vpop.f32.mrf.mxu0  ;;  %13564 = vmatmul.mubr.bf16.gmra.mxu1 %v15038_v58 }
 0x2ab   : > { %v19440_v37 = vadd.f32 %v8861_v14, %v8573_v61  ;;  %13567 = vmatprep.mubr.bf16.mxu1 %v15040_v36  ;;  %v8670_v62 = vpop.f32.mrf.mxu1  ;;  %v8581_v61 = vadd.f32 %v19244_v56, %v19239_v25  ;;  %v19452_v14 = vpop.permute.xlu0 %9405 }
 0x2ac   : > { %v8863_v27 = vpop.f32.mrf.mxu0  ;;  %v19456_v49 = vpop.permute.xlu1 %9407 }
 0x2ad   : > { %21026 = vst [vmem:[#allocation62_spill] sm:$0xff] %v19440_v37  ;;  %v19446_v7 = vpop.f32.mrf.mxu1 }
 0x2ae   : > { %v8864_v5 = vpop.f32.mrf.mxu0 }
 0x2af   : > { %v19448_v53 = vadd.f32 %v8864_v5, %v8576_v26  ;;  %v8673_v43 = vpop.f32.mrf.mxu1  ;;  %v8584_v26 = vadd.f32 %v19244_v56, %v19264_v48  ;;  %v19468_v15 = vpop.permute.xlu0 %9409  ;;  %v8589_v48 = vadd.f32 %v19244_v56, %v19285_v12 }
 0x2b0   : > { %v8866_v58 = vpop.f32.mrf.mxu0  ;;  %v21029_v43 = vld [vmem:[#allocation10_spill] sm:$0xff]  ;;  %v19475_v24 = vpop.permute.xlu1 %9411 }
 0x2b1   : > { %21027 = vst [vmem:[#allocation63_spill] sm:$0xff] %v19448_v53  ;;  %v19454_v36 = vpop.f32.mrf.mxu1  ;;  %v9453_v5 = vmul.f32 %v19399_v13, %v21029_v43  ;;  %v21031_v53 = vld [vmem:[#allocation22_spill] sm:$0xff] }
 0x2b2   : > { %v8869_v27 = vpop.f32.mrf.mxu0  ;;  %13568 = vmatmul.mubr.bf16.gmra.mxu1 %v15041_v51  ;;  %v9454_v50 = vmul.f32 %v19403_v59, %v21031_v53  ;;  %v21040_v53 = vld [vmem:[#allocation21_spill] sm:$0xff] }
 0x2b3   : > { %v19458_v62 = vadd.f32 %v8869_v27, %v8581_v61  ;;  %v8678_v37 = vpop.f32.mrf.mxu1  ;;  %v21033_v61 = vld [vmem:[#allocation12_spill] sm:$0xff]  ;;  %v19483_v12 = vpop.permute.xlu0 %9413 }
 0x2b4   : > { %v8871_v30 = vpop.f32.mrf.mxu0  ;;  %v9455_v27 = vmul.f32 %v9394_v4, %v21033_v61 }
 0x2b5   : > { %21028 = vst [vmem:[#allocation64_spill] sm:$0xff] %v19458_v62  ;;  %v19464_v58 = vpop.f32.mrf.mxu1  ;;  %v12540_v62 = vmul.f32 -1.442695, %v9453_v5  ;;  %v21035_v5 = vld [vmem:[#allocation11_spill] sm:$0xff] }
 0x2b6   : > { %21030 = vst [vmem:[#allocation65_spill] sm:$0xff] %v19464_v58  ;;  %v8872_v25 = vpop.f32.mrf.mxu0  ;;  %v12541_v58 = vmul.f32 -1.442695, %v9454_v50 }
 0x2b7   : > { %v19470_v51 = vadd.f32 %v8872_v25, %v8584_v26  ;;  %v8681_v37 = vpop.f32.mrf.mxu1  ;;  %v12542_v26 = vmul.f32 -1.442695, %v9455_v27  ;;  %15047 = vpow2.f32 %v12540_v62  ;;  %v15457_v62 = vld [vmem:[%s15728_s13 + $0x39] sm:$0xff] }
 0x2b8   : > { %v8874_v30 = vpop.f32.mrf.mxu0  ;;  %v8592_v37 = vadd.f32 %v19244_v56, %v19301_v63  ;;  %15049 = vpow2.f32 %v12541_v58 }
 0x2b9   : > { %21032 = vst [vmem:[#allocation66_spill] sm:$0xff] %v19470_v51  ;;  %v19477_v13 = vpop.f32.mrf.mxu1  ;;  %v9456_v30 = vmul.f32 %v19415_v35, %v21035_v5  ;;  %v15458_v35 = vld [vmem:[%s15728_s13 + $0x61] sm:$0xff]  ;;  %15051 = vpow2.f32 %v12542_v26  ;;  %v15461_v26 = vld [vmem:[%s15728_s13 + $0x99] sm:$0xff]  ;;  %v15463_v5 = vld [vmem:[%s15728_s13 + $0xc9] sm:$0xff] }
 0x2ba   : > { %v8877_v43 = vpop.f32.mrf.mxu0 }
 0x2bb   : > { %v19479_v59 = vadd.f32 %v8877_v43, %v8589_v48  ;;  %v8686_v25 = vpop.f32.mrf.mxu1  ;;  %v19489_v43 = vpop.permute.xlu1 %9415  ;;  %v15456_v48 = vld [vmem:[%s15728_s13 + $0x31] sm:$0xff] }
 0x2bc   : > { %v8879_v4 = vpop.f32.mrf.mxu0  ;;  %v19495_v63 = vsel %vm854_vm0, %v15456_v48, 0.0  ;;  %v19499_v25 = vsel %vm854_vm0, %v15457_v62, 0.0  ;;  %v15460_v48 = vld [vmem:[%s15728_s13 + $0x91] sm:$0xff]  ;;  %v8597_v62 = vadd.f32 %v19244_v56, %v19309_v2 }
 0x2bd   : > { %21034 = vst [vmem:[#allocation67_spill] sm:$0xff] %v19479_v59  ;;  %v19487_v51 = vpop.f32.mrf.mxu1  ;;  %v19503_v4 = vsel %vm854_vm0, %v15458_v35, 0.0  ;;  %v9457_v35 = vmul.f32 %v19426_v40, %v21040_v53  ;;  %v15045_v40 = vld [vmem:[%s20847_s5 + $0x8] sm:$0xff]  }
 0x2be   : > { %v8880_v50 = vpop.f32.mrf.mxu0  ;;  %21037 = vst [vmem:[#allocation69_spill] sm:$0xff] %v19503_v4  ;;  %13583 = vmatprep.subr.bf16.mxu0 %v15045_v40 }
 0x2bf   : > { %v19491_v27 = vadd.f32 %v8880_v50, %v8592_v37  ;;  %v8689_v58 = vpop.f32.mrf.mxu1  ;;  %v15459_v37 = vld [vmem:[%s15728_s13 + $0x69] sm:$0xff]  ;;  %13584 = vmatpush3.bf16.msra.mxu0 %v15045_v40 }
 0x2c0   : > { %v8882_v59 = vpop.f32.mrf.mxu0  ;;  %v19507_v50 = vsel %vm854_vm0, %v15459_v37, 0.0  ;;  %v15462_v58 = vld [vmem:[%s15728_s13 + $0xc1] sm:$0xff]  ;;  %v15474_v40 = vld [vmem:[%s15728_s13 + $0x249] sm:$0xff] }
 0x2c1   : > { %21036 = vst [vmem:[#allocation68_spill] sm:$0xff] %v19491_v27  ;;  %21038 = vst [vmem:[#allocation70_spill] sm:$0xff] %v19507_v50  ;;  %v19511_v27 = vsel %vm854_vm0, %v15460_v48, 0.0  ;;  %v19519_v59 = vsel %vm854_vm0, %v15461_v26, 0.0  ;;  %v19523_v37 = vsel %vm854_vm0, %v15462_v58, 0.0  ;;  %v19527_v48 = vsel %vm854_vm0, %v15463_v5, 0.0  ;;  %v19529_v2 = vpop.f32.mrf.mxu1 }
 0x2c2   : > { %21039 = vst [vmem:[#allocation71_spill] sm:$0xff] %v19511_v27  ;;  %21041 = vst [vmem:[#allocation72_spill] sm:$0xff] %v19519_v59  ;;  %v12543_v27 = vmul.f32 -1.442695, %v9456_v30  ;;  %v8885_v61 = vpop.f32.mrf.mxu0  ;;  %v15464_v26 = vld [vmem:[%s15728_s13 + $0xf1] sm:$0xff]  ;;  %v15465_v58 = vld [vmem:[%s15728_s13 + $0xf9] sm:$0xff] }
 0x2c3   : > { %21042 = vst [vmem:[#allocation73_spill] sm:$0xff] %v19523_v37  ;;  %21043 = vst [vmem:[#allocation74_spill] sm:$0xff] %v19527_v48  ;;  %v19536_v53 = vsel %vm854_vm0, %v15464_v26, 0.0  ;;  %v19540_v37 = vsel %vm854_vm0, %v15465_v58, 0.0  ;;  %v15466_v5 = vld [vmem:[%s15728_s13 + $0x121] sm:$0xff]  ;;  %v19546_v48 = vpop.permute.xlu0 %9417  ;;  %v19548_v59 = vadd.f32 %v8885_v61, %v8597_v62  ;;  %v15467_v50 = vld [vmem:[%s15728_s13 + $0x129] sm:$0xff]  ;;  %v8694_v61 = vpop.f32.mrf.mxu1 }
 0x2c4   : > { %21044 = vst [vmem:[#allocation75_spill] sm:$0xff] %v19529_v2  ;;  %21045 = vst [vmem:[#allocation76_spill] sm:$0xff] %v19536_v53  ;;  %v19544_v30 = vsel %vm854_vm0, %v15466_v5, 0.0  ;;  %v19552_v4 = vsel %vm854_vm0, %v15467_v50, 0.0  ;;  %v15468_v26 = vld [vmem:[%s15728_s13 + $0x151] sm:$0xff]  ;;  %v15469_v58 = vld [vmem:[%s15728_s13 + $0x1e1] sm:$0xff]  ;;  %v8887_v62 = vpop.f32.mrf.mxu0  ;;  %15053 = vpow2.f32 %v12543_v27 }
 0x2c5   : > { %21046 = vst [vmem:[#allocation77_spill] sm:$0xff] %v19540_v37  ;;  %21047 = vst [vmem:[#allocation78_spill] sm:$0xff] %v19544_v30  ;;  %v19556_v53 = vsel %vm854_vm0, %v15468_v26, 0.0  ;;  %v19560_v37 = vsel %vm854_vm0, %v15469_v58, 0.0  ;;  %v21052_v5 = vld [vmem:[#allocation13_spill] sm:$0xff]  ;;  %v8600_v26 = vadd.f32 %v19244_v56, %v19318_v19  ;;  %v15473_v19 = vld [vmem:[%s15728_s13 + $0x241] sm:$0xff] }
 0x2c6   : > { %21048 = vst [vmem:[#allocation79_spill] sm:$0xff] %v19548_v59  ;;  %21049 = vst [vmem:[#allocation80_spill] sm:$0xff] %v19552_v4  ;;  %v9458_v30 = vmul.f32 %v19430_v38, %v21052_v5  ;;  %v15470_v59 = vld [vmem:[%s15728_s13 + $0x1e9] sm:$0xff]  ;;  %v21054_v4 = vld [vmem:[#allocation14_spill] sm:$0xff]  ;;  %v19590_v5 = vsel %vm854_vm0, %v15474_v40, 0.0 }
 0x2c7   : > { %21050 = vst [vmem:[#allocation81_spill] sm:$0xff] %v19556_v53  ;;  %21051 = vst [vmem:[#allocation82_spill] sm:$0xff] %v19560_v37  ;;  %v19566_v50 = vsel %vm854_vm0, %v15470_v59, 0.0  ;;  %v12544_v53 = vmul.f32 -1.442695, %v9457_v35  ;;  %v9459_v58 = vmul.f32 %v19438_v1, %v21054_v4  ;;  %v19572_v37 = vpop.permute.xlu1 %9419  ;;  %v15471_v38 = vld [vmem:[%s15728_s13 + $0x211] sm:$0xff]  ;;  %v19586_v1 = vpop.f32.mrf.mxu1 }
 0x2c8   : > { %21053 = vst [vmem:[#allocation83_spill] sm:$0xff] %v19566_v50  ;;  %v19576_v61 = vsel %vm854_vm0, %v15471_v38, 0.0  ;;  %v15472_v62 = vld [vmem:[%s15728_s13 + $0x219] sm:$0xff]  ;;  %v19584_v35 = vsel %vm854_vm0, %v15473_v19, 0.0  ;;  %21058 = vst [vmem:[#allocation87_spill] sm:$0xff] %v19586_v1  ;;  %v8888_v50 = vpop.f32.mrf.mxu0  ;;  %v15475_v38 = vld [vmem:[%s15728_s13 + $0x271] sm:$0xff] }
 0x2c9   : > { %21055 = vst [vmem:[#allocation84_spill] sm:$0xff] %v19576_v61  ;;  %v19580_v59 = vsel %vm854_vm0, %v15472_v62, 0.0  ;;  %21057 = vst [vmem:[#allocation86_spill] sm:$0xff] %v19584_v35  ;;  %v19594_v61 = vsel %vm854_vm0, %v15475_v38, 0.0  ;;  %v15476_v4 = vld [vmem:[%s15728_s13 + $0x279] sm:$0xff]  ;;  %v15477_v27 = vld [vmem:[%s15728_s13 + $0x289] sm:$0xff]  ;;  %v8697_v1 = vpop.f32.mrf.mxu1  ;;  %15055 = vpow2.f32 %v12544_v53 }
 0x2ca   : > { %21056 = vst [vmem:[#allocation85_spill] sm:$0xff] %v19580_v59  ;;  %21059 = vst [vmem:[#allocation88_spill] sm:$0xff] %v19590_v5  ;;  %v19598_v62 = vsel %vm854_vm0, %v15476_v4, 0.0  ;;  %v19600_v59 = vadd.f32 %v8888_v50, %v8600_v26  ;;  %v19604_v19 = vsel %vm854_vm0, %v15477_v27, 0.0  ;;  %v15478_v35 = vld [vmem:[%s15728_s13 + $0x291] sm:$0xff]  ;;  %v8890_v4 = vpop.f32.mrf.mxu0  ;;  %v8605_v26 = vadd.f32 %v19244_v56, %v19324_v3  ;;  %v15481_v1 = vld [vmem:[%s15728_s13 + $0x2b9] sm:$0xff] }
 0x2cb   : > { %21060 = vst [vmem:[#allocation89_spill] sm:$0xff] %v19594_v61  ;;  %21061 = vst [vmem:[#allocation90_spill] sm:$0xff] %v19598_v62  ;;  %v19608_v40 = vsel %vm854_vm0, %v15478_v35, 0.0  ;;  %v12545_v5 = vmul.f32 -1.442695, %v9458_v30  ;;  %v21065_v38 = vld [vmem:[#allocation16_spill] sm:$0xff]  ;;  %v19618_v35 = vpop.permute.xlu0 %9421  ;;  %v15048_v30 = vpop.eup %15047 }
 0x2cc   : > { %21062 = vst [vmem:[#allocation91_spill] sm:$0xff] %v19600_v59  ;;  %21063 = vst [vmem:[#allocation92_spill] sm:$0xff] %v19604_v19  ;;  %v9460_v61 = vmul.f32 %v19444_v10, %v21065_v38  ;;  %v15479_v62 = vld [vmem:[%s15728_s13 + $0x2a1] sm:$0xff]  ;;  %v12546_v27 = vmul.f32 -1.442695, %v9459_v58  ;;  %v19626_v4 = vsel %vm854_vm0, %v15481_v1, 0.0  ;;  %v8893_v19 = vpop.f32.mrf.mxu0 }
 0x2cd   : > { %21064 = vst [vmem:[#allocation93_spill] sm:$0xff] %v19608_v40  ;;  %v19614_v50 = vsel %vm854_vm0, %v15479_v62, 0.0  ;;  %v15480_v40 = vld [vmem:[%s15728_s13 + $0x2a9] sm:$0xff]  ;;  %21068 = vst [vmem:[#allocation96_spill] sm:$0xff] %v19626_v4  ;;  %v15482_v62 = vld [vmem:[%s15728_s13 + $0x2c1] sm:$0xff]  ;;  %15057 = vpow2.f32 %v12545_v5 }
 0x2ce   : > { %21066 = vst [vmem:[#allocation94_spill] sm:$0xff] %v19614_v50  ;;  %v19622_v10 = vsel %vm854_vm0, %v15480_v40, 0.0  ;;  %v19630_v3 = vsel %vm854_vm0, %v15482_v62, 0.0  ;;  %v21070_v53 = vld [vmem:[#allocation15_spill] sm:$0xff]  ;;  %v19634_v50 = vpop.f32.mrf.mxu1  ;;  %v15483_v59 = vld [vmem:[%s15728_s13 + $0x2d1] sm:$0xff]  ;;  %v19648_v62 = vpop.permute.xlu1 %9423  ;;  %15059 = vpow2.f32 %v12546_v27 }
 0x2cf   : > { %21067 = vst [vmem:[#allocation95_spill] sm:$0xff] %v19622_v10  ;;  %21069 = vst [vmem:[#allocation97_spill] sm:$0xff] %v19630_v3  ;;  %v9461_v58 = vmul.f32 %v19452_v14, %v21070_v53  ;;  %v19638_v40 = vsel %vm854_vm0, %v15483_v59, 0.0  ;;  %v15484_v10 = vld [vmem:[%s15728_s13 + $0x2d9] sm:$0xff]  ;;  %v15485_v1 = vld [vmem:[%s15728_s13 + $0x2e9] sm:$0xff]  ;;  %v19650_v3 = vadd.f32 %v8893_v19, %v8605_v26  ;;  %v15050_v14 = vpop.eup %15049  ;;  %v8608_v19 = vadd.f32 %v19244_v56, %v19333_v39 }
 0x2d0   : > { %21071 = vst [vmem:[#allocation98_spill] sm:$0xff] %v19634_v50  ;;  %21072 = vst [vmem:[#allocation99_spill] sm:$0xff] %v19638_v40  ;;  %v19642_v38 = vsel %vm854_vm0, %v15484_v10, 0.0  ;;  %v19646_v4 = vsel %vm854_vm0, %v15485_v1, 0.0  ;;  %v15486_v53 = vld [vmem:[%s15728_s13 + $0x2f1] sm:$0xff]  ;;  %v15487_v59 = vld [vmem:[%s15728_s13 + $0x301] sm:$0xff]  ;;  %v8702_v1 = vpop.f32.mrf.mxu1 }
 0x2d1   : > { %21073 = vst [vmem:[#allocation100_spill] sm:$0xff] %v19642_v38  ;;  %21074 = vst [vmem:[#allocation101_spill] sm:$0xff] %v19646_v4  ;;  %v19654_v50 = vsel %vm854_vm0, %v15486_v53, 0.0  ;;  %v19658_v40 = vsel %vm854_vm0, %v15487_v59, 0.0  ;;  %v12547_v10 = vmul.f32 -1.442695, %v9460_v61  ;;  %v8895_v4 = vpop.f32.mrf.mxu0  ;;  %v15052_v38 = vpop.eup %15051 }
 0x2d2   : > { %21075 = vst [vmem:[#allocation102_spill] sm:$0xff] %v19650_v3  ;;  %21076 = vst [vmem:[#allocation103_spill] sm:$0xff] %v19654_v50  ;;  %v9581_v26 = vadd.f32 1.0, %v15048_v30  ;;  %v21078_v3 = vld [vmem:[#allocation18_spill] sm:$0xff]  ;;  %v15488_v50 = vld [vmem:[%s15728_s13 + $0x309] sm:$0xff] }
 0x2d3   : > { %21077 = vst [vmem:[#allocation104_spill] sm:$0xff] %v19658_v40  ;;  %v9462_v53 = vmul.f32 %v19456_v49, %v21078_v3  ;;  %v19666_v2 = vsel %vm854_vm0, %v15488_v50, 0.0  ;;  %v15489_v59 = vld [vmem:[%s15728_s13 + $0x321] sm:$0xff]  ;;  %v12548_v61 = vmul.f32 -1.442695, %v9461_v58  ;;  %v21081_v4 = vld [vmem:[#allocation20_spill] sm:$0xff]  ;;  %v19674_v40 = vpop.f32.mrf.mxu1  ;;  %v8896_v39 = vpop.f32.mrf.mxu0  ;;  %v9464_v50 = vmul.f32 %v19475_v24, %v19059_v45 }
 0x2d4   : > { %21079 = vst [vmem:[#allocation105_spill] sm:$0xff] %v19666_v2  ;;  %v19670_v5 = vsel %vm854_vm0, %v15489_v59, 0.0  ;;  %v9463_v1 = vmul.f32 %v19468_v15, %v21081_v4  ;;  %v15490_v27 = vld [vmem:[%s15728_s13 + $0x331] sm:$0xff]  ;;  %v9582_v49 = vadd.f32 1.0, %v15050_v14  ;;  %v19682_v2 = vpop.permute.xlu0 %9425  ;;  %v19684_v59 = vadd.f32 %v8896_v39, %v8608_v19  ;;  %v15491_v58 = vld [vmem:[%s15728_s13 + $0x339] sm:$0xff]  ;;  %v19696_v39 = vpop.permute.xlu1 %9427 }
 0x2d5   : > { %21080 = vst [vmem:[#allocation106_spill] sm:$0xff] %v19670_v5  ;;  %v19678_v30 = vsel %vm854_vm0, %v15490_v27, 0.0  ;;  %v19688_v15 = vsel %vm854_vm0, %v15491_v58, 0.0  ;;  %v9583_v5 = vadd.f32 1.0, %v15052_v38  ;;  %15061 = vpow2.f32 %v12547_v10  ;;  %v8898_v14 = vpop.f32.mrf.mxu0  ;;  %v15492_v58 = vld [vmem:[%s15728_s13 + $0x391] sm:$0xff]  ;;  %v15493_v10 = vld [vmem:[%s15728_s13 + $0x399] sm:$0xff] }
 0x2d6   : > { %21082 = vst [vmem:[#allocation107_spill] sm:$0xff] %v19678_v30  ;;  %21083 = vst [vmem:[#allocation108_spill] sm:$0xff] %v19684_v59  ;;  %v9465_v27 = vmul.f32 %v19483_v12, %v19074_v0  ;;  %v8705_v30 = vpop.f32.mrf.mxu1  ;;  %v8613_v3 = vadd.f32 %v19244_v56, %v19339_v42  ;;  %15063 = vrcp.f32 %v9581_v26  ;;  %v12549_v24 = vmul.f32 -1.442695, %v9462_v53  ;;  %v15054_v53 = vpop.eup %15053  ;;  %v15495_v59 = vld [vmem:[%s15728_s13 + $0x3c9] sm:$0xff] }
 0x2d7   : > { %21084 = vst [vmem:[#allocation109_spill] sm:$0xff] %v19688_v15  ;;  %v9466_v19 = vmul.f32 %v19489_v43, %v19096_v32  ;;  %v19700_v38 = vsel %vm854_vm0, %v15492_v58, 0.0  ;;  %v19704_v12 = vsel %vm854_vm0, %v15493_v10, 0.0  ;;  %15065 = vpow2.f32 %v12548_v61  ;;  %v8901_v26 = vpop.f32.mrf.mxu0  ;;  %v15494_v58 = vld [vmem:[%s15728_s13 + $0x3c1] sm:$0xff] }
 0x2d8   : > { %21085 = vst [vmem:[#allocation110_spill] sm:$0xff] %v19700_v38  ;;  %21086 = vst [vmem:[#allocation111_spill] sm:$0xff] %v19704_v12  ;;  %v12550_v30 = vmul.f32 -1.442695, %v9463_v1  ;;  %v19706_v42 = vpop.f32.mrf.mxu1  ;;  %15067 = vrcp.f32 %v9582_v49  ;;  %v12551_v14 = vmul.f32 -1.442695, %v9464_v50  ;;  %v9467_v43 = vmul.f32 %v19546_v48, %v19082_v23  ;;  %v9430_v50 = vpop.permute.xlu0 %9429 }
 0x2d9   : > { %v19710_v15 = vadd.f32 %v8901_v26, %v8613_v3  ;;  %v19714_v38 = vsel %vm854_vm0, %v15494_v58, 0.0  ;;  %15069 = vrcp.f32 %v9583_v5  ;;  %v12552_v61 = vmul.f32 -1.442695, %v9465_v27  ;;  %v8903_v12 = vpop.f32.mrf.mxu0  ;;  %v15056_v26 = vpop.eup %15055  ;;  %v15496_v5 = vld [vmem:[%s15728_s13 + $0x3f1] sm:$0xff]  ;;  %v15515_v23 = vld [vmem:[%s15728_s13 + $0xe1] sm:$0xff] }
 0x2da   : > { %21088 = vst [vmem:[#allocation113_spill] sm:$0xff] %v19714_v38  ;;  %v9468_v1 = vmul.f32 %v19572_v37, %v19109_v31  ;;  %v8710_v10 = vpop.f32.mrf.mxu1  ;;  %v19720_v49 = vsel %vm854_vm0, %v15495_v59, 0.0  ;;  %v8616_v48 = vadd.f32 %v19244_v56, %v19345_v33  ;;  %15071 = vpow2.f32 %v12549_v24  ;;  %v21091_v24 = vld [vmem:[#allocation30_spill] sm:$0xff] }
 0x2db   : > { %21087 = vst [vmem:[#allocation112_spill] sm:$0xff] %v19710_v15  ;;  %21089 = vst [vmem:[#allocation114_spill] sm:$0xff] %v19720_v49  ;;  %v12553_v3 = vmul.f32 -1.442695, %v9466_v19  ;;  %v19726_v27 = vsel %vm854_vm0, %v15496_v5, 0.0  ;;  %v9584_v37 = vadd.f32 1.0, %v15054_v53  ;;  %15073 = vpow2.f32 %v12550_v30  ;;  %v8904_v58 = vpop.f32.mrf.mxu0  ;;  %v9432_v10 = vpop.permute.xlu1 %9431 }
 0x2dc   : > { %21090 = vst [vmem:[#allocation115_spill] sm:$0xff] %v19726_v27  ;;  %v9469_v12 = vmul.f32 %v19618_v35, %v19122_v6  ;;  %v19730_v59 = vpop.f32.mrf.mxu1  ;;  %15075 = vpow2.f32 %v12551_v14  ;;  %v12554_v33 = vmul.f32 -1.442695, %v9467_v43  ;;  %v9470_v19 = vmul.f32 %v19648_v62, %v21091_v24  ;;  %v15497_v5 = vld [vmem:[%s15728_s13 + $0x3f9] sm:$0xff]  ;;  %v15498_v30 = vld [vmem:[%s15728_s13 + $0x421] sm:$0xff]  ;;  %v15058_v43 = vpop.eup %15057  ;;  %v15499_v15 = vld [vmem:[%s15728_s13 + $0x429] sm:$0xff] }
 0x2dd   : > { %v19734_v49 = vadd.f32 %v8904_v58, %v8616_v48  ;;  %v19738_v53 = vsel %vm854_vm0, %v15497_v5, 0.0  ;;  %v19742_v35 = vsel %vm854_vm0, %v15498_v30, 0.0  ;;  %15077 = vpow2.f32 %v12552_v61  ;;  %v8906_v14 = vpop.f32.mrf.mxu0  ;;  %v15060_v5 = vpop.eup %15059  ;;  %v21097_v61 = vld [vmem:[#allocation29_spill] sm:$0xff] }
 0x2de   : > { %21093 = vst [vmem:[#allocation117_spill] sm:$0xff] %v19738_v53  ;;  %21094 = vst [vmem:[#allocation118_spill] sm:$0xff] %v19742_v35  ;;  %v12555_v27 = vmul.f32 -1.442695, %v9468_v1  ;;  %v8713_v38 = vpop.f32.mrf.mxu1  ;;  %v19746_v62 = vsel %vm854_vm0, %v15499_v15, 0.0  ;;  %v8621_v48 = vadd.f32 %v19244_v56, %v19351_v47  ;;  %v9585_v58 = vadd.f32 1.0, %v15056_v26 }
 0x2df   : > { %21092 = vst [vmem:[#allocation116_spill] sm:$0xff] %v19734_v49  ;;  %21095 = vst [vmem:[#allocation119_spill] sm:$0xff] %v19746_v62  ;;  %15079 = vpow2.f32 %v12553_v3  ;;  %v15500_v53 = vld [vmem:[%s15728_s13 + $0x451] sm:$0xff]  ;;  %v12556_v38 = vmul.f32 -1.442695, %v9469_v12  ;;  %v9471_v1 = vmul.f32 %v19682_v2, %v21097_v61  ;;  %v8909_v15 = vpop.f32.mrf.mxu0  ;;  %v21098_v56 = vld [vmem:[#allocation31_spill] sm:$0xff]  ;;  %v9434_v3 = vpop.permute.xlu0 %9433 }
 0x2e0   : > { %v19752_v30 = vsel %vm854_vm0, %v15500_v53, 0.0  ;;  %15081 = vrcp.f32 %v9584_v37  ;;  %v19756_v14 = vpop.f32.mrf.mxu1  ;;  %v12557_v62 = vmul.f32 -1.442695, %v9470_v19  ;;  %v9472_v47 = vmul.f32 %v19696_v39, %v21098_v56  ;;  %v15501_v35 = vld [vmem:[%s15728_s13 + $0x459] sm:$0xff]  ;;  %v15502_v37 = vld [vmem:[%s15728_s13 + $0x481] sm:$0xff] }
 0x2e1   : > { %21096 = vst [vmem:[#allocation120_spill] sm:$0xff] %v19752_v30  ;;  %15083 = vpow2.f32 %v12554_v33  ;;  %v19760_v26 = vadd.f32 %v8909_v15, %v8621_v48  ;;  %v19764_v53 = vsel %vm854_vm0, %v15501_v35, 0.0  ;;  %v19768_v2 = vsel %vm854_vm0, %v15502_v37, 0.0  ;;  %v8911_v19 = vpop.f32.mrf.mxu0  ;;  %v19773_v39 = vld [vmem:[%s20846_s4] ss:$0 sm:$0xff] }
 0x2e2   : > { %21100 = vst [vmem:[#allocation122_spill] sm:$0xff] %v19764_v53  ;;  %21101 = vst [vmem:[#allocation123_spill] sm:$0xff] %v19768_v2  ;;  %v9586_v12 = vadd.f32 1.0, %v15058_v43  ;;  %15085 = vpow2.f32 %v12555_v27  ;;  %v8718_v33 = vpop.f32.mrf.mxu1  ;;  %v15062_v30 = vpop.eup %15061  ;;  %v8624_v48 = vadd.f32 %v19773_v39, %v19357_v52  ;;  %v9587_v35 = vadd.f32 1.0, %v15060_v5  ;;  %v15504_v27 = vld [vmem:[%s15728_s13 + $0x489] sm:$0xff]  ;;  %v15514_v31 = vld [vmem:[%s15728_s13 + $0xd9] sm:$0xff] }
 0x2e3   : > { %21099 = vst [vmem:[#allocation121_spill] sm:$0xff] %v19760_v26  ;;  %15087 = vrcp.f32 %v9585_v58  ;;  %v9473_v15 = vmul.f32 %v9430_v50, %v19167_v54  ;;  %v19778_v53 = vpop.permute.xlu1 %9435  ;;  %v19780_v37 = vpop.eup %15063  ;;  %v19784_v43 = vsel %vm854_vm0, %v15504_v27, 0.0  ;;  %v15505_v33 = vld [vmem:[%s15728_s13 + $0x4b1] sm:$0xff]  ;;  %v12558_v2 = vmul.f32 -1.442695, %v9471_v1  ;;  %v15506_v1 = vld [vmem:[%s15728_s13 + $0x19] sm:$0xff] }
 0x2e4   : > { %21102 = vst [vmem:[#allocation124_spill] sm:$0xff] %v19784_v43  ;;  %v19788_v19 = vsel %vm854_vm0, %v15505_v33, 0.0  ;;  %15089 = vpow2.f32 %v12556_v38  ;;  %v19790_v52 = vpop.f32.mrf.mxu1  ;;  %v8912_v58 = vpop.f32.mrf.mxu0  ;;  %v12559_v50 = vmul.f32 -1.442695, %v9472_v47  ;;  %v9474_v26 = vmul.f32 %v9432_v10, %v19191_v17 }
 0x2e5   : > { %21103 = vst [vmem:[#allocation125_spill] sm:$0xff] %v19788_v19  ;;  %v15066_v5 = vpop.eup %15065  ;;  %15091 = vpow2.f32 %v12557_v62  ;;  %v19793_v49 = vadd.f32 %v8912_v58, %v8624_v48  ;;  %v9588_v43 = vadd.f32 1.0, %v15062_v30  ;;  %v9475_v33 = vmul.f32 %v9434_v3, %v19188_v11  ;;  %v19806_v48 = vpop.permute.xlu0 %9437  ;;  %v15507_v30 = vld [vmem:[%s15728_s13 + $0x21] sm:$0xff]  ;;  %v15510_v11 = vld [vmem:[%s15728_s13 + $0x79] sm:$0xff] }
 0x2e6   : > { %v19795_v27 = vpop.eup %15067  ;;  %15093 = vrcp.f32 %v9586_v12  ;;  %v8721_v19 = vpop.f32.mrf.mxu1  ;;  %v19800_v54 = vsel %vm854_vm0, %v15506_v1, 0.0  ;;  %v8629_v10 = vadd.f32 %v19773_v39, %v19363_v46  ;;  %v12560_v47 = vmul.f32 -1.442695, %v9473_v15  ;;  %v15046_v1 = vld [vmem:[%s20847_s5] sm:$0xff]   ;;  %v15508_v46 = vld [vmem:[%s15728_s13 + $0x49] sm:$0xff]  ;;  %v15509_v15 = vld [vmem:[%s15728_s13 + $0x51] sm:$0xff] }
 0x2e7   : > { %21104 = vst [vmem:[#allocation126_spill] sm:$0xff] %v19793_v49  ;;  %v8914_v38 = vpop.f32.mrf.mxu0  ;;  %v19802_v62 = vpop.eup %15069  ;;  %15095 = vrcp.f32 %v9587_v35  ;;  %v19810_v3 = vsel %vm854_vm0, %v15507_v30, 0.0  ;;  %v9589_v19 = vadd.f32 1.0, %v15066_v5  ;;  %v19819_v35 = vsel %vm854_vm0, %v15508_v46, 0.0  ;;  %13585 = vmatprep.subr.bf16.mxu0 %v15046_v1 }
 0x2e8   : > { %v15072_v12 = vpop.eup %15071  ;;  %15097 = vpow2.f32 %v12558_v2  ;;  %v19812_v58 = vpop.f32.mrf.mxu1  ;;  %v19823_v30 = vsel %vm854_vm0, %v15509_v15, 0.0  ;;  %v12561_v2 = vmul.f32 -1.442695, %v9474_v26  ;;  %v19831_v24 = vsel %vm854_vm0, %v15510_v11, 0.0  ;;  %v15511_v15 = vld [vmem:[%s15728_s13 + $0x81] sm:$0xff]  ;;  %v15512_v26 = vld [vmem:[%s15728_s13 + $0xa9] sm:$0xff]  ;;  %13586 = vmatpush3.bf16.msra.mxu0 %v15046_v1 }
 0x2e9   : > { %v8917_v38 = vpop.f32.mrf.mxu0  ;;  %v15074_v49 = vpop.eup %15073  ;;  %15099 = vpow2.f32 %v12559_v50  ;;  %v12562_v56 = vmul.f32 -1.442695, %v9475_v33  ;;  %v19835_v32 = vsel %vm854_vm0, %v15511_v15, 0.0  ;;  %v19839_v50 = vsel %vm854_vm0, %v15512_v26, 0.0 }
 0x2ea   : > { %v19825_v5 = vpop.permute.xlu1 %9439  ;;  %v19827_v17 = vadd.f32 %v8917_v38, %v8629_v10  ;;  %v15076_v46 = vpop.eup %15075  ;;  %15101 = vrcp.f32 %v9588_v43  ;;  %v8632_v11 = vadd.f32 %v19773_v39, %v19369_v29  ;;  %v9590_v38 = vadd.f32 1.0, %v15072_v12  ;;  %v15513_v43 = vld [vmem:[%s15728_s13 + $0xb1] sm:$0xff] }
 0x2eb   : > { %v8726_v6 = vpop.f32.mrf.mxu1  ;;  %v8919_v61 = vpop.f32.mrf.mxu0  ;;  %15103 = vpow2.f32 %v12560_v47  ;;  %v8637_v33 = vadd.f32 %v19773_v39, %v19375_v8  ;;  %v9591_v15 = vadd.f32 1.0, %v15074_v49  ;;  %v9476_v26 = vmul.f32 %v19778_v53, %v19200_v41 }
 0x2ec   : > { %21105 = vst [vmem:[#allocation127_spill] sm:$0xff] %v19827_v17  ;;  %v15078_v10 = vpop.eup %15077  ;;  %v19845_v6 = vsel %vm854_vm0, %v15513_v43, 0.0  ;;  %15105 = vrcp.f32 %v9589_v19  ;;  %v9592_v12 = vadd.f32 1.0, %v15076_v46  ;;  %v9442_v1 = vpop.permute.xlu0 %9441  ;;  %v19859_v0 = vsel %vm854_vm0, %v15514_v31, 0.0 }
 0x2ed   : > { %v15080_v61 = vpop.eup %15079  ;;  %v19851_v17 = vpop.f32.mrf.mxu1  ;;  %15107 = vpow2.f32 %v12561_v2  ;;  %v8640_v49 = vadd.f32 %v19773_v39, %v19381_v20  ;;  %v9593_v53 = vadd.f32 1.0, %v15078_v10  ;;  %v19865_v46 = vsel %vm854_vm0, %v15515_v23, 0.0 }
 0x2ee   : > { %21106 = vst [vmem:[#allocation128_spill] sm:$0xff] %v19851_v17  ;;  %v8920_v29 = vpop.f32.mrf.mxu0  ;;  %v19853_v47 = vpop.eup %15081  ;;  %15109 = vpow2.f32 %v12562_v56  ;;  %v9594_v31 = vadd.f32 1.0, %v15080_v61  ;;  %v9477_v20 = vmul.f32 %v19806_v48, %v19213_v55  ;;  %v12563_v23 = vmul.f32 -1.442695, %v9476_v26  ;;  %v15517_v55 = vld [vmem:[%s15728_s13 + $0x111] sm:$0xff] }
 0x2ef   : > { %v19855_v43 = vadd.f32 %v8920_v29, %v8632_v11  ;;  %v15084_v8 = vpop.eup %15083  ;;  %v8729_v19 = vpop.f32.mrf.mxu1  ;;  %v19869_v11 = vadd.f32 %v19773_v39, %v19387_v22  ;;  %15111 = vrcp.f32 %v9590_v38  ;;  %v15516_v22 = vld [vmem:[%s15728_s13 + $0x109] sm:$0xff]  ;;  %v19889_v17 = vsel %vm854_vm0, %v15517_v55, 0.0 }
 0x2f0   : > { %v8922_v41 = vpop.f32.mrf.mxu0  ;;  %v15086_v2 = vpop.eup %15085  ;;  %15113 = vrcp.f32 %v9591_v15  ;;  %v19883_v38 = vsel %vm854_vm0, %v15516_v22, 0.0  ;;  %v19893_v15 = vadd.f32 %v19773_v39, %v19401_v60  ;;  %v9478_v22 = vmul.f32 %v19825_v5, %v19236_v34 }
 0x2f1   : > { %21107 = vst [vmem:[#allocation129_spill] sm:$0xff] %v19855_v43  ;;  %v9444_v10 = vpop.permute.xlu1 %9443  ;;  %v19873_v56 = vpop.eup %15087  ;;  %v19877_v41 = vadd.f32 %v19773_v39, %v19393_v28  ;;  %15115 = vrcp.f32 %v9592_v12  ;;  %v9595_v43 = vadd.f32 1.0, %v15084_v8  ;;  %v9596_v26 = vadd.f32 1.0, %v15086_v2 }
 0x2f2   : > { %v19879_v29 = vpop.f32.mrf.mxu1  ;;  %v8925_v19 = vpop.f32.mrf.mxu0  ;;  %15117 = vrcp.f32 %v9593_v53  ;;  %v12564_v55 = vmul.f32 -1.442695, %v9477_v20  ;;  %v9479_v8 = vmul.f32 %v9442_v1, %v19233_v57  ;;  %v19908_v53 = vadd.f32 %v19773_v39, %v19417_v44 }
 0x2f3   : > { %21108 = vst [vmem:[#allocation130_spill] sm:$0xff] %v19879_v29  ;;  %v15090_v61 = vpop.eup %15089  ;;  %v19885_v48 = vadd.f32 %v8925_v19, %v8637_v33  ;;  %v19901_v33 = vadd.f32 %v19773_v39, %v19409_v9  ;;  %15119 = vrcp.f32 %v9594_v31  ;;  %v9446_v19 = vpop.permute.xlu0 %9445  ;;  %v19918_v1 = vadd.f32 %v19773_v39, %v19436_v21 }
 0x2f4   : > { %v15092_v28 = vpop.eup %15091  ;;  %v8734_v29 = vpop.f32.mrf.mxu1  ;;  %v9597_v5 = vadd.f32 1.0, %v15090_v61  ;;  %15121 = vpow2.f32 %v12563_v23  ;;  %v12565_v23 = vmul.f32 -1.442695, %v9478_v22  ;;  %v9480_v61 = vmul.f32 %v9444_v10, %v19258_v16 }
 0x2f5   : > { %21109 = vst [vmem:[#allocation131_spill] sm:$0xff] %v19885_v48  ;;  %v8927_v45 = vpop.f32.mrf.mxu0  ;;  %v19897_v12 = vpop.eup %15093  ;;  %15123 = vrcp.f32 %v9595_v43  ;;  %v9598_v20 = vadd.f32 1.0, %v15092_v28  ;;  %v19929_v21 = vadd.f32 %v19773_v39, %v19454_v36  ;;  %v12566_v43 = vmul.f32 -1.442695, %v9479_v8 }
 0x2f6   : > { %v19904_v60 = vpop.eup %15095  ;;  %v19912_v45 = vadd.f32 %v19773_v39, %v19428_v18  ;;  %v19914_v2 = vpop.f32.mrf.mxu1  ;;  %v19924_v18 = vadd.f32 %v19773_v39, %v19446_v7  ;;  %15125 = vrcp.f32 %v9596_v26  ;;  %v21112_v26 = vld [vmem:[#allocation65_spill] sm:$0xff] }
 0x2f7   : > { %21110 = vst [vmem:[#allocation132_spill] sm:$0xff] %v19914_v2  ;;  %v8928_v9 = vpop.f32.mrf.mxu0  ;;  %v15098_v31 = vpop.eup %15097  ;;  %15127 = vpow2.f32 %v12564_v55  ;;  %v19937_v22 = vadd.f32 %v19773_v39, %v21112_v26 }
 0x2f8   : > { %v9448_v29 = vpop.permute.xlu1 %9447  ;;  %v19920_v48 = vadd.f32 %v8928_v9, %v8640_v49  ;;  %v15100_v44 = vpop.eup %15099  ;;  %v19933_v49 = vmul.f32 %v19780_v37, %v19800_v54  ;;  %15129 = vrcp.f32 %v9597_v5  ;;  %v9599_v7 = vadd.f32 1.0, %v15098_v31 }
 0x2f9   : > { %v8737_v34 = vpop.f32.mrf.mxu1  ;;  %v8930_v57 = vpop.f32.mrf.mxu0  ;;  %15131 = vrcp.f32 %v9598_v20  ;;  %v9600_v55 = vadd.f32 1.0, %v15100_v44  ;;  %v19947_v54 = vmul.f32 %v19795_v27, %v19810_v3  ;;  %v19951_v5 = vmul.f32 %v19802_v62, %v19495_v63  ;;  %v21116_v3 = vld [vmem:[#allocation42_spill] sm:$0xff] }
 0x2fa   : > { %21111 = vst [vmem:[#allocation133_spill] sm:$0xff] %v19920_v48  ;;  %v15102_v2 = vpop.eup %15101  ;;  %v21113_v34 = vld [vmem:[#allocation40_spill] sm:$0xff]  ;;  %v9450_v8 = vpop.permute.xlu0 %9449  ;;  %15133 = vpow2.f32 %v12565_v23  ;;  %v12567_v31 = vmul.f32 -1.442695, %v9480_v61  ;;  %v19967_v61 = vmul.f32 %v19873_v56, %v19819_v35  ;;  %v19979_v35 = vmul.f32 %v19897_v12, %v19823_v30 }
 0x2fb   : > { %v15104_v28 = vpop.eup %15103  ;;  %v9481_v57 = vmul.f32 %v9446_v19, %v21113_v34  ;;  %v19940_v10 = vpop.f32.mrf.mxu1  ;;  %21115 = vst [vmem:[#allocation134_spill] sm:$0xff] %v19947_v54  ;;  %v19955_v19 = vadd.f32 %v19773_v39, %v19477_v13  ;;  %15135 = vpow2.f32 %v12566_v43  ;;  %v21117_v34 = vld [vmem:[#allocation41_spill] sm:$0xff] }
 0x2fc   : > { %v8933_v9 = vpop.f32.mrf.mxu0  ;;  %v15106_v36 = vpop.eup %15105  ;;  %v9601_v27 = vadd.f32 1.0, %v15104_v28  ;;  %15137 = vrcp.f32 %v9599_v7  ;;  %v9483_v13 = vmul.f32 %v9450_v8, %v21117_v34  ;;  %v21119_v7 = vld [vmem:[#allocation44_spill] sm:$0xff] }
 0x2fd   : > { %v19943_v48 = vadd.f32 %v8933_v9, %v19869_v11  ;;  %v15108_v37 = vpop.eup %15107  ;;  %v8742_v20 = vpop.f32.mrf.mxu1  ;;  %v19959_v11 = vmul.f32 %v19853_v47, %v19499_v25  ;;  %v9482_v9 = vmul.f32 %v9448_v29, %v21116_v3  ;;  %v12568_v62 = vmul.f32 -1.442695, %v9481_v57 }
 0x2fe   : > { %v8935_v44 = vpop.f32.mrf.mxu0  ;;  %v15110_v26 = vpop.eup %15109  ;;  %15139 = vrcp.f32 %v9600_v55  ;;  %v9602_v25 = vadd.f32 1.0, %v15108_v37  ;;  %v19971_v47 = vadd.f32 %v19773_v39, %v19487_v51  ;;  %v21120_v55 = vld [vmem:[#allocation75_spill] sm:$0xff]  ;;  %v19993_v30 = vmul.f32 %v15106_v36, %v19831_v24 }
 0x2ff   : > { %21114 = vst [vmem:[#allocation65_spill] sm:$0xff] %v19943_v48  ;;  %v9452_v48 = vpop.permute.xlu1 %9451  ;;  %v15112_v63 = vpop.eup %15111  ;;  %v9603_v28 = vadd.f32 1.0, %v15110_v26  ;;  %15141 = vpow2.f32 %v12567_v31  ;;  %v19983_v51 = vadd.f32 %v19773_v39, %v21120_v55  ;;  %v12569_v37 = vmul.f32 -1.442695, %v9482_v9  ;;  %v21128_v55 = vld [vmem:[#allocation46_spill] sm:$0xff] }
 0x300   : > { %v19963_v54 = vpop.f32.mrf.mxu1  ;;  %v8936_v23 = vpop.f32.mrf.mxu0  ;;  %v9484_v57 = vmul.f32 %v9452_v48, %v21119_v7  ;;  %15143 = vrcp.f32 %v9601_v27  ;;  %v12570_v48 = vmul.f32 -1.442695, %v9483_v13  ;;  %21125 = vst [vmem:[#allocation75_spill] sm:$0xff] %v19993_v30  ;;  %v21126_v27 = vld [vmem:[#allocation87_spill] sm:$0xff] }
 0x301   : > { %v15114_v20 = vpop.eup %15113  ;;  %v19974_v29 = vadd.f32 %v8936_v23, %v19877_v41  ;;  %v21121_v41 = vld [vmem:[#allocation69_spill] sm:$0xff]  ;;  %15145 = vpow2.f32 %v12568_v62  ;;  %v19997_v9 = vadd.f32 %v19773_v39, %v21126_v27  ;;  %v21131_v27 = vld [vmem:[#allocation12_spill] sm:$0xff] }
 0x302   : > { %v15116_v43 = vpop.eup %15115  ;;  %v8745_v8 = vpop.f32.mrf.mxu1  ;;  %v19987_v23 = vmul.f32 %v19904_v60, %v21121_v41  ;;  %15147 = vrcp.f32 %v9602_v25  ;;  %v21129_v41 = vld [vmem:[#allocation98_spill] sm:$0xff]  ;;  %v20008_v25 = vmul.f32 %v15112_v63, %v19835_v32  ;;  %v21135_v32 = vld [vmem:[#allocation72_spill] sm:$0xff] }
 0x303   : > { %21118 = vst [vmem:[#allocation42_spill] sm:$0xff] %v19974_v29  ;;  %v8938_v44 = vpop.f32.mrf.mxu0  ;;  %v15118_v56 = vpop.eup %15117  ;;  %15149 = vrcp.f32 %v9603_v28  ;;  %v20020_v63 = vmul.f32 %v15116_v43, %v21135_v32 }
 0x304   : > { %21122 = vst [vmem:[#allocation41_spill] sm:$0xff] %v19987_v23  ;;  %v15120_v31 = vpop.eup %15119  ;;  %v13509_v8 = vpop.f32.mrf.mxu1  ;;  %v21123_v44 = vld [vmem:[#allocation70_spill] sm:$0xff]  ;;  %15151 = vpow2.f32 %v12569_v37  ;;  %v20032_v43 = vmul.f32 %v15118_v56, %v19839_v50 }
 0x305   : > { %v8941_v26 = vpop.f32.mrf.mxu0  ;;  %v19990_v29 = vmul.f32 %v15102_v2, %v21123_v44  ;;  %v15122_v12 = vpop.eup %15121  ;;  %v9079_v62 = vadd.f32 %v13509_v8, %v21128_v55  ;;  %v20005_v2 = vadd.f32 %v19773_v39, %v21129_v41  ;;  %v12571_v44 = vmul.f32 -1.442695, %v9484_v57  ;;  %21130 = vst [vmem:[#allocation70_spill] sm:$0xff] %v20008_v25  ;;  %21136 = vst [vmem:[#allocation46_spill] sm:$0xff] %v20020_v63  ;;  %v21146_v50 = vld [vmem:[#allocation74_spill] sm:$0xff] }
 0x306   : > { %v20000_v60 = vadd.f32 %v8941_v26, %v19893_v15  ;;  %v15124_v13 = vpop.eup %15123  ;;  %v9070_v36 = vpop.f32.mrf.mxu1  ;;  %v21132_v15 = vld [vmem:[#allocation43_spill] sm:$0xff]  ;;  %v9604_v55 = vadd.f32 1.0, %v15122_v12  ;;  %15153 = vpow2.f32 %v12570_v48  ;;  %v20017_v57 = vadd.f32 %v19773_v39, %v19674_v40  ;;  %21140 = vst [vmem:[#allocation12_spill] sm:$0xff] %v20032_v43 }
 0x307   : > { %21124 = vst [vmem:[#allocation44_spill] sm:$0xff] %v19990_v29  ;;  %v8943_v24 = vpop.f32.mrf.mxu0  ;;  %v15126_v30 = vpop.eup %15125  ;;  %v9839_v29 = vmul.f32 %v9079_v62, %v21131_v27  ;;  %v9071_v26 = vadd.f32 %v9070_v36, %v21132_v15  ;;  %v21137_v62 = vld [vmem:[#allocation10_spill] sm:$0xff]  ;;  %15155 = vpow2.f32 %v12571_v44  ;;  %v20029_v40 = vadd.f32 %v19773_v39, %v19706_v42 }
 0x308   : > { %21127 = vst [vmem:[#allocation69_spill] sm:$0xff] %v20000_v60  ;;  %v21133_v60 = vld [vmem:[#allocation71_spill] sm:$0xff]  ;;  %v15128_v28 = vpop.eup %15127  ;;  %v13510_v24 = vpop.f32.mrf.mxu1  ;;  %v20043_v56 = vmul.f32 %v15126_v30, %v21146_v50 }
 0x309   : > { %v20013_v8 = vmul.f32 %v15114_v20, %v21133_v60  ;;  %v8944_v41 = vpop.f32.mrf.mxu0  ;;  %v15130_v37 = vpop.eup %15129  ;;  %v12574_v25 = vmul.f32 -1.442695, %v9839_v29  ;;  %v9837_v23 = vmul.f32 %v9071_v26, %v21137_v62  ;;  %v21139_v20 = vld [vmem:[#allocation47_spill] sm:$0xff]  ;;  %v20035_v29 = vmul.f32 %v15120_v31, %v19845_v6 }
 0x30a   : > { %v20024_v36 = vadd.f32 %v8944_v41, %v19901_v33  ;;  %v9082_v60 = vadd.f32 %v13510_v24, %v21139_v20  ;;  %v15132_v12 = vpop.eup %15131  ;;  %v9073_v15 = vpop.f32.mrf.mxu1  ;;  %v21142_v41 = vld [vmem:[#allocation11_spill] sm:$0xff]  ;;  %v21143_v24 = vld [vmem:[#allocation45_spill] sm:$0xff]  ;;  %21147 = vst [vmem:[#allocation72_spill] sm:$0xff] %v20043_v56  ;;  %v20047_v31 = vadd.f32 %v19773_v39, %v19730_v59  ;;  %v20055_v30 = vmul.f32 %v15130_v37, %v19859_v0 }
 0x30b   : > { %21134 = vst [vmem:[#allocation87_spill] sm:$0xff] %v20013_v8  ;;  %v8946_v48 = vpop.f32.mrf.mxu0  ;;  %21141 = vst [vmem:[#allocation43_spill] sm:$0xff] %v20035_v29  ;;  %v15134_v26 = vpop.eup %15133  ;;  %15157 = vpow2.f32 %v12574_v25  ;;  %v12572_v33 = vmul.f32 -1.442695, %v9837_v23  ;;  %v9074_v20 = vadd.f32 %v9073_v15, %v21143_v24  ;;  %v21148_v25 = vld [vmem:[#allocation22_spill] sm:$0xff]  ;;  %v21156_v37 = vld [vmem:[#allocation21_spill] sm:$0xff] }
 0x30c   : > { %21138 = vst [vmem:[#allocation98_spill] sm:$0xff] %v20024_v36  ;;  %v9840_v32 = vmul.f32 %v9082_v60, %v21142_v41  ;;  %v15136_v44 = vpop.eup %15135  ;;  %15159 = vrcp.f32 %v9604_v55  ;;  %v9605_v36 = vadd.f32 1.0, %v15128_v28  ;;  %v13513_v63 = vpop.f32.mrf.mxu1  ;;  %v21144_v48 = vld [vmem:[#allocation73_spill] sm:$0xff]  ;;  %v9606_v55 = vadd.f32 1.0, %v15134_v26  ;;  %v21149_v24 = vld [vmem:[#allocation50_spill] sm:$0xff]  ;;  %21150 = vst [vmem:[#allocation10_spill] sm:$0xff] %v20055_v30 }
 0x30d   : > { %v8949_v42 = vpop.f32.mrf.mxu0  ;;  %v20040_v8 = vmul.f32 %v15124_v13, %v21144_v48  ;;  %v15138_v6 = vpop.eup %15137  ;;  %v9838_v60 = vmul.f32 %v9074_v20, %v21148_v25  ;;  %15161 = vpow2.f32 %v12572_v33  ;;  %v9095_v13 = vadd.f32 %v13513_v63, %v21149_v24  ;;  %v21154_v63 = vld [vmem:[#allocation76_spill] sm:$0xff] }
 0x30e   : > { %v12575_v23 = vmul.f32 -1.442695, %v9840_v32  ;;  %v20051_v15 = vadd.f32 %v8949_v42, %v19908_v53  ;;  %v15140_v28 = vpop.eup %15139  ;;  %v9607_v56 = vadd.f32 1.0, %v15136_v44  ;;  %v21151_v32 = vld [vmem:[#allocation48_spill] sm:$0xff]  ;;  %v21152_v53 = vld [vmem:[#allocation14_spill] sm:$0xff]  ;;  %v20060_v33 = vmul.f32 %v15132_v12, %v19865_v46 }
 0x30f   : > { %21145 = vst [vmem:[#allocation71_spill] sm:$0xff] %v20040_v8  ;;  %v8951_v48 = vpop.f32.mrf.mxu0  ;;  %v9086_v8 = vpop.f32.mrf.mxu1  ;;  %v12573_v59 = vmul.f32 -1.442695, %v9838_v60  ;;  %v9843_v42 = vmul.f32 %v9095_v13, %v21152_v53  ;;  %v20063_v24 = vmul.f32 %v15138_v6, %v21154_v63  ;;  %v20072_v46 = vadd.f32 %v19773_v39, %v19756_v14  ;;  %v21161_v14 = vld [vmem:[#allocation77_spill] sm:$0xff] }
 0x310   : > { %v15142_v50 = vpop.eup %15141  ;;  %15163 = vpow2.f32 %v12575_v23  ;;  %v9087_v29 = vadd.f32 %v9086_v8, %v21151_v32  ;;  %21153 = vst [vmem:[#allocation47_spill] sm:$0xff] %v20060_v33  ;;  %v21158_v8 = vld [vmem:[#allocation51_spill] sm:$0xff] }
 0x311   : > { %v15144_v20 = vpop.eup %15143  ;;  %15165 = vrcp.f32 %v9605_v36  ;;  %v8952_v43 = vpop.f32.mrf.mxu0  ;;  %21155 = vst [vmem:[#allocation11_spill] sm:$0xff] %v20063_v24  ;;  %v9608_v13 = vadd.f32 1.0, %v15142_v50  ;;  %v12578_v12 = vmul.f32 -1.442695, %v9843_v42  ;;  %v15518_v50 = vld [vmem:[%s15728_s13 + $0x1c9] sm:$0xff]  ;;  %v20081_v42 = vmul.f32 %v15140_v28, %v21161_v14 }
 0x312   : > { %v13514_v26 = vpop.f32.mrf.mxu1  ;;  %v15146_v0 = vpop.eup %15145  ;;  %15167 = vpow2.f32 %v12573_v59  ;;  %v9841_v44 = vmul.f32 %v9087_v29, %v21156_v37  ;;  %v20067_v23 = vadd.f32 %v8952_v43, %v19912_v45  ;;  %v21159_v29 = vld [vmem:[#allocation16_spill] sm:$0xff]  ;;  %v21160_v45 = vld [vmem:[#allocation49_spill] sm:$0xff]  ;;  %v20078_v30 = vsel %vm854_vm0, %v15518_v50, 0.0 }
 0x313   : > { %v9098_v60 = vadd.f32 %v13514_v26, %v21158_v8  ;;  %v15148_v36 = vpop.eup %15147  ;;  %15169 = vrcp.f32 %v9606_v55  ;;  %v8954_v6 = vpop.f32.mrf.mxu0  ;;  %v9609_v26 = vadd.f32 1.0, %v15146_v0  ;;  %21162 = vst [vmem:[#allocation73_spill] sm:$0xff] %v20081_v42  ;;  %v20089_v0 = vadd.f32 %v19773_v39, %v19790_v52  ;;  %v15519_v42 = vld [vmem:[%s15728_s13 + $0x1d1] sm:$0xff] }
 0x314   : > { %21157 = vst [vmem:[#allocation45_spill] sm:$0xff] %v20067_v23  ;;  %v9089_v48 = vpop.f32.mrf.mxu1  ;;  %v15150_v32 = vpop.eup %15149  ;;  %15171 = vrcp.f32 %v9607_v56  ;;  %v12576_v59 = vmul.f32 -1.442695, %v9841_v44  ;;  %v21163_v44 = vld [vmem:[#allocation13_spill] sm:$0xff]  ;;  %v20093_v28 = vmul.f32 %v15144_v20, %v19883_v38 }
 0x315   : > { %v9844_v63 = vmul.f32 %v9098_v60, %v21159_v29  ;;  %v9090_v43 = vadd.f32 %v9089_v48, %v21160_v45  ;;  %v15152_v33 = vpop.eup %15151  ;;  %15173 = vpow2.f32 %v12578_v12  ;;  %v8957_v55 = vpop.f32.mrf.mxu0  ;;  %v21165_v12 = vld [vmem:[#allocation19_spill] sm:$0xff]  ;;  %v15534_v23 = vld [vmem:[%s15728_s13 + $0x439] sm:$0xff] }
 0x316   : > { %v13517_v8 = vpop.f32.mrf.mxu1  ;;  %v15154_v6 = vpop.eup %15153  ;;  %15175 = vpow2.f32 %v12576_v59  ;;  %v20085_v48 = vadd.f32 %v8957_v55, %v19918_v1  ;;  %21166 = vst [vmem:[#allocation22_spill] sm:$0xff] %v20093_v28  ;;  %v20098_v1 = vsel %vm854_vm0, %v15519_v42, 0.0  ;;  %v20110_v42 = vadd.f32 1.0, %v15152_v33 }
 0x317   : > { %v12579_v56 = vmul.f32 -1.442695, %v9844_v63  ;;  %v9842_v60 = vmul.f32 %v9090_v43, %v21163_v44  ;;  %15177 = vrcp.f32 %v9608_v13  ;;  %v9111_v45 = vadd.f32 %v13517_v8, %v21165_v12  ;;  %v8959_v50 = vpop.f32.mrf.mxu0  ;;  %v15156_v14 = vpop.eup %15155  ;;  %v21167_v63 = vld [vmem:[#allocation52_spill] sm:$0xff] }
 0x318   : > { %21164 = vst [vmem:[#allocation74_spill] sm:$0xff] %v20085_v48  ;;  %v9102_v24 = vpop.f32.mrf.mxu1  ;;  %v15158_v13 = vpop.eup %15157  ;;  %v9611_v52 = vadd.f32 1.0, %v15154_v6  ;;  %v20102_v50 = vmul.f32 %v15148_v36, %v19889_v17  ;;  %21172 = vst [vmem:[#allocation76_spill] sm:$0xff] %v20110_v42  ;;  %v21173_v6 = vld [vmem:[#allocation53_spill] sm:$0xff]  ;;  %v21174_v48 = vld [vmem:[#allocation78_spill] sm:$0xff] }
 0x319   : > { %15179 = vpow2.f32 %v12579_v56  ;;  %v12577_v59 = vmul.f32 -1.442695, %v9842_v60  ;;  %v9103_v43 = vadd.f32 %v9102_v24, %v21167_v63  ;;  %v9847_v55 = vmul.f32 %v9111_v45, %v21081_v4  ;;  %v8960_v8 = vpop.f32.mrf.mxu0  ;;  %v20104_v38 = vpop.eup %15159  ;;  %v21170_v56 = vld [vmem:[#allocation15_spill] sm:$0xff]  ;;  %v21185_v42 = vld [vmem:[#allocation56_spill] sm:$0xff] }
 0x31a   : > { %15181 = vrcp.f32 %v9609_v26  ;;  %v13518_v12 = vpop.f32.mrf.mxu1  ;;  %21168 = vst [vmem:[#allocation50_spill] sm:$0xff] %v20102_v50  ;;  %21169 = vst [vmem:[#allocation48_spill] sm:$0xff] %v20104_v38  ;;  %v9967_v20 = vadd.f32 1.0, %v15158_v13  ;;  %v20108_v60 = vadd.f32 %v8960_v8, %v19924_v18  ;;  %v20114_v17 = vmul.f32 %v15150_v32, %v21174_v48  ;;  %v15162_v36 = vpop.eup %15161  ;;  %v21177_v18 = vld [vmem:[#allocation17_spill] sm:$0xff]  ;;  %v21189_v38 = vld [vmem:[#allocation130_spill] sm:$0xff] }
 0x31b   : > { %15183 = vpow2.f32 %v12577_v59  ;;  %v9845_v24 = vmul.f32 %v9103_v43, %v21170_v56  ;;  %v12582_v26 = vmul.f32 -1.442695, %v9847_v55  ;;  %v9114_v45 = vadd.f32 %v13518_v12, %v21173_v6  ;;  %v8962_v63 = vpop.f32.mrf.mxu0  ;;  %v21179_v55 = vld [vmem:[#allocation23_spill] sm:$0xff]  ;;  %v15520_v50 = vld [vmem:[%s15728_s13 + $0x1f9] sm:$0xff] }
 0x31c   : > { %21171 = vst [vmem:[#allocation14_spill] sm:$0xff] %v20108_v60  ;;  %v9105_v28 = vpop.f32.mrf.mxu1  ;;  %21175 = vst [vmem:[#allocation21_spill] sm:$0xff] %v20114_v17  ;;  %v20118_v59 = vadd.f32 %v19773_v39, %v19812_v58  ;;  %15185 = vrcp.f32 %v9967_v20  ;;  %v20121_v8 = vadd.f32 1.0, %v15156_v14  ;;  %v20126_v32 = vsel %vm854_vm0, %v15520_v50, 0.0  ;;  %v21181_v20 = vld [vmem:[#allocation18_spill] sm:$0xff] }
 0x31d   : > { %v12580_v43 = vmul.f32 -1.442695, %v9845_v24  ;;  %v9106_v13 = vadd.f32 %v9105_v28, %v21177_v18  ;;  %v15164_v33 = vpop.eup %15163  ;;  %15187 = vpow2.f32 %v12582_v26  ;;  %v9848_v12 = vmul.f32 %v9114_v45, %v21179_v55  ;;  %v8965_v6 = vpop.f32.mrf.mxu0  ;;  %v21183_v18 = vld [vmem:[#allocation128_spill] sm:$0xff] }
 0x31e   : > { %21176 = vst [vmem:[#allocation51_spill] sm:$0xff] %v20118_v59  ;;  %21178 = vst [vmem:[#allocation16_spill] sm:$0xff] %v20121_v8  ;;  %v13521_v63 = vpop.f32.mrf.mxu1  ;;  %v20128_v48 = vpop.eup %15165  ;;  %15189 = vrcp.f32 %v9611_v52  ;;  %v9968_v58 = vadd.f32 1.0, %v15164_v33  ;;  %v20132_v28 = vadd.f32 %v8965_v6, %v19929_v21  ;;  %v20136_v26 = vadd.f32 %v19773_v39, %v21183_v18  ;;  %v21187_v33 = vld [vmem:[#allocation54_spill] sm:$0xff] }
 0x31f   : > { %21180 = vst [vmem:[#allocation49_spill] sm:$0xff] %v20128_v48  ;;  %v9846_v24 = vmul.f32 %v9106_v13, %v21181_v20  ;;  %v15168_v14 = vpop.eup %15167  ;;  %15191 = vpow2.f32 %v12580_v43  ;;  %v12583_v45 = vmul.f32 -1.442695, %v9848_v12  ;;  %v9127_v50 = vadd.f32 %v13521_v63, %v21185_v42  ;;  %v8967_v8 = vpop.f32.mrf.mxu0  ;;  %v21191_v43 = vld [vmem:[#allocation25_spill] sm:$0xff]  ;;  %v15521_v63 = vld [vmem:[%s15728_s13 + $0x201] sm:$0xff] }
 0x320   : > { %21182 = vst [vmem:[#allocation77_spill] sm:$0xff] %v20132_v28  ;;  %21184 = vst [vmem:[#allocation13_spill] sm:$0xff] %v20136_v26  ;;  %v9118_v17 = vpop.f32.mrf.mxu1  ;;  %v20139_v48 = vpop.eup %15169  ;;  %v9965_v52 = vadd.f32 1.0, %v15162_v36  ;;  %15193 = vrcp.f32 %v9968_v58  ;;  %v20146_v18 = vadd.f32 %v19773_v39, %v21189_v38  ;;  %v9966_v58 = vadd.f32 1.0, %v15168_v14  ;;  %v15522_v28 = vld [vmem:[%s15728_s13 + $0x229] sm:$0xff]  ;;  %v21205_v26 = vld [vmem:[#allocation58_spill] sm:$0xff] }
 0x321   : > { %21186 = vst [vmem:[#allocation19_spill] sm:$0xff] %v20139_v48  ;;  %v12581_v13 = vmul.f32 -1.442695, %v9846_v24  ;;  %v9119_v21 = vadd.f32 %v9118_v17, %v21187_v33  ;;  %v20142_v6 = vpop.eup %15171  ;;  %15195 = vpow2.f32 %v12583_v45  ;;  %v9851_v12 = vmul.f32 %v9127_v50, %v21191_v43  ;;  %v8968_v42 = vpop.f32.mrf.mxu0  ;;  %v21192_v24 = vld [vmem:[#allocation24_spill] sm:$0xff] }
 0x322   : > { %21188 = vst [vmem:[#allocation52_spill] sm:$0xff] %v20142_v6  ;;  %21190 = vst [vmem:[#allocation53_spill] sm:$0xff] %v20146_v18  ;;  %v13522_v8 = vpop.f32.mrf.mxu1  ;;  %v20151_v48 = vsel %vm854_vm0, %v15521_v63, 0.0  ;;  %v15174_v36 = vpop.eup %15173  ;;  %v20155_v33 = vadd.f32 %v8968_v42, %v19937_v22  ;;  %v21194_v6 = vld [vmem:[#allocation57_spill] sm:$0xff]  ;;  %v20160_v63 = vsel %vm854_vm0, %v15522_v28, 0.0  ;;  %v21196_v14 = vld [vmem:[#allocation132_spill] sm:$0xff] }
 0x323   : > { %v9849_v17 = vmul.f32 %v9119_v21, %v21192_v24  ;;  %v9130_v38 = vadd.f32 %v13522_v8, %v21194_v6  ;;  %v15176_v60 = vpop.eup %15175  ;;  %v9971_v45 = vadd.f32 1.0, %v15174_v36  ;;  %15197 = vpow2.f32 %v12581_v13  ;;  %v8970_v18 = vpop.f32.mrf.mxu0  ;;  %v21198_v22 = vld [vmem:[#allocation27_spill] sm:$0xff] }
 0x324   : > { %21193 = vst [vmem:[#allocation78_spill] sm:$0xff] %v20155_v33  ;;  %v12586_v50 = vmul.f32 -1.442695, %v9851_v12  ;;  %v9121_v43 = vpop.f32.mrf.mxu1  ;;  %v20162_v20 = vpop.eup %15177  ;;  %v20166_v21 = vadd.f32 %v19773_v39, %v21196_v14  ;;  %15199 = vrcp.f32 %v9965_v52  ;;  %v21199_v42 = vld [vmem:[#allocation55_spill] sm:$0xff]  ;;  %v20172_v18 = vadd.f32 %v19773_v39, %v19940_v10  ;;  %v15523_v33 = vld [vmem:[%s15728_s13 + $0x231] sm:$0xff] }
 0x325   : > { %21195 = vst [vmem:[#allocation17_spill] sm:$0xff] %v20162_v20  ;;  %v9852_v6 = vmul.f32 %v9130_v38, %v21198_v22  ;;  %v9122_v8 = vadd.f32 %v9121_v43, %v21199_v42  ;;  %15201 = vrcp.f32 %v9971_v45  ;;  %v12584_v12 = vmul.f32 -1.442695, %v9849_v17  ;;  %v8973_v28 = vpop.f32.mrf.mxu0  ;;  %v21202_v43 = vld [vmem:[#allocation26_spill] sm:$0xff]  ;;  %v21204_v17 = vld [vmem:[#allocation60_spill] sm:$0xff] }
 0x326   : > { %21197 = vst [vmem:[#allocation128_spill] sm:$0xff] %v20166_v21  ;;  %v15180_v13 = vpop.eup %15179  ;;  %21200 = vst [vmem:[#allocation56_spill] sm:$0xff] %v20172_v18  ;;  %v13525_v36 = vpop.f32.mrf.mxu1  ;;  %v20176_v20 = vsel %vm854_vm0, %v15523_v33, 0.0  ;;  %15203 = vrcp.f32 %v9966_v58  ;;  %v9969_v52 = vadd.f32 1.0, %v15176_v60  ;;  %v20182_v45 = vadd.f32 %v8973_v28, %v19955_v19  ;;  %v21207_v19 = vld [vmem:[#allocation29_spill] sm:$0xff] }
 0x327   : > { %v20178_v14 = vpop.eup %15181  ;;  %v9972_v38 = vadd.f32 1.0, %v15180_v13  ;;  %v9850_v42 = vmul.f32 %v9122_v8, %v21202_v43  ;;  %15205 = vpow2.f32 %v12586_v50  ;;  %v12587_v10 = vmul.f32 -1.442695, %v9852_v6  ;;  %v8975_v22 = vpop.f32.mrf.mxu0  ;;  %v21235_v43 = vld [vmem:[#allocation79_spill] sm:$0xff] }
 0x328   : > { %21201 = vst [vmem:[#allocation54_spill] sm:$0xff] %v20178_v14  ;;  %v15184_v21 = vpop.eup %15183  ;;  %21203 = vst [vmem:[#allocation130_spill] sm:$0xff] %v20182_v45  ;;  %v9143_v18 = vadd.f32 %v13525_v36, %v21204_v17  ;;  %v9134_v24 = vpop.f32.mrf.mxu1  ;;  %v15524_v14 = vld [vmem:[%s15728_s13 + $0x259] sm:$0xff]  ;;  %v20192_v50 = vadd.f32 %v19773_v39, %v19963_v54  ;;  %v15525_v45 = vld [vmem:[%s15728_s13 + $0x261] sm:$0xff] }
 0x329   : > { %15207 = vrcp.f32 %v9972_v38  ;;  %v12585_v33 = vmul.f32 -1.442695, %v9850_v42  ;;  %v9135_v55 = vadd.f32 %v9134_v24, %v21205_v26  ;;  %v20188_v60 = vsel %vm854_vm0, %v15524_v14, 0.0  ;;  %v15186_v58 = vpop.eup %15185  ;;  %v8976_v13 = vpop.f32.mrf.mxu0  ;;  %v21208_v36 = vld [vmem:[#allocation82_spill] sm:$0xff]  ;;  %v21209_v26 = vld [vmem:[#allocation28_spill] sm:$0xff] }
 0x32a   : > { %21206 = vst [vmem:[#allocation57_spill] sm:$0xff] %v20192_v50  ;;  %v9970_v6 = vadd.f32 1.0, %v15184_v21  ;;  %15209 = vpow2.f32 %v12584_v12  ;;  %v9855_v8 = vmul.f32 %v9143_v18, %v21207_v19  ;;  %v13526_v22 = vpop.f32.mrf.mxu1  ;;  %v15188_v28 = vpop.eup %15187  ;;  %v20196_v38 = vmul.f32 %v15186_v58, %v21208_v36  ;;  %v21212_v21 = vld [vmem:[#allocation61_spill] sm:$0xff]  ;;  %v21213_v36 = vld [vmem:[#allocation59_spill] sm:$0xff] }
 0x32b   : > { %15211 = vrcp.f32 %v9969_v52  ;;  %v9853_v24 = vmul.f32 %v9135_v55, %v21209_v26  ;;  %v20200_v14 = vadd.f32 %v8976_v13, %v19971_v47  ;;  %v20202_v42 = vpop.eup %15189  ;;  %v9975_v39 = vadd.f32 1.0, %v15188_v28  ;;  %v8978_v12 = vpop.f32.mrf.mxu0  ;;  %v21214_v28 = vld [vmem:[#allocation31_spill] sm:$0xff] }
 0x32c   : > { %21211 = vst [vmem:[#allocation55_spill] sm:$0xff] %v20202_v42  ;;  %15213 = vpow2.f32 %v12587_v10  ;;  %v12590_v54 = vmul.f32 -1.442695, %v9855_v8  ;;  %v9146_v18 = vadd.f32 %v13526_v22, %v21212_v21  ;;  %v9137_v17 = vpop.f32.mrf.mxu1  ;;  %v15192_v50 = vpop.eup %15191  ;;  %v20208_v55 = vsel %vm854_vm0, %v15525_v45, 0.0  ;;  %v21217_v12 = vld [vmem:[#allocation30_spill] sm:$0xff] }
 0x32d   : > { %21210 = vst [vmem:[#allocation132_spill] sm:$0xff] %v20200_v14  ;;  %15215 = vpow2.f32 %v12585_v33  ;;  %v12588_v58 = vmul.f32 -1.442695, %v9853_v24  ;;  %v9138_v52 = vadd.f32 %v9137_v17, %v21213_v36  ;;  %v15194_v47 = vpop.eup %15193  ;;  %v9973_v13 = vadd.f32 1.0, %v15192_v50  ;;  %v8981_v8 = vpop.f32.mrf.mxu0  ;;  %v15526_v14 = vld [vmem:[%s15728_s13 + $0x379] sm:$0xff]  ;;  %v21216_v24 = vld [vmem:[#allocation83_spill] sm:$0xff] }
 0x32e   : > { %15217 = vrcp.f32 %v9970_v6  ;;  %v9856_v10 = vmul.f32 %v9146_v18, %v21214_v28  ;;  %v13529_v42 = vpop.f32.mrf.mxu1  ;;  %v20213_v22 = vsel %vm854_vm0, %v15526_v14, 0.0  ;;  %v15196_v33 = vpop.eup %15195  ;;  %v20216_v21 = vmul.f32 %v15194_v47, %v21216_v24  ;;  %v21219_v18 = vld [vmem:[#allocation64_spill] sm:$0xff]  ;;  %v21220_v47 = vld [vmem:[#allocation62_spill] sm:$0xff] }
 0x32f   : > { %21215 = vst [vmem:[#allocation60_spill] sm:$0xff] %v20213_v22  ;;  %15219 = vpow2.f32 %v12590_v54  ;;  %v9854_v45 = vmul.f32 %v9138_v52, %v21217_v12  ;;  %v20220_v17 = vadd.f32 %v8981_v8, %v19983_v51  ;;  %v9976_v50 = vadd.f32 1.0, %v15196_v33  ;;  %v8983_v14 = vpop.f32.mrf.mxu0  ;;  %v15527_v54 = vld [vmem:[%s15728_s13 + $0x381] sm:$0xff]  ;;  %v15528_v33 = vld [vmem:[%s15728_s13 + $0x3a9] sm:$0xff] }
 0x330   : > { %15221 = vrcp.f32 %v9975_v39  ;;  %v12591_v6 = vmul.f32 -1.442695, %v9856_v10  ;;  %v9159_v36 = vadd.f32 %v13529_v42, %v21219_v18  ;;  %v9150_v22 = vpop.f32.mrf.mxu1  ;;  %v15198_v28 = vpop.eup %15197  ;;  %v20226_v52 = vsel %vm854_vm0, %v15527_v54, 0.0  ;;  %v21222_v39 = vld [vmem:[#allocation33_spill] sm:$0xff]  ;;  %v21225_v14 = vld [vmem:[#allocation32_spill] sm:$0xff]  ;;  %v21226_v54 = vld [vmem:[#allocation66_spill] sm:$0xff] }
 0x331   : > { %21218 = vst [vmem:[#allocation58_spill] sm:$0xff] %v20220_v17  ;;  %15223 = vpow2.f32 %v12588_v58  ;;  %v12589_v26 = vmul.f32 -1.442695, %v9854_v45  ;;  %v9151_v24 = vadd.f32 %v9150_v22, %v21220_v47  ;;  %21221 = vst [vmem:[#allocation82_spill] sm:$0xff] %v20226_v52  ;;  %v15200_v51 = vpop.eup %15199  ;;  %v20229_v10 = vpop.f32.mrf.mxu0  ;;  %v20233_v18 = vsel %vm854_vm0, %v15528_v33, 0.0  ;;  %v15529_v58 = vld [vmem:[%s15728_s13 + $0x3b1] sm:$0xff] }
 0x332   : > { %15225 = vrcp.f32 %v9973_v13  ;;  %v9859_v8 = vmul.f32 %v9159_v36, %v21222_v39  ;;  %v13530_v42 = vpop.f32.mrf.mxu1  ;;  %21223 = vst [vmem:[#allocation61_spill] sm:$0xff] %v20233_v18  ;;  %v20237_v22 = vsel %vm854_vm0, %v15529_v58, 0.0  ;;  %v15202_v45 = vpop.eup %15201  ;;  %v15530_v52 = vld [vmem:[%s15728_s13 + $0x3d9] sm:$0xff]  ;;  %v9974_v12 = vadd.f32 1.0, %v15198_v28  ;;  %v15531_v17 = vld [vmem:[%s15728_s13 + $0x3e1] sm:$0xff] }
 0x333   : > { %21224 = vst [vmem:[#allocation59_spill] sm:$0xff] %v20237_v22  ;;  %15227 = vpow2.f32 %v12591_v6  ;;  %v9857_v47 = vmul.f32 %v9151_v24, %v21225_v14  ;;  %v9162_v13 = vadd.f32 %v13530_v42, %v21226_v54  ;;  %v20243_v36 = vsel %vm854_vm0, %v15530_v52, 0.0  ;;  %v15204_v39 = vpop.eup %15203  ;;  %v8986_v33 = vpop.f32.mrf.mxu0  ;;  %v21229_v42 = vld [vmem:[#allocation35_spill] sm:$0xff] }
 0x334   : > { %21227 = vst [vmem:[#allocation83_spill] sm:$0xff] %v20243_v36  ;;  %15229 = vrcp.f32 %v9976_v50  ;;  %v12594_v19 = vmul.f32 -1.442695, %v9859_v8  ;;  %v9153_v18 = vpop.f32.mrf.mxu1  ;;  %v20247_v58 = vsel %vm854_vm0, %v15531_v17, 0.0  ;;  %v15206_v6 = vpop.eup %15205  ;;  %v21230_v22 = vld [vmem:[#allocation63_spill] sm:$0xff]  ;;  %v21231_v8 = vld [vmem:[#allocation84_spill] sm:$0xff] }
 0x335   : > { %21228 = vst [vmem:[#allocation64_spill] sm:$0xff] %v20247_v58  ;;  %15231 = vpow2.f32 %v12589_v26  ;;  %v12592_v24 = vmul.f32 -1.442695, %v9857_v47  ;;  %v9860_v54 = vmul.f32 %v9162_v13, %v21229_v42  ;;  %v9154_v52 = vadd.f32 %v9153_v18, %v21230_v22  ;;  %v20251_v28 = vpop.f32.mrf.mxu0  ;;  %v15532_v17 = vld [vmem:[%s15728_s13 + $0x409] sm:$0xff]  ;;  %v21233_v13 = vld [vmem:[#allocation34_spill] sm:$0xff]  ;;  %v15533_v18 = vld [vmem:[%s15728_s13 + $0x411] sm:$0xff] }
 0x336   : > { %v15208_v36 = vpop.eup %15207  ;;  %v9979_v14 = vadd.f32 1.0, %v15206_v6  ;;  %15233 = vpow2.f32 %v12594_v19  ;;  %v13533_v50 = vpop.f32.mrf.mxu1  ;;  %v20254_v33 = vmul.f32 %v15202_v45, %v21231_v8  ;;  %v20258_v58 = vsel %vm854_vm0, %v15532_v17, 0.0 }
 0x337   : > { %21232 = vst [vmem:[#allocation62_spill] sm:$0xff] %v20258_v58  ;;  %v15210_v26 = vpop.eup %15209  ;;  %15235 = vpow2.f32 %v12592_v24  ;;  %v12595_v47 = vmul.f32 -1.442695, %v9860_v54  ;;  %v9858_v42 = vmul.f32 %v9154_v52, %v21233_v13  ;;  %v20263_v22 = vsel %vm854_vm0, %v15533_v18, 0.0  ;;  %v8991_v45 = vpop.f32.mrf.mxu0  ;;  %v21237_v54 = vld [vmem:[#allocation67_spill] sm:$0xff] }
 0x338   : > { %21234 = vst [vmem:[#allocation66_spill] sm:$0xff] %v20263_v22  ;;  %v15212_v19 = vpop.eup %15211  ;;  %15237 = vrcp.f32 %v9974_v12  ;;  %v9977_v6 = vadd.f32 1.0, %v15210_v26  ;;  %v9175_v59 = vadd.f32 %v13533_v50, %v21235_v43  ;;  %v9166_v8 = vpop.f32.mrf.mxu1  ;;  %v20268_v17 = vsel %vm854_vm0, %v15534_v23, 0.0  ;;  %v21238_v12 = vld [vmem:[#allocation37_spill] sm:$0xff] }
 0x339   : > { %21236 = vst [vmem:[#allocation63_spill] sm:$0xff] %v20268_v17  ;;  %v15214_v58 = vpop.eup %15213  ;;  %15239 = vpow2.f32 %v12595_v47  ;;  %v12593_v24 = vmul.f32 -1.442695, %v9858_v42  ;;  %v9167_v52 = vadd.f32 %v9166_v8, %v21237_v54  ;;  %v10126_v13 = vmul.f32 %v15200_v51, %v20078_v30  ;;  %v20273_v56 = vpop.f32.mrf.mxu0  ;;  %v21239_v50 = vld [vmem:[#allocation85_spill] sm:$0xff]  ;;  %v21240_v42 = vld [vmem:[#allocation36_spill] sm:$0xff] }
 0x33a   : > { %v15216_v18 = vpop.eup %15215  ;;  %15241 = vrcp.f32 %v9979_v14  ;;  %v9980_v22 = vadd.f32 1.0, %v15214_v58  ;;  %v9863_v26 = vmul.f32 %v9175_v59, %v21238_v12  ;;  %v13534_v43 = vpop.f32.mrf.mxu1  ;;  %v20276_v45 = vmul.f32 %v15208_v36, %v21239_v50  ;;  %v21241_v59 = vld [vmem:[#allocation91_spill] sm:$0xff] }
 0x33b   : > { %v20278_v23 = vpop.eup %15217  ;;  %v9978_v17 = vadd.f32 1.0, %v15216_v18  ;;  %15243 = vpow2.f32 %v12593_v24  ;;  %v9861_v47 = vmul.f32 %v9167_v52, %v21240_v42  ;;  %v20283_v30 = vadd.f32 %v20196_v38, %v19951_v5  ;;  %v8994_v8 = vpop.f32.mrf.mxu0  ;;  %v21242_v24 = vld [vmem:[#allocation68_spill] sm:$0xff] }
 0x33c   : > { %v15220_v51 = vpop.eup %15219  ;;  %15245 = vrcp.f32 %v9977_v6  ;;  %v12598_v14 = vmul.f32 -1.442695, %v9863_v26  ;;  %v9178_v58 = vadd.f32 %v13534_v43, %v21241_v59  ;;  %v9169_v54 = vpop.f32.mrf.mxu1  ;;  %v10127_v36 = vmul.f32 %v15204_v39, %v20098_v1 }
 0x33d   : > { %v15222_v50 = vpop.eup %15221  ;;  %15247 = vrcp.f32 %v9980_v22  ;;  %v9983_v12 = vadd.f32 1.0, %v15220_v51  ;;  %v12596_v18 = vmul.f32 -1.442695, %v9861_v47  ;;  %v9170_v4 = vadd.f32 %v9169_v54, %v21242_v24  ;;  %v20293_v6 = vpop.f32.mrf.mxu0  ;;  %v21243_v22 = vld [vmem:[#allocation38_spill] sm:$0xff] }
 0x33e   : > { %v15224_v52 = vpop.eup %15223  ;;  %v20290_v5 = vadd.f32 %v20229_v10, %v19997_v9  ;;  %15249 = vpow2.f32 %v12598_v14  ;;  %v9864_v38 = vmul.f32 %v9178_v58, %v19258_v16  ;;  %v13537_v26 = vpop.f32.mrf.mxu1  ;;  %v20296_v43 = vadd.f32 %v10126_v13, %v19933_v49  ;;  %v21244_v10 = vld [vmem:[#allocation112_spill] sm:$0xff]  ;;  %v21245_v54 = vld [vmem:[#allocation134_spill] sm:$0xff] }
 0x33f   : > { %v20298_v1 = vpop.eup %15225  ;;  %15251 = vrcp.f32 %v9978_v17  ;;  %v9981_v39 = vadd.f32 1.0, %v15224_v52  ;;  %v9862_v47 = vmul.f32 %v9170_v4, %v21243_v22  ;;  %v10130_v51 = vmul.f32 %v15212_v19, %v20126_v32  ;;  %v8999_v58 = vpop.f32.mrf.mxu0  ;;  %v21246_v17 = vld [vmem:[#allocation102_spill] sm:$0xff] }
 0x340   : > { %v15228_v59 = vpop.eup %15227  ;;  %15253 = vpow2.f32 %v12596_v18  ;;  %v12599_v9 = vmul.f32 -1.442695, %v9864_v38  ;;  %v9191_v14 = vadd.f32 %v13537_v26, %v21244_v10  ;;  %v9182_v8 = vpop.f32.mrf.mxu1  ;;  %v20304_v24 = vadd.f32 %v10127_v36, %v21245_v54  ;;  %v21247_v26 = vld [vmem:[#allocation40_spill] sm:$0xff] }
 0x341   : > { %v15230_v49 = vpop.eup %15229  ;;  %15255 = vrcp.f32 %v9983_v12  ;;  %v9984_v13 = vadd.f32 1.0, %v15228_v59  ;;  %v12597_v16 = vmul.f32 -1.442695, %v9862_v47  ;;  %v9183_v52 = vadd.f32 %v9182_v8, %v21246_v17  ;;  %v20312_v19 = vpop.f32.mrf.mxu0  ;;  %v21248_v10 = vld [vmem:[#allocation116_spill] sm:$0xff] }
 0x342   : > { %v15232_v42 = vpop.eup %15231  ;;  %v20309_v4 = vadd.f32 %v20251_v28, %v20005_v2  ;;  %15257 = vpow2.f32 %v12599_v9  ;;  %v9867_v32 = vmul.f32 %v9191_v14, %v21117_v34  ;;  %v13538_v18 = vpop.f32.mrf.mxu1  ;;  %v20316_v36 = vadd.f32 %v20216_v21, %v19959_v11  ;;  %v21249_v21 = vld [vmem:[#allocation108_spill] sm:$0xff] }
 0x343   : > { %v15234_v12 = vpop.eup %15233  ;;  %15259 = vrcp.f32 %v9981_v39  ;;  %v9982_v38 = vadd.f32 1.0, %v15232_v42  ;;  %v9865_v47 = vmul.f32 %v9183_v52, %v21247_v26  ;;  %v20320_v59 = vadd.f32 %v10130_v51, %v19967_v61  ;;  %v9002_v58 = vpop.f32.mrf.mxu0 }
 0x344   : > { %v15236_v2 = vpop.eup %15235  ;;  %v9987_v28 = vadd.f32 1.0, %v15234_v12  ;;  %15261 = vpow2.f32 %v12597_v16  ;;  %v12602_v9 = vmul.f32 -1.442695, %v9867_v32  ;;  %v9194_v14 = vadd.f32 %v13538_v18, %v21248_v10  ;;  %v9185_v8 = vpop.f32.mrf.mxu1  ;;  %v21250_v32 = vld [vmem:[#allocation86_spill] sm:$0xff]  ;;  %v21252_v58 = vld [vmem:[#allocation88_spill] sm:$0xff] }
 0x345   : > { %v15238_v54 = vpop.eup %15237  ;;  %15263 = vrcp.f32 %v9984_v13  ;;  %v9985_v11 = vadd.f32 1.0, %v15236_v2  ;;  %v9186_v17 = vadd.f32 %v9185_v8, %v21249_v21  ;;  %v10131_v42 = vmul.f32 %v20278_v23, %v20151_v48  ;;  %v20331_v51 = vpop.f32.mrf.mxu0 }
 0x346   : > { %v15240_v39 = vpop.eup %15239  ;;  %15265 = vrcp.f32 %v9982_v38  ;;  %v20328_v61 = vadd.f32 %v20273_v56, %v20017_v57  ;;  %v9868_v16 = vmul.f32 %v9194_v14, %v21119_v7  ;;  %v13541_v52 = vpop.f32.mrf.mxu1  ;;  %v20334_v18 = vmul.f32 %v15222_v50, %v21250_v32  ;;  %v21251_v57 = vld [vmem:[#allocation127_spill] sm:$0xff]  ;;  %v21253_v32 = vld [vmem:[#allocation121_spill] sm:$0xff] }
 0x347   : > { %v20336_v13 = vpop.eup %15241  ;;  %15267 = vrcp.f32 %v9987_v28  ;;  %v9988_v12 = vadd.f32 1.0, %v15240_v39  ;;  %v12600_v2 = vmul.f32 -1.442695, %v9865_v47  ;;  %v9866_v48 = vmul.f32 %v9186_v17, %v21116_v3  ;;  %v9007_v10 = vpop.f32.mrf.mxu0 }
 0x348   : > { %v15244_v23 = vpop.eup %15243  ;;  %15269 = vpow2.f32 %v12602_v9  ;;  %v12603_v38 = vmul.f32 -1.442695, %v9868_v16  ;;  %v9207_v56 = vadd.f32 %v13541_v52, %v21251_v57  ;;  %v9198_v14 = vpop.f32.mrf.mxu1  ;;  %v20341_v8 = vmul.f32 %v15230_v49, %v21252_v58  ;;  %v21254_v57 = vld [vmem:[#allocation41_spill] sm:$0xff]  ;;  %v21256_v58 = vld [vmem:[#allocation44_spill] sm:$0xff] }
 0x349   : > { %v20343_v21 = vpop.eup %15245  ;;  %15271 = vrcp.f32 %v9985_v11  ;;  %v12601_v50 = vmul.f32 -1.442695, %v9866_v48  ;;  %v9199_v28 = vadd.f32 %v9198_v14, %v21253_v32  ;;  %v20347_v47 = vadd.f32 %v10131_v42, %v19979_v35  ;;  %v20350_v16 = vpop.f32.mrf.mxu0  ;;  %v21255_v48 = vld [vmem:[#allocation129_spill] sm:$0xff] }
 0x34a   : > { %v15248_v17 = vpop.eup %15247  ;;  %15273 = vrcp.f32 %v9988_v12  ;;  %v9986_v9 = vadd.f32 1.0, %v15244_v23  ;;  %v10289_v39 = vmul.f32 %v9207_v56, %v21131_v27  ;;  %v13542_v52 = vpop.f32.mrf.mxu1  ;;  %v20354_v49 = vadd.f32 %v20254_v33, %v21254_v57 }
 0x34b   : > { %v15250_v10 = vpop.eup %15249  ;;  %15275 = vpow2.f32 %v12600_v2  ;;  %v10287_v11 = vmul.f32 %v9199_v28, %v21137_v62  ;;  %v9210_v14 = vadd.f32 %v13542_v52, %v21255_v48  ;;  %v10134_v35 = vmul.f32 %v20298_v1, %v20160_v63  ;;  %v9010_v23 = vpop.f32.mrf.mxu0  ;;  %v21257_v28 = vld [vmem:[#allocation126_spill] sm:$0xff] }
 0x34c   : > { %v20360_v42 = vpop.eup %15251  ;;  %v9991_v12 = vadd.f32 1.0, %v15250_v10  ;;  %15277 = vpow2.f32 %v12603_v38  ;;  %v12606_v27 = vmul.f32 -1.442695, %v10289_v39  ;;  %v9201_v56 = vpop.f32.mrf.mxu1  ;;  %v20364_v33 = vadd.f32 %v20276_v45, %v21256_v58 }
 0x34d   : > { %v15254_v32 = vpop.eup %15253  ;;  %15279 = vpow2.f32 %v12601_v50  ;;  %v12604_v2 = vmul.f32 -1.442695, %v10287_v11  ;;  %v10290_v62 = vmul.f32 %v9210_v14, %v21142_v41  ;;  %v9202_v52 = vadd.f32 %v9201_v56, %v21257_v28  ;;  %v20374_v38 = vpop.f32.mrf.mxu0  ;;  %v21258_v11 = vld [vmem:[#allocation75_spill] sm:$0xff]  ;;  %v21262_v28 = vld [vmem:[#allocation70_spill] sm:$0xff] }
 0x34e   : > { %v20368_v57 = vpop.eup %15255  ;;  %15281 = vrcp.f32 %v9986_v9  ;;  %v9989_v63 = vadd.f32 1.0, %v15254_v32  ;;  %v20372_v1 = vadd.f32 %v20293_v6, %v20029_v40  ;;  %v13545_v39 = vpop.f32.mrf.mxu1  ;;  %v10135_v45 = vmul.f32 %v15238_v54, %v20176_v20  ;;  %v21259_v6 = vld [vmem:[#allocation65_spill] sm:$0xff] }
 0x34f   : > { %v15258_v10 = vpop.eup %15257  ;;  %15283 = vpow2.f32 %v12606_v27  ;;  %v12607_v50 = vmul.f32 -1.442695, %v10290_v62  ;;  %v10288_v41 = vmul.f32 %v9202_v52, %v21148_v25  ;;  %v20379_v48 = vadd.f32 %v10134_v35, %v21258_v11  ;;  %v9015_v56 = vpop.f32.mrf.mxu0  ;;  %v21260_v27 = vld [vmem:[#allocation131_spill] sm:$0xff]  ;;  %v21261_v25 = vld [vmem:[#allocation89_spill] sm:$0xff] }
 0x350   : > { %v15260_v14 = vpop.eup %15259  ;;  %15285 = vrcp.f32 %v9991_v12  ;;  %v9992_v9 = vadd.f32 1.0, %v15258_v10  ;;  %v20383_v40 = vadd.f32 %v20312_v19, %v20047_v31  ;;  %v9223_v23 = vadd.f32 %v13545_v39, %v21259_v6  ;;  %v9214_v58 = vpop.f32.mrf.mxu1  ;;  %v21263_v39 = vld [vmem:[#allocation90_spill] sm:$0xff] }
 0x351   : > { %v15262_v20 = vpop.eup %15261  ;;  %15287 = vpow2.f32 %v12604_v2  ;;  %v12605_v54 = vmul.f32 -1.442695, %v10288_v41  ;;  %v9215_v32 = vadd.f32 %v9214_v58, %v21260_v27  ;;  %v20389_v35 = vmul.f32 %v20336_v13, %v21261_v25  ;;  %v20394_v31 = vpop.f32.mrf.mxu0  ;;  %v21265_v58 = vld [vmem:[#allocation87_spill] sm:$0xff] }
 0x352   : > { %v20391_v62 = vpop.eup %15263  ;;  %15289 = vrcp.f32 %v9989_v63  ;;  %v10293_v12 = vmul.f32 %v9223_v23, %v21152_v53  ;;  %v13546_v19 = vpop.f32.mrf.mxu1  ;;  %v20397_v52 = vadd.f32 %v10135_v45, %v21262_v28  ;;  %v20400_v2 = vmul.f32 %v15248_v17, %v21263_v39  ;;  %v21264_v63 = vld [vmem:[#allocation42_spill] sm:$0xff]  ;;  %v21268_v28 = vld [vmem:[#allocation93_spill] sm:$0xff] }
 0x353   : > { %v15266_v10 = vpop.eup %15265  ;;  %v20404_v41 = vadd.f32 %v20331_v51, %v20072_v46  ;;  %15291 = vpow2.f32 %v12607_v50  ;;  %v10291_v13 = vmul.f32 %v9215_v32, %v21156_v37  ;;  %v9226_v11 = vadd.f32 %v13546_v19, %v21264_v63  ;;  %v9018_v45 = vpop.f32.mrf.mxu0  ;;  %v21266_v50 = vld [vmem:[#allocation133_spill] sm:$0xff] }
 0x354   : > { %v20408_v53 = vpop.eup %15267  ;;  %15293 = vrcp.f32 %v9992_v9  ;;  %v9990_v6 = vadd.f32 1.0, %v15262_v20  ;;  %v12610_v23 = vmul.f32 -1.442695, %v10293_v12  ;;  %v9217_v56 = vpop.f32.mrf.mxu1  ;;  %v20412_v17 = vadd.f32 %v20334_v18, %v21265_v58  ;;  %v21267_v12 = vld [vmem:[#allocation92_spill] sm:$0xff]  ;;  %v21270_v45 = vld [vmem:[#allocation46_spill] sm:$0xff] }
 0x355   : > { %v15270_v27 = vpop.eup %15269  ;;  %15295 = vpow2.f32 %v12605_v54  ;;  %v12608_v46 = vmul.f32 -1.442695, %v10291_v13  ;;  %v10294_v51 = vmul.f32 %v9226_v11, %v21159_v29  ;;  %v9218_v37 = vadd.f32 %v9217_v56, %v21266_v50  ;;  %v20418_v9 = vpop.f32.mrf.mxu0  ;;  %v21273_v50 = vld [vmem:[#allocation94_spill] sm:$0xff] }
 0x356   : > { %v20416_v32 = vpop.eup %15271  ;;  %v9995_v25 = vadd.f32 1.0, %v15270_v27  ;;  %15297 = vpow2.f32 %v12610_v23  ;;  %v13549_v20 = vpop.f32.mrf.mxu1  ;;  %v20421_v19 = vmul.f32 %v15260_v14, %v21267_v12  ;;  %v20424_v18 = vmul.f32 %v15266_v10, %v21268_v28  ;;  %v21271_v27 = vld [vmem:[#allocation69_spill] sm:$0xff]  ;;  %v21274_v12 = vld [vmem:[#allocation15_spill] sm:$0xff] }
 0x357   : > { %v20426_v39 = vpop.eup %15273  ;;  %15299 = vpow2.f32 %v12608_v46  ;;  %v12611_v54 = vmul.f32 -1.442695, %v10294_v51  ;;  %v10292_v29 = vmul.f32 %v9218_v37, %v21163_v44  ;;  %v10138_v13 = vmul.f32 %v20343_v21, %v20188_v60  ;;  %v9023_v10 = vpop.f32.mrf.mxu0 }
 0x358   : > { %21269 = vst [vmem:[#allocation84_spill] sm:$0xff] %v20424_v18  ;;  %v20431_v63 = vpop.eup %15275  ;;  %15301 = vrcp.f32 %v9990_v6  ;;  %v20435_v11 = vadd.f32 %v20350_v16, %v20089_v0  ;;  %v9239_v14 = vadd.f32 %v13549_v20, %v20051_v15  ;;  %v9230_v23 = vpop.f32.mrf.mxu1  ;;  %v20440_v56 = vadd.f32 %v20341_v8, %v21270_v45  ;;  %v21272_v16 = vld [vmem:[#allocation20_spill] sm:$0xff]  ;;  %v21277_v45 = vld [vmem:[#allocation95_spill] sm:$0xff] }
 0x359   : > { %v15278_v58 = vpop.eup %15277  ;;  %15303 = vpow2.f32 %v12611_v54  ;;  %v12609_v44 = vmul.f32 -1.442695, %v10292_v29  ;;  %v9231_v60 = vadd.f32 %v9230_v23, %v21271_v27  ;;  %v10139_v21 = vmul.f32 %v20360_v42, %v20208_v55  ;;  %v20446_v15 = vpop.f32.mrf.mxu0  ;;  %v21275_v54 = vld [vmem:[#allocation12_spill] sm:$0xff] }
 0x35a   : > { %v15280_v6 = vpop.eup %15279  ;;  %15305 = vrcp.f32 %v9995_v25  ;;  %v9996_v0 = vadd.f32 1.0, %v15278_v58  ;;  %v10297_v46 = vmul.f32 %v9239_v14, %v21272_v16  ;;  %v13550_v51 = vpop.f32.mrf.mxu1  ;;  %v20450_v8 = vmul.f32 %v20368_v57, %v21273_v50  ;;  %v21276_v25 = vld [vmem:[#allocation45_spill] sm:$0xff]  ;;  %v21281_v16 = vld [vmem:[#allocation51_spill] sm:$0xff] }
 0x35b   : > { %v15282_v37 = vpop.eup %15281  ;;  %v9994_v20 = vadd.f32 1.0, %v15280_v6  ;;  %15307 = vpow2.f32 %v12609_v44  ;;  %v10295_v28 = vmul.f32 %v9231_v60, %v21274_v12  ;;  %v20454_v29 = vadd.f32 %v10138_v13, %v21275_v54  ;;  %v9026_v10 = vpop.f32.mrf.mxu0  ;;  %v21280_v60 = vld [vmem:[#allocation98_spill] sm:$0xff] }
 0x35c   : > { %v15284_v55 = vpop.eup %15283  ;;  %15309 = vrcp.f32 %v9996_v0  ;;  %v12614_v42 = vmul.f32 -1.442695, %v10297_v46  ;;  %v9242_v14 = vadd.f32 %v13550_v51, %v21276_v25  ;;  %v9233_v23 = vpop.f32.mrf.mxu1  ;;  %v20459_v58 = vmul.f32 %v20391_v62, %v21277_v45  ;;  %v21282_v46 = vld [vmem:[#allocation23_spill] sm:$0xff]  ;;  %v21285_v10 = vld [vmem:[#allocation18_spill] sm:$0xff] }
 0x35d   : > { %v20461_v57 = vpop.eup %15285  ;;  %15311 = vrcp.f32 %v9994_v20  ;;  %v10417_v44 = vadd.f32 1.0, %v15284_v55  ;;  %v12612_v27 = vmul.f32 -1.442695, %v10295_v28  ;;  %v9234_v6 = vadd.f32 %v9233_v23, %v21280_v60  ;;  %v20469_v50 = vpop.f32.mrf.mxu0  ;;  %v21283_v62 = vld [vmem:[#allocation43_spill] sm:$0xff]  ;;  %v21284_v28 = vld [vmem:[#allocation13_spill] sm:$0xff] }
 0x35e   : > { %21278 = vst [vmem:[#allocation79_spill] sm:$0xff] %v20459_v58  ;;  %21279 = vst [vmem:[#allocation67_spill] sm:$0xff] %v20461_v57  ;;  %v15288_v13 = vpop.eup %15287  ;;  %v20466_v0 = vadd.f32 %v20374_v38, %v21281_v16  ;;  %15313 = vpow2.f32 %v12614_v42  ;;  %v10298_v51 = vmul.f32 %v9242_v14, %v21282_v46  ;;  %v13553_v12 = vpop.f32.mrf.mxu1  ;;  %v20472_v54 = vadd.f32 %v10139_v21, %v21283_v62  ;;  %v21286_v14 = vld [vmem:[#allocation77_spill] sm:$0xff]  ;;  %v21287_v46 = vld [vmem:[#allocation96_spill] sm:$0xff] }
 0x35f   : > { %v20474_v25 = vpop.eup %15289  ;;  %15315 = vrcp.f32 %v10417_v44  ;;  %v10415_v20 = vadd.f32 1.0, %v15288_v13  ;;  %v20478_v55 = vadd.f32 %v20394_v31, %v21284_v28  ;;  %v10296_v38 = vmul.f32 %v9234_v6, %v21285_v10  ;;  %v9031_v60 = vpop.f32.mrf.mxu0  ;;  %v21289_v31 = vld [vmem:[#allocation74_spill] sm:$0xff]  ;;  %v21290_v6 = vld [vmem:[#allocation25_spill] sm:$0xff]  ;;  %v21291_v10 = vld [vmem:[#allocation71_spill] sm:$0xff] }
 0x360   : > { %v15292_v23 = vpop.eup %15291  ;;  %15317 = vpow2.f32 %v12612_v27  ;;  %v12615_v42 = vmul.f32 -1.442695, %v10298_v51  ;;  %v9255_v45 = vadd.f32 %v13553_v12, %v21286_v14  ;;  %v9246_v16 = vpop.f32.mrf.mxu1  ;;  %v20484_v21 = vmul.f32 %v20416_v32, %v21287_v46  ;;  %v21292_v32 = vld [vmem:[#allocation97_spill] sm:$0xff] }
 0x361   : > { %v20486_v62 = vpop.eup %15293  ;;  %15319 = vrcp.f32 %v10415_v20  ;;  %v10418_v44 = vadd.f32 1.0, %v15292_v23  ;;  %v12613_v13 = vmul.f32 -1.442695, %v10296_v38  ;;  %v9247_v28 = vadd.f32 %v9246_v16, %v21289_v31  ;;  %v20490_v51 = vpop.f32.mrf.mxu0  ;;  %v21294_v38 = vld [vmem:[#allocation24_spill] sm:$0xff] }
 0x362   : > { %21288 = vst [vmem:[#allocation85_spill] sm:$0xff] %v20484_v21  ;;  %v15296_v57 = vpop.eup %15295  ;;  %15321 = vpow2.f32 %v12615_v42  ;;  %v10301_v27 = vmul.f32 %v9255_v45, %v21290_v6  ;;  %v13554_v12 = vpop.f32.mrf.mxu1  ;;  %v20494_v14 = vadd.f32 %v20389_v35, %v21291_v10  ;;  %v20497_v60 = vmul.f32 %v15282_v37, %v21292_v32  ;;  %v21295_v16 = vld [vmem:[#allocation72_spill] sm:$0xff]  ;;  %v21296_v21 = vld [vmem:[#allocation78_spill] sm:$0xff]  ;;  %v21297_v32 = vld [vmem:[#allocation53_spill] sm:$0xff] }
 0x363   : > { %v15298_v46 = vpop.eup %15297  ;;  %15323 = vrcp.f32 %v10418_v44  ;;  %v10416_v20 = vadd.f32 1.0, %v15296_v57  ;;  %v10299_v23 = vmul.f32 %v9247_v28, %v21294_v38  ;;  %v20502_v42 = vadd.f32 %v20400_v2, %v21295_v16  ;;  %v9034_v10 = vpop.f32.mrf.mxu0  ;;  %v21298_v44 = vld [vmem:[#allocation14_spill] sm:$0xff]  ;;  %v21299_v16 = vld [vmem:[#allocation27_spill] sm:$0xff] }
 0x364   : > { %21293 = vst [vmem:[#allocation91_spill] sm:$0xff] %v20497_v60  ;;  %v15300_v45 = vpop.eup %15299  ;;  %v10421_v31 = vadd.f32 1.0, %v15298_v46  ;;  %15325 = vpow2.f32 %v12613_v13  ;;  %v12618_v6 = vmul.f32 -1.442695, %v10301_v27  ;;  %v9258_v58 = vadd.f32 %v13554_v12, %v21296_v21  ;;  %v9249_v35 = vpop.f32.mrf.mxu1  ;;  %v21300_v27 = vld [vmem:[#allocation99_spill] sm:$0xff] }
 0x365   : > { %v15302_v18 = vpop.eup %15301  ;;  %15327 = vrcp.f32 %v10416_v20  ;;  %v10419_v37 = vadd.f32 1.0, %v15300_v45  ;;  %v20507_v57 = vadd.f32 %v20418_v9, %v21297_v32  ;;  %v9250_v28 = vadd.f32 %v9249_v35, %v21298_v44  ;;  %v21301_v45 = vld [vmem:[#allocation26_spill] sm:$0xff] }
 0x366   : > { %v15304_v38 = vpop.eup %15303  ;;  %15329 = vrcp.f32 %v10421_v31  ;;  %v12616_v2 = vmul.f32 -1.442695, %v10299_v23  ;;  %v10302_v46 = vmul.f32 %v9258_v58, %v21299_v16  ;;  %v13557_v13 = vpop.f32.mrf.mxu1  ;;  %v20513_v21 = vmul.f32 %v20408_v53, %v21300_v27  ;;  %v21302_v9 = vld [vmem:[#allocation58_spill] sm:$0xff]  ;;  %v21303_v31 = vld [vmem:[#allocation100_spill] sm:$0xff]  ;;  %v21305_v16 = vld [vmem:[#allocation29_spill] sm:$0xff] }
 0x367   : > { %v20515_v12 = vpop.eup %15305  ;;  %15331 = vrcp.f32 %v10419_v37  ;;  %v10422_v20 = vadd.f32 1.0, %v15304_v38  ;;  %v10300_v10 = vmul.f32 %v9250_v28, %v21301_v45  ;;  %v9271_v32 = vadd.f32 %v13557_v13, %v21302_v9  ;;  %v21306_v13 = vld [vmem:[#allocation128_spill] sm:$0xff]  ;;  %v21308_v9 = vld [vmem:[#allocation101_spill] sm:$0xff] }
 0x368   : > { %v15308_v60 = vpop.eup %15307  ;;  %v20520_v35 = vadd.f32 1.0, %v20431_v63  ;;  %15333 = vpow2.f32 %v12618_v6  ;;  %v12619_v23 = vmul.f32 -1.442695, %v10302_v46  ;;  %v9262_v58 = vpop.f32.mrf.mxu1  ;;  %v20524_v44 = vmul.f32 %v20426_v39, %v21303_v31  ;;  %v21307_v6 = vld [vmem:[#allocation130_spill] sm:$0xff] }
 0x369   : > { %v20526_v53 = vpop.eup %15309  ;;  %15335 = vrcp.f32 %v10422_v20  ;;  %v10420_v37 = vadd.f32 1.0, %v15308_v60  ;;  %v12617_v38 = vmul.f32 -1.442695, %v10300_v10  ;;  %v10305_v28 = vmul.f32 %v9271_v32, %v21305_v16  ;;  %v21310_v10 = vld [vmem:[#allocation103_spill] sm:$0xff] }
 0x36a   : > { %21304 = vst [vmem:[#allocation68_spill] sm:$0xff] %v20524_v44  ;;  %v20529_v27 = vpop.eup %15311  ;;  %v20533_v63 = vadd.f32 %v20446_v15, %v21306_v13  ;;  %15337 = vpow2.f32 %v12616_v2  ;;  %v9263_v46 = vadd.f32 %v9262_v58, %v21307_v6  ;;  %v13558_v45 = vpop.f32.mrf.mxu1  ;;  %v20538_v39 = vmul.f32 %v20474_v25, %v21308_v9  ;;  %v21312_v15 = vld [vmem:[#allocation56_spill] sm:$0xff]  ;;  %v21314_v9 = vld [vmem:[#allocation31_spill] sm:$0xff] }
 0x36b   : > { %v15314_v31 = vpop.eup %15313  ;;  %15339 = vrcp.f32 %v10420_v37  ;;  %v12622_v60 = vmul.f32 -1.442695, %v10305_v28  ;;  %v9274_v20 = vadd.f32 %v13558_v45, %v20290_v5  ;;  %v20542_v32 = vmul.f32 %v15302_v18, %v21310_v10  ;;  %v21313_v58 = vld [vmem:[#allocation28_spill] sm:$0xff]  ;;  %v21316_v5 = vld [vmem:[#allocation110_spill] sm:$0xff] }
 0x36c   : > { %21309 = vst [vmem:[#allocation38_spill] sm:$0xff] %v20538_v39  ;;  %v15316_v16 = vpop.eup %15315  ;;  %v10425_v44 = vadd.f32 1.0, %v15314_v31  ;;  %v20546_v2 = vadd.f32 %v20469_v50, %v21312_v15  ;;  %15341 = vpow2.f32 %v12619_v23  ;;  %v10303_v13 = vmul.f32 %v9263_v46, %v21313_v58  ;;  %v9265_v6 = vpop.f32.mrf.mxu1  ;;  %v21315_v28 = vld [vmem:[#allocation132_spill] sm:$0xff]  ;;  %v21317_v31 = vld [vmem:[#allocation57_spill] sm:$0xff]  ;;  %v21318_v58 = vld [vmem:[#allocation30_spill] sm:$0xff] }
 0x36d   : > { %21311 = vst [vmem:[#allocation112_spill] sm:$0xff] %v20542_v32  ;;  %v15318_v25 = vpop.eup %15317  ;;  %15343 = vpow2.f32 %v12617_v38  ;;  %v10306_v37 = vmul.f32 %v9274_v20, %v21314_v9  ;;  %v9266_v39 = vadd.f32 %v9265_v6, %v21315_v28  ;;  %v10578_v45 = vmul.f32 %v15316_v16, %v21316_v5  ;;  %v21319_v28 = vld [vmem:[#allocation60_spill] sm:$0xff] }
 0x36e   : > { %v15320_v18 = vpop.eup %15319  ;;  %15345 = vrcp.f32 %v10425_v44  ;;  %v10423_v10 = vadd.f32 1.0, %v15318_v25  ;;  %v20554_v32 = vadd.f32 %v20490_v51, %v21317_v31  ;;  %v12620_v50 = vmul.f32 -1.442695, %v10303_v13  ;;  %v13561_v23 = vpop.f32.mrf.mxu1  ;;  %v21320_v13 = vld [vmem:[#allocation33_spill] sm:$0xff] }
 0x36f   : > { %v15322_v15 = vpop.eup %15321  ;;  %15347 = vpow2.f32 %v12622_v60  ;;  %v12623_v46 = vmul.f32 -1.442695, %v10306_v37  ;;  %v10304_v38 = vmul.f32 %v9266_v39, %v21318_v58  ;;  %v9287_v20 = vadd.f32 %v13561_v23, %v20372_v1 }
 0x370   : > { %v15324_v9 = vpop.eup %15323  ;;  %15349 = vrcp.f32 %v10423_v10  ;;  %v10426_v6 = vadd.f32 1.0, %v15322_v15  ;;  %v9278_v16 = vpop.f32.mrf.mxu1  ;;  %v10576_v44 = vmul.f32 %v15320_v18, %v21319_v28  ;;  %v10610_v25 = vadd.f32 %v10578_v45, %v20283_v30  ;;  %v21321_v10 = vld [vmem:[#allocation111_spill] sm:$0xff]  ;;  %v21322_v28 = vld [vmem:[#allocation32_spill] sm:$0xff] }
 0x371   : > { %v15326_v5 = vpop.eup %15325  ;;  %15351 = vpow2.f32 %v12620_v50  ;;  %v12621_v51 = vmul.f32 -1.442695, %v10304_v38  ;;  %v10309_v31 = vmul.f32 %v9287_v20, %v21320_v13  ;;  %v9279_v60 = vadd.f32 %v9278_v16, %v20309_v4  ;;  %v21323_v20 = vld [vmem:[#allocation82_spill] sm:$0xff]  ;;  %v21324_v16 = vld [vmem:[#allocation113_spill] sm:$0xff] }
 0x372   : > { %v15328_v37 = vpop.eup %15327  ;;  %15353 = vrcp.f32 %v10426_v6  ;;  %v10424_v39 = vadd.f32 1.0, %v15326_v5  ;;  %v13562_v58 = vpop.f32.mrf.mxu1  ;;  %v10608_v1 = vadd.f32 %v10576_v44, %v20296_v43  ;;  %v10579_v23 = vmul.f32 %v15324_v9, %v21321_v10  ;;  %v21325_v9 = vld [vmem:[#allocation35_spill] sm:$0xff] }
 0x373   : > { %v15330_v15 = vpop.eup %15329  ;;  %15355 = vpow2.f32 %v12623_v46  ;;  %v12626_v18 = vmul.f32 -1.442695, %v10309_v31  ;;  %v10307_v30 = vmul.f32 %v9279_v60, %v21322_v28  ;;  %v9290_v45 = vadd.f32 %v13562_v58, %v20383_v40 }
 0x374   : > { %v15332_v50 = vpop.eup %15331  ;;  %15357 = vrcp.f32 %v10424_v39  ;;  %v9281_v38 = vpop.f32.mrf.mxu1  ;;  %v10577_v4 = vmul.f32 %v15328_v37, %v21323_v20  ;;  %v10611_v6 = vadd.f32 %v10579_v23, %v20316_v36  ;;  %v10582_v5 = vmul.f32 %v15330_v15, %v21324_v16  ;;  %v21326_v36 = vld [vmem:[#allocation34_spill] sm:$0xff]  ;;  %v21328_v16 = vld [vmem:[#allocation37_spill] sm:$0xff] }
 0x375   : > { %v15334_v13 = vpop.eup %15333  ;;  %15359 = vpow2.f32 %v12621_v51  ;;  %v12624_v43 = vmul.f32 -1.442695, %v10307_v30  ;;  %v10310_v44 = vmul.f32 %v9290_v45, %v21325_v9  ;;  %v9282_v46 = vadd.f32 %v9281_v38, %v20328_v61  ;;  %v21327_v61 = vld [vmem:[#allocation61_spill] sm:$0xff] }
 0x376   : > { %v15336_v31 = vpop.eup %15335  ;;  %v10429_v60 = vadd.f32 1.0, %v15334_v13  ;;  %15361 = vpow2.f32 %v12626_v18  ;;  %v13565_v40 = vpop.f32.mrf.mxu1  ;;  %v10609_v39 = vadd.f32 %v10577_v4, %v20304_v24  ;;  %v10705_v58 = vpack.c.bf16 %v10611_v6, %v10610_v25 }
 0x377   : > { %v15338_v10 = vpop.eup %15337  ;;  %15363 = vpow2.f32 %v12624_v43  ;;  %v12627_v37 = vmul.f32 -1.442695, %v10310_v44  ;;  %v10308_v23 = vmul.f32 %v9282_v46, %v21326_v36  ;;  %v9303_v15 = vadd.f32 %v13565_v40, %v20466_v0  ;;  %v21329_v0 = vld [vmem:[#allocation59_spill] sm:$0xff]  ;;  %v21330_v46 = vld [vmem:[#allocation36_spill] sm:$0xff] }
 0x378   : > { %v15340_v51 = vpop.eup %15339  ;;  %15365 = vrcp.f32 %v10429_v60  ;;  %v10427_v28 = vadd.f32 1.0, %v15338_v10  ;;  %v10704_v30 = vpack.c.bf16 %v10609_v39, %v10608_v1  ;;  %v9294_v45 = vpop.f32.mrf.mxu1  ;;  %v10580_v38 = vmul.f32 %v15332_v50, %v21327_v61 }
 0x379   : > { %v15342_v20 = vpop.eup %15341  ;;  %15367 = vpow2.f32 %v12627_v37  ;;  %v12625_v18 = vmul.f32 -1.442695, %v10308_v23  ;;  %v10313_v24 = vmul.f32 %v9303_v15, %v21328_v16  ;;  %v9295_v25 = vadd.f32 %v9294_v45, %v20404_v41  ;;  %v21331_v37 = vld [vmem:[#allocation114_spill] sm:$0xff] }
 0x37a   : > { %v15344_v4 = vpop.eup %15343  ;;  %15369 = vrcp.f32 %v10427_v28  ;;  %v10430_v6 = vadd.f32 1.0, %v15342_v20  ;;  %13587 = vmatprep.mubr.bf16.mxu0 %v10704_v30  ;;  %v13566_v13 = vpop.f32.mrf.mxu1  ;;  %v10581_v43 = vmul.f32 %v15340_v51, %v21329_v0  ;;  %v10612_v9 = vadd.f32 %v10580_v38, %v20320_v59  ;;  %v21332_v30 = vld [vmem:[#allocation39_spill] sm:$0xff] }
 0x37b   : > { %v20579_v1 = vpop.eup %15345  ;;  %v10428_v44 = vadd.f32 1.0, %v15344_v4  ;;  %15371 = vpow2.f32 %v12625_v18  ;;  %v12630_v50 = vmul.f32 -1.442695, %v10313_v24  ;;  %v10311_v60 = vmul.f32 %v9295_v25, %v21330_v46  ;;  %13588 = vmatmul.mubr.bf16.vlgmr.msra.gmra.mxu0 %v10705_v58  ;;  %v21333_v25 = vld [vmem:[#allocation83_spill] sm:$0xff] }
 0x37c   : > { %v15348_v40 = vpop.eup %15347  ;;  %15373 = vrcp.f32 %v10430_v6  ;;  %v9306_v41 = vadd.f32 %v13566_v13, %v20478_v55  ;;  %v9297_v39 = vpop.f32.mrf.mxu1  ;;  %v10613_v10 = vadd.f32 %v10581_v43, %v20347_v47  ;;  %v10583_v36 = vmul.f32 %v15336_v31, %v21331_v37 }
 0x37d   : > { %v15350_v23 = vpop.eup %15349  ;;  %15375 = vrcp.f32 %v10428_v44  ;;  %v10433_v59 = vadd.f32 1.0, %v15348_v40  ;;  %v12628_v15 = vmul.f32 -1.442695, %v10311_v60  ;;  %v9298_v51 = vadd.f32 %v9297_v39, %v20435_v11 }
 0x37e   : > { %v15352_v28 = vpop.eup %15351  ;;  %15377 = vpow2.f32 %v12630_v50  ;;  %v10314_v45 = vmul.f32 %v9306_v41, %v21332_v30  ;;  %v13569_v58 = vpop.f32.mrf.mxu1  ;;  %v10706_v61 = vpack.c.bf16 %v10613_v10, %v10612_v9  ;;  %v10614_v38 = vadd.f32 %v10582_v5, %v20354_v49  ;;  %v21334_v9 = vld [vmem:[#allocation64_spill] sm:$0xff] }
 0x37f   : > { %v15354_v55 = vpop.eup %15353  ;;  %15379 = vrcp.f32 %v10433_v59  ;;  %v10431_v20 = vadd.f32 1.0, %v15352_v28  ;;  %v10312_v47 = vmul.f32 %v9298_v51, %v21243_v22  ;;  %v9319_v31 = vadd.f32 %v13569_v58, %v20546_v2  ;;  %v21335_v51 = vld [vmem:[#allocation115_spill] sm:$0xff] }
 0x380   : > { %v15356_v18 = vpop.eup %15355  ;;  %15381 = vpow2.f32 %v12628_v15  ;;  %v12631_v16 = vmul.f32 -1.442695, %v10314_v45  ;;  %13591 = vmatprep.mubr.bf16.mxu0 %v10706_v61  ;;  %v9310_v11 = vpop.f32.mrf.mxu1  ;;  %v10615_v24 = vadd.f32 %v10583_v36, %v20364_v33  ;;  %v10584_v4 = vmul.f32 %v15350_v23, %v21333_v25 }
 0x381   : > { %v15358_v6 = vpop.eup %15357  ;;  %15383 = vrcp.f32 %v10431_v20  ;;  %v10434_v13 = vadd.f32 1.0, %v15356_v18  ;;  %v12629_v49 = vmul.f32 -1.442695, %v10312_v47  ;;  %v10317_v5 = vmul.f32 %v9319_v31, %v21117_v34  ;;  %v21337_v31 = vld [vmem:[#allocation62_spill] sm:$0xff] }
 0x382   : > { %v15360_v0 = vpop.eup %15359  ;;  %15385 = vpow2.f32 %v12631_v16  ;;  %v9311_v22 = vadd.f32 %v9310_v11, %v20507_v57  ;;  %v10707_v2 = vpack.c.bf16 %v10615_v24, %v10614_v38  ;;  %v13570_v43 = vpop.f32.mrf.mxu1  ;;  %v10585_v44 = vmul.f32 %v15358_v6, %v21334_v9  ;;  %v21338_v11 = vld [vmem:[#allocation118_spill] sm:$0xff]  ;;  %v21339_v24 = vld [vmem:[#allocation119_spill] sm:$0xff] }
 0x383   : > { %v15362_v50 = vpop.eup %15361  ;;  %15387 = vrcp.f32 %v10434_v13  ;;  %v10432_v46 = vadd.f32 1.0, %v15360_v0  ;;  %v12634_v33 = vmul.f32 -1.442695, %v10317_v5  ;;  %v9322_v60 = vadd.f32 %v13570_v43, %v20554_v32  ;;  %v21341_v13 = vld [vmem:[#allocation11_spill] sm:$0xff] }
 0x384   : > { %v15364_v40 = vpop.eup %15363  ;;  %v10437_v41 = vadd.f32 1.0, %v15362_v50  ;;  %15389 = vpow2.f32 %v12629_v49  ;;  %v10315_v39 = vmul.f32 %v9311_v22, %v21247_v26  ;;  %13592 = vmatmul.mubr.bf16.gmra.mxu0 %v10707_v2  ;;  %v9313_v34 = vpop.f32.mrf.mxu1  ;;  %v10616_v10 = vadd.f32 %v10584_v4, %v20379_v48 }
 0x385   : > { %v15366_v57 = vpop.eup %15365  ;;  %15391 = vrcp.f32 %v10432_v46  ;;  %v10435_v37 = vadd.f32 1.0, %v15364_v40  ;;  %v10318_v36 = vmul.f32 %v9322_v60, %v21119_v7  ;;  %v9314_v23 = vadd.f32 %v9313_v34, %v20533_v63  ;;  %v21336_v7 = vld [vmem:[#allocation117_spill] sm:$0xff] }
 0x386   : > { %v15368_v59 = vpop.eup %15367  ;;  %15393 = vrcp.f32 %v10437_v41  ;;  %v12632_v15 = vmul.f32 -1.442695, %v10315_v39  ;;  %v10617_v32 = vadd.f32 %v10585_v44, %v20397_v52  ;;  %v10586_v28 = vmul.f32 %v20579_v1, %v21335_v51  ;;  %v21342_v44 = vld [vmem:[#allocation120_spill] sm:$0xff]  ;;  %v21344_v60 = vld [vmem:[#allocation105_spill] sm:$0xff]  ;;  %v21345_v39 = vld [vmem:[#allocation63_spill] sm:$0xff] }
 0x387   : > { %v15370_v26 = vpop.eup %15369  ;;  %15395 = vrcp.f32 %v10435_v37  ;;  %v10438_v30 = vadd.f32 1.0, %v15368_v59  ;;  %v12635_v45 = vmul.f32 -1.442695, %v10318_v36  ;;  %v10316_v48 = vmul.f32 %v9314_v23, %v21116_v3  ;;  %v15535_v37 = vld [vmem:[%s15728_s13 + $0x441] sm:$0xff]  ;;  %v15536_v23 = vld [vmem:[%s15728_s13 + $0x469] sm:$0xff] }
 0x388   : > { %v15372_v58 = vpop.eup %15371  ;;  %15397 = vpow2.f32 %v12634_v33  ;;  %v10708_v61 = vpack.c.bf16 %v10617_v32, %v10616_v10  ;;  %v10587_v38 = vmul.f32 %v15354_v55, %v21336_v7  ;;  %v10618_v63 = vadd.f32 %v10586_v28, %v20412_v17  ;;  %v21340_v55 = vld [vmem:[#allocation66_spill] sm:$0xff]  ;;  %v21348_v28 = vld [vmem:[#allocation73_spill] sm:$0xff] }
 0x389   : > { %v15374_v20 = vpop.eup %15373  ;;  %15399 = vrcp.f32 %v10438_v30  ;;  %v10436_v47 = vadd.f32 1.0, %v15372_v58  ;;  %v12633_v52 = vmul.f32 -1.442695, %v10316_v48  ;;  %v10588_v18 = vmul.f32 %v15370_v26, %v21337_v31  ;;  %v21349_v26 = vld [vmem:[#allocation79_spill] sm:$0xff]  ;;  %v21351_v7 = vld [vmem:[#allocation106_spill] sm:$0xff] }
 0x38a   : > { %v15376_v1 = vpop.eup %15375  ;;  %15401 = vpow2.f32 %v12632_v15  ;;  %13595 = vmatprep.mubr.bf16.mxu0 %v10708_v61  ;;  %v10619_v16 = vadd.f32 %v10587_v38, %v20440_v56  ;;  %v10590_v3 = vmul.f32 %v15366_v57, %v21338_v11  ;;  %v10591_v25 = vmul.f32 %v15374_v20, %v21339_v24  ;;  %v21347_v15 = vld [vmem:[#allocation84_spill] sm:$0xff]  ;;  %v21356_v24 = vld [vmem:[#allocation21_spill] sm:$0xff] }
 0x38b   : > { %v15378_v4 = vpop.eup %15377  ;;  %15403 = vrcp.f32 %v10436_v47  ;;  %v10589_v6 = vmul.f32 %v15376_v1, %v21340_v55  ;;  %v10620_v17 = vadd.f32 %v10588_v18, %v20454_v29  ;;  %v10176_v49 = vadd.f32 %v20450_v8, %v21341_v13  ;;  %v21343_v8 = vld [vmem:[#allocation10_spill] sm:$0xff]  ;;  %v21353_v18 = vld [vmem:[#allocation109_spill] sm:$0xff]  ;;  %v21354_v11 = vld [vmem:[#allocation80_spill] sm:$0xff] }
 0x38c   : > { %v15380_v5 = vpop.eup %15379  ;;  %v10441_v0 = vadd.f32 1.0, %v15378_v4  ;;  %15405 = vpow2.f32 %v12635_v45  ;;  %v10709_v22 = vpack.c.bf16 %v10619_v16, %v10618_v63  ;;  %v10622_v2 = vadd.f32 %v10590_v3, %v20494_v14  ;;  %v21350_v45 = vld [vmem:[#allocation122_spill] sm:$0xff]  ;;  %v21352_v63 = vld [vmem:[#allocation107_spill] sm:$0xff]  ;;  %v21355_v3 = vld [vmem:[#allocation48_spill] sm:$0xff] }
 0x38d   : > { %v15382_v56 = vpop.eup %15381  ;;  %15407 = vpow2.f32 %v12633_v52  ;;  %v10621_v43 = vadd.f32 %v10589_v6, %v20472_v54  ;;  %v10623_v9 = vadd.f32 %v10591_v25, %v20502_v42  ;;  %v10594_v50 = vmul.f32 %v15380_v5, %v21342_v44  ;;  %v21359_v13 = vld [vmem:[#allocation85_spill] sm:$0xff] }
 0x38e   : > { %v15384_v46 = vpop.eup %15383  ;;  %15409 = vrcp.f32 %v10441_v0  ;;  %v10439_v29 = vadd.f32 1.0, %v15382_v56  ;;  %13596 = vmatmul.mubr.bf16.gmra.mxu0 %v10709_v22  ;;  %v10174_v33 = vadd.f32 %v20421_v19, %v21343_v8  ;;  %v20622_v14 = vmul.f32 %v20486_v62, %v21344_v60  ;;  %v21346_v62 = vld [vmem:[#allocation47_spill] sm:$0xff]  ;;  %v21360_v0 = vld [vmem:[#allocation16_spill] sm:$0xff] }
 0x38f   : > { %v15386_v40 = vpop.eup %15385  ;;  %v10710_v41 = vpack.c.bf16 %v10621_v43, %v10620_v17  ;;  %v10711_v54 = vpack.c.bf16 %v10623_v9, %v10622_v2  ;;  %v10592_v42 = vmul.f32 %v15384_v46, %v21345_v39  ;;  %v20625_v34 = vadd.f32 %v10594_v50, %v10176_v49  ;;  %v21358_v17 = vld [vmem:[#allocation22_spill] sm:$0xff]  ;;  %v15537_v2 = vld [vmem:[%s15728_s13 + $0x471] sm:$0xff]  ;;  %v21364_v39 = vld [vmem:[#allocation67_spill] sm:$0xff] }
 0x390   : > { %v15388_v10 = vpop.eup %15387  ;;  %15411 = vrcp.f32 %v10439_v29  ;;  %v10442_v57 = vadd.f32 1.0, %v15386_v40  ;;  %v2761_v36 = vsel %vm854_vm0, %v15535_v37, 0.0  ;;  %v2764_v19 = vsel %vm854_vm0, %v15536_v23, 0.0  ;;  %v21361_v50 = vld [vmem:[#allocation68_spill] sm:$0xff]  ;;  %v15538_v40 = vld [vmem:[%s15728_s13 + $0x139] sm:$0xff]  ;;  %v21367_v37 = vld [vmem:[#allocation91_spill] sm:$0xff] }
 0x391   : > { %v15390_v59 = vpop.eup %15389  ;;  %13599 = vmatprep.mubr.bf16.mxu0 %v10710_v41  ;;  %v10175_v32 = vadd.f32 %v21347_v15, %v21346_v62  ;;  %v10624_v51 = vadd.f32 %v10592_v42, %v10174_v33  ;;  %v10177_v30 = vadd.f32 %v21349_v26, %v21348_v28  ;;  %v10595_v48 = vmul.f32 %v15388_v10, %v21350_v45  ;;  %v21362_v29 = vld [vmem:[#allocation124_spill] sm:$0xff]  ;;  %v15539_v62 = vld [vmem:[%s15728_s13 + $0x159] sm:$0xff] }
 0x392   : > { %v15392_v58 = vpop.eup %15391  ;;  %15413 = vrcp.f32 %v10442_v57  ;;  %v10440_v61 = vadd.f32 1.0, %v15390_v59  ;;  %v20638_v38 = vmul.f32 %v20529_v27, %v21351_v7  ;;  %v20642_v20 = vmul.f32 %v20515_v12, %v21352_v63  ;;  %v21357_v12 = vld [vmem:[#allocation123_spill] sm:$0xff]  ;;  %v21365_v10 = vld [vmem:[#allocation76_spill] sm:$0xff]  ;;  %v21366_v57 = vld [vmem:[#allocation50_spill] sm:$0xff] }
 0x393   : > { %v15394_v47 = vpop.eup %15393  ;;  %15415 = vrcp.f32 %v20520_v35  ;;  %v10593_v52 = vmul.f32 %v15392_v58, %v2761_v36  ;;  %v10627_v31 = vadd.f32 %v10595_v48, %v10177_v30  ;;  %v20647_v1 = vmul.f32 %v20526_v53, %v21353_v18  ;;  %v21369_v28 = vld [vmem:[#allocation52_spill] sm:$0xff]  ;;  %v21370_v63 = vld [vmem:[#allocation49_spill] sm:$0xff] }
 0x394   : > { %v15396_v16 = vpop.eup %15395  ;;  %15417 = vrcp.f32 %v10440_v61  ;;  %v9732_v27 = vmul.f32 %v21355_v3, %v21354_v11  ;;  %v10180_v25 = vadd.f32 %v20513_v21, %v21356_v24  ;;  %v10598_v4 = vmul.f32 %v15394_v47, %v21357_v12  ;;  %v15540_v61 = vld [vmem:[%s15728_s13 + $0x499] sm:$0xff]  ;;  %v15542_v24 = vld [vmem:[%s15728_s13 + $0x141] sm:$0xff] }
 0x395   : > { %v15398_v55 = vpop.eup %15397  ;;  %v10625_v6 = vadd.f32 %v10593_v52, %v10175_v32  ;;  %v10713_v35 = vpack.c.bf16 %v10627_v31, %v20625_v34  ;;  %v10178_v49 = vadd.f32 %v21359_v13, %v21358_v17  ;;  %v10596_v5 = vmul.f32 %v15396_v16, %v2764_v19  ;;  %v21371_v31 = vld [vmem:[#allocation125_spill] sm:$0xff]  ;;  %v21372_v12 = vld [vmem:[#allocation38_spill] sm:$0xff] }
 0x396   : > { %v15400_v53 = vpop.eup %15399  ;;  %15419 = vrcp.f32 %v21360_v0  ;;  %v10445_v22 = vadd.f32 1.0, %v15398_v55  ;;  %13600 = vmatmul.mubr.bf16.gmra.mxu0 %v10711_v54  ;;  %v2765_v56 = vsel %vm854_vm0, %v15537_v2, 0.0  ;;  %v20660_v21 = vadd.f32 %v10598_v4, %v10180_v25  ;;  %v21363_v54 = vld [vmem:[#allocation104_spill] sm:$0xff]  ;;  %v15541_v11 = vld [vmem:[%s15728_s13 + $0x4b9] sm:$0xff] }
 0x397   : > { %v15402_v43 = vpop.eup %15401  ;;  %v10712_v9 = vpack.c.bf16 %v10625_v6, %v10624_v51  ;;  %v10628_v44 = vadd.f32 %v10596_v5, %v10178_v49  ;;  %v10181_v46 = vadd.f32 %v21361_v50, %v9732_v27  ;;  %v10599_v8 = vmul.f32 %v15400_v53, %v21362_v29  ;;  %v21368_v51 = vld [vmem:[#allocation81_spill] sm:$0xff]  ;;  %v15543_v5 = vld [vmem:[%s15728_s13 + $0x4a1] sm:$0xff]  ;;  %v21375_v29 = vld [vmem:[#allocation112_spill] sm:$0xff] }
 0x398   : > { %v15404_v33 = vpop.eup %15403  ;;  %15421 = vrcp.f32 %v10445_v22  ;;  %v10443_v60 = vadd.f32 1.0, %v15402_v43  ;;  %v2704_v41 = vsel %vm854_vm0, %v15538_v40, 0.0  ;;  %v10152_v42 = vmul.f32 %v21364_v39, %v21363_v54  ;;  %v21373_v6 = vld [vmem:[#allocation17_spill] sm:$0xff]  ;;  %v21374_v22 = vld [vmem:[#allocation19_spill] sm:$0xff] }
 0x399   : > { %v15406_v34 = vpop.eup %15405  ;;  %15423 = vrcp.f32 %v21365_v10  ;;  %13603 = vmatprep.mubr.bf16.mxu0 %v10712_v9  ;;  %v10179_v36 = vadd.f32 %v21367_v37, %v21366_v57  ;;  %v10597_v23 = vmul.f32 %v15404_v33, %v2765_v56  ;;  %v20671_v19 = vadd.f32 %v10599_v8, %v10181_v46  ;;  %v15544_v9 = vld [vmem:[%s15728_s13 + $0x181] sm:$0xff]  ;;  %v15545_v50 = vld [vmem:[%s15728_s13 + $0x319] sm:$0xff] }
 0x39a   : > { %v15408_v59 = vpop.eup %15407  ;;  %v2707_v15 = vsel %vm854_vm0, %v15539_v62, 0.0  ;;  %15425 = vrcp.f32 %v10443_v60  ;;  %v10446_v32 = vadd.f32 1.0, %v15406_v34  ;;  %v9735_v26 = vmul.f32 %v21369_v28, %v21368_v51  ;;  %v15547_v39 = vld [vmem:[%s15728_s13 + $0x4e1] sm:$0xff] }
 0x39b   : > { %v15410_v30 = vpop.eup %15409  ;;  %v10444_v45 = vadd.f32 1.0, %v15408_v59  ;;  %v10629_v48 = vadd.f32 %v10597_v23, %v10179_v36  ;;  %v10715_v58 = vpack.c.bf16 %v20671_v19, %v20660_v21  ;;  %v2768_v7 = vsel %vm854_vm0, %v15540_v61, 0.0  ;;  %v21376_v36 = vld [vmem:[#allocation55_spill] sm:$0xff]  ;;  %v15549_v59 = vld [vmem:[%s15728_s13 + $0x171] sm:$0xff] }
 0x39c   : > { %15427 = vrcp.f32 %v10446_v32  ;;  %v9733_v47 = vmul.f32 %v21370_v63, %v2704_v41  ;;  %v10184_v52 = vadd.f32 %v10152_v42, %v9735_v26  ;;  %v10602_v18 = vmul.f32 %v15410_v30, %v21371_v31  ;;  %v15546_v41 = vld [vmem:[%s15728_s13 + $0x189] sm:$0xff]  ;;  %v21377_v26 = vld [vmem:[#allocation54_spill] sm:$0xff] }
 0x39d   : > { %v15412_v16 = vpop.eup %15411  ;;  %v2771_v3 = vsel %vm854_vm0, %v15541_v11, 0.0  ;;  %15429 = vrcp.f32 %v10444_v45  ;;  %v10714_v27 = vpack.c.bf16 %v10629_v48, %v10628_v44  ;;  %v2705_v25 = vsel %vm854_vm0, %v15542_v24, 0.0  ;;  %v15548_v42 = vld [vmem:[%s15728_s13 + $0x169] sm:$0xff] }
 0x39e   : > { %13604 = vmatmul.mubr.bf16.gmra.mxu0 %v10713_v35  ;;  %v10182_v4 = vadd.f32 %v21372_v12, %v9733_v47  ;;  %v10600_v55 = vmul.f32 %v15412_v16, %v2768_v7  ;;  %v9736_v17 = vmul.f32 %v21373_v6, %v2707_v15  ;;  %v10634_v13 = vadd.f32 %v10602_v18, %v10184_v52  ;;  %v15550_v15 = vld [vmem:[%s15728_s13 + $0x4c9] sm:$0xff]  ;;  %v15552_v52 = vld [vmem:[%s15728_s13 + $0x4d1] sm:$0xff] }
 0x39f   : > { %v15414_v49 = vpop.eup %15413  ;;  %13607 = vmatprep.mubr.bf16.mxu0 %v10714_v27  ;;  %v2769_v53 = vsel %vm854_vm0, %v15543_v5, 0.0  ;;  %v9734_v2 = vmul.f32 %v21374_v22, %v2705_v25  ;;  %v2710_v44 = vsel %vm854_vm0, %v15544_v9, 0.0  ;;  %v2740_v46 = vsel %vm854_vm0, %v15545_v50, 0.0  ;;  %v15551_v7 = vld [vmem:[%s15728_s13 + $0x4e9] sm:$0xff]  ;;  %s269_s13 = sand.u32 1, %s15605_s25  }
 0x3a0   : > { %v15416_v0 = vpop.eup %15415  ;;  %v10632_v56 = vadd.f32 %v10600_v55, %v10182_v4  ;;  %v10185_v35 = vadd.f32 %v20622_v14, %v9736_v17  ;;  %v10603_v21 = vmul.f32 %v15414_v49, %v2771_v3  ;;  %v2711_v54 = vsel %vm854_vm0, %v15546_v41, 0.0  ;;  %v20721_v49 = vld [vmem:[%s20848_s6] ss:$0 sm:$0xff]  ;;  %s11160_s9 = sshll.u32 %s269_s13, 8  ;;  %s20802_s28 = scalar_lea.sflag [#allocation8], %s269_s13 }
 0x3a1   : > { %v15418_v43 = vpop.eup %15417  ;;  %v10183_v8 = vadd.f32 %v21375_v29, %v9734_v2  ;;  %v2774_v14 = vsel %vm854_vm0, %v15547_v39, 0.0  ;;  %v2708_v34 = vsel %vm854_vm0, %v15548_v42, 0.0  ;;  %v10154_v37 = vmul.f32 %v15416_v0, %v2740_v46  ;;  %s20728_s15 = scalar_lea.vmem [#allocation7], %s11160_s9 }
 0x3a2   : > { %v10601_v33 = vmul.f32 %v15418_v43, %v2769_v53  ;;  %v10635_v60 = vadd.f32 %v10603_v21, %v10185_v35  ;;  %v9739_v23 = vmul.f32 %v21376_v36, %v2710_v44  ;;  %v2709_v62 = vsel %vm854_vm0, %v15549_v59, 0.0  ;;  %s11094_s16 = sshll.u32 %s20728_s15, 4  ;;  %s20796_s16 = int_to_ptr.vmem [resolvable:$true] %s11094_s16 }
 0x3a3   : > { %v15420_v40 = vpop.eup %15419  ;;  %v2772_v32 = vsel %vm854_vm0, %v15550_v15, 0.0  ;;  %v9737_v30 = vmul.f32 %v21377_v26, %v2708_v34  ;;  %v2775_v63 = vsel %vm854_vm0, %v15551_v7, 0.0  ;;  %v2773_v31 = vsel %vm854_vm0, %v15552_v52, 0.0  ;;  %s15553_s20 = scalar_lea.vmem %s20796_s16, 4096  ;;  %p15560_p0 = scmp.lt.s32.totalorder %s20796_s16, %s15558_s22 }
 0x3a4   : > { %v10633_v10 = vadd.f32 %v10601_v33, %v10183_v8  ;;  %v10717_v57 = vpack.c.bf16 %v10635_v60, %v10634_v13  ;;  %v10188_v45 = vadd.f32 %v20642_v20, %v9739_v23  ;;  %v9740_v47 = vmul.f32 %v15420_v40, %v2711_v54  ;;  %p15554_p11 = scmp.ne.s32.totalorder %s20796_s16, %s15553_s20  ;;  %p15561_p1 = scmp.lt.s32.totalorder %s15559_s23, %s15553_s20 }
 0x3a5   : > { %v15422_v19 = vpop.eup %15421  ;;  %v10186_v18 = vadd.f32 %v10154_v37, %v9737_v30 }
 0x3a6   : > { %v15424_v51 = vpop.eup %15423  ;;  %13608 = vmatmul.mubr.bf16.gmra.mxu0 %v10715_v58  ;;  %v10716_v28 = vpack.c.bf16 %v10633_v10, %v10632_v56  ;;  %v10606_v48 = vmul.f32 %v15422_v19, %v2774_v14  ;;  %v10189_v20 = vadd.f32 %v20647_v1, %v9740_v47  ;;  %p15555_p12 = pnand %p15554_p11, %p15698_p5  ;;  %p15562_p2 = por %p15561_p1, %p15560_p0 }
 0x3a7   : > { %v15426_v61 = vpop.eup %15425  ;;  %v9738_v3 = vmul.f32 %v15424_v51, %v2709_v62 }
 0x3a8   : > { %13611 = vmatprep.mubr.bf16.mxu0 %v10716_v28  ;;  %v10604_v16 = vmul.f32 %v15426_v61, %v2772_v32  ;;  %v10638_v11 = vadd.f32 %v10606_v48, %v10188_v45  ;;  %p15556_p13 = pneg %p15555_p12 }
 0x3a9   : > { %v15428_v58 = vpop.eup %15427  ;;  %v10187_v12 = vadd.f32 %v20638_v38, %v9738_v3 }
 0x3aa   : > { %v15430_v27 = vpop.eup %15429  ;;  %v10636_v24 = vadd.f32 %v10604_v16, %v10186_v18  ;;  %v10607_v25 = vmul.f32 %v15428_v58, %v2775_v63  ;;  %p15563_p3 = pnand %p15562_p2, %p15556_p13 }
 0x3ab   : > { %v10605_v4 = vmul.f32 %v15430_v27, %v2773_v31 }
 0x3ac   : > { %v10639_v55 = vadd.f32 %v10607_v25, %v10189_v20 }
 0x3ad   : > { %v10637_v6 = vadd.f32 %v10605_v4, %v10187_v12 }
 0x3ae   : > { %13612 = vmatmul.mubr.bf16.gmra.mxu0 %v10717_v57  ;;  %v10719_v17 = vpack.c.bf16 %v10639_v55, %v10638_v11 }
 0x3af   : > { %v10718_v13 = vpack.c.bf16 %v10637_v6, %v10636_v24 }
 0x3b1   : > { %13615 = vmatprep.mubr.bf16.mxu0 %v10718_v13 }
 0x3b6   : > { %13616 = vmatmul.mubr.bf16.gmra.mxu0 %v10719_v17 }
 0x43b   : > { %v13589_v1 = vpop.f32.mrf.mxu0 }
 0x43c   : > { %v10834_v5 = vadd.f32 %v13589_v1, %v20721_v49 }
 0x43d   : > { %v10825_v38 = vpop.f32.mrf.mxu0 }
 0x43e   : > { %vm10954_vm1 = vcmp.gt.f32.partialorder %v10834_v5, 0.0  ;;  %v10986_v53 = vmul.f32 0.1, %v10834_v5  ;;  %v10826_v0 = vadd.f32 %v20721_v49, %v10825_v38 }
 0x43f   : > { %v13590_v22 = vpop.f32.mrf.mxu0 }
 0x440   : > { %v11018_v2 = vsel %vm10954_vm1, %v10834_v5, %v10986_v53  ;;  %vm10952_vm2 = vcmp.gt.f32.partialorder %v10826_v0, 0.0  ;;  %v10984_v56 = vmul.f32 0.1, %v10826_v0  ;;  %v10837_v35 = vadd.f32 %v13590_v22, %v20721_v49 }
 0x441   : > { %11050 = vst [vmem:[%s20728_s15 + $0x10] sm:$0xff] %v11018_v2  ;;  %v10828_v21 = vpop.f32.mrf.mxu0 }
 0x442   : > { %v11016_v43 = vsel %vm10952_vm2, %v10826_v0, %v10984_v56  ;;  %vm10955_vm3 = vcmp.gt.f32.partialorder %v10837_v35, 0.0  ;;  %v10987_v9 = vmul.f32 0.1, %v10837_v35  ;;  %v10829_v44 = vadd.f32 %v20721_v49, %v10828_v21 }
 0x443   : > { %11048 = vst [vmem:[%s20728_s15] sm:$0xff] %v11016_v43 }
 0x444   : > { %v11019_v50 = vsel %vm10955_vm3, %v10837_v35, %v10987_v9  ;;  %vm10953_vm4 = vcmp.gt.f32.partialorder %v10829_v44, 0.0  ;;  %v10985_v46 = vmul.f32 0.1, %v10829_v44  ;;  %v13593_v29 = vpop.f32.mrf.mxu0 }
 0x445   : > { %11051 = vst [vmem:[%s20728_s15 + $0x18] sm:$0xff] %v11019_v50  ;;  %v10850_v8 = vadd.f32 %v13593_v29, %v20721_v49 }
 0x446   : > { %v11017_v33 = vsel %vm10953_vm4, %v10829_v44, %v10985_v46  ;;  %v10841_v60 = vpop.f32.mrf.mxu0 }
 0x447   : > { %11049 = vst [vmem:[%s20728_s15 + $0x8] sm:$0xff] %v11017_v33  ;;  %vm10958_vm5 = vcmp.gt.f32.partialorder %v10850_v8, 0.0  ;;  %v10990_v40 = vmul.f32 0.1, %v10850_v8  ;;  %v10842_v41 = vadd.f32 %v20721_v49, %v10841_v60 }
 0x448   : > { %v13594_v54 = vpop.f32.mrf.mxu0 }
 0x449   : > { %v11022_v39 = vsel %vm10958_vm5, %v10850_v8, %v10990_v40  ;;  %vm10956_vm6 = vcmp.gt.f32.partialorder %v10842_v41, 0.0  ;;  %v10988_v14 = vmul.f32 0.1, %v10842_v41  ;;  %v10853_v42 = vadd.f32 %v13594_v54, %v20721_v49 }
 0x44a   : > { %11054 = vst [vmem:[%s20728_s15 + $0x30] sm:$0xff] %v11022_v39  ;;  %v10844_v34 = vpop.f32.mrf.mxu0 }
 0x44b   : > { %v11020_v10 = vsel %vm10956_vm6, %v10842_v41, %v10988_v14  ;;  %vm10959_vm7 = vcmp.gt.f32.partialorder %v10853_v42, 0.0  ;;  %v10991_v57 = vmul.f32 0.1, %v10853_v42  ;;  %v10845_v37 = vadd.f32 %v20721_v49, %v10844_v34 }
 0x44c   : > { %11052 = vst [vmem:[%s20728_s15 + $0x20] sm:$0xff] %v11020_v10 }
 0x44d   : > { %v11023_v36 = vsel %vm10959_vm7, %v10853_v42, %v10991_v57  ;;  %vm10957_vm8 = vcmp.gt.f32.partialorder %v10845_v37, 0.0  ;;  %v10989_v23 = vmul.f32 0.1, %v10845_v37 }
 0x44e   : > { %11055 = vst [vmem:[%s20728_s15 + $0x38] sm:$0xff] %v11023_v36  ;;  %v13597_v19 = vpop.f32.mrf.mxu0 }
 0x44f   : > { %v11021_v59 = vsel %vm10957_vm8, %v10845_v37, %v10989_v23  ;;  %v10866_v62 = vadd.f32 %v13597_v19, %v20721_v49 }
 0x450   : > { %11053 = vst [vmem:[%s20728_s15 + $0x28] sm:$0xff] %v11021_v59  ;;  %v10857_v15 = vpop.f32.mrf.mxu0 }
 0x451   : > { %vm10962_vm9 = vcmp.gt.f32.partialorder %v10866_v62, 0.0  ;;  %v10994_v32 = vmul.f32 0.1, %v10866_v62  ;;  %v10858_v51 = vadd.f32 %v20721_v49, %v10857_v15 }
 0x452   : > { %v13598_v28 = vpop.f32.mrf.mxu0 }
 0x453   : > { %v11026_v26 = vsel %vm10962_vm9, %v10866_v62, %v10994_v32  ;;  %vm10960_vm10 = vcmp.gt.f32.partialorder %v10858_v51, 0.0  ;;  %v10992_v30 = vmul.f32 0.1, %v10858_v51  ;;  %v10869_v45 = vadd.f32 %v13598_v28, %v20721_v49 }
 0x454   : > { %11058 = vst [vmem:[%s20728_s15 + $0x50] sm:$0xff] %v11026_v26  ;;  %v10860_v48 = vpop.f32.mrf.mxu0 }
 0x455   : > { %v11024_v61 = vsel %vm10960_vm10, %v10858_v51, %v10992_v30  ;;  %vm10963_vm11 = vcmp.gt.f32.partialorder %v10869_v45, 0.0  ;;  %v10995_v7 = vmul.f32 0.1, %v10869_v45  ;;  %v10861_v63 = vadd.f32 %v20721_v49, %v10860_v48 }
 0x456   : > { %11056 = vst [vmem:[%s20728_s15 + $0x40] sm:$0xff] %v11024_v61  ;;  %v13601_v47 = vpop.f32.mrf.mxu0 }
 0x457   : > { %v11027_v52 = vsel %vm10963_vm11, %v10869_v45, %v10995_v7  ;;  %vm10961_vm12 = vcmp.gt.f32.partialorder %v10861_v63, 0.0  ;;  %v10993_v31 = vmul.f32 0.1, %v10861_v63  ;;  %v10882_v18 = vadd.f32 %v13601_v47, %v20721_v49 }
 0x458   : > { %11059 = vst [vmem:[%s20728_s15 + $0x58] sm:$0xff] %v11027_v52  ;;  %v10873_v16 = vpop.f32.mrf.mxu0 }
 0x459   : > { %v11025_v11 = vsel %vm10961_vm12, %v10861_v63, %v10993_v31  ;;  %vm10966_vm13 = vcmp.gt.f32.partialorder %v10882_v18, 0.0  ;;  %v10998_v58 = vmul.f32 0.1, %v10882_v18  ;;  %v10874_v3 = vadd.f32 %v20721_v49, %v10873_v16 }
 0x45a   : > { %11057 = vst [vmem:[%s20728_s15 + $0x48] sm:$0xff] %v11025_v11  ;;  %v13602_v27 = vpop.f32.mrf.mxu0 }
 0x45b   : > { %v11030_v24 = vsel %vm10966_vm13, %v10882_v18, %v10998_v58  ;;  %vm10964_vm14 = vcmp.gt.f32.partialorder %v10874_v3, 0.0  ;;  %v10996_v20 = vmul.f32 0.1, %v10874_v3  ;;  %v10885_v25 = vadd.f32 %v13602_v27, %v20721_v49 }
 0x45c   : > { %11062 = vst [vmem:[%s20728_s15 + $0x70] sm:$0xff] %v11030_v24  ;;  %v10876_v12 = vpop.f32.mrf.mxu0 }
 0x45d   : > { %v11028_v4 = vsel %vm10964_vm14, %v10874_v3, %v10996_v20  ;;  %vm10967_vm15 = vcmp.gt.f32.partialorder %v10885_v25, 0.0  ;;  %v10999_v55 = vmul.f32 0.1, %v10885_v25  ;;  %v10877_v6 = vadd.f32 %v20721_v49, %v10876_v12 }
 0x45e   : > { %11060 = vst [vmem:[%s20728_s15 + $0x60] sm:$0xff] %v11028_v4  ;;  %v13605_v17 = vpop.f32.mrf.mxu0 }
 0x45f   : > { %v11031_v13 = vsel %vm10967_vm15, %v10885_v25, %v10999_v55  ;;  %vm10965_vm0 = vcmp.gt.f32.partialorder %v10877_v6, 0.0  ;;  %v10997_v1 = vmul.f32 0.1, %v10877_v6  ;;  %v10898_v5 = vadd.f32 %v13605_v17, %v20721_v49 }
 0x460   : > { %11063 = vst [vmem:[%s20728_s15 + $0x78] sm:$0xff] %v11031_v13  ;;  %v10889_v38 = vpop.f32.mrf.mxu0 }
 0x461   : > { %v11029_v53 = vsel %vm10965_vm0, %v10877_v6, %v10997_v1  ;;  %vm10970_vm1 = vcmp.gt.f32.partialorder %v10898_v5, 0.0  ;;  %v11002_v0 = vmul.f32 0.1, %v10898_v5  ;;  %v10890_v22 = vadd.f32 %v20721_v49, %v10889_v38 }
 0x462   : > { %11061 = vst [vmem:[%s20728_s15 + $0x68] sm:$0xff] %v11029_v53  ;;  %v13606_v2 = vpop.f32.mrf.mxu0 }
 0x463   : > { %v11034_v56 = vsel %vm10970_vm1, %v10898_v5, %v11002_v0  ;;  %vm10968_vm2 = vcmp.gt.f32.partialorder %v10890_v22, 0.0  ;;  %v11000_v35 = vmul.f32 0.1, %v10890_v22  ;;  %v10901_v21 = vadd.f32 %v13606_v2, %v20721_v49 }
 0x464   : > { %11066 = vst [vmem:[%s20728_s15 + $0x90] sm:$0xff] %v11034_v56  ;;  %v10892_v43 = vpop.f32.mrf.mxu0 }
 0x465   : > { %v11032_v9 = vsel %vm10968_vm2, %v10890_v22, %v11000_v35  ;;  %vm10971_vm3 = vcmp.gt.f32.partialorder %v10901_v21, 0.0  ;;  %v11003_v44 = vmul.f32 0.1, %v10901_v21  ;;  %v10893_v50 = vadd.f32 %v20721_v49, %v10892_v43 }
 0x466   : > { %11064 = vst [vmem:[%s20728_s15 + $0x80] sm:$0xff] %v11032_v9  ;;  %v13609_v46 = vpop.f32.mrf.mxu0 }
 0x467   : > { %v11035_v29 = vsel %vm10971_vm3, %v10901_v21, %v11003_v44  ;;  %vm10969_vm4 = vcmp.gt.f32.partialorder %v10893_v50, 0.0  ;;  %v11001_v8 = vmul.f32 0.1, %v10893_v50  ;;  %v10914_v33 = vadd.f32 %v13609_v46, %v20721_v49 }
 0x468   : > { %11067 = vst [vmem:[%s20728_s15 + $0x98] sm:$0xff] %v11035_v29  ;;  %v10905_v60 = vpop.f32.mrf.mxu0 }
 0x469   : > { %v11033_v40 = vsel %vm10969_vm4, %v10893_v50, %v11001_v8  ;;  %vm10974_vm5 = vcmp.gt.f32.partialorder %v10914_v33, 0.0  ;;  %v11006_v41 = vmul.f32 0.1, %v10914_v33  ;;  %v10906_v54 = vadd.f32 %v20721_v49, %v10905_v60 }
 0x46a   : > { %11065 = vst [vmem:[%s20728_s15 + $0x88] sm:$0xff] %v11033_v40  ;;  %v13610_v39 = vpop.f32.mrf.mxu0 }
 0x46b   : > { %v11038_v14 = vsel %vm10974_vm5, %v10914_v33, %v11006_v41  ;;  %vm10972_vm6 = vcmp.gt.f32.partialorder %v10906_v54, 0.0  ;;  %v11004_v42 = vmul.f32 0.1, %v10906_v54  ;;  %v10917_v34 = vadd.f32 %v13610_v39, %v20721_v49 }
 0x46c   : > { %11070 = vst [vmem:[%s20728_s15 + $0xb0] sm:$0xff] %v11038_v14  ;;  %v10908_v10 = vpop.f32.mrf.mxu0 }
 0x46d   : > { %v11036_v57 = vsel %vm10972_vm6, %v10906_v54, %v11004_v42  ;;  %vm10975_vm7 = vcmp.gt.f32.partialorder %v10917_v34, 0.0  ;;  %v11007_v37 = vmul.f32 0.1, %v10917_v34  ;;  %v10909_v36 = vadd.f32 %v20721_v49, %v10908_v10 }
 0x46e   : > { %11068 = vst [vmem:[%s20728_s15 + $0xa0] sm:$0xff] %v11036_v57  ;;  %v13613_v23 = vpop.f32.mrf.mxu0 }
 0x46f   : > { %v11039_v19 = vsel %vm10975_vm7, %v10917_v34, %v11007_v37  ;;  %vm10973_vm8 = vcmp.gt.f32.partialorder %v10909_v36, 0.0  ;;  %v11005_v59 = vmul.f32 0.1, %v10909_v36  ;;  %v10930_v62 = vadd.f32 %v13613_v23, %v20721_v49 }
 0x470   : > { %11071 = vst [vmem:[%s20728_s15 + $0xb8] sm:$0xff] %v11039_v19  ;;  %v10921_v15 = vpop.f32.mrf.mxu0 }
 0x471   : > { %v11037_v32 = vsel %vm10973_vm8, %v10909_v36, %v11005_v59  ;;  %vm10978_vm9 = vcmp.gt.f32.partialorder %v10930_v62, 0.0  ;;  %v11010_v51 = vmul.f32 0.1, %v10930_v62  ;;  %v10922_v28 = vadd.f32 %v20721_v49, %v10921_v15 }
 0x472   : > { %11069 = vst [vmem:[%s20728_s15 + $0xa8] sm:$0xff] %v11037_v32  ;;  %v13614_v26 = vpop.f32.mrf.mxu0 }
 0x473   : > { %v11042_v30 = vsel %vm10978_vm9, %v10930_v62, %v11010_v51  ;;  %vm10976_vm10 = vcmp.gt.f32.partialorder %v10922_v28, 0.0  ;;  %v11008_v45 = vmul.f32 0.1, %v10922_v28  ;;  %v10933_v48 = vadd.f32 %v13614_v26, %v20721_v49 }
 0x474   : > { %11074 = vst [vmem:[%s20728_s15 + $0xd0] sm:$0xff] %v11042_v30  ;;  %v10924_v61 = vpop.f32.mrf.mxu0 }
 0x475   : > { %v11040_v7 = vsel %vm10976_vm10, %v10922_v28, %v11008_v45  ;;  %vm10979_vm11 = vcmp.gt.f32.partialorder %v10933_v48, 0.0  ;;  %v11011_v63 = vmul.f32 0.1, %v10933_v48  ;;  %v10925_v47 = vadd.f32 %v20721_v49, %v10924_v61 }
 0x476   : > { %11072 = vst [vmem:[%s20728_s15 + $0xc0] sm:$0xff] %v11040_v7  ;;  %v13617_v52 = vpop.f32.mrf.mxu0 }
 0x477   : > { %v11043_v31 = vsel %vm10979_vm11, %v10933_v48, %v11011_v63  ;;  %vm10977_vm12 = vcmp.gt.f32.partialorder %v10925_v47, 0.0  ;;  %v11009_v18 = vmul.f32 0.1, %v10925_v47  ;;  %v10946_v16 = vadd.f32 %v13617_v52, %v20721_v49 }
 0x478   : > { %11075 = vst [vmem:[%s20728_s15 + $0xd8] sm:$0xff] %v11043_v31  ;;  %v10937_v11 = vpop.f32.mrf.mxu0 }
 0x479   : > { %v11041_v58 = vsel %vm10977_vm12, %v10925_v47, %v11009_v18  ;;  %vm10982_vm13 = vcmp.gt.f32.partialorder %v10946_v16, 0.0  ;;  %v11014_v3 = vmul.f32 0.1, %v10946_v16  ;;  %v10938_v27 = vadd.f32 %v20721_v49, %v10937_v11 }
 0x47a   : > { %11073 = vst [vmem:[%s20728_s15 + $0xc8] sm:$0xff] %v11041_v58  ;;  %v13618_v24 = vpop.f32.mrf.mxu0 }
 0x47b   : > { %v11046_v20 = vsel %vm10982_vm13, %v10946_v16, %v11014_v3  ;;  %vm10980_vm14 = vcmp.gt.f32.partialorder %v10938_v27, 0.0  ;;  %v11012_v25 = vmul.f32 0.1, %v10938_v27  ;;  %v10949_v12 = vadd.f32 %v13618_v24, %v20721_v49 }
 0x47c   : > { %11078 = vst [vmem:[%s20728_s15 + $0xf0] sm:$0xff] %v11046_v20  ;;  %v10940_v4 = vpop.f32.mrf.mxu0 }
 0x47d   : > { %v11044_v55 = vsel %vm10980_vm14, %v10938_v27, %v11012_v25  ;;  %vm10983_vm15 = vcmp.gt.f32.partialorder %v10949_v12, 0.0  ;;  %v11015_v6 = vmul.f32 0.1, %v10949_v12  ;;  %v10941_v17 = vadd.f32 %v20721_v49, %v10940_v4 }
 0x47e   : > { %11076 = vst [vmem:[%s20728_s15 + $0xe0] sm:$0xff] %v11044_v55 }
 0x47f   : > { %v11047_v13 = vsel %vm10983_vm15, %v10949_v12, %v11015_v6  ;;  %vm10981_vm0 = vcmp.gt.f32.partialorder %v10941_v17, 0.0  ;;  %v11013_v1 = vmul.f32 0.1, %v10941_v17 }
 0x480   : > { %11079 = vst [vmem:[%s20728_s15 + $0xf8] sm:$0xff] %v11047_v13 }
 0x481   : > { %v11045_v5 = vsel %vm10981_vm0, %v10941_v17, %v11013_v1 }
 0x482   : > { %11077 = vst [vmem:[%s20728_s15 + $0xe8] sm:$0xff] %v11045_v5 }
 0x483   : > { %15566 = shalt.err (!%p15563_p3)
}
 0x484   : > { %s15567_s13 = scalar_lea.hbm %s20794_s19, 4096  ;;  %s15571_s9 = scalar_lea.hbm %s20849_s7, 8192 }
 0x485   : > { %p15568_p4 = scmp.ne.s32.totalorder %s20794_s19, %s15567_s13  ;;  %p15572_p9 = scmp.lt.s32.totalorder %s20794_s19, %s20849_s7 }
 0x486   : > { %p15573_p10 = scmp.lt.s32.totalorder %s15571_s9, %s15567_s13 }
 0x487   : > { %p15569_p7 = pnand %p15568_p4, %p15698_p5 }
 0x488   : > { %p15574_p11 = por %p15573_p10, %p15572_p9 }
 0x489   : > { %p15570_p8 = pneg %p15569_p7 }
 0x48b   : > { %p15575_p12 = pnand %p15574_p11, %p15570_p8 }
 0x48d   : > { %15578 = shalt.err (!%p15575_p12)
}
 0x48e   : > { %s15618_s17 = smov 128   ;;  %s15619_s18 = smov 8  }
 0x48f   : > { %13620 = dma.vmem_to_hbm [thread:$0]  (%p15698_p5), %s20796_s16, 4096, %s20794_s19, %s20802_s28, %s15618_s17, %s15618_s17, %s15619_s18  }
 0x490 PF: > { %p13626_p13 = scmp.ge.s32.totalorder %s15613_s27, 2  ;;  %s11109_s20 = sand.u32 1, %s15601_s24  }
 0x491   : > { %s11110_s21 = scalar_lea.sflag [#allocation8], %s11109_s20 }
 0x492   : > { %p13623_p0 = pnand %p13626_p13, %p15702_p6 }
 0x494   : > { %p13624_p1 = pneg %p13623_p0 }
 0x496   : > { %15596 = dma.done.wait (%p13624_p1), %s11110_s21, 4096  }
 0x497   : > { %15598 = vsyncadd (%p13624_p1), %s11110_s21, 4294963200  ;;  %p17_p2 = scmp.ge.s32.totalorder %s15685_s30, 4   ;;  %s21378_s24 = smov %s15605_s25 }
 0x498   : > { %s21379_s25 = smov %s15609_s26  ;;  %s21380_s26 = smov %s15696_s10 }
 0x499   : > { %s21381_s27 = smov %s15685_s30  ;;  %19 = sbr.rel (!%p17_p2) target bundleno = 3 (0x3), region = 88 }
 0x49e   :  { %11115 = vsyncpa [#allocation8], 1 }
 0x49f   :  { %11117 = vsyncpa [#allocation8 + $0x1], 1 }

</bundles_post_ra>
